<compile_context>
chip_gen: v5e
topology: v5e:2x2
jax: 0.10.0
libtpu: 0.0.40
codegen_flags: <defaults>
</compile_context>

<pallas_src>
import functools

import jax
import jax.numpy as jnp
from jax.experimental import pallas as pl
from jax.experimental.pallas import tpu as pltpu


def _predetails_kernel(p1_ref, mask_ref, w1_ref, b1_ref, w2_ref, b2_ref,
                       w3_ref, b3_ref, o_ref, a1_ref, a2_ref, *, Wp, guard):
    # p1_ref  : (1, HWp, 27)       bf16  layer-1 im2col patches, padded domain
    # mask_ref: (HWp, 1)           f32   1 on interior pixels, 0 on halo
    # w1_ref  : (27, 64)           bf16
    # w2_ref  : (9, 64, 64)        bf16  per-tap weights, tap = dy*3 + dx
    # w3_ref  : (9, 64, 3)         bf16
    # b*_ref  : (1, Cout)          f32
    # o_ref   : (1, HWp, 3)        f32   flat padded-domain output
    # a*_ref  : (guard+HWp+guard, C) f32 flat zero-guarded activations (VMEM)
    HWp = o_ref.shape[1]

    # Scratch persists across grid steps and may hold stale/NaN garbage on the
    # first step; the guard rows must be finite zeros so masked halo math stays
    # zero.  Full memset is a handful of vreg stores -> trivial.
    a1_ref[...] = jnp.zeros(a1_ref.shape, a1_ref.dtype)
    a2_ref[...] = jnp.zeros(a2_ref.shape, a2_ref.dtype)

    mask = mask_ref[...]                      # (HWp, 1) f32

    # ---- layer 1: single (HWp, 27) @ (27, 64) bf16 matmul over the padded
    # domain; halo rows forced to zero via the mask.
    y1 = jnp.dot(p1_ref[0], w1_ref[...], preferred_element_type=jnp.float32)
    y1 = jnp.maximum(y1 + b1_ref[...], 0.0) * mask
    a1_ref[guard:guard + HWp, :] = y1         # 8-aligned sublane store

    # 3x3 "same" conv over a flat zero-guarded activation: tap (dy, dx) is a
    # contiguous row-offset slice; 9 small bf16 matmuls accumulated in f32.
    def conv3x3(a_ref, w_ref):
        cout = w_ref.shape[-1]
        acc = jnp.zeros((HWp, cout), jnp.float32)
        for dy in range(3):
            for dx in range(3):
                start = guard + (dy - 1) * Wp + (dx - 1)
                patch = a_ref[start:start + HWp, :].astype(jnp.bfloat16)
                acc = acc + jnp.dot(patch, w_ref[dy * 3 + dx],
                                    preferred_element_type=jnp.float32)
        return acc

    # ---- layer 2
    y2 = jnp.maximum(conv3x3(a1_ref, w2_ref) + b2_ref[...], 0.0) * mask
    a2_ref[guard:guard + HWp, :] = y2

    # ---- layer 3 (no ReLU); halo rows are garbage but sliced away wrapper-side
    y3 = conv3x3(a2_ref, w3_ref) + b3_ref[...]
    o_ref[0] = y3.astype(o_ref.dtype)


def predetails_forward(x_nchw, params):
    w1, w2, w3 = params["w1"], params["w2"], params["w3"]
    b1, b2, b3 = params["b1"], params["b2"], params["b3"]
    N, Cin, H, W = x_nchw.shape
    C1 = w1.shape[-1]   # 64
    C2 = w2.shape[-1]   # 64
    C3 = w3.shape[-1]   # 3
    Hp, Wp = H + 2, W + 2
    HWp = Hp * Wp
    guard = ((Wp + 1 + 7) // 8) * 8           # 8-aligned guard rows >= Wp + 1
    rows = guard + HWp + guard

    # NCHW -> NHWC; layer-1 im2col built over the PADDED domain (pad=2 on the
    # original input), so the kernel's layer-1 output lands directly in the
    # flat padded layout.  Tiny (Cin=3): ~35 KB/image of patches.
    x = jnp.transpose(x_nchw, (0, 2, 3, 1))
    xp2 = jnp.pad(x, ((0, 0), (2, 2), (2, 2), (0, 0)))
    taps = [xp2[:, dy:dy + Hp, dx:dx + Wp, :]
            for dy in range(3) for dx in range(3)]
    p1 = jnp.concatenate(taps, axis=-1).reshape(N, HWp, 9 * Cin)
    p1 = p1.astype(jnp.bfloat16)

    # Interior mask over the padded flat domain.
    mask = jnp.pad(jnp.ones((H, W), jnp.float32), ((1, 1), (1, 1)))
    mask = mask.reshape(HWp, 1)

    # Pack weights (bf16 for the MXU).  Row/tap order = (dy, dx) major, cin
    # minor == row-major reshape of HWIO weights.
    w1c = w1.reshape(9 * Cin, C1).astype(jnp.bfloat16)
    w2t = w2.reshape(9, C1, C2).astype(jnp.bfloat16)
    w3t = w3.reshape(9, C2, C3).astype(jnp.bfloat16)
    b1r = b1.reshape(1, C1).astype(jnp.float32)
    b2r = b2.reshape(1, C2).astype(jnp.float32)
    b3r = b3.reshape(1, C3).astype(jnp.float32)

    kernel = functools.partial(_predetails_kernel, Wp=Wp, guard=guard)

    y = pl.pallas_call(
        kernel,
        out_shape=jax.ShapeDtypeStruct((N, HWp, C3), jnp.float32),
        grid_spec=pltpu.PrefetchScalarGridSpec(
            num_scalar_prefetch=0,
            grid=(N,),
            in_specs=[
                pl.BlockSpec((1, HWp, 9 * Cin), lambda n: (n, 0, 0)),
                pl.BlockSpec((HWp, 1), lambda n: (0, 0)),
                pl.BlockSpec((9 * Cin, C1), lambda n: (0, 0)),
                pl.BlockSpec((1, C1), lambda n: (0, 0)),
                pl.BlockSpec((9, C1, C2), lambda n: (0, 0, 0)),
                pl.BlockSpec((1, C2), lambda n: (0, 0)),
                pl.BlockSpec((9, C2, C3), lambda n: (0, 0, 0)),
                pl.BlockSpec((1, C3), lambda n: (0, 0)),
            ],
            out_specs=pl.BlockSpec((1, HWp, C3), lambda n: (n, 0, 0)),
            scratch_shapes=[
                pltpu.VMEM((rows, C1), jnp.float32),   # flat padded act1
                pltpu.VMEM((rows, C2), jnp.float32),   # flat padded act2
            ],
        ),
        compiler_params=pltpu.CompilerParams(
            dimension_semantics=("parallel",)),
    )(p1, mask, w1c, b1r, w2t, b2r, w3t, b3r)

    # Interior extraction + NHWC -> NCHW on a ~4 KB/image tensor (free, XLA).
    y = y.reshape(N, Hp, Wp, C3)[:, 1:H + 1, 1:W + 1, :]
    return jnp.transpose(y, (0, 3, 1, 2))


def init_params(key):
    # Deterministic init mimicking PyTorch Conv2d default (uniform +/- 1/sqrt(fan_in)).
    ks = jax.random.split(key, 6)

    def conv_init(kw, kb, cin, cout):
        fan_in = cin * 9
        bound = 1.0 / jnp.sqrt(jnp.float32(fan_in))
        w = jax.random.uniform(kw, (3, 3, cin, cout), jnp.float32, -bound, bound)
        b = jax.random.uniform(kb, (cout,), jnp.float32, -bound, bound)
        return w, b

    w1, b1 = conv_init(ks[0], ks[1], 3, 64)
    w2, b2 = conv_init(ks[2], ks[3], 64, 64)
    w3, b3 = conv_init(ks[4], ks[5], 64, 3)
    return dict(w1=w1, b1=b1, w2=w2, b2=b2, w3=w3, b3=b3)


def reference_forward(x_nchw, params):
    # Pure-JAX f32 reference (NHWC conv) for correctness checking.
    x = jnp.transpose(x_nchw, (0, 2, 3, 1))
    dn = ("NHWC", "HWIO", "NHWC")

    def conv(x, w, b):
        y = jax.lax.conv_general_dilated(x, w, (1, 1), "SAME",
                                         dimension_numbers=dn)
        return y + b.reshape(1, 1, 1, -1)

    x = jax.nn.relu(conv(x, params["w1"], params["b1"]))
    x = jax.nn.relu(conv(x, params["w2"], params["b2"]))
    x = conv(x, params["w3"], params["b3"])
    return jnp.transpose(x, (0, 3, 1, 2))


if __name__ == "__main__":
    key = jax.random.PRNGKey(0)
    kx, kp = jax.random.split(key)
    # Input like the PyTorch module expects: NCHW with 3 channels.
    x = jax.random.normal(kx, (2, 3, 16, 16), jnp.float32)
    params = init_params(kp)

    out = jax.jit(predetails_forward)(x, params)
    out = jax.block_until_ready(out)

    ref = reference_forward(x, params)
    assert out.shape == (2, 3, 16, 16)
    max_err = float(jnp.max(jnp.abs(out - ref)))
    # bf16 MXU inputs with f32 accumulation -> small, bounded deviation vs f32 ref.
    assert jnp.allclose(out, ref, atol=5e-2, rtol=5e-2), (
        f"mismatch vs reference (max abs err {max_err})")
    print("KERNEL_OK")
</pallas_src>

<mosaic_0001>
module attributes {stable_mosaic.version = 11 : i64} {
  func.func @_predetails_kernel(%arg0: i32, %arg1: memref<1x324x27xbf16, #tpu.memory_space<vmem>>, %arg2: memref<324x1xf32, #tpu.memory_space<vmem>>, %arg3: memref<27x64xbf16, #tpu.memory_space<vmem>>, %arg4: memref<1x64xf32, #tpu.memory_space<vmem>>, %arg5: memref<9x64x64xbf16, #tpu.memory_space<vmem>>, %arg6: memref<1x64xf32, #tpu.memory_space<vmem>>, %arg7: memref<9x64x3xbf16, #tpu.memory_space<vmem>>, %arg8: memref<1x3xf32, #tpu.memory_space<vmem>>, %arg9: memref<1x324x3xf32, #tpu.memory_space<vmem>>, %arg10: memref<372x64xf32, #tpu.memory_space<vmem>>, %arg11: memref<372x64xf32, #tpu.memory_space<vmem>>) attributes {dimension_semantics = [#tpu.dimension_semantics<parallel>], iteration_bounds = array<i64: 2>, scalar_prefetch = 0 : i64, scratch_operands = 2 : i64, tpu.core_type = #tpu.core_type<tc>, window_params = [{transform_indices = @transform_0, window_bounds = array<i64: 1, 324, 27>}, {pipeline_mode = #tpu.pipeline_mode<synchronous>, transform_indices = @transform_1, window_bounds = array<i64: 324, 1>}, {pipeline_mode = #tpu.pipeline_mode<synchronous>, transform_indices = @transform_2, window_bounds = array<i64: 27, 64>}, {pipeline_mode = #tpu.pipeline_mode<synchronous>, transform_indices = @transform_3, window_bounds = array<i64: 1, 64>}, {pipeline_mode = #tpu.pipeline_mode<synchronous>, transform_indices = @transform_4, window_bounds = array<i64: 9, 64, 64>}, {pipeline_mode = #tpu.pipeline_mode<synchronous>, transform_indices = @transform_5, window_bounds = array<i64: 1, 64>}, {pipeline_mode = #tpu.pipeline_mode<synchronous>, transform_indices = @transform_6, window_bounds = array<i64: 9, 64, 3>}, {pipeline_mode = #tpu.pipeline_mode<synchronous>, transform_indices = @transform_7, window_bounds = array<i64: 1, 3>}, {transform_indices = @transform_8, window_bounds = array<i64: 1, 324, 3>}]} {
    %cst = arith.constant 0.000000e+00 : f32
    %0 = vector.broadcast %cst : f32 to vector<372x64xf32>
    %c0 = arith.constant 0 : index
    %c0_0 = arith.constant 0 : index
    %1 = vector.load %arg10[%c0, %c0_0] : memref<372x64xf32, #tpu.memory_space<vmem>>, vector<372x64xf32>
    tpu.vector_store %arg10[%c0, %c0_0], %0 {strides = array<i32>} : memref<372x64xf32, #tpu.memory_space<vmem>>, vector<372x64xf32>,
    %cst_1 = arith.constant 0.000000e+00 : f32
    %2 = vector.broadcast %cst_1 : f32 to vector<372x64xf32>
    %c0_2 = arith.constant 0 : index
    %c0_3 = arith.constant 0 : index
    %3 = vector.load %arg11[%c0_2, %c0_3] : memref<372x64xf32, #tpu.memory_space<vmem>>, vector<372x64xf32>
    tpu.vector_store %arg11[%c0_2, %c0_3], %2 {strides = array<i32>} : memref<372x64xf32, #tpu.memory_space<vmem>>, vector<372x64xf32>,
    %c0_4 = arith.constant 0 : index
    %c0_5 = arith.constant 0 : index
    %4 = vector.load %arg2[%c0_4, %c0_5] : memref<324x1xf32, #tpu.memory_space<vmem>>, vector<324x1xf32>
    %c0_6 = arith.constant 0 : index
    %c0_7 = arith.constant 0 : index
    %c0_8 = arith.constant 0 : index
    %5 = vector.load %arg1[%c0_6, %c0_7, %c0_8] : memref<1x324x27xbf16, #tpu.memory_space<vmem>>, vector<1x324x27xbf16>
    %6 = vector.shape_cast %5 : vector<1x324x27xbf16> to vector<324x27xbf16>
    %c0_9 = arith.constant 0 : index
    %c0_10 = arith.constant 0 : index
    %7 = vector.load %arg3[%c0_9, %c0_10] : memref<27x64xbf16, #tpu.memory_space<vmem>>, vector<27x64xbf16>
    %cst_11 = arith.constant dense<0.000000e+00> : vector<324x64xf32>
    %8 = tpu.matmul %6, %7, %cst_11 {dimension_numbers = #tpu.dot_dimension_numbers<[1], [0], [0], [1], [0, 0, 1, 1], [], []>} : vector<324x27xbf16>, vector<27x64xbf16>, vector<324x64xf32> -> vector<324x64xf32>
    %c0_12 = arith.constant 0 : index
    %c0_13 = arith.constant 0 : index
    %9 = vector.load %arg4[%c0_12, %c0_13] : memref<1x64xf32, #tpu.memory_space<vmem>>, vector<1x64xf32>
    %10 = vector.broadcast %9 : vector<1x64xf32> to vector<324x64xf32>
    %11 = arith.addf %8, %10 : vector<324x64xf32>
    %cst_14 = arith.constant 0.000000e+00 : f32
    %12 = vector.broadcast %cst_14 : f32 to vector<324x64xf32>
    %13 = arith.maximumf %11, %12 : vector<324x64xf32>
    %14 = vector.broadcast %4 : vector<324x1xf32> to vector<324x64xf32>
    %15 = arith.mulf %13, %14 : vector<324x64xf32>
    %c24 = arith.constant 24 : index
    %c0_15 = arith.constant 0 : index
    %16 = vector.load %arg10[%c24, %c0_15] : memref<372x64xf32, #tpu.memory_space<vmem>>, vector<324x64xf32>
    tpu.vector_store %arg10[%c24, %c0_15], %15 {strides = array<i32>} : memref<372x64xf32, #tpu.memory_space<vmem>>, vector<324x64xf32>,
    %cst_16 = arith.constant 0.000000e+00 : f32
    %17 = vector.broadcast %cst_16 : f32 to vector<324x64xf32>
    %c5 = arith.constant 5 : index
    %c0_17 = arith.constant 0 : index
    %18 = vector.load %arg10[%c5, %c0_17] : memref<372x64xf32, #tpu.memory_space<vmem>>, vector<324x64xf32>
    %19 = arith.truncf %18 : vector<324x64xf32> to vector<324x64xbf16>
    %c0_18 = arith.constant 0 : index
    %c0_19 = arith.constant 0 : index
    %c0_20 = arith.constant 0 : index
    %20 = vector.load %arg5[%c0_18, %c0_19, %c0_20] : memref<9x64x64xbf16, #tpu.memory_space<vmem>>, vector<1x64x64xbf16>
    %21 = vector.shape_cast %20 : vector<1x64x64xbf16> to vector<64x64xbf16>
    %cst_21 = arith.constant dense<0.000000e+00> : vector<324x64xf32>
    %22 = tpu.matmul %19, %21, %cst_21 {dimension_numbers = #tpu.dot_dimension_numbers<[1], [0], [0], [1], [0, 0, 1, 1], [], []>} : vector<324x64xbf16>, vector<64x64xbf16>, vector<324x64xf32> -> vector<324x64xf32>
    %23 = arith.addf %17, %22 : vector<324x64xf32>
    %c6 = arith.constant 6 : index
    %c0_22 = arith.constant 0 : index
    %24 = vector.load %arg10[%c6, %c0_22] : memref<372x64xf32, #tpu.memory_space<vmem>>, vector<324x64xf32>
    %25 = arith.truncf %24 : vector<324x64xf32> to vector<324x64xbf16>
    %c1 = arith.constant 1 : index
    %c0_23 = arith.constant 0 : index
    %c0_24 = arith.constant 0 : index
    %26 = vector.load %arg5[%c1, %c0_23, %c0_24] : memref<9x64x64xbf16, #tpu.memory_space<vmem>>, vector<1x64x64xbf16>
    %27 = vector.shape_cast %26 : vector<1x64x64xbf16> to vector<64x64xbf16>
    %cst_25 = arith.constant dense<0.000000e+00> : vector<324x64xf32>
    %28 = tpu.matmul %25, %27, %cst_25 {dimension_numbers = #tpu.dot_dimension_numbers<[1], [0], [0], [1], [0, 0, 1, 1], [], []>} : vector<324x64xbf16>, vector<64x64xbf16>, vector<324x64xf32> -> vector<324x64xf32>
    %29 = arith.addf %23, %28 : vector<324x64xf32>
    %c7 = arith.constant 7 : index
    %c0_26 = arith.constant 0 : index
    %30 = vector.load %arg10[%c7, %c0_26] : memref<372x64xf32, #tpu.memory_space<vmem>>, vector<324x64xf32>
    %31 = arith.truncf %30 : vector<324x64xf32> to vector<324x64xbf16>
    %c2 = arith.constant 2 : index
    %c0_27 = arith.constant 0 : index
    %c0_28 = arith.constant 0 : index
    %32 = vector.load %arg5[%c2, %c0_27, %c0_28] : memref<9x64x64xbf16, #tpu.memory_space<vmem>>, vector<1x64x64xbf16>
    %33 = vector.shape_cast %32 : vector<1x64x64xbf16> to vector<64x64xbf16>
    %cst_29 = arith.constant dense<0.000000e+00> : vector<324x64xf32>
    %34 = tpu.matmul %31, %33, %cst_29 {dimension_numbers = #tpu.dot_dimension_numbers<[1], [0], [0], [1], [0, 0, 1, 1], [], []>} : vector<324x64xbf16>, vector<64x64xbf16>, vector<324x64xf32> -> vector<324x64xf32>
    %35 = arith.addf %29, %34 : vector<324x64xf32>
    %c23 = arith.constant 23 : index
    %c0_30 = arith.constant 0 : index
    %36 = vector.load %arg10[%c23, %c0_30] : memref<372x64xf32, #tpu.memory_space<vmem>>, vector<324x64xf32>
    %37 = arith.truncf %36 : vector<324x64xf32> to vector<324x64xbf16>
    %c3 = arith.constant 3 : index
    %c0_31 = arith.constant 0 : index
    %c0_32 = arith.constant 0 : index
    %38 = vector.load %arg5[%c3, %c0_31, %c0_32] : memref<9x64x64xbf16, #tpu.memory_space<vmem>>, vector<1x64x64xbf16>
    %39 = vector.shape_cast %38 : vector<1x64x64xbf16> to vector<64x64xbf16>
    %cst_33 = arith.constant dense<0.000000e+00> : vector<324x64xf32>
    %40 = tpu.matmul %37, %39, %cst_33 {dimension_numbers = #tpu.dot_dimension_numbers<[1], [0], [0], [1], [0, 0, 1, 1], [], []>} : vector<324x64xbf16>, vector<64x64xbf16>, vector<324x64xf32> -> vector<324x64xf32>
    %41 = arith.addf %35, %40 : vector<324x64xf32>
    %c24_34 = arith.constant 24 : index
    %c0_35 = arith.constant 0 : index
    %42 = vector.load %arg10[%c24_34, %c0_35] : memref<372x64xf32, #tpu.memory_space<vmem>>, vector<324x64xf32>
    %43 = arith.truncf %42 : vector<324x64xf32> to vector<324x64xbf16>
    %c4 = arith.constant 4 : index
    %c0_36 = arith.constant 0 : index
    %c0_37 = arith.constant 0 : index
    %44 = vector.load %arg5[%c4, %c0_36, %c0_37] : memref<9x64x64xbf16, #tpu.memory_space<vmem>>, vector<1x64x64xbf16>
    %45 = vector.shape_cast %44 : vector<1x64x64xbf16> to vector<64x64xbf16>
    %cst_38 = arith.constant dense<0.000000e+00> : vector<324x64xf32>
    %46 = tpu.matmul %43, %45, %cst_38 {dimension_numbers = #tpu.dot_dimension_numbers<[1], [0], [0], [1], [0, 0, 1, 1], [], []>} : vector<324x64xbf16>, vector<64x64xbf16>, vector<324x64xf32> -> vector<324x64xf32>
    %47 = arith.addf %41, %46 : vector<324x64xf32>
    %c25 = arith.constant 25 : index
    %c0_39 = arith.constant 0 : index
    %48 = vector.load %arg10[%c25, %c0_39] : memref<372x64xf32, #tpu.memory_space<vmem>>, vector<324x64xf32>
    %49 = arith.truncf %48 : vector<324x64xf32> to vector<324x64xbf16>
    %c5_40 = arith.constant 5 : index
    %c0_41 = arith.constant 0 : index
    %c0_42 = arith.constant 0 : index
    %50 = vector.load %arg5[%c5_40, %c0_41, %c0_42] : memref<9x64x64xbf16, #tpu.memory_space<vmem>>, vector<1x64x64xbf16>
    %51 = vector.shape_cast %50 : vector<1x64x64xbf16> to vector<64x64xbf16>
    %cst_43 = arith.constant dense<0.000000e+00> : vector<324x64xf32>
    %52 = tpu.matmul %49, %51, %cst_43 {dimension_numbers = #tpu.dot_dimension_numbers<[1], [0], [0], [1], [0, 0, 1, 1], [], []>} : vector<324x64xbf16>, vector<64x64xbf16>, vector<324x64xf32> -> vector<324x64xf32>
    %53 = arith.addf %47, %52 : vector<324x64xf32>
    %c41 = arith.constant 41 : index
    %c0_44 = arith.constant 0 : index
    %54 = vector.load %arg10[%c41, %c0_44] : memref<372x64xf32, #tpu.memory_space<vmem>>, vector<324x64xf32>
    %55 = arith.truncf %54 : vector<324x64xf32> to vector<324x64xbf16>
    %c6_45 = arith.constant 6 : index
    %c0_46 = arith.constant 0 : index
    %c0_47 = arith.constant 0 : index
    %56 = vector.load %arg5[%c6_45, %c0_46, %c0_47] : memref<9x64x64xbf16, #tpu.memory_space<vmem>>, vector<1x64x64xbf16>
    %57 = vector.shape_cast %56 : vector<1x64x64xbf16> to vector<64x64xbf16>
    %cst_48 = arith.constant dense<0.000000e+00> : vector<324x64xf32>
    %58 = tpu.matmul %55, %57, %cst_48 {dimension_numbers = #tpu.dot_dimension_numbers<[1], [0], [0], [1], [0, 0, 1, 1], [], []>} : vector<324x64xbf16>, vector<64x64xbf16>, vector<324x64xf32> -> vector<324x64xf32>
    %59 = arith.addf %53, %58 : vector<324x64xf32>
    %c42 = arith.constant 42 : index
    %c0_49 = arith.constant 0 : index
    %60 = vector.load %arg10[%c42, %c0_49] : memref<372x64xf32, #tpu.memory_space<vmem>>, vector<324x64xf32>
    %61 = arith.truncf %60 : vector<324x64xf32> to vector<324x64xbf16>
    %c7_50 = arith.constant 7 : index
    %c0_51 = arith.constant 0 : index
    %c0_52 = arith.constant 0 : index
    %62 = vector.load %arg5[%c7_50, %c0_51, %c0_52] : memref<9x64x64xbf16, #tpu.memory_space<vmem>>, vector<1x64x64xbf16>
    %63 = vector.shape_cast %62 : vector<1x64x64xbf16> to vector<64x64xbf16>
    %cst_53 = arith.constant dense<0.000000e+00> : vector<324x64xf32>
    %64 = tpu.matmul %61, %63, %cst_53 {dimension_numbers = #tpu.dot_dimension_numbers<[1], [0], [0], [1], [0, 0, 1, 1], [], []>} : vector<324x64xbf16>, vector<64x64xbf16>, vector<324x64xf32> -> vector<324x64xf32>
    %65 = arith.addf %59, %64 : vector<324x64xf32>
    %c43 = arith.constant 43 : index
    %c0_54 = arith.constant 0 : index
    %66 = vector.load %arg10[%c43, %c0_54] : memref<372x64xf32, #tpu.memory_space<vmem>>, vector<324x64xf32>
    %67 = arith.truncf %66 : vector<324x64xf32> to vector<324x64xbf16>
    %c8 = arith.constant 8 : index
    %c0_55 = arith.constant 0 : index
    %c0_56 = arith.constant 0 : index
    %68 = vector.load %arg5[%c8, %c0_55, %c0_56] : memref<9x64x64xbf16, #tpu.memory_space<vmem>>, vector<1x64x64xbf16>
    %69 = vector.shape_cast %68 : vector<1x64x64xbf16> to vector<64x64xbf16>
    %cst_57 = arith.constant dense<0.000000e+00> : vector<324x64xf32>
    %70 = tpu.matmul %67, %69, %cst_57 {dimension_numbers = #tpu.dot_dimension_numbers<[1], [0], [0], [1], [0, 0, 1, 1], [], []>} : vector<324x64xbf16>, vector<64x64xbf16>, vector<324x64xf32> -> vector<324x64xf32>
    %71 = arith.addf %65, %70 : vector<324x64xf32>
    %c0_58 = arith.constant 0 : index
    %c0_59 = arith.constant 0 : index
    %72 = vector.load %arg6[%c0_58, %c0_59] : memref<1x64xf32, #tpu.memory_space<vmem>>, vector<1x64xf32>
    %73 = vector.broadcast %72 : vector<1x64xf32> to vector<324x64xf32>
    %74 = arith.addf %71, %73 : vector<324x64xf32>
    %cst_60 = arith.constant 0.000000e+00 : f32
    %75 = vector.broadcast %cst_60 : f32 to vector<324x64xf32>
    %76 = arith.maximumf %74, %75 : vector<324x64xf32>
    %77 = vector.broadcast %4 : vector<324x1xf32> to vector<324x64xf32>
    %78 = arith.mulf %76, %77 : vector<324x64xf32>
    %c24_61 = arith.constant 24 : index
    %c0_62 = arith.constant 0 : index
    %79 = vector.load %arg11[%c24_61, %c0_62] : memref<372x64xf32, #tpu.memory_space<vmem>>, vector<324x64xf32>
    tpu.vector_store %arg11[%c24_61, %c0_62], %78 {strides = array<i32>} : memref<372x64xf32, #tpu.memory_space<vmem>>, vector<324x64xf32>,
    %cst_63 = arith.constant 0.000000e+00 : f32
    %80 = vector.broadcast %cst_63 : f32 to vector<324x3xf32>
    %c5_64 = arith.constant 5 : index
    %c0_65 = arith.constant 0 : index
    %81 = vector.load %arg11[%c5_64, %c0_65] : memref<372x64xf32, #tpu.memory_space<vmem>>, vector<324x64xf32>
    %82 = arith.truncf %81 : vector<324x64xf32> to vector<324x64xbf16>
    %c0_66 = arith.constant 0 : index
    %c0_67 = arith.constant 0 : index
    %c0_68 = arith.constant 0 : index
    %83 = vector.load %arg7[%c0_66, %c0_67, %c0_68] : memref<9x64x3xbf16, #tpu.memory_space<vmem>>, vector<1x64x3xbf16>
    %84 = vector.shape_cast %83 : vector<1x64x3xbf16> to vector<64x3xbf16>
    %cst_69 = arith.constant dense<0.000000e+00> : vector<324x3xf32>
    %85 = tpu.matmul %82, %84, %cst_69 {dimension_numbers = #tpu.dot_dimension_numbers<[1], [0], [0], [1], [0, 0, 1, 1], [], []>} : vector<324x64xbf16>, vector<64x3xbf16>, vector<324x3xf32> -> vector<324x3xf32>
    %86 = arith.addf %80, %85 : vector<324x3xf32>
    %c6_70 = arith.constant 6 : index
    %c0_71 = arith.constant 0 : index
    %87 = vector.load %arg11[%c6_70, %c0_71] : memref<372x64xf32, #tpu.memory_space<vmem>>, vector<324x64xf32>
    %88 = arith.truncf %87 : vector<324x64xf32> to vector<324x64xbf16>
    %c1_72 = arith.constant 1 : index
    %c0_73 = arith.constant 0 : index
    %c0_74 = arith.constant 0 : index
    %89 = vector.load %arg7[%c1_72, %c0_73, %c0_74] : memref<9x64x3xbf16, #tpu.memory_space<vmem>>, vector<1x64x3xbf16>
    %90 = vector.shape_cast %89 : vector<1x64x3xbf16> to vector<64x3xbf16>
    %cst_75 = arith.constant dense<0.000000e+00> : vector<324x3xf32>
    %91 = tpu.matmul %88, %90, %cst_75 {dimension_numbers = #tpu.dot_dimension_numbers<[1], [0], [0], [1], [0, 0, 1, 1], [], []>} : vector<324x64xbf16>, vector<64x3xbf16>, vector<324x3xf32> -> vector<324x3xf32>
    %92 = arith.addf %86, %91 : vector<324x3xf32>
    %c7_76 = arith.constant 7 : index
    %c0_77 = arith.constant 0 : index
    %93 = vector.load %arg11[%c7_76, %c0_77] : memref<372x64xf32, #tpu.memory_space<vmem>>, vector<324x64xf32>
    %94 = arith.truncf %93 : vector<324x64xf32> to vector<324x64xbf16>
    %c2_78 = arith.constant 2 : index
    %c0_79 = arith.constant 0 : index
    %c0_80 = arith.constant 0 : index
    %95 = vector.load %arg7[%c2_78, %c0_79, %c0_80] : memref<9x64x3xbf16, #tpu.memory_space<vmem>>, vector<1x64x3xbf16>
    %96 = vector.shape_cast %95 : vector<1x64x3xbf16> to vector<64x3xbf16>
    %cst_81 = arith.constant dense<0.000000e+00> : vector<324x3xf32>
    %97 = tpu.matmul %94, %96, %cst_81 {dimension_numbers = #tpu.dot_dimension_numbers<[1], [0], [0], [1], [0, 0, 1, 1], [], []>} : vector<324x64xbf16>, vector<64x3xbf16>, vector<324x3xf32> -> vector<324x3xf32>
    %98 = arith.addf %92, %97 : vector<324x3xf32>
    %c23_82 = arith.constant 23 : index
    %c0_83 = arith.constant 0 : index
    %99 = vector.load %arg11[%c23_82, %c0_83] : memref<372x64xf32, #tpu.memory_space<vmem>>, vector<324x64xf32>
    %100 = arith.truncf %99 : vector<324x64xf32> to vector<324x64xbf16>
    %c3_84 = arith.constant 3 : index
    %c0_85 = arith.constant 0 : index
    %c0_86 = arith.constant 0 : index
    %101 = vector.load %arg7[%c3_84, %c0_85, %c0_86] : memref<9x64x3xbf16, #tpu.memory_space<vmem>>, vector<1x64x3xbf16>
    %102 = vector.shape_cast %101 : vector<1x64x3xbf16> to vector<64x3xbf16>
    %cst_87 = arith.constant dense<0.000000e+00> : vector<324x3xf32>
    %103 = tpu.matmul %100, %102, %cst_87 {dimension_numbers = #tpu.dot_dimension_numbers<[1], [0], [0], [1], [0, 0, 1, 1], [], []>} : vector<324x64xbf16>, vector<64x3xbf16>, vector<324x3xf32> -> vector<324x3xf32>
    %104 = arith.addf %98, %103 : vector<324x3xf32>
    %c24_88 = arith.constant 24 : index
    %c0_89 = arith.constant 0 : index
    %105 = vector.load %arg11[%c24_88, %c0_89] : memref<372x64xf32, #tpu.memory_space<vmem>>, vector<324x64xf32>
    %106 = arith.truncf %105 : vector<324x64xf32> to vector<324x64xbf16>
    %c4_90 = arith.constant 4 : index
    %c0_91 = arith.constant 0 : index
    %c0_92 = arith.constant 0 : index
    %107 = vector.load %arg7[%c4_90, %c0_91, %c0_92] : memref<9x64x3xbf16, #tpu.memory_space<vmem>>, vector<1x64x3xbf16>
    %108 = vector.shape_cast %107 : vector<1x64x3xbf16> to vector<64x3xbf16>
    %cst_93 = arith.constant dense<0.000000e+00> : vector<324x3xf32>
    %109 = tpu.matmul %106, %108, %cst_93 {dimension_numbers = #tpu.dot_dimension_numbers<[1], [0], [0], [1], [0, 0, 1, 1], [], []>} : vector<324x64xbf16>, vector<64x3xbf16>, vector<324x3xf32> -> vector<324x3xf32>
    %110 = arith.addf %104, %109 : vector<324x3xf32>
    %c25_94 = arith.constant 25 : index
    %c0_95 = arith.constant 0 : index
    %111 = vector.load %arg11[%c25_94, %c0_95] : memref<372x64xf32, #tpu.memory_space<vmem>>, vector<324x64xf32>
    %112 = arith.truncf %111 : vector<324x64xf32> to vector<324x64xbf16>
    %c5_96 = arith.constant 5 : index
    %c0_97 = arith.constant 0 : index
    %c0_98 = arith.constant 0 : index
    %113 = vector.load %arg7[%c5_96, %c0_97, %c0_98] : memref<9x64x3xbf16, #tpu.memory_space<vmem>>, vector<1x64x3xbf16>
    %114 = vector.shape_cast %113 : vector<1x64x3xbf16> to vector<64x3xbf16>
    %cst_99 = arith.constant dense<0.000000e+00> : vector<324x3xf32>
    %115 = tpu.matmul %112, %114, %cst_99 {dimension_numbers = #tpu.dot_dimension_numbers<[1], [0], [0], [1], [0, 0, 1, 1], [], []>} : vector<324x64xbf16>, vector<64x3xbf16>, vector<324x3xf32> -> vector<324x3xf32>
    %116 = arith.addf %110, %115 : vector<324x3xf32>
    %c41_100 = arith.constant 41 : index
    %c0_101 = arith.constant 0 : index
    %117 = vector.load %arg11[%c41_100, %c0_101] : memref<372x64xf32, #tpu.memory_space<vmem>>, vector<324x64xf32>
    %118 = arith.truncf %117 : vector<324x64xf32> to vector<324x64xbf16>
    %c6_102 = arith.constant 6 : index
    %c0_103 = arith.constant 0 : index
    %c0_104 = arith.constant 0 : index
    %119 = vector.load %arg7[%c6_102, %c0_103, %c0_104] : memref<9x64x3xbf16, #tpu.memory_space<vmem>>, vector<1x64x3xbf16>
    %120 = vector.shape_cast %119 : vector<1x64x3xbf16> to vector<64x3xbf16>
    %cst_105 = arith.constant dense<0.000000e+00> : vector<324x3xf32>
    %121 = tpu.matmul %118, %120, %cst_105 {dimension_numbers = #tpu.dot_dimension_numbers<[1], [0], [0], [1], [0, 0, 1, 1], [], []>} : vector<324x64xbf16>, vector<64x3xbf16>, vector<324x3xf32> -> vector<324x3xf32>
    %122 = arith.addf %116, %121 : vector<324x3xf32>
    %c42_106 = arith.constant 42 : index
    %c0_107 = arith.constant 0 : index
    %123 = vector.load %arg11[%c42_106, %c0_107] : memref<372x64xf32, #tpu.memory_space<vmem>>, vector<324x64xf32>
    %124 = arith.truncf %123 : vector<324x64xf32> to vector<324x64xbf16>
    %c7_108 = arith.constant 7 : index
    %c0_109 = arith.constant 0 : index
    %c0_110 = arith.constant 0 : index
    %125 = vector.load %arg7[%c7_108, %c0_109, %c0_110] : memref<9x64x3xbf16, #tpu.memory_space<vmem>>, vector<1x64x3xbf16>
    %126 = vector.shape_cast %125 : vector<1x64x3xbf16> to vector<64x3xbf16>
    %cst_111 = arith.constant dense<0.000000e+00> : vector<324x3xf32>
    %127 = tpu.matmul %124, %126, %cst_111 {dimension_numbers = #tpu.dot_dimension_numbers<[1], [0], [0], [1], [0, 0, 1, 1], [], []>} : vector<324x64xbf16>, vector<64x3xbf16>, vector<324x3xf32> -> vector<324x3xf32>
    %128 = arith.addf %122, %127 : vector<324x3xf32>
    %c43_112 = arith.constant 43 : index
    %c0_113 = arith.constant 0 : index
    %129 = vector.load %arg11[%c43_112, %c0_113] : memref<372x64xf32, #tpu.memory_space<vmem>>, vector<324x64xf32>
    %130 = arith.truncf %129 : vector<324x64xf32> to vector<324x64xbf16>
    %c8_114 = arith.constant 8 : index
    %c0_115 = arith.constant 0 : index
    %c0_116 = arith.constant 0 : index
    %131 = vector.load %arg7[%c8_114, %c0_115, %c0_116] : memref<9x64x3xbf16, #tpu.memory_space<vmem>>, vector<1x64x3xbf16>
    %132 = vector.shape_cast %131 : vector<1x64x3xbf16> to vector<64x3xbf16>
    %cst_117 = arith.constant dense<0.000000e+00> : vector<324x3xf32>
    %133 = tpu.matmul %130, %132, %cst_117 {dimension_numbers = #tpu.dot_dimension_numbers<[1], [0], [0], [1], [0, 0, 1, 1], [], []>} : vector<324x64xbf16>, vector<64x3xbf16>, vector<324x3xf32> -> vector<324x3xf32>
    %134 = arith.addf %128, %133 : vector<324x3xf32>
    %c0_118 = arith.constant 0 : index
    %c0_119 = arith.constant 0 : index
    %135 = vector.load %arg8[%c0_118, %c0_119] : memref<1x3xf32, #tpu.memory_space<vmem>>, vector<1x3xf32>
    %136 = vector.broadcast %135 : vector<1x3xf32> to vector<324x3xf32>
    %137 = arith.addf %134, %136 : vector<324x3xf32>
    %c0_120 = arith.constant 0 : index
    %c0_121 = arith.constant 0 : index
    %c0_122 = arith.constant 0 : index
    %138 = vector.load %arg9[%c0_120, %c0_121, %c0_122] : memref<1x324x3xf32, #tpu.memory_space<vmem>>, vector<1x324x3xf32>
    %139 = vector.shape_cast %138 : vector<1x324x3xf32> to vector<324x3xf32>
    %140 = vector.shape_cast %137 : vector<324x3xf32> to vector<1x324x3xf32>
    tpu.vector_store %arg9[%c0_120, %c0_121, %c0_122], %140 {strides = array<i32>} : memref<1x324x3xf32, #tpu.memory_space<vmem>>, vector<1x324x3xf32>,
    return
  }
  func.func @transform_0(%arg0: i32) -> (i32, i32, i32) {
    %c0_i32 = arith.constant 0 : i32
    %c0_i32_0 = arith.constant 0 : i32
    %c0_i32_1 = arith.constant 0 : i32
    return %arg0, %c0_i32, %c0_i32_0 : i32, i32, i32
  }
  func.func @transform_1(%arg0: i32) -> (i32, i32) {
    %c0_i32 = arith.constant 0 : i32
    %c0_i32_0 = arith.constant 0 : i32
    %c0_i32_1 = arith.constant 0 : i32
    return %c0_i32, %c0_i32_0 : i32, i32
  }
  func.func @transform_2(%arg0: i32) -> (i32, i32) {
    %c0_i32 = arith.constant 0 : i32
    %c0_i32_0 = arith.constant 0 : i32
    %c0_i32_1 = arith.constant 0 : i32
    return %c0_i32, %c0_i32_0 : i32, i32
  }
  func.func @transform_3(%arg0: i32) -> (i32, i32) {
    %c0_i32 = arith.constant 0 : i32
    %c0_i32_0 = arith.constant 0 : i32
    %c0_i32_1 = arith.constant 0 : i32
    return %c0_i32, %c0_i32_0 : i32, i32
  }
  func.func @transform_4(%arg0: i32) -> (i32, i32, i32) {
    %c0_i32 = arith.constant 0 : i32
    %c0_i32_0 = arith.constant 0 : i32
    %c0_i32_1 = arith.constant 0 : i32
    %c0_i32_2 = arith.constant 0 : i32
    return %c0_i32, %c0_i32_0, %c0_i32_1 : i32, i32, i32
  }
  func.func @transform_5(%arg0: i32) -> (i32, i32) {
    %c0_i32 = arith.constant 0 : i32
    %c0_i32_0 = arith.constant 0 : i32
    %c0_i32_1 = arith.constant 0 : i32
    return %c0_i32, %c0_i32_0 : i32, i32
  }
  func.func @transform_6(%arg0: i32) -> (i32, i32, i32) {
    %c0_i32 = arith.constant 0 : i32
    %c0_i32_0 = arith.constant 0 : i32
    %c0_i32_1 = arith.constant 0 : i32
    %c0_i32_2 = arith.constant 0 : i32
    return %c0_i32, %c0_i32_0, %c0_i32_1 : i32, i32, i32
  }
  func.func @transform_7(%arg0: i32) -> (i32, i32) {
    %c0_i32 = arith.constant 0 : i32
    %c0_i32_0 = arith.constant 0 : i32
    %c0_i32_1 = arith.constant 0 : i32
    return %c0_i32, %c0_i32_0 : i32, i32
  }
  func.func @transform_8(%arg0: i32) -> (i32, i32, i32) {
    %c0_i32 = arith.constant 0 : i32
    %c0_i32_0 = arith.constant 0 : i32
    %c0_i32_1 = arith.constant 0 : i32
    return %arg0, %c0_i32, %c0_i32_0 : i32, i32, i32
  }
}

</mosaic_0001>

<bundles_post_ra>
// kernel: predetails_forward.1
= control target key start
LH: loop header
LB: loop body
LE: loop exit
PB: predicated region body
PF: predicated region fallthrough
CT: control target
= control target key end

     0   :  { %s7973_s27 = smov 0   ;;  %s11435_s0 = inlined_call_operand.vmem [shape: bf16[2,324,27], index: 0, kind: input, shape index: {}]   ;;  %s11436_s1 = inlined_call_operand.vmem [shape: f32[324,1], index: 1, kind: input, shape index: {}]   ;;  %s11437_s2 = inlined_call_operand.vmem [shape: bf16[27,64], index: 2, kind: input, shape index: {}]   ;;  %s11438_s3 = inlined_call_operand.vmem [shape: f32[1,64], index: 3, kind: input, shape index: {}]   ;;  %s11439_s4 = inlined_call_operand.vmem [shape: bf16[9,64,64], index: 4, kind: input, shape index: {}]   ;;  %s11440_s5 = inlined_call_operand.vmem [shape: f32[1,64], index: 5, kind: input, shape index: {}]   ;;  %s11441_s6 = inlined_call_operand.vmem [shape: bf16[9,64,3], index: 6, kind: input, shape index: {}]   ;;  %s11442_s7 = inlined_call_operand.vmem [shape: f32[1,3], index: 7, kind: input, shape index: {}]   ;;  %s11443_s8 = inlined_call_operand.vmem [shape: f32[2,324,3], index: 8, kind: output, shape index: {}]  }
   0x1 LB: > { %s6880_s28 = sadd.s32 4294967295, %s7923_s27   ;;  %p6884_p0 = scmp.ge.s32.totalorder %s7923_s27, 1  ;;  %s7923_s27 = sphi %s7973_s27, %s18_s27  }
   0x2   : > { %p262_p1 = scmp.lt.s32.totalorder %s7923_s27, 3 }
   0x4   : > { %p263_p2 = pnand %p6884_p0, %p262_p1 }
   0x6   : > { %266 = sbr.rel (%p263_p2) target bundleno = 2188 (0x88c), region = 52 }
   0xb   : > { %v6973_v0 = vld [vmem:[%s11437_s2 + $0x8] sm:$0xf]  ;;  %v7813_v1 = vld [vmem:[%s11437_s2 + $0x8] sm:$0x30]  ;;  %vm671_vm0 = vcmask 1044480   ;;  %vm672_vm1 = vcmask 1045504  }
   0xc   : > { %v6974_v2 = vor.u32 %v7813_v1, %v6973_v0  ;;  %p296_p3 = scmp.lt.s32.totalorder %s6880_s28, 1  ;;  %v403_v3 = vld [vmem:[%s11436_s1] sm:$0xff]  ;;  %v7925_v4 = vmov 65535   ;;  %v7926_v6 = vmov 0   ;;  %v405_v7 = vld [vmem:[%s11436_s1 + $0x10] sm:$0xff]  ;;  %v404_v11 = vld [vmem:[%s11436_s1 + $0x8] sm:$0xff] }
   0xd   : > { %v673_v5 = vsel %vm671_vm0, 4294967295, %v7925_v4  ;;  %7909 = vset.pattern.permute.xlu0 %v7926_v6  ;;  %7910 = vset.pattern.permute.xlu1 %v7926_v6  ;;  %v7812_v10 = vld [vmem:[%s11437_s2] sm:$0xff]  ;;  %vm607_vm2 = vcmask 220160   ;;  %v406_v13 = vld [vmem:[%s11436_s1 + $0x18] sm:$0xff]  ;;  %v409_v15 = vld [vmem:[%s11436_s1 + $0x30] sm:$0xff]  ;;  %vm307_vm3 = vcmask 523264  }
   0xe   : > { %v674_v8 = vsel %vm672_vm1, %v673_v5, 0  ;;  %s12223_s28 = smov (!%p296_p3, %s6880_s28), 1  ;;  %834 = vperm.xlu0 %7909, %v403_v3   ;;  %844 = vperm.xlu1 %7910, %v405_v7   ;;  %v407_v17 = vld [vmem:[%s11436_s1 + $0x20] sm:$0xff]  ;;  %v410_v18 = vld [vmem:[%s11436_s1 + $0x38] sm:$0xff]  ;;  %v408_v19 = vld [vmem:[%s11436_s1 + $0x28] sm:$0xff]  ;;  %v7927_v39 = vmov 0.0  }
   0xf   : > { %v676_v9 = vand.u32 %v6974_v2, %v674_v8  ;;  %7911 = vset.pattern.permute.xlu2 %v7926_v6  ;;  %s7896_s15 = smul.u32 164, %s12223_s28  ;;  %v432_v21 = vld [vmem:[%s11436_s1 + $0xe8] sm:$0xff]  ;;  %v413_v23 = vld [vmem:[%s11436_s1 + $0x50] sm:$0xff]  ;;  %v411_v26 = vld [vmem:[%s11436_s1 + $0x40] sm:$0xff]  ;;  %311 = vst.msk [vmem:[#allocation2 + $0x18] sm:$0xff] %vm307_vm3, %v7927_v39  ;;  %vm354_vm4 = vcmask 519168  }
  0x10   : > { %854 = vperm.xlu2 %7911, %v407_v17   ;;  %v412_v22 = vld [vmem:[%s11436_s1 + $0x48] sm:$0xff]  ;;  %v434_v27 = vld [vmem:[%s11436_s1 + $0xf8] sm:$0xff]  ;;  %v435_v28 = vld [vmem:[%s11436_s1 + $0x100] sm:$0xff]  ;;  %308 = vst.msk [vmem:[#allocation2] sm:$0xff] %vm307_vm3, %v7927_v39  ;;  %vm6782_vm5 = vcmask 23552   ;;  %vm6823_vm6 = vcmask 19456  }
  0x11   : > { %684 = vmatpush.bf16.msra.mxu0 %v676_v9  ;;  %7886 = vmatpush.bf16.msra.mxu3 %v676_v9  ;;  %s8002_s20 = scalar_lea.vmem %s11435_s0, %s7896_s15  ;;  %v7821_v31 = vld [vmem:[%s11439_s4 + $0x38] sm:$0xff]  ;;  %v433_v33 = vld [vmem:[%s11436_s1 + $0xf0] sm:$0xff]  ;;  %v436_v34 = vld [vmem:[%s11436_s1 + $0x108] sm:$0xff]  ;;  %309 = vst.msk [vmem:[#allocation2 + $0x8] sm:$0xff] %vm307_vm3, %v7927_v39  ;;  %s7897_s15 = smul.u32 328, %s12223_s28 }
  0x12   : > { %v7792_v12 = vld [vmem:[%s8002_s20] sm:$0xff]  ;;  %v7793_v14 = vld [vmem:[%s8002_s20 + $0x8] sm:$0xff]  ;;  %v7794_v16 = vld [vmem:[%s8002_s20 + $0x10] sm:$0xff]  ;;  %1351 = vmatpush.bf16.msra.mxu1 %v7821_v31  ;;  %310 = vst.msk [vmem:[#allocation2 + $0x10] sm:$0xff] %vm307_vm3, %v7927_v39 }
  0x13   : > { %v7795_v20 = vld [vmem:[%s8002_s20 + $0x18] sm:$0xff]  ;;  %v7796_v24 = vld [vmem:[%s8002_s20 + $0x20] sm:$0xff]  ;;  %v7797_v29 = vld [vmem:[%s8002_s20 + $0x28] sm:$0xff]  ;;  %312 = vst.msk [vmem:[#allocation2 + $0x20] sm:$0xff] %vm307_vm3, %v7927_v39  ;;  %s11055_s28 = scalar_lea.vmem %s11443_s8, %s7897_s15 }
  0x14   : > { %v7808_v25 = vld [vmem:[%s8002_s20 + $0x80] sm:$0xff]  ;;  %v7809_v30 = vld [vmem:[%s8002_s20 + $0x88] sm:$0xff]  ;;  %v7817_v32 = vld [vmem:[%s11439_s4 + $0x18] sm:$0xff]  ;;  %313 = vst.msk [vmem:[#allocation2 + $0x28] sm:$0xff] %vm307_vm3, %v7927_v39 }
  0x15   : > { %685 = vmatpush.bf16.msra.mxu0 %v7812_v10  ;;  %7887 = vmatpush.bf16.msra.mxu3 %v7812_v10  ;;  %v416_v35 = vld [vmem:[%s11436_s1 + $0x68] sm:$0xff]  ;;  %v7820_v36 = vld [vmem:[%s11439_s4 + $0x30] sm:$0xff]  ;;  %v414_v42 = vld [vmem:[%s11436_s1 + $0x58] sm:$0xff]  ;;  %314 = vst.msk [vmem:[#allocation2 + $0x30] sm:$0xff] %vm307_vm3, %v7927_v39 }
  0x16   : > { %839 = vperm.xlu0 %7909, %v404_v11   ;;  %849 = vperm.xlu1 %7910, %v406_v13   ;;  %v7816_v37 = vld [vmem:[%s11439_s4 + $0x10] sm:$0xff]  ;;  %v7819_v40 = vld [vmem:[%s11439_s4 + $0x28] sm:$0xff]  ;;  %v7818_v45 = vld [vmem:[%s11439_s4 + $0x20] sm:$0xff]  ;;  %315 = vst.msk [vmem:[#allocation2 + $0x38] sm:$0xff] %vm307_vm3, %v7927_v39 }
  0x17   : > { %1551 = vmatpush.bf16.msra.mxu2 %v7817_v32  ;;  %1352 = vmatpush.bf16.msra.mxu1 %v7820_v36  ;;  %v7798_v38 = vld [vmem:[%s8002_s20 + $0x30] sm:$0xff]  ;;  %v7815_v41 = vld [vmem:[%s11439_s4 + $0x8] sm:$0xff]  ;;  %v7814_v46 = vld [vmem:[%s11439_s4] sm:$0xff]  ;;  %316 = vst.msk [vmem:[#allocation2 + $0x40] sm:$0xff] %vm307_vm3, %v7927_v39 }
  0x18   : > { %6975 = vmatmul.msk.bf16.vlgmr.msra.gmra.mxu0 %vm607_vm2, %v7792_v12  ;;  %859 = vperm.xlu2 %7911, %v408_v19   ;;  %v437_v43 = vld [vmem:[%s11436_s1 + $0x110] sm:$0xff]  ;;  %317 = vst.msk [vmem:[#allocation2 + $0x48] sm:$0xff] %vm307_vm3, %v7927_v39  ;;  %v1189_v48 = vld [vmem:[#allocation2 + $0x6] sm:$0xff]  ;;  %v418_v55 = vld [vmem:[%s11436_s1 + $0x78] sm:$0xff] }
  0x19   : > { %6991 = vmatmul.msk.bf16.vlgmr.msra.gmra.mxu3 %vm607_vm2, %v7808_v25  ;;  %v417_v44 = vld [vmem:[%s11436_s1 + $0x70] sm:$0xff]  ;;  %v1119_v49 = vld [vmem:[#allocation2 + $0x5] sm:$0xff]  ;;  %318 = vst.msk [vmem:[#allocation2 + $0x50] sm:$0xff] %vm307_vm3, %v7927_v39  ;;  %v7799_v56 = vld [vmem:[%s8002_s20 + $0x38] sm:$0xff] }
  0x1a   : > { %7888 = vmatpush.bf16.msrb.mxu3 %v7821_v31  ;;  %v7810_v47 = vld [vmem:[%s8002_s20 + $0x90] sm:$0xff]  ;;  %v415_v52 = vld [vmem:[%s11436_s1 + $0x60] sm:$0xff]  ;;  %319 = vst.msk [vmem:[#allocation2 + $0x58] sm:$0xff] %vm307_vm3, %v7927_v39  ;;  %v7801_v3 = vld [vmem:[%s8002_s20 + $0x48] sm:$0xff] }
  0x1b   : > { %1552 = vmatpush.bf16.msra.mxu2 %v7816_v37  ;;  %1353 = vmatpush.bf16.msra.mxu1 %v7819_v40  ;;  %v1190_v50 = vld [vmem:[#allocation2 + $0xe] sm:$0xff]  ;;  %320 = vst.msk [vmem:[#allocation2 + $0x60] sm:$0xff] %vm307_vm3, %v7927_v39  ;;  %v8175_v57 = vld [vmem:[%s11438_s3] ss:$0 sm:$0xff]  ;;  %v7811_v5 = vld [vmem:[%s8002_s20 + $0x98] sm:$0xff] }
  0x1c   : > { %v1120_v51 = vld [vmem:[#allocation2 + $0xd] sm:$0xff]  ;;  %v1230_v53 = vpack.c.bf16 %v1190_v50, %v1189_v48  ;;  %321 = vst.msk [vmem:[#allocation2 + $0x68] sm:$0xff] %vm307_vm3, %v7927_v39  ;;  %v7800_v58 = vld [vmem:[%s8002_s20 + $0x40] sm:$0xff]  ;;  %v438_v9 = vld [vmem:[%s11436_s1 + $0x118] sm:$0xff] }
  0x1d   : > { %v1160_v54 = vpack.c.bf16 %v1120_v51, %v1119_v49  ;;  %322 = vst.msk [vmem:[#allocation2 + $0x70] sm:$0xff] %vm307_vm3, %v7927_v39  ;;  %v419_v2 = vld [vmem:[%s11436_s1 + $0x80] sm:$0xff]  ;;  %v440_v4 = vld [vmem:[%s11436_s1 + $0x128] sm:$0xff]  ;;  %v421_v7 = vld [vmem:[%s11436_s1 + $0x90] sm:$0xff] }
  0x1e   : > { %864 = vperm.xlu0 %7909, %v409_v15   ;;  %869 = vperm.xlu1 %7910, %v410_v18   ;;  %323 = vst.msk [vmem:[#allocation2 + $0x78] sm:$0xff] %vm307_vm3, %v7927_v39  ;;  %v441_v8 = vld [vmem:[%s11436_s1 + $0x130] sm:$0xff]  ;;  %v484_v10 = vld [vmem:[%s8002_s20 + $0xa0] sm:$0x3]  ;;  %v426_v31 = vld [vmem:[%s11436_s1 + $0xb8] sm:$0xff] }
  0x1f   : > { %7889 = vmatpush.bf16.msrb.mxu3 %v7820_v36  ;;  %1553 = vmatpush.bf16.msra.mxu2 %v7815_v41  ;;  %324 = vst.msk [vmem:[#allocation2 + $0x80] sm:$0xff] %vm307_vm3, %v7927_v39  ;;  %v574_v11 = vunpack.c.l.b16 %v484_v10  ;;  %v7802_v12 = vld [vmem:[%s8002_s20 + $0x50] sm:$0xff]  ;;  %v423_v15 = vld [vmem:[%s11436_s1 + $0xa0] sm:$0xff] }
  0x20   : > { %874 = vperm.xlu2 %7911, %v411_v26   ;;  %1354 = vmatpush.bf16.msra.mxu1 %v7818_v45  ;;  %325 = vst.msk [vmem:[#allocation2 + $0x88] sm:$0xff] %vm307_vm3, %v7927_v39 }
  0x21   : > { %326 = vst.msk [vmem:[#allocation2 + $0x90] sm:$0xff] %vm307_vm3, %v7927_v39 }
  0x22   : > { %327 = vst.msk [vmem:[#allocation2 + $0x98] sm:$0xff] %vm307_vm3, %v7927_v39 }
  0x23   : > { %7890 = vmatpush.bf16.msrb.mxu3 %v7819_v40  ;;  %1554 = vmatpush.bf16.msra.mxu2 %v7814_v46  ;;  %328 = vst.msk [vmem:[#allocation2 + $0xa0] sm:$0xff] %vm307_vm3, %v7927_v39  ;;  %v7803_v40 = vld [vmem:[%s8002_s20 + $0x58] sm:$0xff] }
  0x24   : > { %7020 = vmatmul.msk.bf16.vlgmr.msra.gmra.mxu1 %vm307_vm3, %v1230_v53  ;;  %329 = vst.msk [vmem:[#allocation2 + $0xa8] sm:$0xff] %vm307_vm3, %v7927_v39 }
  0x25   : > { %330 = vst.msk [vmem:[#allocation2 + $0xb0] sm:$0xff] %vm307_vm3, %v7927_v39 }
  0x26   : > { %979 = vperm.xlu1 %7910, %v432_v21   ;;  %879 = vperm.xlu0 %7909, %v412_v22   ;;  %331 = vst.msk [vmem:[#allocation2 + $0xb8] sm:$0xff] %vm307_vm3, %v7927_v39 }
  0x27   : > { %7891 = vmatpush.bf16.msrb.mxu3 %v7818_v45  ;;  %7057 = vmatmul.msk.bf16.vlgmr.msra.gmra.mxu2 %vm307_vm3, %v1160_v54  ;;  %332 = vst.msk [vmem:[#allocation2 + $0xc0] sm:$0xff] %vm307_vm3, %v7927_v39  ;;  %v430_v45 = vld [vmem:[%s11436_s1 + $0xd8] sm:$0xff] }
  0x28   : > { %6976 = vmatmul.msk.bf16.gmra.mxu0 %vm607_vm2, %v7793_v14  ;;  %984 = vperm.xlu2 %7911, %v433_v33   ;;  %333 = vst.msk [vmem:[#allocation2 + $0xc8] sm:$0xff] %vm307_vm3, %v7927_v39  ;;  %v424_v14 = vld [vmem:[%s11436_s1 + $0xa8] sm:$0xff] }
  0x29   : > { %6992 = vmatmul.msk.bf16.gmra.mxu3 %vm607_vm2, %v7809_v30  ;;  %334 = vst.msk [vmem:[#allocation2 + $0xd0] sm:$0xff] %vm307_vm3, %v7927_v39  ;;  %v427_v30 = vld [vmem:[%s11436_s1 + $0xc0] sm:$0xff] }
  0x2a   : > { %335 = vst.msk [vmem:[#allocation2 + $0xd8] sm:$0xff] %vm307_vm3, %v7927_v39 }
  0x2b   : > { %7892 = vmatpush.bf16.msra.mxu3 %v7817_v32  ;;  %336 = vst.msk [vmem:[#allocation2 + $0xe0] sm:$0xff] %vm307_vm3, %v7927_v39 }
  0x2c   : > { %337 = vst.msk [vmem:[#allocation2 + $0xe8] sm:$0xff] %vm307_vm3, %v7927_v39 }
  0x2d   : > { %338 = vst.msk [vmem:[#allocation2 + $0xf0] sm:$0xff] %vm307_vm3, %v7927_v39 }
  0x2e   : > { %884 = vperm.xlu1 %7910, %v413_v23   ;;  %989 = vperm.xlu0 %7909, %v434_v27   ;;  %339 = vst.msk [vmem:[#allocation2 + $0xf8] sm:$0xff] %vm307_vm3, %v7927_v39 }
  0x2f   : > { %7893 = vmatpush.bf16.msra.mxu3 %v7816_v37  ;;  %340 = vst.msk [vmem:[#allocation2 + $0x100] sm:$0xff] %vm307_vm3, %v7927_v39 }
  0x30   : > { %889 = vperm.xlu2 %7911, %v414_v42   ;;  %341 = vst.msk [vmem:[#allocation2 + $0x108] sm:$0xff] %vm307_vm3, %v7927_v39 }
  0x31   : > { %342 = vst.msk [vmem:[#allocation2 + $0x110] sm:$0xff] %vm307_vm3, %v7927_v39 }
  0x32   : > { %343 = vst.msk [vmem:[#allocation2 + $0x118] sm:$0xff] %vm307_vm3, %v7927_v39 }
  0x33   : > { %7894 = vmatpush.bf16.msra.mxu3 %v7815_v41  ;;  %344 = vst.msk [vmem:[#allocation2 + $0x120] sm:$0xff] %vm307_vm3, %v7927_v39 }
  0x34   : > { %345 = vst.msk [vmem:[#allocation2 + $0x128] sm:$0xff] %vm307_vm3, %v7927_v39 }
  0x35   : > { %346 = vst.msk [vmem:[#allocation2 + $0x130] sm:$0xff] %vm307_vm3, %v7927_v39 }
  0x36   : > { %994 = vperm.xlu0 %7909, %v435_v28   ;;  %999 = vperm.xlu1 %7910, %v436_v34   ;;  %347 = vst.msk [vmem:[#allocation2 + $0x138] sm:$0xff] %vm307_vm3, %v7927_v39 }
  0x37   : > { %7895 = vmatpush.bf16.msra.mxu3 %v7814_v46  ;;  %348 = vst.msk [vmem:[#allocation2 + $0x140] sm:$0xff] %vm307_vm3, %v7927_v39 }
  0x38   : > { %6977 = vmatmul.msk.bf16.gmra.mxu0 %vm607_vm2, %v7794_v16  ;;  %894 = vperm.xlu2 %7911, %v415_v52   ;;  %349 = vst.msk [vmem:[#allocation2 + $0x148] sm:$0xff] %vm307_vm3, %v7927_v39  ;;  %v595_v16 = vpack.c.b16 %v574_v11, %v574_v11 }
  0x39   : > { %6993 = vmatmul.msk.bf16.gmra.mxu3 %vm607_vm2, %v7810_v47  ;;  %350 = vst.msk [vmem:[#allocation2 + $0x150] sm:$0xff] %vm307_vm3, %v7927_v39 }
  0x3a   : > { %351 = vst.msk [vmem:[#allocation2 + $0x158] sm:$0xff] %vm307_vm3, %v7927_v39 }
  0x3b   : > { %352 = vst.msk [vmem:[#allocation2 + $0x160] sm:$0xff] %vm307_vm3, %v7927_v39 }
  0x3c   : > { %353 = vst.msk [vmem:[#allocation2 + $0x168] sm:$0xff] %vm307_vm3, %v7927_v39 }
  0x3d   : > { %356 = vst.msk [vmem:[#allocation3] sm:$0xff] %vm307_vm3, %v7927_v39 }
  0x3e   : > { %899 = vperm.xlu0 %7909, %v416_v35   ;;  %1004 = vperm.xlu1 %7910, %v437_v43   ;;  %357 = vst.msk [vmem:[#allocation3 + $0x8] sm:$0xff] %vm307_vm3, %v7927_v39 }
  0x3f   : > { %358 = vst.msk [vmem:[#allocation3 + $0x10] sm:$0xff] %vm307_vm3, %v7927_v39 }
  0x40   : > { %359 = vst.msk [vmem:[#allocation3 + $0x18] sm:$0xff] %vm307_vm3, %v7927_v39  ;;  %1009 = vperm.xlu2 %7911, %v438_v9  }
  0x41   : > { %360 = vst.msk [vmem:[#allocation3 + $0x20] sm:$0xff] %vm307_vm3, %v7927_v39 }
  0x42   : > { %361 = vst.msk [vmem:[#allocation3 + $0x28] sm:$0xff] %vm307_vm3, %v7927_v39 }
  0x43   : > { %362 = vst.msk [vmem:[#allocation3 + $0x30] sm:$0xff] %vm307_vm3, %v7927_v39 }
  0x44   : > { %363 = vst.msk [vmem:[#allocation3 + $0x38] sm:$0xff] %vm307_vm3, %v7927_v39 }
  0x45   : > { %364 = vst.msk [vmem:[#allocation3 + $0x40] sm:$0xff] %vm307_vm3, %v7927_v39 }
  0x46   : > { %904 = vperm.xlu0 %7909, %v417_v44   ;;  %909 = vperm.xlu1 %7910, %v418_v55   ;;  %365 = vst.msk [vmem:[#allocation3 + $0x48] sm:$0xff] %vm307_vm3, %v7927_v39  ;;  %v420_v44 = vld [vmem:[%s11436_s1 + $0x88] sm:$0xff] }
  0x47   : > { %366 = vst.msk [vmem:[#allocation3 + $0x50] sm:$0xff] %vm307_vm3, %v7927_v39 }
  0x48   : > { %6978 = vmatmul.msk.bf16.gmra.mxu0 %vm607_vm2, %v7795_v20  ;;  %367 = vst.msk [vmem:[#allocation3 + $0x58] sm:$0xff] %vm307_vm3, %v7927_v39 }
  0x49   : > { %368 = vst.msk [vmem:[#allocation3 + $0x60] sm:$0xff] %vm307_vm3, %v7927_v39  ;;  %6994 = vmatmul.msk.bf16.gmra.mxu3 %vm607_vm2, %v7811_v5 }
  0x4a   : > { %369 = vst.msk [vmem:[#allocation3 + $0x68] sm:$0xff] %vm307_vm3, %v7927_v39 }
  0x4b   : > { %370 = vst.msk [vmem:[#allocation3 + $0x70] sm:$0xff] %vm307_vm3, %v7927_v39 }
  0x4c   : > { %371 = vst.msk [vmem:[#allocation3 + $0x78] sm:$0xff] %vm307_vm3, %v7927_v39 }
  0x4d   : > { %372 = vst.msk [vmem:[#allocation3 + $0x80] sm:$0xff] %vm307_vm3, %v7927_v39 }
  0x4e   : > { %914 = vperm.xlu1 %7910, %v419_v2   ;;  %1019 = vperm.xlu0 %7909, %v440_v4   ;;  %373 = vst.msk [vmem:[#allocation3 + $0x88] sm:$0xff] %vm307_vm3, %v7927_v39  ;;  %v7804_v2 = vld [vmem:[%s8002_s20 + $0x60] sm:$0xff] }
  0x4f   : > { %374 = vst.msk [vmem:[#allocation3 + $0x90] sm:$0xff] %vm307_vm3, %v7927_v39 }
  0x50   : > { %375 = vst.msk [vmem:[#allocation3 + $0x98] sm:$0xff] %vm307_vm3, %v7927_v39 }
  0x51   : > { %376 = vst.msk [vmem:[#allocation3 + $0xa0] sm:$0xff] %vm307_vm3, %v7927_v39 }
  0x52   : > { %377 = vst.msk [vmem:[#allocation3 + $0xa8] sm:$0xff] %vm307_vm3, %v7927_v39 }
  0x53   : > { %378 = vst.msk [vmem:[#allocation3 + $0xb0] sm:$0xff] %vm307_vm3, %v7927_v39 }
  0x54   : > { %379 = vst.msk [vmem:[#allocation3 + $0xb8] sm:$0xff] %vm307_vm3, %v7927_v39 }
  0x55   : > { %380 = vst.msk [vmem:[#allocation3 + $0xc0] sm:$0xff] %vm307_vm3, %v7927_v39 }
  0x56   : > { %381 = vst.msk [vmem:[#allocation3 + $0xc8] sm:$0xff] %vm307_vm3, %v7927_v39  ;;  %924 = vperm.xlu1 %7910, %v421_v7   ;;  %1024 = vperm.xlu0 %7909, %v441_v8  }
  0x57   : > { %382 = vst.msk [vmem:[#allocation3 + $0xd0] sm:$0xff] %vm307_vm3, %v7927_v39 }
  0x58   : > { %6979 = vmatmul.msk.bf16.gmra.mxu0 %vm607_vm2, %v7796_v24  ;;  %383 = vst.msk [vmem:[#allocation3 + $0xd8] sm:$0xff] %vm307_vm3, %v7927_v39 }
  0x59   : > { %384 = vst.msk [vmem:[#allocation3 + $0xe0] sm:$0xff] %vm307_vm3, %v7927_v39  ;;  %6995 = vmatmul.msk.bf16.gmra.mxu3 %vm607_vm2, %v595_v16 }
  0x5a   : > { %385 = vst.msk [vmem:[#allocation3 + $0xe8] sm:$0xff] %vm307_vm3, %v7927_v39 }
  0x5b   : > { %386 = vst.msk [vmem:[#allocation3 + $0xf0] sm:$0xff] %vm307_vm3, %v7927_v39 }
  0x5c   : > { %387 = vst.msk [vmem:[#allocation3 + $0xf8] sm:$0xff] %vm307_vm3, %v7927_v39 }
  0x5d   : > { %388 = vst.msk [vmem:[#allocation3 + $0x100] sm:$0xff] %vm307_vm3, %v7927_v39 }
  0x5e   : > { %389 = vst.msk [vmem:[#allocation3 + $0x108] sm:$0xff] %vm307_vm3, %v7927_v39  ;;  %939 = vperm.xlu1 %7910, %v424_v14   ;;  %934 = vperm.xlu0 %7909, %v423_v15  }
  0x5f   : > { %390 = vst.msk [vmem:[#allocation3 + $0x110] sm:$0xff] %vm307_vm3, %v7927_v39 }
  0x60   : > { %391 = vst.msk [vmem:[#allocation3 + $0x118] sm:$0xff] %vm307_vm3, %v7927_v39 }
  0x61   : > { %392 = vst.msk [vmem:[#allocation3 + $0x120] sm:$0xff] %vm307_vm3, %v7927_v39 }
  0x62   : > { %393 = vst.msk [vmem:[#allocation3 + $0x128] sm:$0xff] %vm307_vm3, %v7927_v39 }
  0x63   : > { %394 = vst.msk [vmem:[#allocation3 + $0x130] sm:$0xff] %vm307_vm3, %v7927_v39 }
  0x64   : > { %395 = vst.msk [vmem:[#allocation3 + $0x138] sm:$0xff] %vm307_vm3, %v7927_v39 }
  0x65   : > { %396 = vst.msk [vmem:[#allocation3 + $0x140] sm:$0xff] %vm307_vm3, %v7927_v39 }
  0x66   : > { %397 = vst.msk [vmem:[#allocation3 + $0x148] sm:$0xff] %vm307_vm3, %v7927_v39  ;;  %954 = vperm.xlu1 %7910, %v427_v30   ;;  %949 = vperm.xlu0 %7909, %v426_v31  }
  0x67   : > { %398 = vst.msk [vmem:[#allocation3 + $0x150] sm:$0xff] %vm307_vm3, %v7927_v39 }
  0x68   : > { %6980 = vmatmul.msk.bf16.gmra.mxu0 %vm607_vm2, %v7797_v29  ;;  %v439_v29 = vld [vmem:[%s11436_s1 + $0x120] sm:$0xff]  ;;  %399 = vst.msk [vmem:[#allocation3 + $0x158] sm:$0xff] %vm307_vm3, %v7927_v39 }
  0x69   : > { %1014 = vperm.xlu2 %7911, %v439_v29   ;;  %400 = vst.msk [vmem:[#allocation3 + $0x160] sm:$0xff] %vm307_vm3, %v7927_v39 }
  0x6a   : > { %v8314_v18 = vpop.permute.xlu2 %854  ;;  %401 = vst.msk [vmem:[#allocation3 + $0x168] sm:$0xff] %vm307_vm3, %v7927_v39  ;;  %v429_v39 = vld [vmem:[%s11436_s1 + $0xd0] sm:$0xff] }
  0x6b   : > { %11496 = vst [vmem:[#allocation6_spill] sm:$0xff] %v8314_v18 }
  0x6e   : > { %969 = vperm.xlu1 %7910, %v430_v45   ;;  %964 = vperm.xlu0 %7909, %v429_v39  }
  0x71   : > { %919 = vperm.xlu2 %7911, %v420_v44  }
  0x72   : > { %v8357_v37 = vpop.permute.xlu2 %859 }
  0x73   : > { %11499 = vst [vmem:[#allocation9_spill] sm:$0xff] %v8357_v37 }
  0x78   : > { %6981 = vmatmul.msk.bf16.gmra.mxu0 %vm607_vm2, %v7798_v38 }
  0x7a   : > { %v8406_v5 = vpop.permute.xlu2 %874 }
  0x7b   : > { %11502 = vst [vmem:[#allocation12_spill] sm:$0xff] %v8406_v5 }
  0x80   : > { %v8189_v61 = vpop.permute.xlu0 %834  ;;  %v8307_v17 = vpop.permute.xlu1 %844 }
  0x81   : > { %11494 = vst [vmem:[#allocation4_spill] sm:$0xff] %v8189_v61 }
  0x82   : > { %11495 = vst [vmem:[#allocation5_spill] sm:$0xff] %v8307_v17 }
  0x88   : > { %6982 = vmatmul.msk.bf16.gmra.mxu0 %vm607_vm2, %v7799_v56  ;;  %v8333_v25 = vpop.permute.xlu0 %839  ;;  %v8349_v32 = vpop.permute.xlu1 %849 }
  0x89   : > { %11497 = vst [vmem:[#allocation7_spill] sm:$0xff] %v8333_v25 }
  0x8a   : > { %11498 = vst [vmem:[#allocation8_spill] sm:$0xff] %v8349_v32 }
  0x90   : > { %v8381_v47 = vpop.permute.xlu0 %864 }
  0x91   : > { %11500 = vst [vmem:[#allocation10_spill] sm:$0xff] %v8381_v47 }
  0x95   : > { %v687_v59 = vpop.f32.mrf.mxu0 }
  0x96   : > { %v688_v60 = vadd.f32 %v8175_v57, %v687_v59  ;;  %v443_v59 = vld [vmem:[%s11436_s1 + $0x140] sm:$0xf] }
  0x97   : > { %1034 = vperm.xlu1 %7910, %v443_v59  }
  0x98   : > { %v791_v62 = vmax.f32 %v688_v60, 0.0  ;;  %6983 = vmatmul.msk.bf16.gmra.mxu0 %vm607_vm2, %v7800_v58  ;;  %v8393_v60 = vpop.permute.xlu1 %869 }
  0x99   : > { %11501 = vst [vmem:[#allocation11_spill] sm:$0xff] %v8393_v60 }
  0x9a   : > { %v1037_v63 = vmul.f32 %v8189_v61, %v791_v62 }
  0x9c   : > { %1078 = vst.msk [vmem:[#allocation2 + $0x18] sm:$0xff] %vm307_vm3, %v1037_v63  ;;  %v442_v63 = vld [vmem:[%s11436_s1 + $0x138] sm:$0xff] }
  0x9d   : > { %v689_v0 = vpop.f32.mrf.mxu0  ;;  %1029 = vperm.xlu0 %7909, %v442_v63  }
  0x9e   : > { %v690_v19 = vadd.f32 %v8175_v57, %v689_v0  ;;  %v422_v0 = vld [vmem:[%s11436_s1 + $0x98] sm:$0xff] }
  0x9f   : > { %929 = vperm.xlu2 %7911, %v422_v0   ;;  %v767_v0 = vpop.f32.mrf.mxu3 }
  0xa0   : > { %v792_v23 = vmax.f32 %v690_v19, 0.0  ;;  %v8413_v16 = vpop.permute.xlu1 %979  ;;  %v8415_v19 = vpop.permute.xlu0 %879 }
  0xa1   : > { %11503 = vst [vmem:[#allocation13_spill] sm:$0xff] %v8413_v16 }
  0xa2   : > { %v1038_v34 = vmul.f32 %v8333_v25, %v792_v23  ;;  %11504 = vst [vmem:[#allocation14_spill] sm:$0xff] %v8415_v19 }
  0xa3   : > { %v1191_v50 = vld [vmem:[#allocation2 + $0x16] sm:$0xff] }
  0xa4   : > { %1079 = vst.msk [vmem:[#allocation2 + $0x20] sm:$0xff] %vm307_vm3, %v1038_v34  ;;  %v1121_v52 = vld [vmem:[#allocation2 + $0x15] sm:$0xff] }
  0xa5   : > { %v692_v1 = vpop.f32.mrf.mxu0 }
  0xa6   : > { %v693_v20 = vadd.f32 %v8175_v57, %v692_v1 }
  0xa8   : > { %6984 = vmatmul.msk.bf16.gmra.mxu0 %vm607_vm2, %v7801_v3  ;;  %v793_v26 = vmax.f32 %v693_v20, 0.0 }
  0xaa   : > { %v1039_v36 = vmul.f32 %v8307_v17, %v793_v26 }
  0xab   : > { %v1192_v51 = vld [vmem:[#allocation2 + $0x1e] sm:$0xff] }
  0xac   : > { %1080 = vst.msk [vmem:[#allocation2 + $0x28] sm:$0xff] %vm307_vm3, %v1039_v36  ;;  %v1122_v53 = vld [vmem:[#allocation2 + $0x1d] sm:$0xff]  ;;  %v1231_v54 = vpack.c.bf16 %v1192_v51, %v1191_v50 }
  0xad   : > { %v694_v6 = vpop.f32.mrf.mxu0  ;;  %v1161_v55 = vpack.c.bf16 %v1122_v53, %v1121_v52 }
  0xae   : > { %v695_v21 = vadd.f32 %v8175_v57, %v694_v6  ;;  %7021 = vmatmul.msk.bf16.gmra.mxu1 %vm307_vm3, %v1231_v54 }
  0xaf   : > { %7058 = vmatmul.msk.bf16.gmra.mxu2 %vm307_vm3, %v1161_v55 }
  0xb0   : > { %v794_v28 = vmax.f32 %v695_v21, 0.0 }
  0xb2   : > { %v1040_v38 = vmul.f32 %v8349_v32, %v794_v28 }
  0xb3   : > { %v1193_v9 = vld [vmem:[#allocation2 + $0x26] sm:$0xff] }
  0xb4   : > { %1081 = vst.msk [vmem:[#allocation2 + $0x30] sm:$0xff] %vm307_vm3, %v1040_v38  ;;  %v1123_v10 = vld [vmem:[#allocation2 + $0x25] sm:$0xff] }
  0xb5   : > { %v697_v13 = vpop.f32.mrf.mxu0 }
  0xb6   : > { %v698_v22 = vadd.f32 %v8175_v57, %v697_v13 }
  0xb8   : > { %6985 = vmatmul.msk.bf16.gmra.mxu0 %vm607_vm2, %v7802_v12  ;;  %v795_v33 = vmax.f32 %v698_v22, 0.0  ;;  %v7805_v22 = vld [vmem:[%s8002_s20 + $0x68] sm:$0xff] }
  0xba   : > { %v1041_v41 = vmul.f32 %v8314_v18, %v795_v33 }
  0xbb   : > { %v1194_v6 = vld [vmem:[#allocation2 + $0x2e] sm:$0xff] }
  0xbc   : > { %1082 = vst.msk [vmem:[#allocation2 + $0x38] sm:$0xff] %vm307_vm3, %v1041_v41  ;;  %v1124_v7 = vld [vmem:[#allocation2 + $0x2d] sm:$0xff]  ;;  %v1232_v12 = vpack.c.bf16 %v1194_v6, %v1193_v9  ;;  %v768_v6 = vadd.f32 %v8175_v57, %v767_v0 }
  0xbd   : > { %v699_v24 = vpop.f32.mrf.mxu0  ;;  %v1162_v13 = vpack.c.bf16 %v1124_v7, %v1123_v10  ;;  %v425_v41 = vld [vmem:[%s11436_s1 + $0xb0] sm:$0xff] }
  0xbe   : > { %v700_v27 = vadd.f32 %v8175_v57, %v699_v24  ;;  %7022 = vmatmul.msk.bf16.gmra.mxu1 %vm307_vm3, %v1232_v12  ;;  %v8420_v24 = vpop.permute.xlu2 %984  ;;  %944 = vperm.xlu2 %7911, %v425_v41   ;;  %v823_v9 = vmax.f32 %v768_v6, 0.0 }
  0xbf   : > { %7059 = vmatmul.msk.bf16.gmra.mxu2 %vm307_vm3, %v1162_v13  ;;  %11505 = vst [vmem:[#allocation15_spill] sm:$0xff] %v8420_v24 }
  0xc0   : > { %v796_v35 = vmax.f32 %v700_v27, 0.0  ;;  %v8424_v27 = vpop.permute.xlu1 %884 }
  0xc1   : > { %11506 = vst [vmem:[#allocation16_spill] sm:$0xff] %v8424_v27 }
  0xc2   : > { %v1042_v42 = vmul.f32 %v8357_v37, %v796_v35 }
  0xc3   : > { %v1195_v31 = vld [vmem:[#allocation2 + $0x36] sm:$0xff] }
  0xc4   : > { %1083 = vst.msk [vmem:[#allocation2 + $0x40] sm:$0xff] %vm307_vm3, %v1042_v42  ;;  %v1125_v33 = vld [vmem:[#allocation2 + $0x35] sm:$0xff] }
  0xc5   : > { %v702_v43 = vpop.f32.mrf.mxu0 }
  0xc6   : > { %v703_v46 = vadd.f32 %v8175_v57, %v702_v43  ;;  %v8434_v42 = vpop.permute.xlu2 %889  ;;  %v8436_v43 = vpop.permute.xlu0 %989 }
  0xc7   : > { %11507 = vst [vmem:[#allocation17_spill] sm:$0xff] %v8434_v42 }
  0xc8   : > { %6986 = vmatmul.msk.bf16.gmra.mxu0 %vm607_vm2, %v7803_v40  ;;  %v797_v48 = vmax.f32 %v703_v46, 0.0  ;;  %11508 = vst [vmem:[#allocation18_spill] sm:$0xff] %v8436_v43  ;;  %v7806_v46 = vld [vmem:[%s8002_s20 + $0x70] sm:$0xff] }
  0xca   : > { %v1043_v49 = vmul.f32 %v8381_v47, %v797_v48 }
  0xcb   : > { %v1196_v28 = vld [vmem:[#allocation2 + $0x3e] sm:$0xff] }
  0xcc   : > { %1084 = vst.msk [vmem:[#allocation2 + $0x48] sm:$0xff] %vm307_vm3, %v1043_v49  ;;  %v1126_v29 = vld [vmem:[#allocation2 + $0x3d] sm:$0xff]  ;;  %v1233_v35 = vpack.c.bf16 %v1196_v28, %v1195_v31 }
  0xcd   : > { %v704_v56 = vpop.f32.mrf.mxu0  ;;  %v1163_v36 = vpack.c.bf16 %v1126_v29, %v1125_v33 }
  0xce   : > { %v705_v58 = vadd.f32 %v8175_v57, %v704_v56  ;;  %7023 = vmatmul.msk.bf16.gmra.mxu1 %vm307_vm3, %v1233_v35  ;;  %v8443_v49 = vpop.permute.xlu2 %894  ;;  %v8445_v50 = vpop.permute.xlu0 %994 }
  0xcf   : > { %7060 = vmatmul.msk.bf16.gmra.mxu2 %vm307_vm3, %v1163_v36  ;;  %11509 = vst [vmem:[#allocation19_spill] sm:$0xff] %v8443_v49  ;;  %v1069_v12 = vmul.f32 %v8445_v50, %v823_v9 }
  0xd0   : > { %v798_v62 = vmax.f32 %v705_v58, 0.0  ;;  %11510 = vst [vmem:[#allocation20_spill] sm:$0xff] %v8445_v50 }
  0xd1   : > { %1110 = vst.msk [vmem:[#allocation2 + $0x118] sm:$0xff] %vm307_vm3, %v1069_v12 }
  0xd2   : > { %v1044_v1 = vmul.f32 %v8393_v60, %v798_v62 }
  0xd3   : > { %v1197_v54 = vld [vmem:[#allocation2 + $0x46] sm:$0xff] }
  0xd4   : > { %1085 = vst.msk [vmem:[#allocation2 + $0x50] sm:$0xff] %vm307_vm3, %v1044_v1  ;;  %v1127_v55 = vld [vmem:[#allocation2 + $0x45] sm:$0xff] }
  0xd5   : > { %v707_v3 = vpop.f32.mrf.mxu0  ;;  %v428_v1 = vld [vmem:[%s11436_s1 + $0xc8] sm:$0xff] }
  0xd6   : > { %v708_v4 = vadd.f32 %v8175_v57, %v707_v3  ;;  %v7829_v3 = vld [vmem:[%s11439_s4 + $0x78] sm:$0xff]  ;;  %959 = vperm.xlu2 %7911, %v428_v1   ;;  %v8461_v7 = vpop.permute.xlu0 %899 }
  0xd7   : > { %11512 = vst [vmem:[#allocation22_spill] sm:$0xff] %v8461_v7  ;;  %2134 = vmatpush.bf16.msrb.mxu0 %v7829_v3 }
  0xd8   : > { %6987 = vmatmul.msk.bf16.gmra.mxu0 %vm607_vm2, %v7804_v2  ;;  %v799_v8 = vmax.f32 %v708_v4, 0.0  ;;  %v8455_v2 = vpop.permute.xlu1 %999 }
  0xd9   : > { %11511 = vst [vmem:[#allocation21_spill] sm:$0xff] %v8455_v2 }
  0xda   : > { %v1045_v11 = vmul.f32 %v8406_v5, %v799_v8  ;;  %v7828_v8 = vld [vmem:[%s11439_s4 + $0x70] sm:$0xff] }
  0xdb   : > { %v1198_v51 = vld [vmem:[#allocation2 + $0x4e] sm:$0xff]  ;;  %2135 = vmatpush.bf16.msrb.mxu0 %v7828_v8 }
  0xdc   : > { %1086 = vst.msk [vmem:[#allocation2 + $0x58] sm:$0xff] %vm307_vm3, %v1045_v11  ;;  %v1128_v52 = vld [vmem:[#allocation2 + $0x4d] sm:$0xff]  ;;  %v1234_v58 = vpack.c.bf16 %v1198_v51, %v1197_v54  ;;  %v7807_v11 = vld [vmem:[%s8002_s20 + $0x78] sm:$0xff] }
  0xdd   : > { %v709_v14 = vpop.f32.mrf.mxu0  ;;  %v1164_v59 = vpack.c.bf16 %v1128_v52, %v1127_v55  ;;  %v7826_v52 = vld [vmem:[%s11439_s4 + $0x60] sm:$0xff] }
  0xde   : > { %v710_v15 = vadd.f32 %v8175_v57, %v709_v14  ;;  %7024 = vmatmul.msk.bf16.gmra.mxu1 %vm307_vm3, %v1234_v58  ;;  %v431_v14 = vld [vmem:[%s11436_s1 + $0xe0] sm:$0xff]  ;;  %v8479_v29 = vpop.permute.xlu0 %904 }
  0xdf   : > { %7061 = vmatmul.msk.bf16.gmra.mxu2 %vm307_vm3, %v1164_v59  ;;  %974 = vperm.xlu2 %7911, %v431_v14   ;;  %11514 = vst [vmem:[#allocation24_spill] sm:$0xff] %v8479_v29  ;;  %v1973_v55 = vld [vmem:[#allocation2 + $0x1f] sm:$0xff]  ;;  %v1972_v59 = vld [vmem:[#allocation2 + $0x17] sm:$0xff] }
  0xe0   : > { %v800_v20 = vmax.f32 %v710_v15, 0.0 }
  0xe2   : > { %v1046_v21 = vmul.f32 %v8415_v19, %v800_v20  ;;  %v769_v20 = vpop.f32.mrf.mxu3 }
  0xe3   : > { %v770_v28 = vadd.f32 %v8175_v57, %v769_v20  ;;  %v1129_v31 = vld [vmem:[#allocation2 + $0x55] sm:$0xff] }
  0xe4   : > { %1087 = vst.msk [vmem:[#allocation2 + $0x60] sm:$0xff] %vm307_vm3, %v1046_v21  ;;  %v8476_v21 = vpop.permute.xlu1 %1004 }
  0xe5   : > { %v712_v23 = vpop.f32.mrf.mxu0  ;;  %11513 = vst [vmem:[#allocation23_spill] sm:$0xff] %v8476_v21  ;;  %v824_v33 = vmax.f32 %v770_v28, 0.0 }
  0xe6   : > { %v713_v26 = vadd.f32 %v8175_v57, %v712_v23  ;;  %v8508_v9 = vpop.permute.xlu0 %1019 }
  0xe7   : > { %11518 = vst [vmem:[#allocation28_spill] sm:$0xff] %v8508_v9 }
  0xe8   : > { %6988 = vmatmul.msk.bf16.gmra.mxu0 %vm607_vm2, %v7805_v22  ;;  %v801_v30 = vmax.f32 %v713_v26, 0.0 }
  0xea   : > { %v1047_v34 = vmul.f32 %v8424_v27, %v801_v30  ;;  %v1199_v30 = vld [vmem:[#allocation2 + $0x56] sm:$0xff] }
  0xeb   : > { %v1200_v22 = vld [vmem:[#allocation2 + $0x5e] sm:$0xff] }
  0xec   : > { %1088 = vst.msk [vmem:[#allocation2 + $0x68] sm:$0xff] %vm307_vm3, %v1047_v34  ;;  %v1130_v23 = vld [vmem:[#allocation2 + $0x5d] sm:$0xff]  ;;  %v1235_v35 = vpack.c.bf16 %v1200_v22, %v1199_v30  ;;  %v8494_v51 = vpop.permute.xlu1 %909 }
  0xed   : > { %v714_v38 = vpop.f32.mrf.mxu0  ;;  %v1165_v36 = vpack.c.bf16 %v1130_v23, %v1129_v31  ;;  %11516 = vst [vmem:[#allocation26_spill] sm:$0xff] %v8494_v51  ;;  %v1556_v31 = vpop.f32.mrf.mxu2 }
  0xee   : > { %v715_v40 = vadd.f32 %v8175_v57, %v714_v38  ;;  %v1070_v38 = vmul.f32 %v8455_v2, %v824_v33  ;;  %7025 = vmatmul.msk.bf16.gmra.mxu1 %vm307_vm3, %v1235_v35 }
  0xef   : > { %7062 = vmatmul.msk.bf16.gmra.mxu2 %vm307_vm3, %v1165_v36 }
  0xf0   : > { %v802_v44 = vmax.f32 %v715_v40, 0.0  ;;  %1111 = vst.msk [vmem:[#allocation2 + $0x120] sm:$0xff] %vm307_vm3, %v1070_v38 }
  0xf2   : > { %v1048_v45 = vmul.f32 %v8434_v42, %v802_v44  ;;  %v772_v44 = vpop.f32.mrf.mxu3 }
  0xf4   : > { %1089 = vst.msk [vmem:[#allocation2 + $0x70] sm:$0xff] %vm307_vm3, %v1048_v45  ;;  %v7827_v45 = vld [vmem:[%s11439_s4 + $0x68] sm:$0xff]  ;;  %v8506_v8 = vpop.permute.xlu1 %914 }
  0xf5   : > { %v717_v39 = vpop.f32.mrf.mxu0  ;;  %2136 = vmatpush.bf16.msrb.mxu0 %v7827_v45  ;;  %11517 = vst [vmem:[#allocation27_spill] sm:$0xff] %v8506_v8  ;;  %v1975_v45 = vld [vmem:[#allocation2 + $0x2f] sm:$0xff] }
  0xf6   : > { %v718_v48 = vadd.f32 %v8175_v57, %v717_v39  ;;  %v773_v39 = vadd.f32 %v8175_v57, %v772_v44  ;;  %v8527_v44 = vpop.permute.xlu0 %1024 }
  0xf7   : > { %11522 = vst [vmem:[#allocation32_spill] sm:$0xff] %v8527_v44  ;;  %v1154_v42 = vld [vmem:[#allocation2 + $0x11d] sm:$0xff] }
  0xf8   : > { %6989 = vmatmul.msk.bf16.gmra.mxu0 %vm607_vm2, %v7806_v46  ;;  %v803_v53 = vmax.f32 %v718_v48, 0.0  ;;  %v8492_v48 = vpop.permute.xlu2 %1009 }
  0xf9   : > { %11515 = vst [vmem:[#allocation25_spill] sm:$0xff] %v8492_v48  ;;  %2137 = vmatpush.bf16.msrb.mxu0 %v7826_v52  ;;  %v1974_v52 = vld [vmem:[#allocation2 + $0x27] sm:$0xff] }
  0xfa   : > { %v1049_v56 = vmul.f32 %v8443_v49, %v803_v53  ;;  %v825_v53 = vmax.f32 %v773_v39, 0.0  ;;  %v774_v0 = vpop.f32.mrf.mxu3 }
  0xfb   : > { %v1202_v1 = vld [vmem:[#allocation2 + $0x6e] sm:$0xff]  ;;  %v775_v6 = vadd.f32 %v8175_v57, %v774_v0 }
  0xfc   : > { %1090 = vst.msk [vmem:[#allocation2 + $0x78] sm:$0xff] %vm307_vm3, %v1049_v56  ;;  %v1071_v56 = vmul.f32 %v8476_v21, %v825_v53  ;;  %v1132_v3 = vld [vmem:[#allocation2 + $0x6d] sm:$0xff] }
  0xfd   : > { %v719_v62 = vpop.f32.mrf.mxu0  ;;  %v826_v12 = vmax.f32 %v775_v6, 0.0 }
  0xfe   : > { %v720_v63 = vadd.f32 %v8175_v57, %v719_v62  ;;  %1112 = vst.msk [vmem:[#allocation2 + $0x128] sm:$0xff] %vm307_vm3, %v1071_v56 }
  0xff   : > { %v1072_v22 = vmul.f32 %v8492_v48, %v826_v12 }
 0x100   : > { %v804_v4 = vmax.f32 %v720_v63, 0.0  ;;  %v2013_v63 = vpack.c.bf16 %v1973_v55, %v1972_v59 }
 0x101   : > { %1113 = vst.msk [vmem:[#allocation2 + $0x130] sm:$0xff] %vm307_vm3, %v1072_v22 }
 0x102   : > { %v1050_v10 = vmul.f32 %v8461_v7, %v804_v4  ;;  %v777_v30 = vpop.f32.mrf.mxu3 }
 0x103   : > { %v1133_v0 = vld [vmem:[#allocation2 + $0x75] sm:$0xff] }
 0x104   : > { %1091 = vst.msk [vmem:[#allocation2 + $0x80] sm:$0xff] %vm307_vm3, %v1050_v10  ;;  %v1201_v10 = vld [vmem:[#allocation2 + $0x66] sm:$0xff] }
 0x105   : > { %v722_v13 = vpop.f32.mrf.mxu0 }
 0x106   : > { %v723_v15 = vadd.f32 %v8175_v57, %v722_v13  ;;  %v8510_v13 = vpop.permute.xlu2 %1014 }
 0x107   : > { %11519 = vst [vmem:[#allocation29_spill] sm:$0xff] %v8510_v13 }
 0x108   : > { %6990 = vmatmul.msk.bf16.gmra.mxu0 %vm607_vm2, %v7807_v11  ;;  %v805_v26 = vmax.f32 %v723_v15, 0.0  ;;  %v1131_v11 = vld [vmem:[#allocation2 + $0x65] sm:$0xff]  ;;  %v1236_v15 = vpack.c.bf16 %v1202_v1, %v1201_v10 }
 0x109   : > { %v1166_v20 = vpack.c.bf16 %v1132_v3, %v1131_v11  ;;  %v8538_v11 = vpop.permute.xlu0 %934 }
 0x10a   : > { %v1051_v34 = vmul.f32 %v8479_v29, %v805_v26  ;;  %v1356_v26 = vpop.f32.mrf.mxu1  ;;  %7026 = vmatmul.msk.bf16.gmra.mxu1 %vm307_vm3, %v1236_v15  ;;  %v779_v55 = vpop.f32.mrf.mxu3  ;;  %11524 = vst [vmem:[#allocation34_spill] sm:$0xff] %v8538_v11 }
 0x10b   : > { %7063 = vmatmul.msk.bf16.gmra.mxu2 %vm307_vm3, %v1166_v20  ;;  %v8520_v35 = vadd.f32 %v1556_v31, %v1356_v26  ;;  %v1204_v56 = vld [vmem:[#allocation2 + $0x7e] sm:$0xff] }
 0x10c   : > { %1092 = vst.msk [vmem:[#allocation2 + $0x88] sm:$0xff] %vm307_vm3, %v1051_v34  ;;  %v778_v34 = vadd.f32 %v8175_v57, %v777_v30 }
 0x10d   : > { %v724_v40 = vpop.f32.mrf.mxu0 }
 0x10e   : > { %v725_v41 = vadd.f32 %v8175_v57, %v724_v40  ;;  %v827_v36 = vmax.f32 %v778_v34, 0.0  ;;  %v8522_v38 = vpop.permute.xlu2 %919  ;;  %v8524_v40 = vpop.permute.xlu1 %924  ;;  %v1977_v34 = vld [vmem:[#allocation2 + $0x3f] sm:$0xff] }
 0x10f   : > { %11520 = vst [vmem:[#allocation30_spill] sm:$0xff] %v8522_v38 }
 0x110   : > { %v806_v46 = vmax.f32 %v725_v41, 0.0  ;;  %11521 = vst [vmem:[#allocation31_spill] sm:$0xff] %v8524_v40 }
 0x112   : > { %v1052_v54 = vmul.f32 %v8494_v51, %v806_v46  ;;  %v1073_v46 = vmul.f32 %v8510_v13, %v827_v36  ;;  %v782_v20 = vpop.f32.mrf.mxu3 }
 0x113   : > { %v783_v26 = vadd.f32 %v8175_v57, %v782_v20 }
 0x114   : > { %1093 = vst.msk [vmem:[#allocation2 + $0x90] sm:$0xff] %vm307_vm3, %v1052_v54  ;;  %v2014_v54 = vpack.c.bf16 %v1975_v45, %v1974_v52  ;;  %v1976_v45 = vld [vmem:[#allocation2 + $0x37] sm:$0xff] }
 0x115   : > { %v727_v58 = vpop.f32.mrf.mxu0  ;;  %1114 = vst.msk [vmem:[#allocation2 + $0x138] sm:$0xff] %vm307_vm3, %v1073_v46 }
 0x116   : > { %v728_v62 = vadd.f32 %v8175_v57, %v727_v58  ;;  %v1134_v58 = vld [vmem:[#allocation2 + $0x7d] sm:$0xff]  ;;  %v8546_v22 = vpop.permute.xlu2 %929 }
 0x117   : > { %v1167_v10 = vpack.c.bf16 %v1134_v58, %v1133_v0  ;;  %11525 = vst [vmem:[#allocation35_spill] sm:$0xff] %v8546_v22  ;;  %v1135_v58 = vld [vmem:[#allocation2 + $0x85] sm:$0xff] }
 0x118   : > { %v807_v4 = vmax.f32 %v728_v62, 0.0  ;;  %7147 = vmatmul.msk.bf16.vlgmr.msrb.gmra.mxu0 %vm307_vm3, %v2013_v63  ;;  %v780_v62 = vadd.f32 %v8175_v57, %v779_v55  ;;  %v1203_v63 = vld [vmem:[#allocation2 + $0x76] sm:$0xff] }
 0x119   : > { %v1237_v6 = vpack.c.bf16 %v1204_v56, %v1203_v63  ;;  %v1205_v56 = vld [vmem:[#allocation2 + $0x86] sm:$0xff] }
 0x11a   : > { %v1053_v14 = vmul.f32 %v8506_v8, %v807_v4  ;;  %v828_v3 = vmax.f32 %v780_v62, 0.0  ;;  %v8536_v4 = vpop.permute.xlu1 %939  ;;  %v784_v52 = vpop.f32.mrf.mxu3 }
 0x11b   : > { %11523 = vst [vmem:[#allocation33_spill] sm:$0xff] %v8536_v4  ;;  %7027 = vmatmul.msk.bf16.gmra.mxu1 %vm307_vm3, %v1237_v6  ;;  %7064 = vmatmul.msk.bf16.gmra.mxu2 %vm307_vm3, %v1167_v10 }
 0x11c   : > { %1094 = vst.msk [vmem:[#allocation2 + $0x98] sm:$0xff] %vm307_vm3, %v1053_v14  ;;  %v1074_v12 = vmul.f32 %v8508_v9, %v828_v3  ;;  %v785_v3 = vadd.f32 %v8175_v57, %v784_v52  ;;  %v1978_v52 = vld [vmem:[#allocation2 + $0x47] sm:$0xff] }
 0x11d   : > { %v729_v23 = vpop.f32.mrf.mxu0 }
 0x11e   : > { %v730_v28 = vadd.f32 %v8175_v57, %v729_v23  ;;  %1115 = vst.msk [vmem:[#allocation2 + $0x140] sm:$0xff] %vm307_vm3, %v1074_v12 }
 0x120   : > { %v808_v33 = vmax.f32 %v730_v28, 0.0  ;;  %v829_v28 = vmax.f32 %v783_v26, 0.0 }
 0x122   : > { %v1054_v41 = vmul.f32 %v8522_v38, %v808_v33  ;;  %v8550_v31 = vpop.permute.xlu1 %954  ;;  %v8552_v33 = vpop.permute.xlu0 %949  ;;  %v1075_v36 = vmul.f32 %v8527_v44, %v829_v28 }
 0x123   : > { %11526 = vst [vmem:[#allocation36_spill] sm:$0xff] %v8550_v31  ;;  %v787_v12 = vpop.f32.mrf.mxu3 }
 0x124   : > { %1095 = vst.msk [vmem:[#allocation2 + $0xa0] sm:$0xff] %vm307_vm3, %v1054_v41  ;;  %v788_v20 = vadd.f32 %v8175_v57, %v787_v12 }
 0x125   : > { %v732_v39 = vpop.f32.mrf.mxu0  ;;  %11527 = vst [vmem:[#allocation37_spill] sm:$0xff] %v8552_v33  ;;  %v2009_v47 = vld [vmem:[#allocation2 + $0x13f] sm:$0xff] }
 0x126   : > { %v733_v53 = vadd.f32 %v8175_v57, %v732_v39  ;;  %1116 = vst.msk [vmem:[#allocation2 + $0x148] sm:$0xff] %vm307_vm3, %v1075_v36  ;;  %v2015_v39 = vpack.c.bf16 %v1977_v34, %v1976_v45  ;;  %v831_v28 = vmax.f32 %v788_v20, 0.0  ;;  %v1979_v36 = vld [vmem:[#allocation2 + $0x4f] sm:$0xff] }
 0x128   : > { %v809_v59 = vmax.f32 %v733_v53, 0.0  ;;  %7148 = vmatmul.msk.bf16.gmra.mxu0 %vm307_vm3, %v2014_v54  ;;  %v1206_v53 = vld [vmem:[#allocation2 + $0x8e] sm:$0xff] }
 0x129   : > { %v1136_v54 = vld [vmem:[#allocation2 + $0x8d] sm:$0xff]  ;;  %v1238_v62 = vpack.c.bf16 %v1206_v53, %v1205_v56  ;;  %v8585_v56 = vpop.f32.mrf.mxu2 }
 0x12a   : > { %v1055_v1 = vmul.f32 %v8524_v40, %v809_v59  ;;  %v1168_v63 = vpack.c.bf16 %v1136_v54, %v1135_v58  ;;  %v8560_v0 = vpop.permute.xlu1 %969  ;;  %v2016_v54 = vpack.c.bf16 %v1979_v36, %v1978_v52  ;;  %11533 = vst [vmem:[#allocation43_spill] sm:$0xff] %v8585_v56 }
 0x12b   : > { %11528 = vst [vmem:[#allocation38_spill] sm:$0xff] %v8560_v0  ;;  %7028 = vmatmul.msk.bf16.gmra.mxu1 %vm307_vm3, %v1238_v62  ;;  %v1208_v58 = vld [vmem:[#allocation2 + $0x9e] sm:$0xff] }
 0x12c   : > { %1096 = vst.msk [vmem:[#allocation2 + $0xa8] sm:$0xff] %vm307_vm3, %v1055_v1  ;;  %v8562_v1 = vpop.permute.xlu0 %964  ;;  %7065 = vmatmul.msk.bf16.gmra.mxu2 %vm307_vm3, %v1168_v63  ;;  %v1207_v63 = vld [vmem:[#allocation2 + $0x96] sm:$0xff] }
 0x12d   : > { %v734_v14 = vpop.f32.mrf.mxu0  ;;  %11529 = vst [vmem:[#allocation39_spill] sm:$0xff] %v8562_v1 }
 0x12e   : > { %v735_v15 = vadd.f32 %v8175_v57, %v734_v14  ;;  %v830_v14 = vmax.f32 %v785_v3, 0.0  ;;  %v1137_v3 = vld [vmem:[#allocation2 + $0x95] sm:$0xff] }
 0x130   : > { %v810_v23 = vmax.f32 %v735_v15, 0.0 }
 0x132   : > { %v1056_v30 = vmul.f32 %v8546_v22, %v810_v23  ;;  %v8570_v23 = vpop.f32.mrf.mxu1  ;;  %v1561_v36 = vpop.f32.mrf.mxu2 }
 0x133   : > { %11530 = vst [vmem:[#allocation40_spill] sm:$0xff] %v8570_v23 }
 0x134   : > { %1097 = vst.msk [vmem:[#allocation2 + $0xb0] sm:$0xff] %vm307_vm3, %v1056_v30  ;;  %v8573_v30 = vpop.permute.xlu1 %1034  ;;  %v8575_v34 = vpop.permute.xlu0 %1029 }
 0x135   : > { %v737_v41 = vpop.f32.mrf.mxu0  ;;  %11531 = vst [vmem:[#allocation41_spill] sm:$0xff] %v8573_v30  ;;  %v1076_v45 = vmul.f32 %v8575_v34, %v830_v14 }
 0x136   : > { %v738_v46 = vadd.f32 %v8175_v57, %v737_v41  ;;  %11532 = vst [vmem:[#allocation42_spill] sm:$0xff] %v8575_v34  ;;  %v1077_v41 = vmul.f32 %v8573_v30, %v831_v28 }
 0x137   : > { %1117 = vst.msk [vmem:[#allocation2 + $0x150] sm:$0xff] %vm307_vm3, %v1076_v45 }
 0x138   : > { %v811_v55 = vmax.f32 %v738_v46, 0.0  ;;  %7149 = vmatmul.msk.bf16.gmra.mxu0 %vm307_vm3, %v2015_v39  ;;  %v7833_v46 = vld [vmem:[%s11439_s4 + $0x98] sm:$0xff]  ;;  %1118 = vst.msk [vmem:[#allocation2 + $0x158] sm:$0xf] %vm354_vm4, %v1077_v41 }
 0x139   : > { %2446 = vmatpush.bf16.msrb.mxu1 %v7833_v46  ;;  %v1981_v46 = vld [vmem:[#allocation2 + $0x5f] sm:$0xff] }
 0x13a   : > { %v1057_v59 = vmul.f32 %v8538_v11, %v811_v55  ;;  %v789_v55 = vpop.f32.mrf.mxu3 }
 0x13b   : > { %v2614_v32 = vld [vmem:[#allocation2 + $0xa9] sm:$0xff] }
 0x13c   : > { %1098 = vst.msk [vmem:[#allocation2 + $0xb8] sm:$0xff] %vm307_vm3, %v1057_v59  ;;  %v1138_v59 = vld [vmem:[#allocation2 + $0x9d] sm:$0xff] }
 0x13d   : > { %v739_v6 = vpop.f32.mrf.mxu0  ;;  %v1169_v12 = vpack.c.bf16 %v1138_v59, %v1137_v3  ;;  %v1140_v59 = vld [vmem:[#allocation2 + $0xad] sm:$0xff] }
 0x13e   : > { %v740_v10 = vadd.f32 %v8175_v57, %v739_v6  ;;  %v8589_v6 = vpop.permute.xlu2 %944  ;;  %v1209_v3 = vld [vmem:[#allocation2 + $0xa6] sm:$0xff] }
 0x13f   : > { %11534 = vst [vmem:[#allocation44_spill] sm:$0xff] %v8589_v6  ;;  %7066 = vmatmul.msk.bf16.gmra.mxu2 %vm307_vm3, %v1169_v12 }
 0x140   : > { %v812_v15 = vmax.f32 %v740_v10, 0.0  ;;  %v1239_v10 = vpack.c.bf16 %v1208_v58, %v1207_v63  ;;  %v1210_v58 = vld [vmem:[#allocation2 + $0xae] sm:$0xff]  ;;  %v1563_v63 = vpop.f32.mrf.mxu2 }
 0x142   : > { %v1058_v26 = vmul.f32 %v8536_v4, %v812_v15  ;;  %v1361_v15 = vpop.f32.mrf.mxu1  ;;  %7029 = vmatmul.msk.bf16.gmra.mxu1 %vm307_vm3, %v1239_v10  ;;  %v1139_v10 = vld [vmem:[#allocation2 + $0xa5] sm:$0xff] }
 0x143   : > { %v8597_v45 = vadd.f32 %v1561_v36, %v1361_v15  ;;  %v1240_v15 = vpack.c.bf16 %v1210_v58, %v1209_v3 }
 0x144   : > { %1099 = vst.msk [vmem:[#allocation2 + $0xc0] sm:$0xff] %vm307_vm3, %v1058_v26 }
 0x145   : > { %v742_v39 = vpop.f32.mrf.mxu0 }
 0x146   : > { %v743_v53 = vadd.f32 %v8175_v57, %v742_v39 }
 0x148   : > { %v813_v62 = vmax.f32 %v743_v53, 0.0  ;;  %7150 = vmatmul.msk.bf16.gmra.mxu0 %vm307_vm3, %v2016_v54  ;;  %v1980_v53 = vld [vmem:[#allocation2 + $0x57] sm:$0xff] }
 0x149   : > { %v2017_v55 = vpack.c.bf16 %v1981_v46, %v1980_v53  ;;  %v8609_v46 = vpop.permute.xlu2 %959 }
 0x14a   : > { %v1059_v14 = vmul.f32 %v8589_v6, %v813_v62  ;;  %v1363_v39 = vpop.f32.mrf.mxu1  ;;  %11535 = vst [vmem:[#allocation45_spill] sm:$0xff] %v8609_v46 }
 0x14b   : > { %v1212_v3 = vld [vmem:[#allocation2 + $0xbe] sm:$0xff] }
 0x14c   : > { %1100 = vst.msk [vmem:[#allocation2 + $0xc8] sm:$0xff] %vm307_vm3, %v1059_v14  ;;  %v8603_v14 = vadd.f32 %v1563_v63, %v1363_v39 }
 0x14d   : > { %v744_v20 = vpop.f32.mrf.mxu0 }
 0x14e   : > { %v745_v26 = vadd.f32 %v8175_v57, %v744_v20  ;;  %v1170_v20 = vpack.c.bf16 %v1140_v59, %v1139_v10  ;;  %v1982_v59 = vld [vmem:[#allocation2 + $0x67] sm:$0xff]  ;;  %v1142_v10 = vld [vmem:[#allocation2 + $0xbd] sm:$0xff] }
 0x150   : > { %v814_v28 = vmax.f32 %v745_v26, 0.0  ;;  %7067 = vmatmul.msk.bf16.gmra.mxu2 %vm307_vm3, %v1170_v20  ;;  %v1211_v20 = vld [vmem:[#allocation2 + $0xb6] sm:$0xff] }
 0x152   : > { %v1060_v41 = vmul.f32 %v8552_v33, %v814_v28  ;;  %v1366_v26 = vpop.f32.mrf.mxu1  ;;  %7030 = vmatmul.msk.bf16.gmra.mxu1 %vm307_vm3, %v1240_v15 }
 0x154   : > { %1101 = vst.msk [vmem:[#allocation2 + $0xd0] sm:$0xff] %vm307_vm3, %v1060_v41 }
 0x155   : > { %v747_v52 = vpop.f32.mrf.mxu0 }
 0x156   : > { %v748_v54 = vadd.f32 %v8175_v57, %v747_v52  ;;  %v1566_v52 = vpop.f32.mrf.mxu2 }
 0x157   : > { %v8612_v39 = vadd.f32 %v1566_v52, %v1366_v26 }
 0x158   : > { %v815_v62 = vmax.f32 %v748_v54, 0.0  ;;  %7151 = vmatmul.msk.bf16.gmra.mxu0 %vm307_vm3, %v2017_v55  ;;  %v1983_v54 = vld [vmem:[#allocation2 + $0x6f] sm:$0xff] }
 0x159   : > { %v2018_v63 = vpack.c.bf16 %v1983_v54, %v1982_v59 }
 0x15a   : > { %v1061_v12 = vmul.f32 %v8550_v31, %v815_v62  ;;  %v1368_v55 = vpop.f32.mrf.mxu1 }
 0x15c   : > { %1102 = vst.msk [vmem:[#allocation2 + $0xd8] sm:$0xff] %vm307_vm3, %v1061_v12 }
 0x15d   : > { %v749_v28 = vpop.f32.mrf.mxu0 }
 0x15e   : > { %v750_v36 = vadd.f32 %v8175_v57, %v749_v28  ;;  %v1568_v15 = vpop.f32.mrf.mxu2  ;;  %v1141_v28 = vld [vmem:[#allocation2 + $0xb5] sm:$0xff] }
 0x15f   : > { %v1171_v52 = vpack.c.bf16 %v1142_v10, %v1141_v28  ;;  %v1984_v10 = vld [vmem:[#allocation2 + $0x77] sm:$0xff]  ;;  %v1144_v28 = vld [vmem:[#allocation2 + $0xcd] sm:$0xff] }
 0x160   : > { %v816_v41 = vmax.f32 %v750_v36, 0.0  ;;  %v8618_v36 = vadd.f32 %v1568_v15, %v1368_v55  ;;  %v1985_v55 = vld [vmem:[#allocation2 + $0x7f] sm:$0xff] }
 0x161   : > { %7068 = vmatmul.msk.bf16.gmra.mxu2 %vm307_vm3, %v1171_v52 }
 0x162   : > { %v1062_v53 = vmul.f32 %v8609_v46, %v816_v41  ;;  %v1241_v41 = vpack.c.bf16 %v1212_v3, %v1211_v20  ;;  %v2019_v20 = vpack.c.bf16 %v1985_v55, %v1984_v10  ;;  %v7915_v55 = vld [vmem:[%s11438_s3] ss:$0 sm:$0xff]  ;;  %v1994_v46 = vld [vmem:[#allocation2 + $0xc7] sm:$0xff] }
 0x163   : > { %v1996_v4 = vld [vmem:[#allocation2 + $0xd7] sm:$0xff] }
 0x164   : > { %1103 = vst.msk [vmem:[#allocation2 + $0xe0] sm:$0xff] %vm307_vm3, %v1062_v53  ;;  %v1371_v53 = vpop.f32.mrf.mxu1  ;;  %7031 = vmatmul.msk.bf16.gmra.mxu1 %vm307_vm3, %v1241_v41  ;;  %v8630_v41 = vpop.permute.xlu2 %974 }
 0x165   : > { %v752_v58 = vpop.f32.mrf.mxu0  ;;  %11536 = vst [vmem:[#allocation46_spill] sm:$0xff] %v8630_v41 }
 0x166   : > { %v753_v62 = vadd.f32 %v8175_v57, %v752_v58  ;;  %v1571_v59 = vpop.f32.mrf.mxu2 }
 0x168   : > { %v817_v12 = vmax.f32 %v753_v62, 0.0  ;;  %7152 = vmatmul.msk.bf16.gmra.mxu0 %vm307_vm3, %v2018_v63  ;;  %v8625_v63 = vadd.f32 %v1571_v59, %v1371_v53  ;;  %v1143_v53 = vld [vmem:[#allocation2 + $0xc5] sm:$0xff] }
 0x169   : > { %v1172_v34 = vpack.c.bf16 %v1144_v28, %v1143_v53 }
 0x16a   : > { %v1063_v26 = vmul.f32 %v8562_v1, %v817_v12 }
 0x16c   : > { %1104 = vst.msk [vmem:[#allocation2 + $0xe8] sm:$0xff] %vm307_vm3, %v1063_v26  ;;  %v1373_v12 = vpop.f32.mrf.mxu1 }
 0x16d   : > { %v754_v30 = vpop.f32.mrf.mxu0 }
 0x16e   : > { %v755_v54 = vadd.f32 %v8175_v57, %v754_v30  ;;  %v1214_v30 = vld [vmem:[#allocation2 + $0xce] sm:$0xff]  ;;  %v1573_v52 = vpop.f32.mrf.mxu2 }
 0x16f   : > { %v8633_v59 = vadd.f32 %v1573_v52, %v1373_v12 }
 0x170   : > { %v818_v58 = vmax.f32 %v755_v54, 0.0  ;;  %v1213_v54 = vld [vmem:[#allocation2 + $0xc6] sm:$0xff] }
 0x171   : > { %7069 = vmatmul.msk.bf16.gmra.mxu2 %vm307_vm3, %v1172_v34  ;;  %v1216_v34 = vld [vmem:[#allocation2 + $0xde] sm:$0xff] }
 0x172   : > { %v1064_v62 = vmul.f32 %v8560_v0, %v818_v58 }
 0x173   : > { %v1998_v40 = vld [vmem:[#allocation2 + $0xe7] sm:$0xff] }
 0x174   : > { %1105 = vst.msk [vmem:[#allocation2 + $0xf0] sm:$0xff] %vm307_vm3, %v1064_v62  ;;  %v1242_v62 = vpack.c.bf16 %v1214_v30, %v1213_v54  ;;  %v1376_v44 = vpop.f32.mrf.mxu1  ;;  %v1987_v30 = vld [vmem:[#allocation2 + $0x8f] sm:$0xff]  ;;  %v1986_v54 = vld [vmem:[#allocation2 + $0x87] sm:$0xff] }
 0x175   : > { %v757_v3 = vpop.f32.mrf.mxu0 }
 0x176   : > { %v758_v15 = vadd.f32 %v8175_v57, %v757_v3  ;;  %7032 = vmatmul.msk.bf16.gmra.mxu1 %vm307_vm3, %v1242_v62  ;;  %v1146_v62 = vld [vmem:[#allocation2 + $0xdd] sm:$0xff] }
 0x178   : > { %v819_v26 = vmax.f32 %v758_v15, 0.0  ;;  %7153 = vmatmul.msk.bf16.gmra.mxu0 %vm307_vm3, %v2019_v20  ;;  %v1576_v15 = vpop.f32.mrf.mxu2 }
 0x179   : > { %v8642_v20 = vadd.f32 %v1576_v15, %v1376_v44 }
 0x17a   : > { %v1065_v58 = vmul.f32 %v8630_v41, %v819_v26  ;;  %v7832_v26 = vld [vmem:[%s11439_s4 + $0x90] sm:$0xff]  ;;  %v2596_v41 = vld [vmem:[#allocation2 + $0x19] sm:$0xff] }
 0x17b   : > { %2447 = vmatpush.bf16.msrb.mxu1 %v7832_v26  ;;  %v7837_v26 = vld [vmem:[%s11439_s4 + $0xb8] sm:$0xff] }
 0x17c   : > { %1106 = vst.msk [vmem:[#allocation2 + $0xf8] sm:$0xff] %vm307_vm3, %v1065_v58  ;;  %v1378_v28 = vpop.f32.mrf.mxu1  ;;  %v2020_v58 = vpack.c.bf16 %v1987_v30, %v1986_v54  ;;  %2758 = vmatpush.bf16.msrb.mxu2 %v7837_v26  ;;  %v7830_v26 = vld [vmem:[%s11439_s4 + $0x80] sm:$0xff] }
 0x17d   : > { %v759_v57 = vpop.f32.mrf.mxu0 }
 0x17e   : > { %v760_v3 = vadd.f32 %v7915_v55, %v759_v57 }
 0x180   : > { %v820_v10 = vmax.f32 %v760_v3, 0.0  ;;  %v1578_v44 = vpop.f32.mrf.mxu2  ;;  %v1215_v3 = vld [vmem:[#allocation2 + $0xd6] sm:$0xff] }
 0x181   : > { %v1243_v9 = vpack.c.bf16 %v1216_v34, %v1215_v3 }
 0x182   : > { %v1066_v12 = vmul.f32 %v8413_v16, %v820_v10  ;;  %v1145_v10 = vld [vmem:[#allocation2 + $0xd5] sm:$0xff] }
 0x183   : > { %v1173_v13 = vpack.c.bf16 %v1146_v62, %v1145_v10  ;;  %v1148_v10 = vld [vmem:[#allocation2 + $0xed] sm:$0xff] }
 0x184   : > { %1107 = vst.msk [vmem:[#allocation2 + $0x100] sm:$0xff] %vm307_vm3, %v1066_v12  ;;  %v8650_v12 = vadd.f32 %v1578_v44, %v1378_v28  ;;  %v1381_v48 = vpop.f32.mrf.mxu1  ;;  %v1988_v44 = vld [vmem:[#allocation2 + $0x97] sm:$0xff] }
 0x185   : > { %v762_v52 = vpop.f32.mrf.mxu0  ;;  %7070 = vmatmul.msk.bf16.gmra.mxu2 %vm307_vm3, %v1173_v13  ;;  %v7835_v13 = vld [vmem:[%s11439_s4 + $0xa8] sm:$0xff] }
 0x186   : > { %v763_v53 = vadd.f32 %v7915_v55, %v762_v52  ;;  %7033 = vmatmul.msk.bf16.gmra.mxu1 %vm307_vm3, %v1243_v9  ;;  %v7831_v9 = vld [vmem:[%s11439_s4 + $0x88] sm:$0xff] }
 0x187   : > { %2448 = vmatpush.bf16.msrb.mxu1 %v7831_v9 }
 0x188   : > { %v821_v57 = vmax.f32 %v763_v53, 0.0  ;;  %7154 = vmatmul.msk.bf16.gmra.mxu0 %vm307_vm3, %v2020_v58  ;;  %v1581_v53 = vpop.f32.mrf.mxu2  ;;  %v7836_v58 = vld [vmem:[%s11439_s4 + $0xb0] sm:$0xff] }
 0x189   : > { %v8662_v34 = vadd.f32 %v1581_v53, %v1381_v48  ;;  %2759 = vmatpush.bf16.msrb.mxu2 %v7836_v58  ;;  %v1218_v48 = vld [vmem:[#allocation2 + $0xee] sm:$0xff] }
 0x18a   : > { %v1067_v15 = vmul.f32 %v8420_v24, %v821_v57 }
 0x18b   : > { %2449 = vmatpush.bf16.msrb.mxu1 %v7830_v26  ;;  %v1150_v26 = vld [vmem:[#allocation2 + $0xfd] sm:$0xff] }
 0x18c   : > { %1108 = vst.msk [vmem:[#allocation2 + $0x108] sm:$0xff] %vm307_vm3, %v1067_v15  ;;  %v1383_v62 = vpop.f32.mrf.mxu1  ;;  %v1217_v15 = vld [vmem:[#allocation2 + $0xe6] sm:$0xff] }
 0x18d   : > { %v764_v52 = vpop.f32.mrf.mxu0  ;;  %2760 = vmatpush.bf16.msrb.mxu2 %v7835_v13 }
 0x18e   : > { %v765_v30 = vadd.f32 %v7915_v55, %v764_v52  ;;  %v1989_v55 = vld [vmem:[#allocation2 + $0x9f] sm:$0xff] }
 0x18f   : > { %v2021_v3 = vpack.c.bf16 %v1989_v55, %v1988_v44 }
 0x190   : > { %v822_v54 = vmax.f32 %v765_v30, 0.0  ;;  %v1583_v52 = vpop.f32.mrf.mxu2  ;;  %v1147_v30 = vld [vmem:[#allocation2 + $0xe5] sm:$0xff] }
 0x191   : > { %v8680_v53 = vadd.f32 %v1583_v52, %v1383_v62  ;;  %v1174_v58 = vpack.c.bf16 %v1148_v10, %v1147_v30  ;;  %v1991_v62 = vld [vmem:[#allocation2 + $0xaf] sm:$0xff]  ;;  %v1220_v30 = vld [vmem:[#allocation2 + $0xfe] sm:$0xff] }
 0x192   : > { %v1068_v28 = vmul.f32 %v8436_v43, %v822_v54  ;;  %v7834_v54 = vld [vmem:[%s11439_s4 + $0xa0] sm:$0xff] }
 0x193   : > { %2761 = vmatpush.bf16.msrb.mxu2 %v7834_v54  ;;  %v1221_v9 = vld [vmem:[#allocation2 + $0x106] sm:$0xff]  ;;  %v1224_v43 = vld [vmem:[#allocation2 + $0x11e] sm:$0xff] }
 0x194   : > { %1109 = vst.msk [vmem:[#allocation2 + $0x110] sm:$0xff] %vm307_vm3, %v1068_v28  ;;  %v1244_v28 = vpack.c.bf16 %v1218_v48, %v1217_v15  ;;  %v1386_v55 = vpop.f32.mrf.mxu1  ;;  %v1990_v15 = vld [vmem:[#allocation2 + $0xa7] sm:$0xff] }
 0x195   : > { %v8671_v57 = vpop.f32.mrf.mxu0  ;;  %7071 = vmatmul.msk.bf16.gmra.mxu2 %vm307_vm3, %v1174_v58  ;;  %v2022_v52 = vpack.c.bf16 %v1991_v62, %v1990_v15 }
 0x196   : > { %11537 = vst [vmem:[#allocation47_spill] sm:$0xff] %v8671_v57  ;;  %7034 = vmatmul.msk.bf16.gmra.mxu1 %vm307_vm3, %v1244_v28  ;;  %v1149_v28 = vld [vmem:[#allocation2 + $0xf5] sm:$0xff] }
 0x198   : > { %7155 = vmatmul.msk.bf16.gmra.mxu0 %vm307_vm3, %v2021_v3  ;;  %v1586_v21 = vpop.f32.mrf.mxu2 }
 0x199   : > { %v8687_v2 = vadd.f32 %v1586_v21, %v1386_v55 }
 0x19b   : > { %v1222_v13 = vld [vmem:[#allocation2 + $0x10e] sm:$0xff]  ;;  %v1223_v50 = vld [vmem:[#allocation2 + $0x116] sm:$0xff] }
 0x19c   : > { %v1246_v3 = vpack.c.bf16 %v1222_v13, %v1221_v9  ;;  %v1388_v48 = vpop.f32.mrf.mxu1  ;;  %v1219_v9 = vld [vmem:[#allocation2 + $0xf6] sm:$0xff]  ;;  %v1247_v24 = vpack.c.bf16 %v1224_v43, %v1223_v50  ;;  %v2597_v43 = vld [vmem:[#allocation2 + $0x21] sm:$0xff] }
 0x19d   : > { %v8682_v44 = vpop.f32.mrf.mxu0  ;;  %v1245_v58 = vpack.c.bf16 %v1220_v30, %v1219_v9  ;;  %v1992_v30 = vld [vmem:[#allocation2 + $0xb7] sm:$0xff] }
 0x19e   : > { %11538 = vst [vmem:[#allocation48_spill] sm:$0xff] %v8682_v44  ;;  %7036 = vmatmul.msk.bf16.vlgmr.msrb.gmra.mxu3 %vm307_vm3, %v1246_v3  ;;  %v1175_v3 = vpack.c.bf16 %v1150_v26, %v1149_v28  ;;  %v2285_v28 = vld [vmem:[#allocation2 + $0x20] sm:$0xff] }
 0x1a0   : > { %v1588_v54 = vpop.f32.mrf.mxu2 }
 0x1a1   : > { %v8692_v13 = vadd.f32 %v1588_v54, %v1388_v48 }
 0x1a4   : > { %v1391_v21 = vpop.f32.mrf.mxu1 }
 0x1a5   : > { %v8689_v10 = vpop.f32.mrf.mxu0  ;;  %7072 = vmatmul.msk.bf16.gmra.mxu2 %vm307_vm3, %v1175_v3  ;;  %v1226_v3 = vld [vmem:[#allocation2 + $0x12e] sm:$0xff] }
 0x1a6   : > { %11539 = vst [vmem:[#allocation49_spill] sm:$0xff] %v8689_v10  ;;  %7035 = vmatmul.msk.bf16.gmra.mxu1 %vm307_vm3, %v1245_v58  ;;  %v1225_v58 = vld [vmem:[#allocation2 + $0x126] sm:$0xff] }
 0x1a7   : > { %v1248_v1 = vpack.c.bf16 %v1226_v3, %v1225_v58  ;;  %v1227_v3 = vld [vmem:[#allocation2 + $0x136] sm:$0xff] }
 0x1a8   : > { %7156 = vmatmul.msk.bf16.gmra.mxu0 %vm307_vm3, %v2022_v52  ;;  %v1591_v62 = vpop.f32.mrf.mxu2  ;;  %v1993_v52 = vld [vmem:[#allocation2 + $0xbf] sm:$0xff] }
 0x1a9   : > { %v8699_v15 = vadd.f32 %v1591_v62, %v1391_v21  ;;  %v2023_v26 = vpack.c.bf16 %v1993_v52, %v1992_v30  ;;  %v2637_v62 = vpack.c.bf16 %v2597_v43, %v2596_v41  ;;  %v2599_v43 = vld [vmem:[#allocation2 + $0x31] sm:$0xff] }
 0x1ac   : > { %v1393_v48 = vpop.f32.mrf.mxu1 }
 0x1ad   : > { %v8694_v55 = vpop.f32.mrf.mxu0 }
 0x1ae   : > { %11540 = vst [vmem:[#allocation50_spill] sm:$0xff] %v8694_v55  ;;  %7037 = vmatmul.msk.bf16.gmra.mxu3 %vm307_vm3, %v1247_v24  ;;  %v2284_v24 = vld [vmem:[#allocation2 + $0x18] sm:$0xff] }
 0x1af   : > { %v2325_v21 = vpack.c.bf16 %v2285_v28, %v2284_v24  ;;  %v2287_v28 = vld [vmem:[#allocation2 + $0x30] sm:$0xff]  ;;  %v1228_v24 = vld [vmem:[#allocation2 + $0x13e] sm:$0xff] }
 0x1b0   : > { %v1593_v9 = vpop.f32.mrf.mxu2  ;;  %v1249_v6 = vpack.c.bf16 %v1228_v24, %v1227_v3  ;;  %v2601_v3 = vld [vmem:[#allocation2 + $0x41] sm:$0xff] }
 0x1b1   : > { %v8704_v50 = vadd.f32 %v1593_v9, %v1393_v48  ;;  %v1995_v48 = vld [vmem:[#allocation2 + $0xcf] sm:$0xff] }
 0x1b2   : > { %v2024_v31 = vpack.c.bf16 %v1995_v48, %v1994_v46  ;;  %v1997_v48 = vld [vmem:[#allocation2 + $0xdf] sm:$0xff] }
 0x1b3   : > { %v2025_v11 = vpack.c.bf16 %v1997_v48, %v1996_v4  ;;  %v1999_v48 = vld [vmem:[#allocation2 + $0xef] sm:$0xff] }
 0x1b4   : > { %v1396_v16 = vpop.f32.mrf.mxu1  ;;  %v2026_v38 = vpack.c.bf16 %v1999_v48, %v1998_v40  ;;  %v1151_v40 = vld [vmem:[#allocation2 + $0x105] sm:$0xff] }
 0x1b5   : > { %v8701_v54 = vpop.f32.mrf.mxu0  ;;  %7237 = vmatmul.msk.bf16.vlgmr.msrb.gmra.mxu2 %vm307_vm3, %v2637_v62  ;;  %v2598_v62 = vld [vmem:[#allocation2 + $0x29] sm:$0xff] }
 0x1b6   : > { %11541 = vst [vmem:[#allocation51_spill] sm:$0xff] %v8701_v54  ;;  %7192 = vmatmul.msk.bf16.vlgmr.msrb.gmra.mxu1 %vm307_vm3, %v2325_v21 }
 0x1b8   : > { %7157 = vmatmul.msk.bf16.gmra.mxu0 %vm307_vm3, %v2023_v26  ;;  %v1596_v52 = vpop.f32.mrf.mxu2 }
 0x1b9   : > { %v8711_v30 = vadd.f32 %v1596_v52, %v1396_v16  ;;  %v2638_v52 = vpack.c.bf16 %v2599_v43, %v2598_v62  ;;  %v2289_v43 = vld [vmem:[#allocation2 + $0x40] sm:$0xff] }
 0x1bc   : > { %v1398_v26 = vpop.f32.mrf.mxu1 }
 0x1bd   : > { %v8706_v0 = vpop.f32.mrf.mxu0 }
 0x1be   : > { %11542 = vst [vmem:[#allocation52_spill] sm:$0xff] %v8706_v0  ;;  %7038 = vmatmul.msk.bf16.gmra.mxu3 %vm307_vm3, %v1248_v1  ;;  %v2286_v1 = vld [vmem:[#allocation2 + $0x28] sm:$0xff] }
 0x1bf   : > { %v2326_v16 = vpack.c.bf16 %v2287_v28, %v2286_v1  ;;  %v1229_v1 = vld [vmem:[#allocation2 + $0x146] sm:$0xf] }
 0x1c0   : > { %v1598_v41 = vpop.f32.mrf.mxu2  ;;  %v1250_v22 = vpack.c.bf16 %v1229_v1, %v1229_v1  ;;  %v2603_v1 = vld [vmem:[#allocation2 + $0x51] sm:$0xff] }
 0x1c1   : > { %v8716_v58 = vadd.f32 %v1598_v41, %v1398_v26 }
 0x1c4   : > { %v1401_v21 = vpop.f32.mrf.mxu1 }
 0x1c5   : > { %v8713_v9 = vpop.f32.mrf.mxu0  ;;  %7238 = vmatmul.msk.bf16.gmra.mxu2 %vm307_vm3, %v2638_v52 }
 0x1c6   : > { %11543 = vst [vmem:[#allocation53_spill] sm:$0xff] %v8713_v9  ;;  %7193 = vmatmul.msk.bf16.gmra.mxu1 %vm307_vm3, %v2326_v16  ;;  %v2288_v16 = vld [vmem:[#allocation2 + $0x38] sm:$0xff]  ;;  %v2302_v9 = vld [vmem:[#allocation2 + $0xa8] sm:$0xff] }
 0x1c7   : > { %v2327_v52 = vpack.c.bf16 %v2289_v43, %v2288_v16 }
 0x1c8   : > { %7158 = vmatmul.msk.bf16.gmra.mxu0 %vm307_vm3, %v2024_v31  ;;  %v1601_v31 = vpop.f32.mrf.mxu2 }
 0x1c9   : > { %v8723_v46 = vadd.f32 %v1601_v31, %v1401_v21 }
 0x1cc   : > { %v1403_v26 = vpop.f32.mrf.mxu1 }
 0x1cd   : > { %v8718_v33 = vpop.f32.mrf.mxu0 }
 0x1ce   : > { %11544 = vst [vmem:[#allocation54_spill] sm:$0xff] %v8718_v33  ;;  %7039 = vmatmul.msk.bf16.gmra.mxu3 %vm307_vm3, %v1249_v6  ;;  %v2600_v6 = vld [vmem:[#allocation2 + $0x39] sm:$0xff] }
 0x1cf   : > { %v2639_v21 = vpack.c.bf16 %v2601_v3, %v2600_v6  ;;  %v2291_v3 = vld [vmem:[#allocation2 + $0x50] sm:$0xff] }
 0x1d0   : > { %v1603_v28 = vpop.f32.mrf.mxu2  ;;  %v1152_v6 = vld [vmem:[#allocation2 + $0x10d] sm:$0xff] }
 0x1d1   : > { %v8728_v24 = vadd.f32 %v1603_v28, %v1403_v26  ;;  %v1176_v48 = vpack.c.bf16 %v1152_v6, %v1151_v40  ;;  %v2293_v6 = vld [vmem:[#allocation2 + $0x60] sm:$0xff]  ;;  %v2292_v40 = vld [vmem:[#allocation2 + $0x58] sm:$0xff] }
 0x1d2   : > { %v2329_v49 = vpack.c.bf16 %v2293_v6, %v2292_v40  ;;  %v2607_v40 = vld [vmem:[#allocation2 + $0x71] sm:$0xff] }
 0x1d4   : > { %v1406_v62 = vpop.f32.mrf.mxu1 }
 0x1d5   : > { %v8725_v41 = vpop.f32.mrf.mxu0  ;;  %7239 = vmatmul.msk.bf16.gmra.mxu2 %vm307_vm3, %v2639_v21  ;;  %v2290_v21 = vld [vmem:[#allocation2 + $0x48] sm:$0xff] }
 0x1d6   : > { %11545 = vst [vmem:[#allocation55_spill] sm:$0xff] %v8725_v41  ;;  %7194 = vmatmul.msk.bf16.gmra.mxu1 %vm307_vm3, %v2327_v52 }
 0x1d8   : > { %7159 = vmatmul.msk.bf16.gmra.mxu0 %vm307_vm3, %v2025_v11  ;;  %v1606_v4 = vpop.f32.mrf.mxu2 }
 0x1d9   : > { %v8735_v11 = vadd.f32 %v1606_v4, %v1406_v62  ;;  %v7825_v62 = vld [vmem:[%s11439_s4 + $0x58] sm:$0xff]  ;;  %v2328_v4 = vpack.c.bf16 %v2291_v3, %v2290_v21 }
 0x1da   : > { %1822 = vmatpush.bf16.msrb.mxu3 %v7825_v62  ;;  %v2000_v3 = vld [vmem:[#allocation2 + $0xf7] sm:$0xff] }
 0x1dc   : > { %v1408_v26 = vpop.f32.mrf.mxu1 }
 0x1dd   : > { %v8730_v31 = vpop.f32.mrf.mxu0 }
 0x1de   : > { %11546 = vst [vmem:[#allocation56_spill] sm:$0xff] %v8730_v31  ;;  %7040 = vmatmul.msk.bf16.gmra.mxu3 %vm307_vm3, %v1250_v22  ;;  %v2602_v22 = vld [vmem:[#allocation2 + $0x49] sm:$0xff]  ;;  %v2008_v31 = vld [vmem:[#allocation2 + $0x137] sm:$0xff] }
 0x1df   : > { %v2640_v8 = vpack.c.bf16 %v2603_v1, %v2602_v22  ;;  %v2605_v22 = vld [vmem:[#allocation2 + $0x61] sm:$0xff] }
 0x1e0   : > { %v1608_v43 = vpop.f32.mrf.mxu2 }
 0x1e1   : > { %v8740_v16 = vadd.f32 %v1608_v43, %v1408_v26  ;;  %v2001_v43 = vld [vmem:[#allocation2 + $0xff] sm:$0xff] }
 0x1e2   : > { %v2027_v1 = vpack.c.bf16 %v2001_v43, %v2000_v3 }
 0x1e4   : > { %v1411_v52 = vpop.f32.mrf.mxu1 }
 0x1e5   : > { %v8737_v28 = vpop.f32.mrf.mxu0  ;;  %7240 = vmatmul.msk.bf16.gmra.mxu2 %vm307_vm3, %v2640_v8 }
 0x1e6   : > { %11547 = vst [vmem:[#allocation57_spill] sm:$0xff] %v8737_v28  ;;  %7195 = vmatmul.msk.bf16.gmra.mxu1 %vm307_vm3, %v2328_v4  ;;  %v1153_v4 = vld [vmem:[#allocation2 + $0x115] sm:$0xff] }
 0x1e7   : > { %v1177_v27 = vpack.c.bf16 %v1154_v42, %v1153_v4  ;;  %v2295_v4 = vld [vmem:[#allocation2 + $0x70] sm:$0xff] }
 0x1e8   : > { %7160 = vmatmul.msk.bf16.gmra.mxu0 %vm307_vm3, %v2026_v38  ;;  %v1611_v38 = vpop.f32.mrf.mxu2 }
 0x1e9   : > { %v8750_v26 = vadd.f32 %v1611_v38, %v1411_v52 }
 0x1ec   : > { %v1413_v29 = vpop.f32.mrf.mxu1 }
 0x1ed   : > { %v8745_v51 = vpop.f32.mrf.mxu0 }
 0x1ee   : > { %11548 = vst [vmem:[#allocation58_spill] sm:$0xff] %v8745_v51  ;;  %7073 = vmatmul.msk.bf16.vlgmr.msra.gmra.mxu3 %vm307_vm3, %v1176_v48  ;;  %v2604_v48 = vld [vmem:[#allocation2 + $0x59] sm:$0xff] }
 0x1ef   : > { %v2641_v52 = vpack.c.bf16 %v2605_v22, %v2604_v48  ;;  %v2002_v22 = vld [vmem:[#allocation2 + $0x107] sm:$0xff] }
 0x1f0   : > { %v1613_v21 = vpop.f32.mrf.mxu2  ;;  %v1156_v48 = vld [vmem:[#allocation2 + $0x12d] sm:$0xff] }
 0x1f1   : > { %v8755_v62 = vadd.f32 %v1613_v21, %v1413_v29  ;;  %v7824_v29 = vld [vmem:[%s11439_s4 + $0x50] sm:$0xff] }
 0x1f2   : > { %1823 = vmatpush.bf16.msrb.mxu3 %v7824_v29 }
 0x1f4   : > { %v1416_v8 = vpop.f32.mrf.mxu1 }
 0x1f5   : > { %v8752_v7 = vpop.f32.mrf.mxu0  ;;  %7241 = vmatmul.msk.bf16.gmra.mxu2 %vm307_vm3, %v2641_v52 }
 0x1f6   : > { %11549 = vst [vmem:[#allocation59_spill] sm:$0xff] %v8752_v7  ;;  %7196 = vmatmul.msk.bf16.gmra.mxu1 %vm307_vm3, %v2329_v49 }
 0x1f8   : > { %7161 = vmatmul.msk.bf16.gmra.mxu0 %vm307_vm3, %v2027_v1  ;;  %v1616_v43 = vpop.f32.mrf.mxu2  ;;  %v2003_v1 = vld [vmem:[#allocation2 + $0x10f] sm:$0xff] }
 0x1f9   : > { %v8762_v3 = vadd.f32 %v1616_v43, %v1416_v8  ;;  %v2028_v42 = vpack.c.bf16 %v2003_v1, %v2002_v22  ;;  %v1155_v8 = vld [vmem:[#allocation2 + $0x125] sm:$0xff] }
 0x1fa   : > { %v2294_v43 = vld [vmem:[#allocation2 + $0x68] sm:$0xff]  ;;  %v1178_v29 = vpack.c.bf16 %v1156_v48, %v1155_v8 }
 0x1fb   : > { %v2330_v7 = vpack.c.bf16 %v2295_v4, %v2294_v43  ;;  %v2609_v8 = vld [vmem:[#allocation2 + $0x81] sm:$0xff] }
 0x1fc   : > { %v1418_v21 = vpop.f32.mrf.mxu1  ;;  %v1158_v43 = vld [vmem:[#allocation2 + $0x13d] sm:$0xff] }
 0x1fd   : > { %v8757_v38 = vpop.f32.mrf.mxu0 }
 0x1fe   : > { %11550 = vst [vmem:[#allocation60_spill] sm:$0xff] %v8757_v38  ;;  %7074 = vmatmul.msk.bf16.gmra.mxu3 %vm307_vm3, %v1177_v27  ;;  %v2606_v38 = vld [vmem:[#allocation2 + $0x69] sm:$0xff] }
 0x1ff   : > { %v2642_v19 = vpack.c.bf16 %v2607_v40, %v2606_v38  ;;  %v2005_v38 = vld [vmem:[#allocation2 + $0x11f] sm:$0xff] }
 0x200   : > { %v1618_v49 = vpop.f32.mrf.mxu2 }
 0x201   : > { %v8770_v27 = vadd.f32 %v1618_v49, %v1418_v21  ;;  %v2004_v21 = vld [vmem:[#allocation2 + $0x117] sm:$0xff]  ;;  %v7823_v49 = vld [vmem:[%s11439_s4 + $0x48] sm:$0xff] }
 0x202   : > { %1824 = vmatpush.bf16.msrb.mxu3 %v7823_v49  ;;  %v2029_v40 = vpack.c.bf16 %v2005_v38, %v2004_v21  ;;  %v2006_v38 = vld [vmem:[#allocation2 + $0x127] sm:$0xff] }
 0x204   : > { %v1421_v52 = vpop.f32.mrf.mxu1 }
 0x205   : > { %v8767_v6 = vpop.f32.mrf.mxu0  ;;  %7242 = vmatmul.msk.bf16.gmra.mxu2 %vm307_vm3, %v2642_v19  ;;  %v2297_v19 = vld [vmem:[#allocation2 + $0x80] sm:$0xff] }
 0x206   : > { %11551 = vst [vmem:[#allocation61_spill] sm:$0xff] %v8767_v6  ;;  %7197 = vmatmul.msk.bf16.gmra.mxu1 %vm307_vm3, %v2330_v7 }
 0x208   : > { %7162 = vmatmul.msk.bf16.gmra.mxu0 %vm307_vm3, %v2028_v42  ;;  %v1621_v1 = vpop.f32.mrf.mxu2 }
 0x209   : > { %v8777_v22 = vadd.f32 %v1621_v1, %v1421_v52  ;;  %v1157_v52 = vld [vmem:[#allocation2 + $0x135] sm:$0xff] }
 0x20a   : > { %v2296_v1 = vld [vmem:[#allocation2 + $0x78] sm:$0xff] }
 0x20b   : > { %v2331_v6 = vpack.c.bf16 %v2297_v19, %v2296_v1  ;;  %v2298_v1 = vld [vmem:[#allocation2 + $0x88] sm:$0xff] }
 0x20c   : > { %v1423_v42 = vpop.f32.mrf.mxu1 }
 0x20d   : > { %v8772_v51 = vpop.f32.mrf.mxu0 }
 0x20e   : > { %11552 = vst [vmem:[#allocation62_spill] sm:$0xff] %v8772_v51  ;;  %7075 = vmatmul.msk.bf16.gmra.mxu3 %vm307_vm3, %v1178_v29  ;;  %v2608_v51 = vld [vmem:[#allocation2 + $0x79] sm:$0xff] }
 0x20f   : > { %v2643_v5 = vpack.c.bf16 %v2609_v8, %v2608_v51  ;;  %v2299_v8 = vld [vmem:[#allocation2 + $0x90] sm:$0xff] }
 0x210   : > { %v1623_v7 = vpop.f32.mrf.mxu2 }
 0x211   : > { %v8785_v48 = vadd.f32 %v1623_v7, %v1423_v42 }
 0x214   : > { %v1426_v29 = vpop.f32.mrf.mxu1 }
 0x215   : > { %v8782_v4 = vpop.f32.mrf.mxu0  ;;  %7243 = vmatmul.msk.bf16.gmra.mxu2 %vm307_vm3, %v2643_v5  ;;  %v7822_v5 = vld [vmem:[%s11439_s4 + $0x40] sm:$0xff] }
 0x216   : > { %11553 = vst [vmem:[#allocation63_spill] sm:$0xff] %v8782_v4  ;;  %v1179_v4 = vpack.c.bf16 %v1158_v43, %v1157_v52  ;;  %7198 = vmatmul.msk.bf16.gmra.mxu1 %vm307_vm3, %v2331_v6  ;;  %v2611_v6 = vld [vmem:[#allocation2 + $0x91] sm:$0xff]  ;;  %v1159_v43 = vld [vmem:[#allocation2 + $0x145] sm:$0xf]  ;;  %1825 = vmatpush.bf16.msrb.mxu3 %v7822_v5 }
 0x218   : > { %7163 = vmatmul.msk.bf16.gmra.mxu0 %vm307_vm3, %v2029_v40  ;;  %v1626_v21 = vpop.f32.mrf.mxu2  ;;  %v2007_v40 = vld [vmem:[#allocation2 + $0x12f] sm:$0xff] }
 0x219   : > { %v8792_v49 = vadd.f32 %v1626_v21, %v1426_v29  ;;  %v2030_v51 = vpack.c.bf16 %v2007_v40, %v2006_v38  ;;  %v2610_v21 = vld [vmem:[#allocation2 + $0x89] sm:$0xff] }
 0x21a   : > { %v2644_v38 = vpack.c.bf16 %v2611_v6, %v2610_v21  ;;  %v2300_v21 = vld [vmem:[#allocation2 + $0x98] sm:$0xff] }
 0x21c   : > { %v1428_v7 = vpop.f32.mrf.mxu1 }
 0x21d   : > { %v8787_v28 = vpop.f32.mrf.mxu0 }
 0x21e   : > { %11554 = vst [vmem:[#allocation64_spill] sm:$0xff] %v8787_v28  ;;  %7076 = vmatmul.msk.bf16.gmra.mxu3 %vm307_vm3, %v1179_v4 }
 0x220   : > { %v1628_v19 = vpop.f32.mrf.mxu2 }
 0x221   : > { %v8794_v42 = vpop.f32.mrf.mxu3  ;;  %v8802_v4 = vadd.f32 %v1628_v19, %v1428_v7 }
 0x224   : > { %v1431_v29 = vpop.f32.mrf.mxu1 }
 0x225   : > { %v8796_v60 = vpop.f32.mrf.mxu0  ;;  %7244 = vmatmul.msk.bf16.gmra.mxu2 %vm307_vm3, %v2644_v38 }
 0x226   : > { %11555 = vst [vmem:[#allocation65_spill] sm:$0xff] %v8796_v60  ;;  %v2332_v60 = vpack.c.bf16 %v2299_v8, %v2298_v1  ;;  %v2031_v8 = vpack.c.bf16 %v2009_v47, %v2008_v31 }
 0x228   : > { %7164 = vmatmul.msk.bf16.gmra.mxu0 %vm307_vm3, %v2030_v51  ;;  %v1180_v51 = vpack.c.bf16 %v1159_v43, %v1159_v43  ;;  %7199 = vmatmul.msk.bf16.gmra.mxu1 %vm307_vm3, %v2332_v60  ;;  %v1631_v7 = vpop.f32.mrf.mxu2  ;;  %v2301_v43 = vld [vmem:[#allocation2 + $0xa0] sm:$0xff] }
 0x229   : > { %v8804_v52 = vpop.f32.mrf.mxu3  ;;  %v8811_v19 = vadd.f32 %v1631_v7, %v1431_v29  ;;  %v2613_v60 = vld [vmem:[#allocation2 + $0xa1] sm:$0xff]  ;;  %v2333_v37 = vpack.c.bf16 %v2301_v43, %v2300_v21  ;;  %v2011_v43 = vld [vmem:[#allocation2 + $0x14f] sm:$0xff] }
 0x22a   : > { %v1660_v7 = vld [vmem:[#allocation2 + $0x7] sm:$0xff] }
 0x22c   : > { %v1433_v41 = vpop.f32.mrf.mxu1 }
 0x22d   : > { %v8806_v40 = vpop.f32.mrf.mxu0 }
 0x22e   : > { %11556 = vst [vmem:[#allocation66_spill] sm:$0xff] %v8806_v40  ;;  %7077 = vmatmul.msk.bf16.gmra.mxu3 %vm307_vm3, %v1180_v51  ;;  %v2612_v51 = vld [vmem:[#allocation2 + $0x99] sm:$0xff]  ;;  %v1661_v40 = vld [vmem:[#allocation2 + $0xf] sm:$0xff] }
 0x22f   : > { %v2645_v33 = vpack.c.bf16 %v2613_v60, %v2612_v51  ;;  %v1701_v47 = vpack.c.bf16 %v1661_v40, %v1660_v7  ;;  %v2303_v7 = vld [vmem:[#allocation2 + $0xb0] sm:$0xff] }
 0x230   : > { %v1633_v6 = vpop.f32.mrf.mxu2  ;;  %v2334_v0 = vpack.c.bf16 %v2303_v7, %v2302_v9 }
 0x231   : > { %v8813_v28 = vpop.f32.mrf.mxu3  ;;  %v8818_v1 = vadd.f32 %v1633_v6, %v1433_v41  ;;  %v7841_v41 = vld [vmem:[%s11439_s4 + $0xd8] sm:$0xff]  ;;  %v2010_v6 = vld [vmem:[#allocation2 + $0x147] sm:$0xff] }
 0x232   : > { %3070 = vmatpush.bf16.msra.mxu3 %v7841_v41  ;;  %v2032_v21 = vpack.c.bf16 %v2011_v43, %v2010_v6 }
 0x234   : > { %v8822_v29 = vpop.f32.mrf.mxu1 }
 0x235   : > { %v8815_v5 = vpop.f32.mrf.mxu0  ;;  %11558 = vst [vmem:[#allocation68_spill] sm:$0xff] %v8822_v29  ;;  %7245 = vmatmul.msk.bf16.gmra.mxu2 %vm307_vm3, %v2645_v33  ;;  %v7849_v33 = vld [vmem:[%s11439_s4 + $0x118] sm:$0xff] }
 0x236   : > { %11557 = vst [vmem:[#allocation67_spill] sm:$0xff] %v8815_v5  ;;  %3694 = vmatpush.bf16.msra.mxu1 %v7849_v33 }
 0x238   : > { %7165 = vmatmul.msk.bf16.gmra.mxu0 %vm307_vm3, %v2031_v8  ;;  %7200 = vmatmul.msk.bf16.gmra.mxu1 %vm307_vm3, %v2333_v37  ;;  %v8832_v31 = vpop.f32.mrf.mxu2  ;;  %v7845_v37 = vld [vmem:[%s11439_s4 + $0xf8] sm:$0xff] }
 0x239   : > { %v8820_v38 = vpop.f32.mrf.mxu3  ;;  %11560 = vst [vmem:[#allocation70_spill] sm:$0xff] %v8832_v31  ;;  %3382 = vmatpush.bf16.msra.mxu0 %v7845_v37  ;;  %v1662_v37 = vld [vmem:[#allocation2 + $0x17] sm:$0xff] }
 0x23c   : > { %v8836_v60 = vpop.f32.mrf.mxu1 }
 0x23d   : > { %v8824_v18 = vpop.f32.mrf.mxu0  ;;  %11561 = vst [vmem:[#allocation71_spill] sm:$0xff] %v8836_v60 }
 0x23e   : > { %11559 = vst [vmem:[#allocation69_spill] sm:$0xff] %v8824_v18  ;;  %7102 = vmatmul.msk.bf16.vlgmr.msrb.gmra.mxu3 %vm307_vm3, %v1701_v47  ;;  %v2615_v47 = vld [vmem:[#allocation2 + $0xb1] sm:$0xff]  ;;  %v1663_v18 = vld [vmem:[#allocation2 + $0x1f] sm:$0xff] }
 0x23f   : > { %v2646_v17 = vpack.c.bf16 %v2615_v47, %v2614_v32  ;;  %v1702_v6 = vpack.c.bf16 %v1663_v18, %v1662_v37  ;;  %v2305_v18 = vld [vmem:[#allocation2 + $0xc0] sm:$0xff]  ;;  %v2304_v37 = vld [vmem:[#allocation2 + $0xb8] sm:$0xff] }
 0x240   : > { %v8847_v51 = vpop.f32.mrf.mxu2 }
 0x241   : > { %v8834_v8 = vpop.f32.mrf.mxu3  ;;  %11563 = vst [vmem:[#allocation73_spill] sm:$0xff] %v8847_v51 }
 0x244   : > { %v8851_v5 = vpop.f32.mrf.mxu1 }
 0x245   : > { %v8844_v40 = vpop.f32.mrf.mxu0  ;;  %11564 = vst [vmem:[#allocation74_spill] sm:$0xff] %v8851_v5  ;;  %7246 = vmatmul.msk.bf16.gmra.mxu2 %vm307_vm3, %v2646_v17  ;;  %v1665_v17 = vld [vmem:[#allocation2 + $0x2f] sm:$0xff] }
 0x246   : > { %11562 = vst [vmem:[#allocation72_spill] sm:$0xff] %v8844_v40 }
 0x248   : > { %7166 = vmatmul.msk.bf16.gmra.mxu0 %vm307_vm3, %v2032_v21  ;;  %7201 = vmatmul.msk.bf16.gmra.mxu1 %vm307_vm3, %v2334_v0  ;;  %v8858_v43 = vpop.f32.mrf.mxu2  ;;  %v2012_v21 = vld [vmem:[#allocation2 + $0x157] sm:$0xf]  ;;  %v2617_v0 = vld [vmem:[#allocation2 + $0xc1] sm:$0xff] }
 0x249   : > { %v8849_v41 = vpop.f32.mrf.mxu3  ;;  %11566 = vst [vmem:[#allocation76_spill] sm:$0xff] %v8858_v43  ;;  %v2033_v32 = vpack.c.bf16 %v2012_v21, %v2012_v21  ;;  %v7843_v43 = vld [vmem:[%s11439_s4 + $0xe8] sm:$0xff] }
 0x24c   : > { %v8862_v40 = vpop.f32.mrf.mxu1 }
 0x24d   : > { %v8853_v54 = vpop.f32.mrf.mxu0  ;;  %11567 = vst [vmem:[#allocation77_spill] sm:$0xff] %v8862_v40  ;;  %v2335_v40 = vpack.c.bf16 %v2305_v18, %v2304_v37  ;;  %v2307_v37 = vld [vmem:[#allocation2 + $0xd0] sm:$0xff] }
 0x24e   : > { %11565 = vst [vmem:[#allocation75_spill] sm:$0xff] %v8853_v54  ;;  %7103 = vmatmul.msk.bf16.gmra.mxu3 %vm307_vm3, %v1702_v6  ;;  %v2616_v6 = vld [vmem:[#allocation2 + $0xb9] sm:$0xff]  ;;  %v7844_v54 = vld [vmem:[%s11439_s4 + $0xf0] sm:$0xff] }
 0x24f   : > { %3383 = vmatpush.bf16.msra.mxu0 %v7844_v54  ;;  %v7842_v54 = vld [vmem:[%s11439_s4 + $0xe0] sm:$0xff] }
 0x250   : > { %v8867_v9 = vpop.f32.mrf.mxu2 }
 0x251   : > { %v8860_v33 = vpop.f32.mrf.mxu3  ;;  %11569 = vst [vmem:[#allocation79_spill] sm:$0xff] %v8867_v9 }
 0x253   : > { %3384 = vmatpush.bf16.msra.mxu0 %v7843_v43  ;;  %v2306_v43 = vld [vmem:[#allocation2 + $0xc8] sm:$0xff] }
 0x254   : > { %v8871_v47 = vpop.f32.mrf.mxu1  ;;  %v2336_v5 = vpack.c.bf16 %v2307_v37, %v2306_v43  ;;  %v3223_v37 = vld [vmem:[#allocation2 + $0x42] sm:$0xff] }
 0x255   : > { %v8864_v25 = vpop.f32.mrf.mxu0  ;;  %11570 = vst [vmem:[#allocation80_spill] sm:$0xff] %v8871_v47 }
 0x256   : > { %11568 = vst [vmem:[#allocation78_spill] sm:$0xff] %v8864_v25  ;;  %v2647_v25 = vpack.c.bf16 %v2617_v0, %v2616_v6  ;;  %v2619_v6 = vld [vmem:[#allocation2 + $0xd1] sm:$0xff] }
 0x257   : > { %3385 = vmatpush.bf16.msra.mxu0 %v7842_v54 }
 0x258   : > { %7167 = vmatmul.msk.bf16.gmra.mxu0 %vm307_vm3, %v2033_v32  ;;  %v1664_v32 = vld [vmem:[#allocation2 + $0x27] sm:$0xff]  ;;  %7202 = vmatmul.msk.bf16.gmra.mxu1 %vm307_vm3, %v2335_v40  ;;  %v8881_v47 = vpop.f32.mrf.mxu2 }
 0x259   : > { %v8869_v7 = vpop.f32.mrf.mxu3  ;;  %v1703_v9 = vpack.c.bf16 %v1665_v17, %v1664_v32  ;;  %7247 = vmatmul.msk.bf16.gmra.mxu2 %vm307_vm3, %v2647_v25  ;;  %11572 = vst [vmem:[#allocation82_spill] sm:$0xff] %v8881_v47  ;;  %v3221_v25 = vld [vmem:[#allocation2 + $0x32] sm:$0xff]  ;;  %v2618_v47 = vld [vmem:[#allocation2 + $0xc9] sm:$0xff] }
 0x25a   : > { %v2648_v61 = vpack.c.bf16 %v2619_v6, %v2618_v47  ;;  %v3222_v47 = vld [vmem:[#allocation2 + $0x3a] sm:$0xff] }
 0x25b   : > { %v3262_v6 = vpack.c.bf16 %v3223_v37, %v3222_v47 }
 0x25c   : > { %v8888_v18 = vpop.f32.mrf.mxu1 }
 0x25d   : > { %v8876_v21 = vpop.f32.mrf.mxu0  ;;  %11573 = vst [vmem:[#allocation83_spill] sm:$0xff] %v8888_v18 }
 0x25e   : > { %11571 = vst [vmem:[#allocation81_spill] sm:$0xff] %v8876_v21  ;;  %7104 = vmatmul.msk.bf16.gmra.mxu3 %vm307_vm3, %v1703_v9  ;;  %v3220_v9 = vld [vmem:[#allocation2 + $0x2a] sm:$0xff]  ;;  %v1667_v21 = vld [vmem:[#allocation2 + $0x3f] sm:$0xff] }
 0x25f   : > { %v3261_v0 = vpack.c.bf16 %v3221_v25, %v3220_v9 }
 0x260   : > { %v8895_v17 = vpop.f32.mrf.mxu2 }
 0x261   : > { %v8886_v55 = vpop.f32.mrf.mxu3  ;;  %11575 = vst [vmem:[#allocation85_spill] sm:$0xff] %v8895_v17 }
 0x264   : > { %v8898_v18 = vpop.f32.mrf.mxu1 }
 0x265   : > { %v8893_v40 = vpop.f32.mrf.mxu0  ;;  %11576 = vst [vmem:[#allocation86_spill] sm:$0xff] %v8898_v18 }
 0x266   : > { %11574 = vst [vmem:[#allocation84_spill] sm:$0xff] %v8893_v40  ;;  %v1666_v40 = vld [vmem:[#allocation2 + $0x37] sm:$0xff] }
 0x267   : > { %v1704_v54 = vpack.c.bf16 %v1667_v21, %v1666_v40  ;;  %v2309_v21 = vld [vmem:[#allocation2 + $0xe0] sm:$0xff] }
 0x268   : > { %7327 = vmatmul.msk.bf16.vlgmr.msra.gmra.mxu0 %vm307_vm3, %v3261_v0  ;;  %7203 = vmatmul.msk.bf16.gmra.mxu1 %vm307_vm3, %v2336_v5  ;;  %v8905_v25 = vpop.f32.mrf.mxu2  ;;  %v2621_v40 = vld [vmem:[#allocation2 + $0xe1] sm:$0xff]  ;;  %v1669_v5 = vld [vmem:[#allocation2 + $0x4f] sm:$0xff] }
 0x269   : > { %v1458_v32 = vpop.f32.mrf.mxu3  ;;  %7248 = vmatmul.msk.bf16.gmra.mxu2 %vm307_vm3, %v2648_v61  ;;  %11578 = vst [vmem:[#allocation88_spill] sm:$0xff] %v8905_v25  ;;  %v2620_v25 = vld [vmem:[#allocation2 + $0xd9] sm:$0xff] }
 0x26c   : > { %v8909_v0 = vpop.f32.mrf.mxu1 }
 0x26d   : > { %v8900_v51 = vpop.f32.mrf.mxu0  ;;  %11579 = vst [vmem:[#allocation89_spill] sm:$0xff] %v8909_v0  ;;  %v2649_v0 = vpack.c.bf16 %v2621_v40, %v2620_v25  ;;  %v3224_v25 = vld [vmem:[#allocation2 + $0x4a] sm:$0xff] }
 0x26e   : > { %11577 = vst [vmem:[#allocation87_spill] sm:$0xff] %v8900_v51  ;;  %7105 = vmatmul.msk.bf16.gmra.mxu3 %vm307_vm3, %v1704_v54  ;;  %v2308_v51 = vld [vmem:[#allocation2 + $0xd8] sm:$0xff] }
 0x26f   : > { %v2337_v18 = vpack.c.bf16 %v2309_v21, %v2308_v51  ;;  %v3225_v51 = vld [vmem:[#allocation2 + $0x52] sm:$0xff] }
 0x270   : > { %v8913_v43 = vpop.f32.mrf.mxu2  ;;  %v3263_v21 = vpack.c.bf16 %v3225_v51, %v3224_v25  ;;  %v7840_v25 = vld [vmem:[%s11439_s4 + $0xd0] sm:$0xff] }
 0x271   : > { %v8907_v9 = vpop.f32.mrf.mxu3  ;;  %11581 = vst [vmem:[#allocation91_spill] sm:$0xff] %v8913_v43  ;;  %3071 = vmatpush.bf16.msra.mxu3 %v7840_v25  ;;  %v7848_v25 = vld [vmem:[%s11439_s4 + $0x110] sm:$0xff] }
 0x272   : > { %3695 = vmatpush.bf16.msra.mxu1 %v7848_v25  ;;  %v2626_v25 = vld [vmem:[#allocation2 + $0x109] sm:$0xff] }
 0x274   : > { %v8918_v54 = vpop.f32.mrf.mxu1 }
 0x275   : > { %v8911_v32 = vpop.f32.mrf.mxu0  ;;  %11582 = vst [vmem:[#allocation92_spill] sm:$0xff] %v8918_v54 }
 0x276   : > { %11580 = vst [vmem:[#allocation90_spill] sm:$0xff] %v8911_v32  ;;  %v1668_v32 = vld [vmem:[#allocation2 + $0x47] sm:$0xff] }
 0x277   : > { %v1705_v10 = vpack.c.bf16 %v1669_v5, %v1668_v32  ;;  %v2311_v32 = vld [vmem:[#allocation2 + $0xf0] sm:$0xff] }
 0x278   : > { %7328 = vmatmul.msk.bf16.gmra.mxu0 %vm307_vm3, %v3262_v6  ;;  %7204 = vmatmul.msk.bf16.gmra.mxu1 %vm307_vm3, %v2337_v18  ;;  %v8925_v37 = vpop.f32.mrf.mxu2  ;;  %v2623_v5 = vld [vmem:[#allocation2 + $0xf1] sm:$0xff] }
 0x279   : > { %v8916_v61 = vpop.f32.mrf.mxu3  ;;  %7249 = vmatmul.msk.bf16.gmra.mxu2 %vm307_vm3, %v2649_v0  ;;  %11584 = vst [vmem:[#allocation94_spill] sm:$0xff] %v8925_v37  ;;  %v2622_v37 = vld [vmem:[#allocation2 + $0xe9] sm:$0xff] }
 0x27c   : > { %v8929_v6 = vpop.f32.mrf.mxu1 }
 0x27d   : > { %v8920_v17 = vpop.f32.mrf.mxu0  ;;  %11585 = vst [vmem:[#allocation95_spill] sm:$0xff] %v8929_v6  ;;  %v2650_v6 = vpack.c.bf16 %v2623_v5, %v2622_v37 }
 0x27e   : > { %11583 = vst [vmem:[#allocation93_spill] sm:$0xff] %v8920_v17  ;;  %7106 = vmatmul.msk.bf16.gmra.mxu3 %vm307_vm3, %v1705_v10  ;;  %v1671_v10 = vld [vmem:[#allocation2 + $0x5f] sm:$0xff]  ;;  %v2310_v17 = vld [vmem:[#allocation2 + $0xe8] sm:$0xff] }
 0x27f   : > { %v2338_v43 = vpack.c.bf16 %v2311_v32, %v2310_v17  ;;  %v3226_v32 = vld [vmem:[#allocation2 + $0x5a] sm:$0xff] }
 0x280   : > { %v8933_v40 = vpop.f32.mrf.mxu2 }
 0x281   : > { %v8927_v47 = vpop.f32.mrf.mxu3  ;;  %11587 = vst [vmem:[#allocation97_spill] sm:$0xff] %v8933_v40  ;;  %v2624_v40 = vld [vmem:[#allocation2 + $0xf9] sm:$0xff] }
 0x284   : > { %v8938_v0 = vpop.f32.mrf.mxu1 }
 0x285   : > { %v8931_v54 = vpop.f32.mrf.mxu0  ;;  %11588 = vst [vmem:[#allocation98_spill] sm:$0xff] %v8938_v0  ;;  %v2312_v0 = vld [vmem:[#allocation2 + $0xf8] sm:$0xff] }
 0x286   : > { %11586 = vst [vmem:[#allocation96_spill] sm:$0xff] %v8931_v54  ;;  %v1670_v54 = vld [vmem:[#allocation2 + $0x57] sm:$0xff] }
 0x287   : > { %v1706_v31 = vpack.c.bf16 %v1671_v10, %v1670_v54  ;;  %v3227_v54 = vld [vmem:[#allocation2 + $0x62] sm:$0xff] }
 0x288   : > { %7329 = vmatmul.msk.bf16.gmra.mxu0 %vm307_vm3, %v3263_v21  ;;  %7205 = vmatmul.msk.bf16.gmra.mxu1 %vm307_vm3, %v2338_v43  ;;  %v8945_v51 = vpop.f32.mrf.mxu2  ;;  %v3264_v43 = vpack.c.bf16 %v3227_v54, %v3226_v32  ;;  %v1672_v32 = vld [vmem:[#allocation2 + $0x67] sm:$0xff] }
 0x289   : > { %v8936_v18 = vpop.f32.mrf.mxu3  ;;  %7250 = vmatmul.msk.bf16.gmra.mxu2 %vm307_vm3, %v2650_v6  ;;  %11590 = vst [vmem:[#allocation100_spill] sm:$0xff] %v8945_v51  ;;  %v2313_v6 = vld [vmem:[#allocation2 + $0x100] sm:$0xff] }
 0x28c   : > { %v8952_v17 = vpop.f32.mrf.mxu1 }
 0x28d   : > { %v8940_v60 = vpop.f32.mrf.mxu0  ;;  %11591 = vst [vmem:[#allocation101_spill] sm:$0xff] %v8952_v17 }
 0x28e   : > { %11589 = vst [vmem:[#allocation99_spill] sm:$0xff] %v8940_v60  ;;  %7107 = vmatmul.msk.bf16.gmra.mxu3 %vm307_vm3, %v1706_v31  ;;  %v2625_v31 = vld [vmem:[#allocation2 + $0x101] sm:$0xff]  ;;  %v1673_v60 = vld [vmem:[#allocation2 + $0x6f] sm:$0xff] }
 0x28f   : > { %v2651_v17 = vpack.c.bf16 %v2625_v31, %v2624_v40  ;;  %v3229_v40 = vld [vmem:[#allocation2 + $0x72] sm:$0xff] }
 0x290   : > { %v8956_v5 = vpop.f32.mrf.mxu2 }
 0x291   : > { %v8950_v21 = vpop.f32.mrf.mxu3  ;;  %11593 = vst [vmem:[#allocation103_spill] sm:$0xff] %v8956_v5  ;;  %v1707_v5 = vpack.c.bf16 %v1673_v60, %v1672_v32  ;;  %v2315_v60 = vld [vmem:[#allocation2 + $0x110] sm:$0xff] }
 0x294   : > { %v8961_v51 = vpop.f32.mrf.mxu1 }
 0x295   : > { %v8954_v37 = vpop.f32.mrf.mxu0  ;;  %11594 = vst [vmem:[#allocation104_spill] sm:$0xff] %v8961_v51 }
 0x296   : > { %11592 = vst [vmem:[#allocation102_spill] sm:$0xff] %v8954_v37  ;;  %v2339_v37 = vpack.c.bf16 %v2313_v6, %v2312_v0  ;;  %v3228_v0 = vld [vmem:[#allocation2 + $0x6a] sm:$0xff] }
 0x297   : > { %v3265_v6 = vpack.c.bf16 %v3229_v40, %v3228_v0 }
 0x298   : > { %7330 = vmatmul.msk.bf16.gmra.mxu0 %vm307_vm3, %v3264_v43  ;;  %7206 = vmatmul.msk.bf16.gmra.mxu1 %vm307_vm3, %v2339_v37  ;;  %v8971_v43 = vpop.f32.mrf.mxu2  ;;  %v2627_v37 = vld [vmem:[#allocation2 + $0x111] sm:$0xff] }
 0x299   : > { %v8959_v10 = vpop.f32.mrf.mxu3  ;;  %7251 = vmatmul.msk.bf16.gmra.mxu2 %vm307_vm3, %v2651_v17  ;;  %11596 = vst [vmem:[#allocation106_spill] sm:$0xff] %v8971_v43 }
 0x29c   : > { %v8975_v44 = vpop.f32.mrf.mxu1 }
 0x29d   : > { %v8966_v54 = vpop.f32.mrf.mxu0  ;;  %11597 = vst [vmem:[#allocation107_spill] sm:$0xff] %v8975_v44  ;;  %v2652_v44 = vpack.c.bf16 %v2627_v37, %v2626_v25  ;;  %v2316_v25 = vld [vmem:[#allocation2 + $0x118] sm:$0xff] }
 0x29e   : > { %11595 = vst [vmem:[#allocation105_spill] sm:$0xff] %v8966_v54  ;;  %7108 = vmatmul.msk.bf16.gmra.mxu3 %vm307_vm3, %v1707_v5  ;;  %v1675_v5 = vld [vmem:[#allocation2 + $0x7f] sm:$0xff]  ;;  %v2314_v54 = vld [vmem:[#allocation2 + $0x108] sm:$0xff] }
 0x29f   : > { %v2340_v43 = vpack.c.bf16 %v2315_v60, %v2314_v54  ;;  %v3231_v54 = vld [vmem:[#allocation2 + $0x82] sm:$0xff]  ;;  %v3230_v60 = vld [vmem:[#allocation2 + $0x7a] sm:$0xff] }
 0x2a0   : > { %v8979_v31 = vpop.f32.mrf.mxu2  ;;  %v3266_v37 = vpack.c.bf16 %v3231_v54, %v3230_v60 }
 0x2a1   : > { %v8973_v51 = vpop.f32.mrf.mxu3  ;;  %11599 = vst [vmem:[#allocation109_spill] sm:$0xff] %v8979_v31 }
 0x2a5   : > { %v8977_v29 = vpop.f32.mrf.mxu0  ;;  %v8984_v32 = vpop.f32.mrf.mxu1 }
 0x2a6   : > { %11598 = vst [vmem:[#allocation108_spill] sm:$0xff] %v8977_v29  ;;  %v1674_v29 = vld [vmem:[#allocation2 + $0x77] sm:$0xff] }
 0x2a7   : > { %11600 = vst [vmem:[#allocation110_spill] sm:$0xff] %v8984_v32  ;;  %v1708_v23 = vpack.c.bf16 %v1675_v5, %v1674_v29  ;;  %v2317_v29 = vld [vmem:[#allocation2 + $0x120] sm:$0xff] }
 0x2a8   : > { %7331 = vmatmul.msk.bf16.gmra.mxu0 %vm307_vm3, %v3265_v6  ;;  %7207 = vmatmul.msk.bf16.gmra.mxu1 %vm307_vm3, %v2340_v43  ;;  %v8991_v40 = vpop.f32.mrf.mxu2  ;;  %v2628_v43 = vld [vmem:[#allocation2 + $0x119] sm:$0xff]  ;;  %v2629_v5 = vld [vmem:[#allocation2 + $0x121] sm:$0xff]  ;;  %v2341_v31 = vpack.c.bf16 %v2317_v29, %v2316_v25 }
 0x2a9   : > { %v8982_v17 = vpop.f32.mrf.mxu3  ;;  %7252 = vmatmul.msk.bf16.gmra.mxu2 %vm307_vm3, %v2652_v44  ;;  %11602 = vst [vmem:[#allocation112_spill] sm:$0xff] %v8991_v40  ;;  %v1677_v44 = vld [vmem:[#allocation2 + $0x8f] sm:$0xff]  ;;  %v2653_v57 = vpack.c.bf16 %v2629_v5, %v2628_v43 }
 0x2aa   : > { %v3233_v29 = vld [vmem:[#allocation2 + $0x92] sm:$0xff]  ;;  %v3232_v43 = vld [vmem:[#allocation2 + $0x8a] sm:$0xff] }
 0x2ab   : > { %v2318_v5 = vld [vmem:[#allocation2 + $0x128] sm:$0xff] }
 0x2ad   : > { %v8986_v56 = vpop.f32.mrf.mxu0  ;;  %v8995_v6 = vpop.f32.mrf.mxu1 }
 0x2ae   : > { %11601 = vst [vmem:[#allocation111_spill] sm:$0xff] %v8986_v56  ;;  %7109 = vmatmul.msk.bf16.gmra.mxu3 %vm307_vm3, %v1708_v23 }
 0x2af   : > { %11604 = vst [vmem:[#allocation114_spill] sm:$0xff] %v8995_v6 }
 0x2b0   : > { %v8999_v56 = vpop.f32.mrf.mxu2 }
 0x2b1   : > { %v8993_v0 = vpop.f32.mrf.mxu3  ;;  %11606 = vst [vmem:[#allocation116_spill] sm:$0xff] %v8999_v56 }
 0x2b2   : > { %11603 = vst [vmem:[#allocation113_spill] sm:$0xff] %v8993_v0 }
 0x2b5   : > { %v8997_v32 = vpop.f32.mrf.mxu0  ;;  %v9002_v40 = vpop.f32.mrf.mxu1 }
 0x2b6   : > { %11605 = vst [vmem:[#allocation115_spill] sm:$0xff] %v8997_v32  ;;  %v1676_v32 = vld [vmem:[#allocation2 + $0x87] sm:$0xff] }
 0x2b7   : > { %11607 = vst [vmem:[#allocation117_spill] sm:$0xff] %v9002_v40  ;;  %v1709_v0 = vpack.c.bf16 %v1677_v44, %v1676_v32  ;;  %v3267_v32 = vpack.c.bf16 %v3233_v29, %v3232_v43  ;;  %v7857_v29 = vld [vmem:[%s11441_s6 + $0x38] sm:$0xff] }
 0x2b8   : > { %7332 = vmatmul.msk.bf16.gmra.mxu0 %vm307_vm3, %v3266_v37  ;;  %7208 = vmatmul.msk.bf16.gmra.mxu1 %vm307_vm3, %v2341_v31  ;;  %v9009_v54 = vpop.f32.mrf.mxu2  ;;  %v2319_v31 = vld [vmem:[#allocation2 + $0x130] sm:$0xff] }
 0x2b9   : > { %v1658_v23 = vpop.f32.mrf.mxu3  ;;  %7253 = vmatmul.msk.bf16.gmra.mxu2 %vm307_vm3, %v2653_v57  ;;  %11609 = vst [vmem:[#allocation119_spill] sm:$0xff] %v9009_v54  ;;  %v2630_v57 = vld [vmem:[#allocation2 + $0x129] sm:$0xff]  ;;  %v1679_v54 = vld [vmem:[#allocation2 + $0x9f] sm:$0xff] }
 0x2ba   : > { %4244 = vmatpush.bf16.msra.mxu2 %v7857_v29 }
 0x2bd   : > { %v9004_v6 = vpop.f32.mrf.mxu0  ;;  %v9011_v37 = vpop.f32.mrf.mxu1 }
 0x2be   : > { %11608 = vst [vmem:[#allocation118_spill] sm:$0xff] %v9004_v6  ;;  %7110 = vmatmul.msk.bf16.gmra.mxu3 %vm307_vm3, %v1709_v0  ;;  %v2631_v6 = vld [vmem:[#allocation2 + $0x131] sm:$0xff] }
 0x2bf   : > { %11610 = vst [vmem:[#allocation120_spill] sm:$0xff] %v9011_v37 }
 0x2c0   : > { %v9018_v44 = vpop.f32.mrf.mxu2 }
 0x2c1   : > { %v1827_v60 = vpop.f32.mrf.mxu3  ;;  %11612 = vst [vmem:[#allocation122_spill] sm:$0xff] %v9018_v44 }
 0x2c2   : > { %v9014_v23 = vadd.f32 %v1827_v60, %v8520_v35  ;;  %v2342_v35 = vpack.c.bf16 %v2319_v31, %v2318_v5  ;;  %v2654_v60 = vpack.c.bf16 %v2631_v6, %v2630_v57  ;;  %v3234_v31 = vld [vmem:[#allocation2 + $0x9a] sm:$0xff] }
 0x2c3   : > { %v2320_v57 = vld [vmem:[#allocation2 + $0x138] sm:$0xff] }
 0x2c5   : > { %v9016_v25 = vpop.f32.mrf.mxu0  ;;  %v9023_v37 = vpop.f32.mrf.mxu1 }
 0x2c6   : > { %11611 = vst [vmem:[#allocation121_spill] sm:$0xff] %v9016_v25  ;;  %v1678_v25 = vld [vmem:[#allocation2 + $0x97] sm:$0xff] }
 0x2c7   : > { %11614 = vst [vmem:[#allocation124_spill] sm:$0xff] %v9023_v37  ;;  %v1710_v56 = vpack.c.bf16 %v1679_v54, %v1678_v25  ;;  %v3235_v25 = vld [vmem:[#allocation2 + $0xa2] sm:$0xff]  ;;  %v2632_v37 = vld [vmem:[#allocation2 + $0x139] sm:$0xff] }
 0x2c8   : > { %7333 = vmatmul.msk.bf16.gmra.mxu0 %vm307_vm3, %v3267_v32  ;;  %7209 = vmatmul.msk.bf16.gmra.mxu1 %vm307_vm3, %v2342_v35  ;;  %v9033_v43 = vpop.f32.mrf.mxu2  ;;  %v3268_v35 = vpack.c.bf16 %v3235_v25, %v3234_v31 }
 0x2c9   : > { %v9021_v0 = vpop.f32.mrf.mxu3  ;;  %7254 = vmatmul.msk.bf16.gmra.mxu2 %vm307_vm3, %v2654_v60  ;;  %11616 = vst [vmem:[#allocation126_spill] sm:$0xff] %v9033_v43  ;;  %v1681_v43 = vld [vmem:[#allocation2 + $0xaf] sm:$0xff] }
 0x2ca   : > { %11613 = vst [vmem:[#allocation123_spill] sm:$0xff] %v9021_v0 }
 0x2cd   : > { %v9025_v40 = vpop.f32.mrf.mxu0  ;;  %v9035_v5 = vpop.f32.mrf.mxu1 }
 0x2ce   : > { %11615 = vst [vmem:[#allocation125_spill] sm:$0xff] %v9025_v40  ;;  %7111 = vmatmul.msk.bf16.gmra.mxu3 %vm307_vm3, %v1710_v56  ;;  %v2321_v40 = vld [vmem:[#allocation2 + $0x140] sm:$0xff] }
 0x2cf   : > { %11617 = vst [vmem:[#allocation127_spill] sm:$0xff] %v9035_v5  ;;  %v2633_v56 = vld [vmem:[#allocation2 + $0x141] sm:$0xff] }
 0x2d0   : > { %v9042_v60 = vpop.f32.mrf.mxu2 }
 0x2d1   : > { %v1832_v32 = vpop.f32.mrf.mxu3  ;;  %11620 = vst [vmem:[#allocation130_spill] sm:$0xff] %v9042_v60 }
 0x2d2   : > { %v9038_v6 = vadd.f32 %v1832_v32, %v8597_v45  ;;  %v2343_v32 = vpack.c.bf16 %v2321_v40, %v2320_v57  ;;  %v7847_v40 = vld [vmem:[%s11439_s4 + $0x108] sm:$0xff] }
 0x2d3   : > { %3696 = vmatpush.bf16.msra.mxu1 %v7847_v40  ;;  %v2634_v57 = vld [vmem:[#allocation2 + $0x149] sm:$0xff] }
 0x2d4   : > { %11618 = vst [vmem:[#allocation128_spill] sm:$0xff] %v9038_v6  ;;  %v1680_v6 = vld [vmem:[#allocation2 + $0xa7] sm:$0xff] }
 0x2d5   : > { %v9040_v54 = vpop.f32.mrf.mxu0  ;;  %v9045_v44 = vpop.f32.mrf.mxu1  ;;  %v1711_v0 = vpack.c.bf16 %v1681_v43, %v1680_v6  ;;  %v2322_v43 = vld [vmem:[#allocation2 + $0x148] sm:$0xff] }
 0x2d6   : > { %11619 = vst [vmem:[#allocation129_spill] sm:$0xff] %v9040_v54  ;;  %v2655_v54 = vpack.c.bf16 %v2633_v56, %v2632_v37  ;;  %v3237_v37 = vld [vmem:[#allocation2 + $0xb2] sm:$0xff] }
 0x2d7   : > { %11621 = vst [vmem:[#allocation131_spill] sm:$0xff] %v9045_v44 }
 0x2d8   : > { %7334 = vmatmul.msk.bf16.gmra.mxu0 %vm307_vm3, %v3268_v35  ;;  %7210 = vmatmul.msk.bf16.gmra.mxu1 %vm307_vm3, %v2343_v32 }
 0x2d9   : > { %v1834_v29 = vpop.f32.mrf.mxu3  ;;  %7255 = vmatmul.msk.bf16.gmra.mxu2 %vm307_vm3, %v2655_v54  ;;  %v2323_v54 = vld [vmem:[#allocation2 + $0x150] sm:$0xff] }
 0x2da   : > { %v9048_v45 = vadd.f32 %v1834_v29, %v8603_v14  ;;  %v7839_v14 = vld [vmem:[%s11439_s4 + $0xc8] sm:$0xff]  ;;  %v1683_v29 = vld [vmem:[#allocation2 + $0xbf] sm:$0xff]  ;;  %v2344_v40 = vpack.c.bf16 %v2323_v54, %v2322_v43 }
 0x2db   : > { %3072 = vmatpush.bf16.msra.mxu3 %v7839_v14  ;;  %v7846_v14 = vld [vmem:[%s11439_s4 + $0x100] sm:$0xff] }
 0x2dc   : > { %v9053_v25 = vpop.f32.mrf.mxu2  ;;  %3697 = vmatpush.bf16.msra.mxu1 %v7846_v14  ;;  %v3238_v43 = vld [vmem:[#allocation2 + $0xba] sm:$0xff] }
 0x2dd   : > { %v2241_v5 = vpop.f32.mrf.mxu0  ;;  %11622 = vst [vmem:[#allocation132_spill] sm:$0xff] %v9053_v25  ;;  %v9055_v35 = vpop.f32.mrf.mxu1  ;;  %v3243_v25 = vld [vmem:[#allocation2 + $0xe2] sm:$0xff] }
 0x2de   : > { %7112 = vmatmul.msk.bf16.gmra.mxu3 %vm307_vm3, %v1711_v0  ;;  %11623 = vst [vmem:[#allocation133_spill] sm:$0xff] %v9055_v35  ;;  %v3236_v0 = vld [vmem:[#allocation2 + $0xaa] sm:$0xff]  ;;  %v3239_v35 = vld [vmem:[#allocation2 + $0xc2] sm:$0xff] }
 0x2df   : > { %v3269_v5 = vpack.c.bf16 %v3237_v37, %v3236_v0  ;;  %v1682_v0 = vld [vmem:[#allocation2 + $0xb7] sm:$0xff]  ;;  %v3270_v54 = vpack.c.bf16 %v3239_v35, %v3238_v43 }
 0x2e1   : > { %v1837_v31 = vpop.f32.mrf.mxu3 }
 0x2e2   : > { %v9058_v44 = vadd.f32 %v1837_v31, %v8612_v39  ;;  %v2635_v39 = vld [vmem:[#allocation2 + $0x151] sm:$0xff] }
 0x2e3   : > { %v2656_v37 = vpack.c.bf16 %v2635_v39, %v2634_v57  ;;  %v2324_v39 = vld [vmem:[#allocation2 + $0x158] sm:$0xf] }
 0x2e4   : > { %v9066_v6 = vpop.f32.mrf.mxu2 }
 0x2e5   : > { %11624 = vst [vmem:[#allocation134_spill] sm:$0xff] %v9066_v6  ;;  %v9069_v32 = vpop.f32.mrf.mxu1  ;;  %v1712_v6 = vpack.c.bf16 %v1683_v29, %v1682_v0  ;;  %v2636_v29 = vld [vmem:[#allocation2 + $0x159] sm:$0xf]  ;;  %v2345_v0 = vpack.c.bf16 %v2324_v39, %v2324_v39  ;;  %v9098_v35 = vpop.f32.mrf.mxu0 }
 0x2e6   : > { %11625 = vst [vmem:[#allocation135_spill] sm:$0xff] %v9069_v32  ;;  %v3241_v39 = vld [vmem:[#allocation2 + $0xd2] sm:$0xff] }
 0x2e8   : > { %7335 = vmatmul.msk.bf16.gmra.mxu0 %vm307_vm3, %v3269_v5  ;;  %7211 = vmatmul.msk.bf16.gmra.mxu1 %vm307_vm3, %v2344_v40  ;;  %v1685_v40 = vld [vmem:[#allocation2 + $0xcf] sm:$0xff] }
 0x2e9   : > { %v1839_v56 = vpop.f32.mrf.mxu3  ;;  %7256 = vmatmul.msk.bf16.gmra.mxu2 %vm307_vm3, %v2656_v37 }
 0x2ea   : > { %v9072_v31 = vadd.f32 %v1839_v56, %v8618_v36 }
 0x2ec   : > { %v9080_v5 = vpop.f32.mrf.mxu2 }
 0x2ed   : > { %11626 = vst [vmem:[#allocation136_spill] sm:$0xff] %v9080_v5  ;;  %v9082_v36 = vpop.f32.mrf.mxu1 }
 0x2ee   : > { %7113 = vmatmul.msk.bf16.gmra.mxu3 %vm307_vm3, %v1712_v6  ;;  %11627 = vst [vmem:[#allocation137_spill] sm:$0xff] %v9082_v36  ;;  %v2657_v36 = vpack.c.bf16 %v2636_v29, %v2636_v29  ;;  %v3240_v29 = vld [vmem:[#allocation2 + $0xca] sm:$0xff] }
 0x2f1   : > { %v1842_v32 = vpop.f32.mrf.mxu3 }
 0x2f2   : > { %v9085_v56 = vadd.f32 %v1842_v32, %v8625_v63  ;;  %v1684_v63 = vld [vmem:[#allocation2 + $0xc7] sm:$0xff] }
 0x2f3   : > { %v1713_v32 = vpack.c.bf16 %v1685_v40, %v1684_v63  ;;  %v9109_v63 = vpop.f32.mrf.mxu0 }
 0x2f4   : > { %v9087_v57 = vpop.f32.mrf.mxu2 }
 0x2f5   : > { %11628 = vst [vmem:[#allocation138_spill] sm:$0xff] %v9087_v57  ;;  %v9090_v6 = vpop.f32.mrf.mxu1 }
 0x2f6   : > { %11629 = vst [vmem:[#allocation139_spill] sm:$0xff] %v9090_v6 }
 0x2f8   : > { %7336 = vmatmul.msk.bf16.gmra.mxu0 %vm307_vm3, %v3270_v54  ;;  %7212 = vmatmul.msk.bf16.gmra.mxu1 %vm307_vm3, %v2345_v0  ;;  %v3533_v0 = vld [vmem:[#allocation2 + $0x33] sm:$0xff] }
 0x2f9   : > { %v1844_v14 = vpop.f32.mrf.mxu3  ;;  %7257 = vmatmul.msk.bf16.gmra.mxu2 %vm307_vm3, %v2657_v36 }
 0x2fa   : > { %v9093_v37 = vadd.f32 %v1844_v14, %v8633_v59  ;;  %v3271_v14 = vpack.c.bf16 %v3241_v39, %v3240_v29 }
 0x2fc   : > { %v9100_v43 = vpop.f32.mrf.mxu2 }
 0x2fd   : > { %11630 = vst [vmem:[#allocation140_spill] sm:$0xff] %v9100_v43  ;;  %v9102_v57 = vpop.f32.mrf.mxu1  ;;  %v3532_v43 = vld [vmem:[#allocation2 + $0x2b] sm:$0xff] }
 0x2fe   : > { %7114 = vmatmul.msk.bf16.gmra.mxu3 %vm307_vm3, %v1713_v32  ;;  %11631 = vst [vmem:[#allocation141_spill] sm:$0xff] %v9102_v57  ;;  %v1687_v32 = vld [vmem:[#allocation2 + $0xdf] sm:$0xff] }
 0x301   : > { %v1847_v54 = vpop.f32.mrf.mxu3 }
 0x302   : > { %v9105_v59 = vadd.f32 %v1847_v54, %v8642_v20  ;;  %v3573_v20 = vpack.c.bf16 %v3533_v0, %v3532_v43  ;;  %v1686_v54 = vld [vmem:[#allocation2 + $0xd7] sm:$0xff]  ;;  %v3535_v0 = vld [vmem:[#allocation2 + $0x43] sm:$0xff] }
 0x303   : > { %v1714_v5 = vpack.c.bf16 %v1687_v32, %v1686_v54  ;;  %v3534_v54 = vld [vmem:[#allocation2 + $0x3b] sm:$0xff] }
 0x304   : > { %v9107_v40 = vpop.f32.mrf.mxu2 }
 0x305   : > { %11632 = vst [vmem:[#allocation142_spill] sm:$0xff] %v9107_v40  ;;  %v9112_v6 = vpop.f32.mrf.mxu1 }
 0x306   : > { %11633 = vst [vmem:[#allocation143_spill] sm:$0xff] %v9112_v6  ;;  %v9126_v6 = vpop.f32.mrf.mxu0 }
 0x308   : > { %7337 = vmatmul.msk.bf16.gmra.mxu0 %vm307_vm3, %v3271_v14  ;;  %7372 = vmatmul.msk.bf16.vlgmr.msra.gmra.mxu1 %vm307_vm3, %v3573_v20 }
 0x309   : > { %v1849_v36 = vpop.f32.mrf.mxu3 }
 0x30a   : > { %v9115_v57 = vadd.f32 %v1849_v36, %v8650_v12  ;;  %v3242_v12 = vld [vmem:[#allocation2 + $0xda] sm:$0xff] }
 0x30b   : > { %v3272_v36 = vpack.c.bf16 %v3243_v25, %v3242_v12 }
 0x30c   : > { %v9119_v39 = vpop.f32.mrf.mxu2 }
 0x30d   : > { %11634 = vst [vmem:[#allocation144_spill] sm:$0xff] %v9119_v39  ;;  %v9121_v40 = vpop.f32.mrf.mxu1 }
 0x30e   : > { %7115 = vmatmul.msk.bf16.gmra.mxu3 %vm307_vm3, %v1714_v5  ;;  %11635 = vst [vmem:[#allocation145_spill] sm:$0xff] %v9121_v40  ;;  %v1689_v5 = vld [vmem:[#allocation2 + $0xef] sm:$0xff]  ;;  %v9136_v60 = vpop.f32.mrf.mxu0 }
 0x311   : > { %v1852_v29 = vpop.f32.mrf.mxu3 }
 0x312   : > { %v9124_v14 = vadd.f32 %v1852_v29, %v8662_v34  ;;  %v3574_v34 = vpack.c.bf16 %v3535_v0, %v3534_v54  ;;  %v1688_v29 = vld [vmem:[#allocation2 + $0xe7] sm:$0xff]  ;;  %v3245_v0 = vld [vmem:[#allocation2 + $0xf2] sm:$0xff] }
 0x313   : > { %v1715_v39 = vpack.c.bf16 %v1689_v5, %v1688_v29 }
 0x314   : > { %v9128_v43 = vpop.f32.mrf.mxu2 }
 0x315   : > { %11636 = vst [vmem:[#allocation146_spill] sm:$0xff] %v9128_v43  ;;  %v9131_v20 = vpop.f32.mrf.mxu1 }
 0x316   : > { %11637 = vst [vmem:[#allocation147_spill] sm:$0xff] %v9131_v20  ;;  %v9150_v5 = vpop.f32.mrf.mxu0 }
 0x318   : > { %7338 = vmatmul.msk.bf16.gmra.mxu0 %vm307_vm3, %v3272_v36  ;;  %7373 = vmatmul.msk.bf16.gmra.mxu1 %vm307_vm3, %v3574_v34 }
 0x319   : > { %v1854_v32 = vpop.f32.mrf.mxu3 }
 0x31a   : > { %v9134_v40 = vadd.f32 %v1854_v32, %v8680_v53  ;;  %v7856_v53 = vld [vmem:[%s11441_s6 + $0x30] sm:$0xff] }
 0x31b   : > { %4245 = vmatpush.bf16.msra.mxu2 %v7856_v53  ;;  %v3244_v32 = vld [vmem:[#allocation2 + $0xea] sm:$0xff]  ;;  %v1690_v53 = vld [vmem:[#allocation2 + $0xf7] sm:$0xff] }
 0x31c   : > { %11638 = vst [vmem:[#allocation148_spill] sm:$0xff] %v9134_v40  ;;  %v9140_v25 = vpop.f32.mrf.mxu2  ;;  %v3273_v54 = vpack.c.bf16 %v3245_v0, %v3244_v32  ;;  %v3247_v40 = vld [vmem:[#allocation2 + $0x102] sm:$0xff] }
 0x31d   : > { %11639 = vst [vmem:[#allocation149_spill] sm:$0xff] %v9140_v25  ;;  %v9142_v36 = vpop.f32.mrf.mxu1 }
 0x31e   : > { %7116 = vmatmul.msk.bf16.gmra.mxu3 %vm307_vm3, %v1715_v39  ;;  %11640 = vst [vmem:[#allocation150_spill] sm:$0xff] %v9142_v36  ;;  %v3537_v39 = vld [vmem:[#allocation2 + $0x53] sm:$0xff]  ;;  %v1691_v36 = vld [vmem:[#allocation2 + $0xff] sm:$0xff]  ;;  %v9164_v32 = vpop.f32.mrf.mxu0 }
 0x321   : > { %v1857_v12 = vpop.f32.mrf.mxu3 }
 0x322   : > { %v9145_v20 = vadd.f32 %v1857_v12, %v8687_v2  ;;  %v3536_v2 = vld [vmem:[#allocation2 + $0x4b] sm:$0xff] }
 0x323   : > { %v3575_v43 = vpack.c.bf16 %v3537_v39, %v3536_v2  ;;  %v1693_v2 = vld [vmem:[#allocation2 + $0x10f] sm:$0xff] }
 0x324   : > { %11641 = vst [vmem:[#allocation151_spill] sm:$0xff] %v9145_v20  ;;  %v9152_v34 = vpop.f32.mrf.mxu2  ;;  %v1716_v20 = vpack.c.bf16 %v1691_v36, %v1690_v53  ;;  %v3539_v36 = vld [vmem:[#allocation2 + $0x63] sm:$0xff] }
 0x325   : > { %11642 = vst [vmem:[#allocation152_spill] sm:$0xff] %v9152_v34  ;;  %v9155_v25 = vpop.f32.mrf.mxu1 }
 0x326   : > { %11643 = vst [vmem:[#allocation153_spill] sm:$0xff] %v9155_v25 }
 0x328   : > { %7339 = vmatmul.msk.bf16.gmra.mxu0 %vm307_vm3, %v3273_v54  ;;  %7374 = vmatmul.msk.bf16.gmra.mxu1 %vm307_vm3, %v3575_v43  ;;  %v7838_v43 = vld [vmem:[%s11439_s4 + $0xc0] sm:$0xff] }
 0x329   : > { %v1859_v29 = vpop.f32.mrf.mxu3  ;;  %3073 = vmatpush.bf16.msra.mxu3 %v7838_v43 }
 0x32a   : > { %v9158_v12 = vadd.f32 %v1859_v29, %v8692_v13  ;;  %v3246_v13 = vld [vmem:[#allocation2 + $0xfa] sm:$0xff] }
 0x32b   : > { %v3274_v29 = vpack.c.bf16 %v3247_v40, %v3246_v13  ;;  %v1692_v13 = vld [vmem:[#allocation2 + $0x107] sm:$0xff] }
 0x32c   : > { %11644 = vst [vmem:[#allocation154_spill] sm:$0xff] %v9158_v12  ;;  %v9162_v0 = vpop.f32.mrf.mxu2  ;;  %v3253_v12 = vld [vmem:[#allocation2 + $0x132] sm:$0xff] }
 0x32d   : > { %11645 = vst [vmem:[#allocation155_spill] sm:$0xff] %v9162_v0  ;;  %v9166_v34 = vpop.f32.mrf.mxu1 }
 0x32e   : > { %7117 = vmatmul.msk.bf16.gmra.mxu3 %vm307_vm3, %v1716_v20  ;;  %11646 = vst [vmem:[#allocation156_spill] sm:$0xff] %v9166_v34  ;;  %v3538_v34 = vld [vmem:[#allocation2 + $0x5b] sm:$0xff] }
 0x32f   : > { %v3576_v40 = vpack.c.bf16 %v3539_v36, %v3538_v34  ;;  %v3541_v36 = vld [vmem:[#allocation2 + $0x73] sm:$0xff] }
 0x331   : > { %v1862_v54 = vpop.f32.mrf.mxu3 }
 0x332   : > { %v9169_v25 = vadd.f32 %v1862_v54, %v8699_v15  ;;  %v9182_v54 = vpop.f32.mrf.mxu0 }
 0x334   : > { %11647 = vst [vmem:[#allocation157_spill] sm:$0xff] %v9169_v25  ;;  %v9171_v39 = vpop.f32.mrf.mxu2 }
 0x335   : > { %11648 = vst [vmem:[#allocation158_spill] sm:$0xff] %v9171_v39  ;;  %v9177_v53 = vpop.f32.mrf.mxu1  ;;  %v1717_v39 = vpack.c.bf16 %v1693_v2, %v1692_v13  ;;  %v3540_v13 = vld [vmem:[#allocation2 + $0x6b] sm:$0xff] }
 0x336   : > { %11649 = vst [vmem:[#allocation159_spill] sm:$0xff] %v9177_v53 }
 0x338   : > { %7340 = vmatmul.msk.bf16.gmra.mxu0 %vm307_vm3, %v3274_v29  ;;  %7375 = vmatmul.msk.bf16.gmra.mxu1 %vm307_vm3, %v3576_v40 }
 0x339   : > { %v1864_v20 = vpop.f32.mrf.mxu3 }
 0x33a   : > { %v9180_v15 = vadd.f32 %v1864_v20, %v8704_v50  ;;  %v3248_v50 = vld [vmem:[#allocation2 + $0x10a] sm:$0xff]  ;;  %v3249_v20 = vld [vmem:[#allocation2 + $0x112] sm:$0xff]  ;;  %v9193_v43 = vpop.f32.mrf.mxu0 }
 0x33c   : > { %11650 = vst [vmem:[#allocation160_spill] sm:$0xff] %v9180_v15  ;;  %v9186_v0 = vpop.f32.mrf.mxu2  ;;  %v3275_v15 = vpack.c.bf16 %v3249_v20, %v3248_v50 }
 0x33d   : > { %11651 = vst [vmem:[#allocation161_spill] sm:$0xff] %v9186_v0  ;;  %v9188_v25 = vpop.f32.mrf.mxu1 }
 0x33e   : > { %7118 = vmatmul.msk.bf16.gmra.mxu3 %vm307_vm3, %v1717_v39  ;;  %11652 = vst [vmem:[#allocation162_spill] sm:$0xff] %v9188_v25  ;;  %v1694_v39 = vld [vmem:[#allocation2 + $0x117] sm:$0xff] }
 0x341   : > { %v1867_v29 = vpop.f32.mrf.mxu3 }
 0x342   : > { %v9191_v53 = vadd.f32 %v1867_v29, %v8711_v30  ;;  %v3577_v30 = vpack.c.bf16 %v3541_v36, %v3540_v13  ;;  %v1695_v29 = vld [vmem:[#allocation2 + $0x11f] sm:$0xff]  ;;  %v9205_v50 = vpop.f32.mrf.mxu0 }
 0x343   : > { %v1718_v0 = vpack.c.bf16 %v1695_v29, %v1694_v39  ;;  %v3543_v39 = vld [vmem:[#allocation2 + $0x83] sm:$0xff]  ;;  %v1697_v29 = vld [vmem:[#allocation2 + $0x12f] sm:$0xff] }
 0x344   : > { %11653 = vst [vmem:[#allocation163_spill] sm:$0xff] %v9191_v53  ;;  %v9195_v34 = vpop.f32.mrf.mxu2  ;;  %v3250_v53 = vld [vmem:[#allocation2 + $0x11a] sm:$0xff] }
 0x345   : > { %11654 = vst [vmem:[#allocation164_spill] sm:$0xff] %v9195_v34  ;;  %v9198_v40 = vpop.f32.mrf.mxu1 }
 0x346   : > { %11655 = vst [vmem:[#allocation165_spill] sm:$0xff] %v9198_v40 }
 0x348   : > { %7341 = vmatmul.msk.bf16.gmra.mxu0 %vm307_vm3, %v3275_v15  ;;  %7376 = vmatmul.msk.bf16.gmra.mxu1 %vm307_vm3, %v3577_v30  ;;  %v1696_v30 = vld [vmem:[#allocation2 + $0x127] sm:$0xff] }
 0x349   : > { %v1869_v2 = vpop.f32.mrf.mxu3 }
 0x34a   : > { %v9201_v25 = vadd.f32 %v1869_v2, %v8716_v58  ;;  %v3251_v58 = vld [vmem:[#allocation2 + $0x122] sm:$0xff]  ;;  %v9216_v13 = vpop.f32.mrf.mxu0 }
 0x34b   : > { %v3276_v2 = vpack.c.bf16 %v3251_v58, %v3250_v53 }
 0x34c   : > { %11656 = vst [vmem:[#allocation166_spill] sm:$0xff] %v9201_v25  ;;  %v9207_v20 = vpop.f32.mrf.mxu2  ;;  %v3542_v25 = vld [vmem:[#allocation2 + $0x7b] sm:$0xff] }
 0x34d   : > { %11657 = vst [vmem:[#allocation167_spill] sm:$0xff] %v9207_v20  ;;  %v9209_v34 = vpop.f32.mrf.mxu1 }
 0x34e   : > { %7119 = vmatmul.msk.bf16.gmra.mxu3 %vm307_vm3, %v1718_v0  ;;  %11658 = vst [vmem:[#allocation168_spill] sm:$0xff] %v9209_v34 }
 0x351   : > { %v1872_v15 = vpop.f32.mrf.mxu3 }
 0x352   : > { %v9212_v40 = vadd.f32 %v1872_v15, %v8723_v46  ;;  %v3578_v46 = vpack.c.bf16 %v3543_v39, %v3542_v25  ;;  %v1719_v15 = vpack.c.bf16 %v1697_v29, %v1696_v30  ;;  %v3545_v25 = vld [vmem:[#allocation2 + $0x93] sm:$0xff]  ;;  %v1699_v29 = vld [vmem:[#allocation2 + $0x13f] sm:$0xff] }
 0x353   : > { %v1698_v30 = vld [vmem:[#allocation2 + $0x137] sm:$0xff] }
 0x354   : > { %11659 = vst [vmem:[#allocation169_spill] sm:$0xff] %v9212_v40  ;;  %v9214_v36 = vpop.f32.mrf.mxu2  ;;  %v9233_v40 = vpop.f32.mrf.mxu0 }
 0x355   : > { %11660 = vst [vmem:[#allocation170_spill] sm:$0xff] %v9214_v36  ;;  %v9219_v20 = vpop.f32.mrf.mxu1 }
 0x356   : > { %11661 = vst [vmem:[#allocation171_spill] sm:$0xff] %v9219_v20  ;;  %v3252_v20 = vld [vmem:[#allocation2 + $0x12a] sm:$0xff] }
 0x358   : > { %7342 = vmatmul.msk.bf16.gmra.mxu0 %vm307_vm3, %v3276_v2  ;;  %7377 = vmatmul.msk.bf16.gmra.mxu1 %vm307_vm3, %v3578_v46 }
 0x359   : > { %v1874_v0 = vpop.f32.mrf.mxu3 }
 0x35a   : > { %v9222_v34 = vadd.f32 %v1874_v0, %v8728_v24  ;;  %v3277_v24 = vpack.c.bf16 %v3253_v12, %v3252_v20 }
 0x35c   : > { %11662 = vst [vmem:[#allocation172_spill] sm:$0xff] %v9222_v34  ;;  %v9226_v53 = vpop.f32.mrf.mxu2 }
 0x35d   : > { %11663 = vst [vmem:[#allocation173_spill] sm:$0xff] %v9226_v53  ;;  %v9228_v36 = vpop.f32.mrf.mxu1  ;;  %v9243_v53 = vpop.f32.mrf.mxu0 }
 0x35e   : > { %7120 = vmatmul.msk.bf16.gmra.mxu3 %vm307_vm3, %v1719_v15  ;;  %11664 = vst [vmem:[#allocation174_spill] sm:$0xff] %v9228_v36  ;;  %v3544_v15 = vld [vmem:[#allocation2 + $0x8b] sm:$0xff] }
 0x361   : > { %v1877_v58 = vpop.f32.mrf.mxu3 }
 0x362   : > { %v9231_v2 = vadd.f32 %v1877_v58, %v8735_v11  ;;  %v3579_v11 = vpack.c.bf16 %v3545_v25, %v3544_v15  ;;  %v1720_v58 = vpack.c.bf16 %v1699_v29, %v1698_v30  ;;  %v3254_v25 = vld [vmem:[#allocation2 + $0x13a] sm:$0xff] }
 0x364   : > { %11665 = vst [vmem:[#allocation175_spill] sm:$0xff] %v9231_v2  ;;  %v9235_v0 = vpop.f32.mrf.mxu2 }
 0x365   : > { %11666 = vst [vmem:[#allocation176_spill] sm:$0xff] %v9235_v0  ;;  %v9238_v46 = vpop.f32.mrf.mxu1  ;;  %v9257_v30 = vpop.f32.mrf.mxu0 }
 0x366   : > { %11667 = vst [vmem:[#allocation177_spill] sm:$0xff] %v9238_v46 }
 0x368   : > { %7343 = vmatmul.msk.bf16.gmra.mxu0 %vm307_vm3, %v3277_v24  ;;  %7378 = vmatmul.msk.bf16.gmra.mxu1 %vm307_vm3, %v3579_v11  ;;  %v3547_v11 = vld [vmem:[#allocation2 + $0xa3] sm:$0xff] }
 0x369   : > { %v1879_v39 = vpop.f32.mrf.mxu3 }
 0x36a   : > { %v9241_v36 = vadd.f32 %v1879_v39, %v8740_v16  ;;  %v7855_v16 = vld [vmem:[%s11441_s6 + $0x28] sm:$0xff] }
 0x36b   : > { %v3255_v39 = vld [vmem:[#allocation2 + $0x142] sm:$0xff]  ;;  %4246 = vmatpush.bf16.msra.mxu2 %v7855_v16 }
 0x36c   : > { %11668 = vst [vmem:[#allocation178_spill] sm:$0xff] %v9241_v36  ;;  %v9247_v12 = vpop.f32.mrf.mxu2  ;;  %v3278_v29 = vpack.c.bf16 %v3255_v39, %v3254_v25  ;;  %v3257_v36 = vld [vmem:[#allocation2 + $0x152] sm:$0xff] }
 0x36d   : > { %11669 = vst [vmem:[#allocation179_spill] sm:$0xff] %v9247_v12  ;;  %v9249_v24 = vpop.f32.mrf.mxu1  ;;  %v9271_v25 = vpop.f32.mrf.mxu0 }
 0x36e   : > { %7121 = vmatmul.msk.bf16.gmra.mxu3 %vm307_vm3, %v1720_v58  ;;  %11670 = vst [vmem:[#allocation180_spill] sm:$0xff] %v9249_v24  ;;  %v1700_v24 = vld [vmem:[#allocation2 + $0x147] sm:$0xf] }
 0x371   : > { %v1882_v20 = vpop.f32.mrf.mxu3 }
 0x372   : > { %v9252_v0 = vadd.f32 %v1882_v20, %v8750_v26  ;;  %v3546_v26 = vld [vmem:[#allocation2 + $0x9b] sm:$0xff] }
 0x373   : > { %v3580_v46 = vpack.c.bf16 %v3547_v11, %v3546_v26 }
 0x374   : > { %11671 = vst [vmem:[#allocation181_spill] sm:$0xff] %v9252_v0  ;;  %v9259_v15 = vpop.f32.mrf.mxu2  ;;  %v1721_v0 = vpack.c.bf16 %v1700_v24, %v1700_v24 }
 0x375   : > { %11672 = vst [vmem:[#allocation182_spill] sm:$0xff] %v9259_v15  ;;  %v9262_v12 = vpop.f32.mrf.mxu1 }
 0x376   : > { %11673 = vst [vmem:[#allocation183_spill] sm:$0xff] %v9262_v12  ;;  %v3256_v12 = vld [vmem:[#allocation2 + $0x14a] sm:$0xff] }
 0x377   : > { %v3279_v2 = vpack.c.bf16 %v3257_v36, %v3256_v12 }
 0x378   : > { %7344 = vmatmul.msk.bf16.gmra.mxu0 %vm307_vm3, %v3278_v29  ;;  %7379 = vmatmul.msk.bf16.gmra.mxu1 %vm307_vm3, %v3580_v46  ;;  %v2909_v46 = vld [vmem:[#allocation2 + $0x31] sm:$0xff] }
 0x379   : > { %v1884_v58 = vpop.f32.mrf.mxu3 }
 0x37a   : > { %v9265_v20 = vadd.f32 %v1884_v58, %v8755_v62  ;;  %v3549_v58 = vld [vmem:[#allocation2 + $0xb3] sm:$0xff] }
 0x37c   : > { %11674 = vst [vmem:[#allocation184_spill] sm:$0xff] %v9265_v20  ;;  %v9269_v16 = vpop.f32.mrf.mxu2 }
 0x37d   : > { %11675 = vst [vmem:[#allocation185_spill] sm:$0xff] %v9269_v16  ;;  %v2553_v29 = vpop.f32.mrf.mxu1  ;;  %v9282_v16 = vpop.f32.mrf.mxu0 }
 0x37e   : > { %7122 = vmatmul.msk.bf16.gmra.mxu3 %vm307_vm3, %v1721_v0  ;;  %v3548_v0 = vld [vmem:[#allocation2 + $0xab] sm:$0xff] }
 0x37f   : > { %v3581_v29 = vpack.c.bf16 %v3549_v58, %v3548_v0 }
 0x381   : > { %v1887_v39 = vpop.f32.mrf.mxu3 }
 0x382   : > { %v9274_v15 = vadd.f32 %v1887_v39, %v8762_v3  ;;  %v2908_v3 = vld [vmem:[#allocation2 + $0x29] sm:$0xff] }
 0x383   : > { %v2949_v39 = vpack.c.bf16 %v2909_v46, %v2908_v3  ;;  %v2911_v46 = vld [vmem:[#allocation2 + $0x41] sm:$0xff] }
 0x384   : > { %11676 = vst [vmem:[#allocation186_spill] sm:$0xff] %v9274_v15  ;;  %v2865_v62 = vpop.f32.mrf.mxu2  ;;  %v3259_v15 = vld [vmem:[#allocation2 + $0x162] sm:$0xff] }
 0x385   : > { %v9277_v11 = vpop.f32.mrf.mxu1  ;;  %v3258_v62 = vld [vmem:[#allocation2 + $0x15a] sm:$0xff]  ;;  %v9291_v20 = vpop.f32.mrf.mxu0 }
 0x386   : > { %11679 = vst [vmem:[#allocation189_spill] sm:$0xff] %v9291_v20  ;;  %v2915_v20 = vld [vmem:[#allocation2 + $0x61] sm:$0xff] }
 0x388   : > { %7345 = vmatmul.msk.bf16.gmra.mxu0 %vm307_vm3, %v3279_v2  ;;  %7380 = vmatmul.msk.bf16.gmra.mxu1 %vm307_vm3, %v3581_v29  ;;  %v3550_v29 = vld [vmem:[#allocation2 + $0xbb] sm:$0xff] }
 0x389   : > { %v1889_v24 = vpop.f32.mrf.mxu3 }
 0x38a   : > { %v9280_v26 = vadd.f32 %v1889_v24, %v8770_v27  ;;  %v3280_v27 = vpack.c.bf16 %v3259_v15, %v3258_v62  ;;  %v3551_v24 = vld [vmem:[#allocation2 + $0xc3] sm:$0xff] }
 0x38c   : > { %11677 = vst [vmem:[#allocation187_spill] sm:$0xff] %v9280_v26  ;;  %v2910_v26 = vld [vmem:[#allocation2 + $0x39] sm:$0xff] }
 0x38d   : > { %v9286_v12 = vpop.f32.mrf.mxu1 }
 0x38e   : > { %7282 = vmatmul.msk.bf16.vlgmr.msra.gmra.mxu3 %vm307_vm3, %v2949_v39  ;;  %v3582_v39 = vpack.c.bf16 %v3551_v24, %v3550_v29 }
 0x391   : > { %v1892_v36 = vpop.f32.mrf.mxu3 }
 0x392   : > { %v9289_v2 = vadd.f32 %v1892_v36, %v8777_v22  ;;  %v2950_v22 = vpack.c.bf16 %v2911_v46, %v2910_v26  ;;  %v9301_v36 = vpop.f32.mrf.mxu0  ;;  %v3552_v26 = vld [vmem:[#allocation2 + $0xcb] sm:$0xff] }
 0x393   : > { %11681 = vst [vmem:[#allocation191_spill] sm:$0xff] %v9301_v36 }
 0x394   : > { %11678 = vst [vmem:[#allocation188_spill] sm:$0xff] %v9289_v2  ;;  %v3553_v2 = vld [vmem:[#allocation2 + $0xd3] sm:$0xff] }
 0x395   : > { %v9294_v0 = vpop.f32.mrf.mxu1  ;;  %v3583_v29 = vpack.c.bf16 %v3553_v2, %v3552_v26  ;;  %v3554_v2 = vld [vmem:[#allocation2 + $0xdb] sm:$0xff] }
 0x396   : > { %v2914_v26 = vld [vmem:[#allocation2 + $0x59] sm:$0xff] }
 0x398   : > { %7346 = vmatmul.msk.bf16.gmra.mxu0 %vm307_vm3, %v3280_v27  ;;  %7381 = vmatmul.msk.bf16.gmra.mxu1 %vm307_vm3, %v3582_v39  ;;  %v2912_v39 = vld [vmem:[#allocation2 + $0x49] sm:$0xff] }
 0x399   : > { %v1894_v58 = vpop.f32.mrf.mxu3 }
 0x39a   : > { %v9297_v3 = vadd.f32 %v1894_v58, %v8785_v48  ;;  %v9308_v34 = vpop.f32.mrf.mxu0  ;;  %v2913_v58 = vld [vmem:[#allocation2 + $0x51] sm:$0xff] }
 0x39b   : > { %11683 = vst [vmem:[#allocation193_spill] sm:$0xff] %v9308_v34  ;;  %v3555_v34 = vld [vmem:[#allocation2 + $0xe3] sm:$0xff] }
 0x39c   : > { %11680 = vst [vmem:[#allocation190_spill] sm:$0xff] %v9297_v3 }
 0x39d   : > { %v9303_v62 = vpop.f32.mrf.mxu1 }
 0x39e   : > { %7283 = vmatmul.msk.bf16.gmra.mxu3 %vm307_vm3, %v2950_v22  ;;  %v2951_v22 = vpack.c.bf16 %v2913_v58, %v2912_v39  ;;  %v3584_v58 = vpack.c.bf16 %v3555_v34, %v3554_v2  ;;  %v3557_v34 = vld [vmem:[#allocation2 + $0xf3] sm:$0xff] }
 0x3a1   : > { %v1897_v15 = vpop.f32.mrf.mxu3 }
 0x3a2   : > { %v9306_v27 = vadd.f32 %v1897_v15, %v8792_v49  ;;  %v9322_v3 = vpop.f32.mrf.mxu0 }
 0x3a4   : > { %11682 = vst [vmem:[#allocation192_spill] sm:$0xff] %v9306_v27 }
 0x3a5   : > { %v9310_v24 = vpop.f32.mrf.mxu1 }
 0x3a8   : > { %7382 = vmatmul.msk.bf16.gmra.mxu1 %vm307_vm3, %v3583_v29  ;;  %v2952_v29 = vpack.c.bf16 %v2915_v20, %v2914_v26 }
 0x3a9   : > { %v1899_v48 = vpop.f32.mrf.mxu3 }
 0x3aa   : > { %v9313_v46 = vadd.f32 %v1899_v48, %v8802_v4  ;;  %v9329_v39 = vpop.f32.mrf.mxu0 }
 0x3ac   : > { %11684 = vst [vmem:[#allocation194_spill] sm:$0xff] %v9313_v46 }
 0x3ad   : > { %v9317_v15 = vpop.f32.mrf.mxu1 }
 0x3ae   : > { %7284 = vmatmul.msk.bf16.gmra.mxu3 %vm307_vm3, %v2951_v22 }
 0x3b1   : > { %v1902_v49 = vpop.f32.mrf.mxu3 }
 0x3b2   : > { %v9320_v27 = vadd.f32 %v1902_v49, %v8811_v19  ;;  %v1637_v19 = vadd.f32 %v8907_v9, %v8794_v42  ;;  %v9339_v46 = vpop.f32.mrf.mxu0  ;;  %v7854_v42 = vld [vmem:[%s11441_s6 + $0x20] sm:$0xff] }
 0x3b3   : > { %4247 = vmatpush.bf16.msra.mxu2 %v7854_v42 }
 0x3b4   : > { %11685 = vst [vmem:[#allocation195_spill] sm:$0xff] %v9320_v27 }
 0x3b5   : > { %v9324_v4 = vpop.f32.mrf.mxu1 }
 0x3b8   : > { %7383 = vmatmul.msk.bf16.gmra.mxu1 %vm307_vm3, %v3584_v58  ;;  %v3556_v58 = vld [vmem:[#allocation2 + $0xeb] sm:$0xff] }
 0x3b9   : > { %v1904_v36 = vpop.f32.mrf.mxu3  ;;  %v3585_v9 = vpack.c.bf16 %v3557_v34, %v3556_v58  ;;  %v1644_v34 = vadd.f32 %v8936_v18, %v8820_v38  ;;  %v3559_v58 = vld [vmem:[#allocation2 + $0x103] sm:$0xff]  ;;  %v1647_v38 = vadd.f32 %v8950_v21, %v8834_v8 }
 0x3ba   : > { %v9327_v48 = vadd.f32 %v1904_v36, %v8818_v1  ;;  %v1639_v1 = vadd.f32 %v8916_v61, %v8804_v52  ;;  %v2917_v36 = vld [vmem:[#allocation2 + $0x71] sm:$0xff]  ;;  %v1642_v52 = vadd.f32 %v8927_v47, %v8813_v28  ;;  %v9354_v61 = vpop.f32.mrf.mxu0  ;;  %v2918_v47 = vld [vmem:[#allocation2 + $0x79] sm:$0xff]  ;;  %v2920_v8 = vld [vmem:[#allocation2 + $0x89] sm:$0xff] }
 0x3bc   : > { %11686 = vst [vmem:[#allocation196_spill] sm:$0xff] %v9327_v48 }
 0x3bd   : > { %v9335_v49 = vpop.f32.mrf.mxu1 }
 0x3be   : > { %7285 = vmatmul.msk.bf16.gmra.mxu3 %vm307_vm3, %v2952_v29  ;;  %v2916_v29 = vld [vmem:[#allocation2 + $0x69] sm:$0xff] }
 0x3c1   : > { %v1907_v22 = vpop.f32.mrf.mxu3 }
 0x3c2   : > { %v9337_v27 = vadd.f32 %v1907_v22, %v1637_v19  ;;  %v2953_v19 = vpack.c.bf16 %v2917_v36, %v2916_v29  ;;  %v2919_v36 = vld [vmem:[#allocation2 + $0x81] sm:$0xff] }
 0x3c4   : > { %11687 = vst [vmem:[#allocation197_spill] sm:$0xff] %v9337_v27  ;;  %v2954_v27 = vpack.c.bf16 %v2919_v36, %v2918_v47 }
 0x3c5   : > { %v9343_v2 = vpop.f32.mrf.mxu1 }
 0x3c8   : > { %7384 = vmatmul.msk.bf16.gmra.mxu1 %vm307_vm3, %v3585_v9  ;;  %v3558_v9 = vld [vmem:[#allocation2 + $0xfb] sm:$0xff] }
 0x3c9   : > { %v1909_v20 = vpop.f32.mrf.mxu3  ;;  %v3586_v28 = vpack.c.bf16 %v3559_v58, %v3558_v9  ;;  %v3560_v58 = vld [vmem:[#allocation2 + $0x10b] sm:$0xff] }
 0x3ca   : > { %v9345_v26 = vadd.f32 %v1909_v20, %v1639_v1  ;;  %v2921_v9 = vld [vmem:[#allocation2 + $0x91] sm:$0xff] }
 0x3cb   : > { %v2955_v21 = vpack.c.bf16 %v2921_v9, %v2920_v8 }
 0x3cc   : > { %11688 = vst [vmem:[#allocation198_spill] sm:$0xff] %v9345_v26  ;;  %v9366_v26 = vpop.f32.mrf.mxu0 }
 0x3cd   : > { %v9356_v1 = vpop.f32.mrf.mxu1  ;;  %11691 = vst [vmem:[#allocation201_spill] sm:$0xff] %v9366_v26  ;;  %v7869_v26 = vld [vmem:[%s11441_s6 + $0x98] sm:$0xff] }
 0x3ce   : > { %7286 = vmatmul.msk.bf16.gmra.mxu3 %vm307_vm3, %v2953_v19  ;;  %5339 = vmatpush.bf16.msrb.mxu2 %v7869_v26  ;;  %v7865_v26 = vld [vmem:[%s11441_s6 + $0x78] sm:$0xff] }
 0x3cf   : > { %5027 = vmatpush.bf16.msrb.mxu1 %v7865_v26  ;;  %v2928_v26 = vld [vmem:[#allocation2 + $0xc9] sm:$0xff] }
 0x3d1   : > { %v1912_v22 = vpop.f32.mrf.mxu3 }
 0x3d2   : > { %v9358_v20 = vadd.f32 %v1912_v22, %v1642_v52 }
 0x3d4   : > { %11689 = vst [vmem:[#allocation199_spill] sm:$0xff] %v9358_v20  ;;  %v9376_v20 = vpop.f32.mrf.mxu0 }
 0x3d5   : > { %v9362_v29 = vpop.f32.mrf.mxu1  ;;  %11693 = vst [vmem:[#allocation203_spill] sm:$0xff] %v9376_v20 }
 0x3d8   : > { %7385 = vmatmul.msk.bf16.gmra.mxu1 %vm307_vm3, %v3586_v28 }
 0x3d9   : > { %v1914_v42 = vpop.f32.mrf.mxu3 }
 0x3da   : > { %v9364_v19 = vadd.f32 %v1914_v42, %v1644_v34  ;;  %v1649_v34 = vadd.f32 %v8959_v10, %v8849_v41  ;;  %v3561_v42 = vld [vmem:[#allocation2 + $0x113] sm:$0xff]  ;;  %v1652_v41 = vadd.f32 %v8973_v51, %v8860_v33 }
 0x3db   : > { %v3587_v47 = vpack.c.bf16 %v3561_v42, %v3560_v58  ;;  %v3562_v58 = vld [vmem:[#allocation2 + $0x11b] sm:$0xff]  ;;  %v3563_v42 = vld [vmem:[#allocation2 + $0x123] sm:$0xff] }
 0x3dc   : > { %11690 = vst [vmem:[#allocation200_spill] sm:$0xff] %v9364_v19  ;;  %v2922_v33 = vld [vmem:[#allocation2 + $0x99] sm:$0xff] }
 0x3dd   : > { %v9372_v52 = vpop.f32.mrf.mxu1 }
 0x3de   : > { %7287 = vmatmul.msk.bf16.gmra.mxu3 %vm307_vm3, %v2954_v27 }
 0x3e1   : > { %v1917_v18 = vpop.f32.mrf.mxu3 }
 0x3e2   : > { %v9374_v22 = vadd.f32 %v1917_v18, %v1647_v38  ;;  %v9386_v38 = vpop.f32.mrf.mxu0 }
 0x3e3   : > { %11695 = vst [vmem:[#allocation205_spill] sm:$0xff] %v9386_v38 }
 0x3e4   : > { %11692 = vst [vmem:[#allocation202_spill] sm:$0xff] %v9374_v22 }
 0x3e5   : > { %v9380_v28 = vpop.f32.mrf.mxu1 }
 0x3e8   : > { %7386 = vmatmul.msk.bf16.gmra.mxu1 %vm307_vm3, %v3587_v47  ;;  %v2923_v47 = vld [vmem:[#allocation2 + $0xa1] sm:$0xff] }
 0x3e9   : > { %v1919_v36 = vpop.f32.mrf.mxu3  ;;  %v2956_v51 = vpack.c.bf16 %v2923_v47, %v2922_v33  ;;  %v2925_v33 = vld [vmem:[#allocation2 + $0xb1] sm:$0xff] }
 0x3ea   : > { %v9382_v27 = vadd.f32 %v1919_v36, %v1649_v34  ;;  %v1654_v34 = vadd.f32 %v8982_v17, %v8869_v7  ;;  %v9396_v36 = vpop.f32.mrf.mxu0 }
 0x3eb   : > { %11697 = vst [vmem:[#allocation207_spill] sm:$0xff] %v9396_v36  ;;  %v11705_v36 = vld [vmem:[#allocation123_spill] sm:$0xff] }
 0x3ec   : > { %11694 = vst [vmem:[#allocation204_spill] sm:$0xff] %v9382_v27  ;;  %v3588_v27 = vpack.c.bf16 %v3563_v42, %v3562_v58  ;;  %v3564_v58 = vld [vmem:[#allocation2 + $0x12b] sm:$0xff]  ;;  %v3565_v42 = vld [vmem:[#allocation2 + $0x133] sm:$0xff] }
 0x3ed   : > { %v9390_v18 = vpop.f32.mrf.mxu1 }
 0x3ee   : > { %7288 = vmatmul.msk.bf16.gmra.mxu3 %vm307_vm3, %v2955_v21 }
 0x3f1   : > { %v1922_v10 = vpop.f32.mrf.mxu3 }
 0x3f2   : > { %v9392_v22 = vadd.f32 %v1922_v10, %v1652_v41  ;;  %v11699_v41 = vld [vmem:[#allocation113_spill] sm:$0xff]  ;;  %v9410_v19 = vpop.f32.mrf.mxu0 }
 0x3f3   : > { %v1657_v7 = vadd.f32 %v11699_v41, %v8886_v55  ;;  %11701 = vst [vmem:[#allocation209_spill] sm:$0xff] %v9410_v19  ;;  %v3589_v55 = vpack.c.bf16 %v3565_v42, %v3564_v58  ;;  %v2924_v41 = vld [vmem:[#allocation2 + $0xa9] sm:$0xff] }
 0x3f4   : > { %11696 = vst [vmem:[#allocation206_spill] sm:$0xff] %v9392_v22  ;;  %v11708_v58 = vld [vmem:[#allocation48_spill] sm:$0xff] }
 0x3f5   : > { %v9398_v8 = vpop.f32.mrf.mxu1 }
 0x3f8   : > { %7387 = vmatmul.msk.bf16.gmra.mxu1 %vm307_vm3, %v3588_v27  ;;  %v11703_v27 = vld [vmem:[#allocation40_spill] sm:$0xff] }
 0x3f9   : > { %v1924_v9 = vpop.f32.mrf.mxu3 }
 0x3fa   : > { %v9400_v21 = vadd.f32 %v1924_v9, %v1654_v34  ;;  %v11702_v34 = vld [vmem:[#allocation47_spill] sm:$0xff]  ;;  %v9420_v19 = vpop.f32.mrf.mxu0 }
 0x3fb   : > { %v2243_v9 = vadd.f32 %v11702_v34, %v9014_v23  ;;  %11707 = vst [vmem:[#allocation47_spill] sm:$0xff] %v9420_v19  ;;  %v3260_v23 = vld [vmem:[#allocation2 + $0x16a] sm:$0xf]  ;;  %v7861_v34 = vld [vmem:[%s11441_s6 + $0x58] sm:$0xff] }
 0x3fc   : > { %11698 = vst [vmem:[#allocation208_spill] sm:$0xff] %v9400_v21  ;;  %v11704_v21 = vld [vmem:[#allocation43_spill] sm:$0xff]  ;;  %4715 = vmatpush.bf16.msrb.mxu0 %v7861_v34 }
 0x3fd   : > { %v9406_v10 = vpop.f32.mrf.mxu1  ;;  %v7859_v34 = vld [vmem:[%s11441_s6 + $0x48] sm:$0xff] }
 0x3fe   : > { %7289 = vmatmul.msk.bf16.gmra.mxu3 %vm307_vm3, %v2956_v51  ;;  %v1559_v51 = vadd.f32 %v11704_v21, %v11703_v27  ;;  %v3281_v21 = vpack.c.bf16 %v3260_v23, %v3260_v23 }
 0x400   : > { %v1932_v38 = vadd.f32 %v11705_v36, %v1559_v51  ;;  %7347 = vmatmul.msk.bf16.gmra.mxu0 %vm307_vm3, %v3281_v21  ;;  %v11709_v36 = vld [vmem:[#allocation70_spill] sm:$0xff]  ;;  %v7860_v51 = vld [vmem:[%s11441_s6 + $0x50] sm:$0xff] }
 0x401   : > { %v1927_v17 = vpop.f32.mrf.mxu3  ;;  %4716 = vmatpush.bf16.msrb.mxu0 %v7860_v51  ;;  %v11714_v51 = vld [vmem:[#allocation73_spill] sm:$0xff] }
 0x402   : > { %v9408_v22 = vadd.f32 %v1927_v17, %v1657_v7  ;;  %v2957_v7 = vpack.c.bf16 %v2925_v33, %v2924_v41  ;;  %v11706_v17 = vld [vmem:[#allocation68_spill] sm:$0xff]  ;;  %v2244_v42 = vadd.f32 %v11708_v58, %v1932_v38  ;;  %v4083_v41 = vld [vmem:[#allocation3 + $0xe] sm:$0xff]  ;;  %v9439_v38 = vld [vmem:[%s11440_s5] ss:$0 sm:$0xff]  ;;  %v9447_v58 = vpop.f32.mrf.mxu0 }
 0x403   : > { %11711 = vst [vmem:[#allocation40_spill] sm:$0xff] %v9447_v58  ;;  %v11715_v58 = vld [vmem:[#allocation4_spill] sm:$0xff] }
 0x404   : > { %11700 = vst [vmem:[#allocation113_spill] sm:$0xff] %v9408_v22  ;;  %v2555_v22 = vadd.f32 %v11706_v17, %v2243_v9 }
 0x405   : > { %v9416_v48 = vpop.f32.mrf.mxu1  ;;  %4717 = vmatpush.bf16.msrb.mxu0 %v7859_v34 }
 0x408   : > { %7388 = vmatmul.msk.bf16.gmra.mxu1 %vm307_vm3, %v3589_v55  ;;  %v4082_v55 = vld [vmem:[#allocation3 + $0x6] sm:$0xff] }
 0x409   : > { %v1929_v47 = vpop.f32.mrf.mxu3  ;;  %v4123_v17 = vpack.c.bf16 %v4083_v41, %v4082_v55 }
 0x40a   : > { %v2867_v47 = vadd.f32 %v11709_v36, %v2555_v22  ;;  %v11710_v22 = vld [vmem:[#allocation71_spill] sm:$0xff]  ;;  %v11712_v36 = vld [vmem:[#allocation128_spill] sm:$0xff] }
 0x40b   : > { %v2556_v23 = vadd.f32 %v11710_v22, %v2244_v42  ;;  %7417 = vmatmul.msk.bf16.vlgmr.msra.gmra.mxu2 %vm307_vm3, %v4123_v17  ;;  %v2927_v42 = vld [vmem:[#allocation2 + $0xc1] sm:$0xff] }
 0x40d   : > { %v9430_v33 = vpop.f32.mrf.mxu1  ;;  %v2868_v41 = vadd.f32 %v11714_v51, %v2556_v23  ;;  %v11716_v51 = vld [vmem:[#allocation74_spill] sm:$0xff] }
 0x40e   : > { %7290 = vmatmul.msk.bf16.gmra.mxu3 %vm307_vm3, %v2957_v7 }
 0x411   : > { %v3075_v9 = vpop.f32.mrf.mxu3 }
 0x412   : > { %v3179_v27 = vadd.f32 %v3075_v9, %v2867_v47  ;;  %v3566_v9 = vld [vmem:[#allocation2 + $0x13b] sm:$0xff] }
 0x414   : > { %v3491_v7 = vadd.f32 %v9098_v35, %v3179_v27  ;;  %v11713_v35 = vld [vmem:[#allocation49_spill] sm:$0xff]  ;;  %v3567_v27 = vld [vmem:[#allocation2 + $0x143] sm:$0xff] }
 0x415   : > { %v2245_v47 = vadd.f32 %v11713_v35, %v11712_v36  ;;  %v9453_v19 = vpop.f32.mrf.mxu1  ;;  %v2926_v36 = vld [vmem:[#allocation2 + $0xb9] sm:$0xff]  ;;  %v3590_v35 = vpack.c.bf16 %v3567_v27, %v3566_v9  ;;  %v11718_v27 = vld [vmem:[#allocation76_spill] sm:$0xff] }
 0x416   : > { %v3803_v21 = vadd.f32 %v9277_v11, %v3491_v7  ;;  %v7853_v11 = vld [vmem:[%s11441_s6 + $0x18] sm:$0xff]  ;;  %v7858_v7 = vld [vmem:[%s11441_s6 + $0x40] sm:$0xff] }
 0x417   : > { %4444 = vmatpush.bf16.msrb.mxu3 %v7853_v11  ;;  %4718 = vmatpush.bf16.msrb.mxu0 %v7858_v7 }
 0x418   : > { %v3848_v55 = vadd.f32 %v9439_v38, %v3803_v21  ;;  %v2958_v21 = vpack.c.bf16 %v2927_v42, %v2926_v36  ;;  %7389 = vmatmul.msk.bf16.gmra.mxu1 %vm307_vm3, %v3590_v35  ;;  %v11719_v35 = vld [vmem:[#allocation7_spill] sm:$0xff] }
 0x419   : > { %v3077_v22 = vpop.f32.mrf.mxu3 }
 0x41a   : > { %v3889_v20 = vmax.f32 %v3848_v55, 0.0  ;;  %v3180_v17 = vadd.f32 %v3077_v22, %v2868_v41  ;;  %v2557_v55 = vadd.f32 %v11716_v51, %v2245_v47  ;;  %v4553_v41 = vld [vmem:[#allocation3 + $0x7] sm:$0xff]  ;;  %v4554_v22 = vld [vmem:[#allocation3 + $0xf] sm:$0xff] }
 0x41c   : > { %v3930_v23 = vmul.f32 %v3889_v20, %v11715_v58  ;;  %v3492_v34 = vadd.f32 %v9109_v63, %v3180_v17  ;;  %v4594_v20 = vpack.c.bf16 %v4554_v22, %v4553_v41  ;;  %v11717_v63 = vld [vmem:[#allocation50_spill] sm:$0xff]  ;;  %v2869_v42 = vadd.f32 %v11718_v27, %v2557_v55  ;;  %v9476_v17 = vpop.f32.mrf.mxu0  ;;  %v11721_v55 = vld [vmem:[#allocation51_spill] sm:$0xff] }
 0x41d   : > { %v2246_v58 = vadd.f32 %v11717_v63, %v9048_v45  ;;  %v9478_v7 = vpop.f32.mrf.mxu1  ;;  %v2247_v41 = vadd.f32 %v11721_v55, %v9058_v44  ;;  %v3568_v22 = vld [vmem:[#allocation2 + $0x14b] sm:$0xff] }
 0x41e   : > { %3971 = vst.msk [vmem:[#allocation3 + $0x18] sm:$0xff] %vm307_vm3, %v3930_v23  ;;  %v3804_v9 = vadd.f32 %v9286_v12, %v3492_v34  ;;  %7291 = vmatmul.msk.bf16.gmra.mxu3 %vm307_vm3, %v2958_v21  ;;  %7499 = vmatmul.msk.bf16.vlgmr.msrb.gmra.mxu0 %vm307_vm3, %v4594_v20  ;;  %v11720_v23 = vld [vmem:[#allocation77_spill] sm:$0xff]  ;;  %v11722_v63 = vld [vmem:[#allocation79_spill] sm:$0xff] }
 0x41f   : > { %v2558_v34 = vadd.f32 %v11720_v23, %v2246_v58 }
 0x420   : > { %v3849_v47 = vadd.f32 %v9439_v38, %v3804_v9  ;;  %v3569_v9 = vld [vmem:[#allocation2 + $0x153] sm:$0xff] }
 0x421   : > { %v3080_v11 = vpop.f32.mrf.mxu3 }
 0x422   : > { %v3890_v36 = vmax.f32 %v3849_v47, 0.0  ;;  %v3181_v12 = vadd.f32 %v3080_v11, %v2869_v42  ;;  %v2870_v47 = vadd.f32 %v11722_v63, %v2558_v34  ;;  %v2929_v42 = vld [vmem:[#allocation2 + $0xd1] sm:$0xff] }
 0x424   : > { %v3931_v21 = vmul.f32 %v3890_v36, %v11719_v35  ;;  %v3493_v45 = vadd.f32 %v9126_v6, %v3181_v12  ;;  %v9494_v58 = vpop.f32.mrf.mxu0  ;;  %v3591_v12 = vpack.c.bf16 %v3569_v9, %v3568_v22 }
 0x425   : > { %v9492_v11 = vpop.f32.mrf.mxu1  ;;  %v4084_v34 = vld [vmem:[#allocation3 + $0x16] sm:$0xff] }
 0x426   : > { %3972 = vst.msk [vmem:[#allocation3 + $0x20] sm:$0xff] %vm307_vm3, %v3931_v21  ;;  %v3805_v51 = vadd.f32 %v9294_v0, %v3493_v45  ;;  %v11723_v0 = vld [vmem:[#allocation5_spill] sm:$0xff]  ;;  %v2959_v21 = vpack.c.bf16 %v2929_v42, %v2928_v26  ;;  %v11724_v45 = vld [vmem:[#allocation80_spill] sm:$0xff] }
 0x427   : > { %v2559_v23 = vadd.f32 %v11724_v45, %v2247_v41  ;;  %v4555_v22 = vld [vmem:[#allocation3 + $0x17] sm:$0xff] }
 0x428   : > { %v3850_v20 = vadd.f32 %v9439_v38, %v3805_v51  ;;  %7390 = vmatmul.msk.bf16.gmra.mxu1 %vm307_vm3, %v3591_v12  ;;  %v7864_v26 = vld [vmem:[%s11441_s6 + $0x70] sm:$0xff] }
 0x429   : > { %v3082_v27 = vpop.f32.mrf.mxu3  ;;  %5028 = vmatpush.bf16.msrb.mxu1 %v7864_v26 }
 0x42a   : > { %v3891_v6 = vmax.f32 %v3850_v20, 0.0  ;;  %v3182_v36 = vadd.f32 %v3082_v27, %v2870_v47  ;;  %v11726_v27 = vld [vmem:[#allocation82_spill] sm:$0xff] }
 0x42b   : > { %v2871_v42 = vadd.f32 %v11726_v27, %v2559_v23  ;;  %v2931_v27 = vld [vmem:[#allocation2 + $0xe1] sm:$0xff] }
 0x42c   : > { %v3932_v35 = vmul.f32 %v3891_v6, %v11723_v0  ;;  %v3494_v44 = vadd.f32 %v9136_v60, %v3182_v36  ;;  %v11725_v60 = vld [vmem:[#allocation52_spill] sm:$0xff]  ;;  %v9523_v23 = vpop.f32.mrf.mxu0 }
 0x42d   : > { %v4085_v51 = vld [vmem:[#allocation3 + $0x1e] sm:$0xff]  ;;  %v2248_v47 = vadd.f32 %v11725_v60, %v9072_v31  ;;  %v9512_v6 = vpop.f32.mrf.mxu1 }
 0x42e   : > { %3973 = vst.msk [vmem:[#allocation3 + $0x28] sm:$0xff] %vm307_vm3, %v3932_v35  ;;  %v3806_v55 = vadd.f32 %v9303_v62, %v3494_v44  ;;  %7292 = vmatmul.msk.bf16.gmra.mxu3 %vm307_vm3, %v2959_v21  ;;  %v4124_v20 = vpack.c.bf16 %v4085_v51, %v4084_v34  ;;  %v4556_v9 = vld [vmem:[#allocation3 + $0x1f] sm:$0xff]  ;;  %v7863_v44 = vld [vmem:[%s11441_s6 + $0x68] sm:$0xff] }
 0x42f   : > { %v9503_v63 = vpack.c.bf16 %v4556_v9, %v4555_v22  ;;  %v11727_v0 = vld [vmem:[#allocation8_spill] sm:$0xff]  ;;  %v11728_v21 = vld [vmem:[#allocation83_spill] sm:$0xff]  ;;  %v11729_v51 = vld [vmem:[#allocation53_spill] sm:$0xff]  ;;  %5029 = vmatpush.bf16.msrb.mxu1 %v7863_v44 }
 0x430   : > { %v3851_v41 = vadd.f32 %v9439_v38, %v3806_v55  ;;  %7418 = vmatmul.msk.bf16.gmra.mxu2 %vm307_vm3, %v4124_v20  ;;  %v2560_v45 = vadd.f32 %v11728_v21, %v2248_v47  ;;  %v2249_v55 = vadd.f32 %v11729_v51, %v9085_v56  ;;  %v3570_v20 = vld [vmem:[#allocation2 + $0x15b] sm:$0xff]  ;;  %v3571_v22 = vld [vmem:[#allocation2 + $0x163] sm:$0xff] }
 0x431   : > { %7500 = vmatmul.msk.bf16.gmra.mxu0 %vm307_vm3, %v9503_v63  ;;  %v3085_v62 = vpop.f32.mrf.mxu3  ;;  %v11730_v9 = vld [vmem:[#allocation85_spill] sm:$0xff]  ;;  %v11731_v56 = vld [vmem:[#allocation6_spill] sm:$0xff] }
 0x432   : > { %v3892_v36 = vmax.f32 %v3851_v41, 0.0  ;;  %v3183_v12 = vadd.f32 %v3085_v62, %v2871_v42  ;;  %v2872_v60 = vadd.f32 %v11730_v9, %v2560_v45  ;;  %v11733_v9 = vld [vmem:[#allocation54_spill] sm:$0xff] }
 0x434   : > { %v3933_v31 = vmul.f32 %v3892_v36, %v11727_v0  ;;  %v3495_v35 = vadd.f32 %v9150_v5, %v3183_v12  ;;  %v3592_v36 = vpack.c.bf16 %v3571_v22, %v3570_v20  ;;  %v2930_v12 = vld [vmem:[#allocation2 + $0xd9] sm:$0xff] }
 0x435   : > { %v9531_v42 = vpop.f32.mrf.mxu1  ;;  %v4086_v21 = vld [vmem:[#allocation3 + $0x26] sm:$0xff] }
 0x436   : > { %3974 = vst.msk [vmem:[#allocation3 + $0x30] sm:$0xff] %vm307_vm3, %v3933_v31  ;;  %v3807_v34 = vadd.f32 %v9310_v24, %v3495_v35  ;;  %v7862_v24 = vld [vmem:[%s11441_s6 + $0x60] sm:$0xff]  ;;  %v2960_v31 = vpack.c.bf16 %v2931_v27, %v2930_v12 }
 0x437   : > { %5030 = vmatpush.bf16.msrb.mxu1 %v7862_v24  ;;  %v11732_v35 = vld [vmem:[#allocation86_spill] sm:$0xff] }
 0x438   : > { %v3852_v5 = vadd.f32 %v9439_v38, %v3807_v34  ;;  %v2561_v44 = vadd.f32 %v11732_v35, %v2249_v55  ;;  %7391 = vmatmul.msk.bf16.gmra.mxu1 %vm307_vm3, %v3592_v36  ;;  %v4557_v20 = vld [vmem:[#allocation3 + $0x27] sm:$0xff]  ;;  %v2250_v55 = vadd.f32 %v11733_v9, %v9093_v37  ;;  %v11737_v35 = vld [vmem:[#allocation55_spill] sm:$0xff]  ;;  %v2933_v9 = vld [vmem:[#allocation2 + $0xf1] sm:$0xff] }
 0x439   : > { %v3087_v41 = vpop.f32.mrf.mxu3  ;;  %v11735_v36 = vld [vmem:[#allocation9_spill] sm:$0xff] }
 0x43a   : > { %v3893_v47 = vmax.f32 %v3852_v5, 0.0  ;;  %v3184_v62 = vadd.f32 %v3087_v41, %v2872_v60  ;;  %v9543_v5 = vpop.f32.mrf.mxu0  ;;  %v11734_v41 = vld [vmem:[#allocation88_spill] sm:$0xff] }
 0x43b   : > { %v2873_v27 = vadd.f32 %v11734_v41, %v2561_v44  ;;  %v2251_v44 = vadd.f32 %v11737_v35, %v9105_v59  ;;  %v2932_v41 = vld [vmem:[#allocation2 + $0xe9] sm:$0xff] }
 0x43c   : > { %v3934_v26 = vmul.f32 %v3893_v47, %v11731_v56  ;;  %v3496_v0 = vadd.f32 %v9164_v32, %v3184_v62  ;;  %v11740_v59 = vld [vmem:[#allocation92_spill] sm:$0xff] }
 0x43d   : > { %v4087_v45 = vld [vmem:[#allocation3 + $0x2e] sm:$0xff]  ;;  %v9554_v47 = vpop.f32.mrf.mxu1 }
 0x43e   : > { %3975 = vst.msk [vmem:[#allocation3 + $0x38] sm:$0xff] %vm307_vm3, %v3934_v26  ;;  %v3808_v34 = vadd.f32 %v9317_v15, %v3496_v0  ;;  %7293 = vmatmul.msk.bf16.gmra.mxu3 %vm307_vm3, %v2960_v31  ;;  %v4125_v51 = vpack.c.bf16 %v4087_v45, %v4086_v21  ;;  %v4558_v22 = vld [vmem:[#allocation3 + $0x2f] sm:$0xff]  ;;  %v11736_v26 = vld [vmem:[#allocation89_spill] sm:$0xff] }
 0x43f   : > { %v9545_v32 = vpack.c.bf16 %v4558_v22, %v4557_v20  ;;  %v2562_v37 = vadd.f32 %v11736_v26, %v2250_v55  ;;  %v3572_v0 = vld [vmem:[#allocation2 + $0x16b] sm:$0xf] }
 0x440   : > { %v3853_v60 = vadd.f32 %v9439_v38, %v3808_v34  ;;  %7419 = vmatmul.msk.bf16.gmra.mxu2 %vm307_vm3, %v4125_v51  ;;  %v11738_v45 = vld [vmem:[#allocation91_spill] sm:$0xff]  ;;  %v3593_v20 = vpack.c.bf16 %v3572_v0, %v3572_v0 }
 0x441   : > { %7501 = vmatmul.msk.bf16.gmra.mxu0 %vm307_vm3, %v9545_v32  ;;  %v3090_v15 = vpop.f32.mrf.mxu3  ;;  %v2874_v34 = vadd.f32 %v11738_v45, %v2562_v37 }
 0x442   : > { %v3894_v62 = vmax.f32 %v3853_v60, 0.0  ;;  %v3185_v24 = vadd.f32 %v3090_v15, %v2873_v27  ;;  %v9565_v51 = vpop.f32.mrf.mxu0  ;;  %v11739_v27 = vld [vmem:[#allocation10_spill] sm:$0xff] }
 0x444   : > { %v3935_v12 = vmul.f32 %v3894_v62, %v11735_v36  ;;  %v3497_v56 = vadd.f32 %v9182_v54, %v3185_v24  ;;  %v2961_v62 = vpack.c.bf16 %v2933_v9, %v2932_v41  ;;  %v2563_v24 = vadd.f32 %v11740_v59, %v2251_v44  ;;  %v11744_v41 = vld [vmem:[#allocation95_spill] sm:$0xff] }
 0x445   : > { %v9567_v54 = vpop.f32.mrf.mxu1  ;;  %v4088_v36 = vld [vmem:[#allocation3 + $0x36] sm:$0xff] }
 0x446   : > { %3976 = vst.msk [vmem:[#allocation3 + $0x40] sm:$0xff] %vm307_vm3, %v3935_v12  ;;  %v3809_v31 = vadd.f32 %v9324_v4, %v3497_v56  ;;  %v4559_v37 = vld [vmem:[#allocation3 + $0x37] sm:$0xff] }
 0x448   : > { %v3854_v21 = vadd.f32 %v9439_v38, %v3809_v31  ;;  %7392 = vmatmul.msk.bf16.gmra.mxu1 %vm307_vm3, %v3593_v20 }
 0x449   : > { %v3092_v22 = vpop.f32.mrf.mxu3 }
 0x44a   : > { %v3895_v55 = vmax.f32 %v3854_v21, 0.0  ;;  %v3186_v60 = vadd.f32 %v3092_v22, %v2874_v34  ;;  %v11742_v21 = vld [vmem:[#allocation94_spill] sm:$0xff]  ;;  %v9587_v9 = vpop.f32.mrf.mxu0 }
 0x44b   : > { %v2875_v45 = vadd.f32 %v11742_v21, %v2563_v24  ;;  %v11746_v24 = vld [vmem:[#allocation97_spill] sm:$0xff] }
 0x44c   : > { %v3936_v15 = vmul.f32 %v3895_v55, %v11739_v27  ;;  %v3498_v4 = vadd.f32 %v9193_v43, %v3186_v60  ;;  %v11741_v43 = vld [vmem:[#allocation56_spill] sm:$0xff]  ;;  %v11743_v55 = vld [vmem:[#allocation11_spill] sm:$0xff] }
 0x44d   : > { %v4089_v12 = vld [vmem:[#allocation3 + $0x3e] sm:$0xff]  ;;  %v2252_v35 = vadd.f32 %v11741_v43, %v9115_v57  ;;  %v9585_v34 = vpop.f32.mrf.mxu1 }
 0x44e   : > { %3977 = vst.msk [vmem:[#allocation3 + $0x48] sm:$0xff] %vm307_vm3, %v3936_v15  ;;  %v3810_v56 = vadd.f32 %v9335_v49, %v3498_v4  ;;  %7294 = vmatmul.msk.bf16.gmra.mxu3 %vm307_vm3, %v2961_v62  ;;  %v4126_v26 = vpack.c.bf16 %v4089_v12, %v4088_v36  ;;  %v4560_v0 = vld [vmem:[#allocation3 + $0x3f] sm:$0xff] }
 0x44f   : > { %v9576_v31 = vpack.c.bf16 %v4560_v0, %v4559_v37  ;;  %v2564_v27 = vadd.f32 %v11744_v41, %v2252_v35  ;;  %v11745_v4 = vld [vmem:[#allocation57_spill] sm:$0xff]  ;;  %v11747_v43 = vld [vmem:[#allocation12_spill] sm:$0xff] }
 0x450   : > { %v3855_v44 = vadd.f32 %v9439_v38, %v3810_v56  ;;  %7420 = vmatmul.msk.bf16.gmra.mxu2 %vm307_vm3, %v4126_v26  ;;  %v2253_v62 = vadd.f32 %v11745_v4, %v9124_v14  ;;  %v2935_v56 = vld [vmem:[#allocation2 + $0x101] sm:$0xff]  ;;  %v11749_v41 = vld [vmem:[#allocation148_spill] sm:$0xff] }
 0x451   : > { %7502 = vmatmul.msk.bf16.gmra.mxu0 %vm307_vm3, %v9576_v31  ;;  %v3095_v49 = vpop.f32.mrf.mxu3  ;;  %v2876_v36 = vadd.f32 %v11746_v24, %v2564_v27  ;;  %v11750_v27 = vld [vmem:[#allocation58_spill] sm:$0xff] }
 0x452   : > { %v3896_v20 = vmax.f32 %v3855_v44, 0.0  ;;  %v3187_v22 = vadd.f32 %v3095_v49, %v2875_v45  ;;  %v9603_v49 = vpop.f32.mrf.mxu0 }
 0x454   : > { %v3937_v60 = vmul.f32 %v3896_v20, %v11743_v55  ;;  %v3499_v57 = vadd.f32 %v9205_v50, %v3187_v22  ;;  %v2934_v50 = vld [vmem:[#allocation2 + $0xf9] sm:$0xff] }
 0x455   : > { %v9598_v26 = vpop.f32.mrf.mxu1  ;;  %v2962_v21 = vpack.c.bf16 %v2935_v56, %v2934_v50  ;;  %v4090_v14 = vld [vmem:[#allocation3 + $0x46] sm:$0xff] }
 0x456   : > { %3978 = vst.msk [vmem:[#allocation3 + $0x50] sm:$0xff] %vm307_vm3, %v3937_v60  ;;  %v3811_v15 = vadd.f32 %v9343_v2, %v3499_v57  ;;  %v11748_v2 = vld [vmem:[#allocation98_spill] sm:$0xff] }
 0x457   : > { %v2565_v45 = vadd.f32 %v11748_v2, %v2253_v62  ;;  %v4561_v60 = vld [vmem:[#allocation3 + $0x47] sm:$0xff] }
 0x458   : > { %v3856_v59 = vadd.f32 %v9439_v38, %v3811_v15  ;;  %7544 = vmatmul.msk.bf16.vlgmr.msrb.gmra.mxu1 %vm307_vm3, %v9503_v63  ;;  %v2254_v15 = vadd.f32 %v11750_v27, %v11749_v41  ;;  %v11751_v63 = vld [vmem:[#allocation100_spill] sm:$0xff] }
 0x459   : > { %v3097_v12 = vpop.f32.mrf.mxu3  ;;  %v2877_v62 = vadd.f32 %v11751_v63, %v2565_v45  ;;  %v11757_v27 = vld [vmem:[#allocation16_spill] sm:$0xff] }
 0x45a   : > { %v3897_v37 = vmax.f32 %v3856_v59, 0.0  ;;  %v3188_v0 = vadd.f32 %v3097_v12, %v2876_v36  ;;  %v11752_v12 = vld [vmem:[#allocation14_spill] sm:$0xff]  ;;  %v11758_v63 = vld [vmem:[#allocation104_spill] sm:$0xff] }
 0x45c   : > { %v3938_v35 = vmul.f32 %v3897_v37, %v11747_v43  ;;  %v3500_v44 = vadd.f32 %v9216_v13, %v3188_v0  ;;  %v11753_v0 = vld [vmem:[#allocation101_spill] sm:$0xff] }
 0x45d   : > { %v4091_v20 = vld [vmem:[#allocation3 + $0x4e] sm:$0xff]  ;;  %v9619_v59 = vpop.f32.mrf.mxu1  ;;  %v2566_v50 = vadd.f32 %v11753_v0, %v2254_v15 }
 0x45e   : > { %3979 = vst.msk [vmem:[#allocation3 + $0x58] sm:$0xff] %vm307_vm3, %v3938_v35  ;;  %v3812_v22 = vadd.f32 %v9356_v1, %v3500_v44  ;;  %7295 = vmatmul.msk.bf16.gmra.mxu3 %vm307_vm3, %v2962_v21  ;;  %v4127_v55 = vpack.c.bf16 %v4091_v20, %v4090_v14  ;;  %v4562_v57 = vld [vmem:[#allocation3 + $0x4f] sm:$0xff]  ;;  %v9626_v35 = vpop.f32.mrf.mxu0 }
 0x45f   : > { %v9610_v13 = vpack.c.bf16 %v4562_v57, %v4561_v60  ;;  %v11754_v44 = vld [vmem:[#allocation151_spill] sm:$0xff]  ;;  %v2937_v60 = vld [vmem:[#allocation2 + $0x111] sm:$0xff] }
 0x460   : > { %v3857_v4 = vadd.f32 %v9439_v38, %v3812_v22  ;;  %7421 = vmatmul.msk.bf16.gmra.mxu2 %vm307_vm3, %v4127_v55  ;;  %v11755_v21 = vld [vmem:[#allocation59_spill] sm:$0xff] }
 0x461   : > { %7503 = vmatmul.msk.bf16.gmra.mxu0 %vm307_vm3, %v9610_v13  ;;  %v3100_v1 = vpop.f32.mrf.mxu3  ;;  %v2255_v2 = vadd.f32 %v11755_v21, %v11754_v44  ;;  %v11756_v14 = vld [vmem:[#allocation103_spill] sm:$0xff]  ;;  %v11761_v21 = vld [vmem:[#allocation106_spill] sm:$0xff] }
 0x462   : > { %v3898_v24 = vmax.f32 %v3857_v4, 0.0  ;;  %v3189_v36 = vadd.f32 %v3100_v1, %v2877_v62  ;;  %v2878_v20 = vadd.f32 %v11756_v14, %v2566_v50  ;;  %v2936_v55 = vld [vmem:[#allocation2 + $0x109] sm:$0xff]  ;;  %v11759_v50 = vld [vmem:[#allocation154_spill] sm:$0xff] }
 0x463   : > { %v2963_v4 = vpack.c.bf16 %v2937_v60, %v2936_v55  ;;  %v2567_v62 = vadd.f32 %v11758_v63, %v2255_v2  ;;  %v7868_v55 = vld [vmem:[%s11441_s6 + $0x90] sm:$0xff]  ;;  %v11762_v60 = vld [vmem:[#allocation17_spill] sm:$0xff] }
 0x464   : > { %v3939_v56 = vmul.f32 %v3898_v24, %v11752_v12  ;;  %v3501_v37 = vadd.f32 %v9233_v40, %v3189_v36  ;;  %5340 = vmatpush.bf16.msrb.mxu2 %v7868_v55  ;;  %v11765_v63 = vld [vmem:[#allocation61_spill] sm:$0xff] }
 0x465   : > { %v9632_v57 = vpop.f32.mrf.mxu1  ;;  %v4092_v1 = vld [vmem:[#allocation3 + $0x56] sm:$0xff] }
 0x466   : > { %3980 = vst.msk [vmem:[#allocation3 + $0x60] sm:$0xff] %vm307_vm3, %v3939_v56  ;;  %v3813_v43 = vadd.f32 %v9362_v29, %v3501_v37  ;;  %v4563_v56 = vld [vmem:[#allocation3 + $0x57] sm:$0xff]  ;;  %v9652_v2 = vpop.f32.mrf.mxu0 }
 0x468   : > { %v3858_v45 = vadd.f32 %v9439_v38, %v3813_v43  ;;  %7545 = vmatmul.msk.bf16.gmra.mxu1 %vm307_vm3, %v9545_v32  ;;  %v11760_v43 = vld [vmem:[#allocation60_spill] sm:$0xff] }
 0x469   : > { %v3102_v22 = vpop.f32.mrf.mxu3  ;;  %v2256_v32 = vadd.f32 %v11760_v43, %v11759_v50 }
 0x46a   : > { %v3899_v40 = vmax.f32 %v3858_v45, 0.0  ;;  %v3190_v41 = vadd.f32 %v3102_v22, %v2878_v20 }
 0x46c   : > { %v3940_v15 = vmul.f32 %v3899_v40, %v11757_v27  ;;  %v3502_v29 = vadd.f32 %v9243_v53, %v3190_v41  ;;  %v7852_v53 = vld [vmem:[%s11441_s6 + $0x10] sm:$0xff]  ;;  %v11763_v27 = vld [vmem:[#allocation107_spill] sm:$0xff] }
 0x46d   : > { %v4093_v24 = vld [vmem:[#allocation3 + $0x5e] sm:$0xff]  ;;  %4445 = vmatpush.bf16.msrb.mxu3 %v7852_v53  ;;  %v9656_v14 = vpop.f32.mrf.mxu1 }
 0x46e   : > { %3981 = vst.msk [vmem:[#allocation3 + $0x68] sm:$0xff] %vm307_vm3, %v3940_v15  ;;  %v3814_v36 = vadd.f32 %v9372_v52, %v3502_v29  ;;  %7296 = vmatmul.msk.bf16.gmra.mxu3 %vm307_vm3, %v2963_v4  ;;  %v4128_v12 = vpack.c.bf16 %v4093_v24, %v4092_v1  ;;  %v4564_v37 = vld [vmem:[#allocation3 + $0x5f] sm:$0xff]  ;;  %v2879_v52 = vadd.f32 %v11761_v21, %v2567_v62  ;;  %v9672_v43 = vpop.f32.mrf.mxu0 }
 0x46f   : > { %v9645_v0 = vpack.c.bf16 %v4564_v37, %v4563_v56  ;;  %v2568_v15 = vadd.f32 %v11763_v27, %v2256_v32  ;;  %v11764_v4 = vld [vmem:[#allocation157_spill] sm:$0xff]  ;;  %v2939_v37 = vld [vmem:[#allocation2 + $0x121] sm:$0xff] }
 0x470   : > { %v3859_v44 = vadd.f32 %v9439_v38, %v3814_v36  ;;  %7422 = vmatmul.msk.bf16.gmra.mxu2 %vm307_vm3, %v4128_v12  ;;  %v2257_v62 = vadd.f32 %v11765_v63, %v11764_v4  ;;  %v11766_v24 = vld [vmem:[#allocation109_spill] sm:$0xff]  ;;  %v11767_v32 = vld [vmem:[#allocation19_spill] sm:$0xff] }
 0x471   : > { %7504 = vmatmul.msk.bf16.gmra.mxu0 %vm307_vm3, %v9645_v0  ;;  %v3105_v45 = vpop.f32.mrf.mxu3  ;;  %v2880_v36 = vadd.f32 %v11766_v24, %v2568_v15  ;;  %v2938_v56 = vld [vmem:[#allocation2 + $0x119] sm:$0xff] }
 0x472   : > { %v3900_v20 = vmax.f32 %v3859_v44, 0.0  ;;  %v3191_v22 = vadd.f32 %v3105_v45, %v2879_v52  ;;  %v2964_v21 = vpack.c.bf16 %v2939_v37, %v2938_v56  ;;  %v11768_v52 = vld [vmem:[#allocation110_spill] sm:$0xff] }
 0x473   : > { %v2569_v45 = vadd.f32 %v11768_v52, %v2257_v62  ;;  %v11770_v15 = vld [vmem:[#allocation62_spill] sm:$0xff] }
 0x474   : > { %v3941_v40 = vmul.f32 %v3900_v20, %v11762_v60  ;;  %v3503_v41 = vadd.f32 %v9257_v30, %v3191_v22  ;;  %v11773_v37 = vld [vmem:[#allocation114_spill] sm:$0xff] }
 0x475   : > { %v9670_v53 = vpop.f32.mrf.mxu1  ;;  %v4094_v20 = vld [vmem:[#allocation3 + $0x66] sm:$0xff] }
 0x476   : > { %3982 = vst.msk [vmem:[#allocation3 + $0x70] sm:$0xff] %vm307_vm3, %v3941_v40  ;;  %v3815_v29 = vadd.f32 %v9380_v28, %v3503_v41  ;;  %v4565_v40 = vld [vmem:[#allocation3 + $0x67] sm:$0xff] }
 0x478   : > { %v3860_v1 = vadd.f32 %v9439_v38, %v3815_v29  ;;  %7546 = vmatmul.msk.bf16.gmra.mxu1 %vm307_vm3, %v9576_v31  ;;  %v11771_v31 = vld [vmem:[#allocation112_spill] sm:$0xff] }
 0x479   : > { %v3107_v12 = vpop.f32.mrf.mxu3  ;;  %v2881_v63 = vadd.f32 %v11771_v31, %v2569_v45  ;;  %v11776_v45 = vld [vmem:[#allocation116_spill] sm:$0xff] }
 0x47a   : > { %v3901_v30 = vmax.f32 %v3860_v1, 0.0  ;;  %v3192_v50 = vadd.f32 %v3107_v12, %v2880_v36  ;;  %v11772_v36 = vld [vmem:[#allocation22_spill] sm:$0xff] }
 0x47c   : > { %v3942_v44 = vmul.f32 %v3901_v30, %v11767_v32  ;;  %v3504_v28 = vadd.f32 %v9271_v25, %v3192_v50  ;;  %v11769_v25 = vld [vmem:[#allocation160_spill] sm:$0xff]  ;;  %v9696_v50 = vpop.f32.mrf.mxu0 }
 0x47d   : > { %v4095_v22 = vld [vmem:[#allocation3 + $0x6e] sm:$0xff]  ;;  %v2258_v29 = vadd.f32 %v11770_v15, %v11769_v25  ;;  %v9691_v62 = vpop.f32.mrf.mxu1  ;;  %v11777_v25 = vld [vmem:[#allocation24_spill] sm:$0xff] }
 0x47e   : > { %3983 = vst.msk [vmem:[#allocation3 + $0x78] sm:$0xff] %vm307_vm3, %v3942_v44  ;;  %v3816_v55 = vadd.f32 %v9390_v18, %v3504_v28  ;;  %7297 = vmatmul.msk.bf16.gmra.mxu3 %vm307_vm3, %v2964_v21  ;;  %v4129_v60 = vpack.c.bf16 %v4095_v22, %v4094_v20  ;;  %v4566_v41 = vld [vmem:[#allocation3 + $0x6f] sm:$0xff] }
 0x47f   : > { %v9682_v27 = vpack.c.bf16 %v4566_v41, %v4565_v40  ;;  %v2570_v30 = vadd.f32 %v11773_v37, %v2258_v29  ;;  %v11774_v44 = vld [vmem:[#allocation163_spill] sm:$0xff]  ;;  %v11778_v29 = vld [vmem:[#allocation189_spill] sm:$0xff] }
 0x480   : > { %v3861_v4 = vadd.f32 %v9439_v38, %v3816_v55  ;;  %7423 = vmatmul.msk.bf16.gmra.mxu2 %vm307_vm3, %v4129_v60  ;;  %v11775_v28 = vld [vmem:[#allocation63_spill] sm:$0xff]  ;;  %v2941_v60 = vld [vmem:[#allocation2 + $0x131] sm:$0xff] }
 0x481   : > { %7505 = vmatmul.msk.bf16.gmra.mxu0 %vm307_vm3, %v9682_v27  ;;  %v3110_v18 = vpop.f32.mrf.mxu3  ;;  %v2259_v21 = vadd.f32 %v11775_v28, %v11774_v44  ;;  %v2882_v20 = vadd.f32 %v11776_v45, %v2570_v30  ;;  %v2940_v55 = vld [vmem:[#allocation2 + $0x129] sm:$0xff] }
 0x482   : > { %v3902_v1 = vmax.f32 %v3861_v4, 0.0  ;;  %v3193_v24 = vadd.f32 %v3110_v18, %v2881_v63  ;;  %v2965_v31 = vpack.c.bf16 %v2941_v60, %v2940_v55  ;;  %v11781_v44 = vld [vmem:[#allocation64_spill] sm:$0xff]  ;;  %v11783_v55 = vld [vmem:[#allocation26_spill] sm:$0xff] }
 0x484   : > { %v3943_v12 = vmul.f32 %v3902_v1, %v11772_v36  ;;  %v3505_v56 = vadd.f32 %v9282_v16, %v3193_v24  ;;  %v9711_v18 = vpop.f32.mrf.mxu0 }
 0x485   : > { %v9704_v40 = vpop.f32.mrf.mxu1  ;;  %v4096_v1 = vld [vmem:[#allocation3 + $0x76] sm:$0xff] }
 0x486   : > { %3984 = vst.msk [vmem:[#allocation3 + $0x80] sm:$0xff] %vm307_vm3, %v3943_v12  ;;  %v3817_v32 = vadd.f32 %v9398_v8, %v3505_v56  ;;  %v11779_v8 = vld [vmem:[#allocation117_spill] sm:$0xff]  ;;  %v4567_v56 = vld [vmem:[#allocation3 + $0x77] sm:$0xff] }
 0x487   : > { %v2571_v63 = vadd.f32 %v11779_v8, %v2259_v21  ;;  %v11782_v21 = vld [vmem:[#allocation119_spill] sm:$0xff]  ;;  %v11787_v8 = vld [vmem:[#allocation65_spill] sm:$0xff] }
 0x488   : > { %v3862_v52 = vadd.f32 %v9439_v38, %v3817_v32  ;;  %7547 = vmatmul.msk.bf16.gmra.mxu1 %vm307_vm3, %v9610_v13  ;;  %v11780_v32 = vld [vmem:[#allocation166_spill] sm:$0xff] }
 0x489   : > { %v3112_v22 = vpop.f32.mrf.mxu3  ;;  %v2260_v28 = vadd.f32 %v11781_v44, %v11780_v32 }
 0x48a   : > { %v3903_v16 = vmax.f32 %v3862_v52, 0.0  ;;  %v3194_v41 = vadd.f32 %v3112_v22, %v2882_v20  ;;  %v2883_v52 = vadd.f32 %v11782_v21, %v2571_v63 }
 0x48c   : > { %v3944_v15 = vmul.f32 %v3903_v16, %v11777_v25  ;;  %v3506_v4 = vadd.f32 %v11778_v29, %v3194_v41  ;;  %v11784_v16 = vld [vmem:[#allocation191_spill] sm:$0xff]  ;;  %v11785_v25 = vld [vmem:[#allocation120_spill] sm:$0xff]  ;;  %v3489_v29 = vpop.f32.mrf.mxu0 }
 0x48d   : > { %v4097_v24 = vld [vmem:[#allocation3 + $0x7e] sm:$0xff]  ;;  %v9725_v45 = vpop.f32.mrf.mxu1 }
 0x48e   : > { %3985 = vst.msk [vmem:[#allocation3 + $0x88] sm:$0xff] %vm307_vm3, %v3944_v15  ;;  %v3818_v36 = vadd.f32 %v9406_v10, %v3506_v4  ;;  %7298 = vmatmul.msk.bf16.gmra.mxu3 %vm307_vm3, %v2965_v31  ;;  %v4130_v12 = vpack.c.bf16 %v4097_v24, %v4096_v1  ;;  %v4568_v37 = vld [vmem:[#allocation3 + $0x7f] sm:$0xff]  ;;  %v2572_v15 = vadd.f32 %v11785_v25, %v2260_v28  ;;  %v11788_v24 = vld [vmem:[#allocation122_spill] sm:$0xff]  ;;  %v11789_v28 = vld [vmem:[#allocation27_spill] sm:$0xff] }
 0x48f   : > { %v9716_v30 = vpack.c.bf16 %v4568_v37, %v4567_v56  ;;  %v11786_v31 = vld [vmem:[#allocation169_spill] sm:$0xff]  ;;  %v2943_v37 = vld [vmem:[#allocation2 + $0x141] sm:$0xff] }
 0x490   : > { %v3863_v13 = vadd.f32 %v9439_v38, %v3818_v36  ;;  %7424 = vmatmul.msk.bf16.gmra.mxu2 %vm307_vm3, %v4130_v12  ;;  %v2261_v63 = vadd.f32 %v11787_v8, %v11786_v31  ;;  %v2884_v36 = vadd.f32 %v11788_v24, %v2572_v15  ;;  %v2942_v56 = vld [vmem:[#allocation2 + $0x139] sm:$0xff]  ;;  %v11792_v31 = vld [vmem:[#allocation172_spill] sm:$0xff] }
 0x491   : > { %7506 = vmatmul.msk.bf16.gmra.mxu0 %vm307_vm3, %v9716_v30  ;;  %v3115_v10 = vpop.f32.mrf.mxu3  ;;  %v11793_v8 = vld [vmem:[#allocation66_spill] sm:$0xff] }
 0x492   : > { %v3904_v20 = vmax.f32 %v3863_v13, 0.0  ;;  %v3195_v22 = vadd.f32 %v3115_v10, %v2883_v52  ;;  %v11790_v52 = vld [vmem:[#allocation193_spill] sm:$0xff] }
 0x494   : > { %v3945_v60 = vmul.f32 %v3904_v20, %v11783_v55  ;;  %v3507_v41 = vadd.f32 %v11784_v16, %v3195_v22  ;;  %v2966_v20 = vpack.c.bf16 %v2943_v37, %v2942_v56 }
 0x495   : > { %v9736_v32 = vpop.f32.mrf.mxu1  ;;  %v4569_v15 = vld [vmem:[#allocation3 + $0x87] sm:$0xff] }
 0x496   : > { %3986 = vst.msk [vmem:[#allocation3 + $0x90] sm:$0xff] %vm307_vm3, %v3945_v60  ;;  %v3819_v4 = vadd.f32 %v9416_v48, %v3507_v41  ;;  %v11791_v48 = vld [vmem:[#allocation124_spill] sm:$0xff]  ;;  %v4098_v60 = vld [vmem:[#allocation3 + $0x86] sm:$0xff] }
 0x497   : > { %v2573_v22 = vadd.f32 %v11791_v48, %v2261_v63  ;;  %v2262_v63 = vadd.f32 %v11793_v8, %v11792_v31  ;;  %v11797_v48 = vld [vmem:[#allocation175_spill] sm:$0xff]  ;;  %v2945_v31 = vld [vmem:[#allocation2 + $0x151] sm:$0xff] }
 0x498   : > { %v3864_v1 = vadd.f32 %v9439_v38, %v3819_v4  ;;  %7548 = vmatmul.msk.bf16.gmra.mxu1 %vm307_vm3, %v9645_v0 }
 0x499   : > { %v3117_v12 = vpop.f32.mrf.mxu3 }
 0x49a   : > { %v3905_v44 = vmax.f32 %v3864_v1, 0.0  ;;  %v3196_v13 = vadd.f32 %v3117_v12, %v2884_v36  ;;  %v11794_v1 = vld [vmem:[#allocation126_spill] sm:$0xff]  ;;  %v9755_v36 = vpop.f32.mrf.mxu2 }
 0x49b   : > { %v9743_v55 = vpop.f32.mrf.mxu0  ;;  %v2885_v24 = vadd.f32 %v11794_v1, %v2573_v22  ;;  %v11798_v22 = vld [vmem:[#allocation67_spill] sm:$0xff] }
 0x49c   : > { %v3946_v21 = vmul.f32 %v3905_v44, %v11789_v28  ;;  %v3508_v10 = vadd.f32 %v11790_v52, %v3196_v13  ;;  %v11795_v44 = vld [vmem:[#allocation30_spill] sm:$0xff]  ;;  %v11800_v1 = vld [vmem:[#allocation31_spill] sm:$0xff] }
 0x49d   : > { %v4099_v16 = vld [vmem:[#allocation3 + $0x8e] sm:$0xff]  ;;  %v9759_v12 = vpop.f32.mrf.mxu1 }
 0x49e   : > { %3987 = vst.msk [vmem:[#allocation3 + $0x98] sm:$0xff] %vm307_vm3, %v3946_v21  ;;  %v3820_v41 = vadd.f32 %v9430_v33, %v3508_v10  ;;  %7299 = vmatmul.msk.bf16.gmra.mxu3 %vm307_vm3, %v2966_v20  ;;  %v4131_v25 = vpack.c.bf16 %v4099_v16, %v4098_v60  ;;  %v4570_v29 = vld [vmem:[#allocation3 + $0x8f] sm:$0xff]  ;;  %v2263_v60 = vadd.f32 %v11798_v22, %v11797_v48 }
 0x49f   : > { %v9748_v4 = vpack.c.bf16 %v4570_v29, %v4569_v15  ;;  %v11796_v21 = vld [vmem:[#allocation127_spill] sm:$0xff]  ;;  %v11802_v22 = vld [vmem:[#allocation178_spill] sm:$0xff] }
 0x4a0   : > { %v3865_v0 = vadd.f32 %v9439_v38, %v3820_v41  ;;  %7425 = vmatmul.msk.bf16.gmra.mxu2 %vm307_vm3, %v4131_v25  ;;  %v2574_v52 = vadd.f32 %v11796_v21, %v2262_v63  ;;  %v11799_v41 = vld [vmem:[#allocation130_spill] sm:$0xff]  ;;  %v2944_v29 = vld [vmem:[#allocation2 + $0x149] sm:$0xff] }
 0x4a1   : > { %7507 = vmatmul.msk.bf16.gmra.mxu0 %vm307_vm3, %v9748_v4  ;;  %v3120_v33 = vpop.f32.mrf.mxu3 }
 0x4a2   : > { %v3906_v56 = vmax.f32 %v3865_v0, 0.0  ;;  %v3197_v37 = vadd.f32 %v3120_v33, %v2885_v24  ;;  %v2886_v25 = vadd.f32 %v11799_v41, %v2574_v52  ;;  %v9774_v0 = vpop.f32.mrf.mxu2  ;;  %v2967_v33 = vpack.c.bf16 %v2945_v31, %v2944_v29  ;;  %v11804_v41 = vld [vmem:[#allocation132_spill] sm:$0xff] }
 0x4a3   : > { %v9764_v10 = vpop.f32.mrf.mxu0 }
 0x4a4   : > { %v3947_v13 = vmul.f32 %v3906_v56, %v11795_v44  ;;  %v3509_v28 = vadd.f32 %v9322_v3, %v3197_v37  ;;  %v11801_v56 = vld [vmem:[#allocation131_spill] sm:$0xff] }
 0x4a5   : > { %v9772_v8 = vpop.f32.mrf.mxu1  ;;  %v2575_v37 = vadd.f32 %v11801_v56, %v2263_v60  ;;  %v4100_v44 = vld [vmem:[#allocation3 + $0x96] sm:$0xff]  ;;  %v11803_v60 = vld [vmem:[#allocation69_spill] sm:$0xff] }
 0x4a6   : > { %3988 = vst.msk [vmem:[#allocation3 + $0xa0] sm:$0xff] %vm307_vm3, %v3947_v13  ;;  %v3821_v20 = vadd.f32 %v9453_v19, %v3509_v28 }
 0x4a8   : > { %v3866_v16 = vadd.f32 %v9439_v38, %v3821_v20  ;;  %7549 = vmatmul.msk.bf16.gmra.mxu1 %vm307_vm3, %v9682_v27  ;;  %v4571_v20 = vld [vmem:[#allocation3 + $0x97] sm:$0xff] }
 0x4a9   : > { %v3122_v15 = vpop.f32.mrf.mxu3 }
 0x4aa   : > { %v3907_v3 = vmax.f32 %v3866_v16, 0.0  ;;  %v3198_v63 = vadd.f32 %v3122_v15, %v2886_v25  ;;  %v2264_v16 = vadd.f32 %v11803_v60, %v11802_v22  ;;  %v2887_v25 = vadd.f32 %v11804_v41, %v2575_v37  ;;  %v2946_v60 = vld [vmem:[#allocation2 + $0x159] sm:$0xff] }
 0x4ac   : > { %v3948_v24 = vmul.f32 %v3907_v3, %v11800_v1  ;;  %v3510_v19 = vadd.f32 %v9329_v39, %v3198_v63  ;;  %v11805_v63 = vld [vmem:[#allocation35_spill] sm:$0xff] }
 0x4ad   : > { %v4101_v13 = vld [vmem:[#allocation3 + $0x9e] sm:$0xff]  ;;  %v9795_v15 = vpop.f32.mrf.mxu1 }
 0x4ae   : > { %3989 = vst.msk [vmem:[#allocation3 + $0xa8] sm:$0xff] %vm307_vm3, %v3948_v24  ;;  %v3822_v28 = vadd.f32 %v9478_v7, %v3510_v19  ;;  %v9783_v21 = vpop.f32.mrf.mxu0  ;;  %7300 = vmatmul.msk.bf16.gmra.mxu3 %vm307_vm3, %v2967_v33  ;;  %v4132_v52 = vpack.c.bf16 %v4101_v13, %v4100_v44  ;;  %v4572_v48 = vld [vmem:[#allocation3 + $0x9f] sm:$0xff] }
 0x4af   : > { %v9786_v39 = vpack.c.bf16 %v4572_v48, %v4571_v20  ;;  %v11806_v19 = vld [vmem:[#allocation133_spill] sm:$0xff]  ;;  %v11808_v13 = vld [vmem:[#allocation72_spill] sm:$0xff]  ;;  %v11809_v20 = vld [vmem:[#allocation134_spill] sm:$0xff] }
 0x4b0   : > { %v3867_v27 = vadd.f32 %v9439_v38, %v3822_v28  ;;  %7426 = vmatmul.msk.bf16.gmra.mxu2 %vm307_vm3, %v4132_v52  ;;  %v2576_v33 = vadd.f32 %v11806_v19, %v2264_v16  ;;  %v11807_v44 = vld [vmem:[#allocation181_spill] sm:$0xff] }
 0x4b1   : > { %7508 = vmatmul.msk.bf16.gmra.mxu0 %vm307_vm3, %v9786_v39  ;;  %v3125_v7 = vpop.f32.mrf.mxu3  ;;  %v2265_v28 = vadd.f32 %v11808_v13, %v11807_v44 }
 0x4b2   : > { %v3908_v29 = vmax.f32 %v3867_v27, 0.0  ;;  %v3199_v31 = vadd.f32 %v3125_v7, %v2887_v25  ;;  %v2888_v48 = vadd.f32 %v11809_v20, %v2576_v33  ;;  %v2947_v27 = vld [vmem:[#allocation2 + $0x161] sm:$0xff]  ;;  %v11812_v20 = vld [vmem:[#allocation184_spill] sm:$0xff] }
 0x4b3   : > { %v9797_v3 = vpop.f32.mrf.mxu2  ;;  %v11810_v7 = vld [vmem:[#allocation34_spill] sm:$0xff] }
 0x4b4   : > { %v3949_v1 = vmul.f32 %v3908_v29, %v11805_v63  ;;  %v3511_v24 = vadd.f32 %v9339_v46, %v3199_v31  ;;  %v2968_v31 = vpack.c.bf16 %v2947_v27, %v2946_v60  ;;  %v11811_v63 = vld [vmem:[#allocation135_spill] sm:$0xff] }
 0x4b5   : > { %v9810_v41 = vpop.f32.mrf.mxu1  ;;  %v4573_v13 = vld [vmem:[#allocation3 + $0xa7] sm:$0xff] }
 0x4b6   : > { %3990 = vst.msk [vmem:[#allocation3 + $0xb0] sm:$0xff] %vm307_vm3, %v3949_v1  ;;  %v3823_v56 = vadd.f32 %v9492_v11, %v3511_v24  ;;  %v9804_v37 = vpop.f32.mrf.mxu0  ;;  %v2577_v1 = vadd.f32 %v11811_v63, %v2265_v28  ;;  %v4102_v24 = vld [vmem:[#allocation3 + $0xa6] sm:$0xff]  ;;  %v11813_v28 = vld [vmem:[#allocation75_spill] sm:$0xff] }
 0x4b8   : > { %v3868_v52 = vadd.f32 %v9439_v38, %v3823_v56  ;;  %7550 = vmatmul.msk.bf16.gmra.mxu1 %vm307_vm3, %v9716_v30 }
 0x4b9   : > { %v3127_v22 = vpop.f32.mrf.mxu3 }
 0x4ba   : > { %v3909_v46 = vmax.f32 %v3868_v52, 0.0  ;;  %v3200_v16 = vadd.f32 %v3127_v22, %v2888_v48  ;;  %v2266_v48 = vadd.f32 %v11813_v28, %v11812_v20  ;;  %v11814_v22 = vld [vmem:[#allocation136_spill] sm:$0xff]  ;;  %v11820_v20 = vld [vmem:[#allocation78_spill] sm:$0xff] }
 0x4bb   : > { %v9812_v25 = vpop.f32.mrf.mxu2  ;;  %v2889_v60 = vadd.f32 %v11814_v22, %v2577_v1  ;;  %v11816_v1 = vld [vmem:[#allocation201_spill] sm:$0xff]  ;;  %v11821_v22 = vld [vmem:[#allocation138_spill] sm:$0xff] }
 0x4bc   : > { %v3950_v11 = vmul.f32 %v3909_v46, %v11810_v7  ;;  %v3512_v29 = vadd.f32 %v9354_v61, %v3200_v16  ;;  %v7851_v7 = vld [vmem:[%s11441_s6 + $0x8] sm:$0xff] }
 0x4bd   : > { %v4103_v19 = vld [vmem:[#allocation3 + $0xae] sm:$0xff]  ;;  %v9833_v27 = vpop.f32.mrf.mxu1  ;;  %4446 = vmatpush.bf16.msrb.mxu3 %v7851_v7 }
 0x4be   : > { %3991 = vst.msk [vmem:[#allocation3 + $0xb8] sm:$0xff] %vm307_vm3, %v3950_v11  ;;  %v3824_v33 = vadd.f32 %v9512_v6, %v3512_v29  ;;  %v9821_v56 = vpop.f32.mrf.mxu0  ;;  %7301 = vmatmul.msk.bf16.gmra.mxu3 %vm307_vm3, %v2968_v31  ;;  %v4133_v44 = vpack.c.bf16 %v4103_v19, %v4102_v24  ;;  %v4574_v52 = vld [vmem:[#allocation3 + $0xaf] sm:$0xff]  ;;  %v11815_v31 = vld [vmem:[#allocation33_spill] sm:$0xff] }
 0x4bf   : > { %v9824_v61 = vpack.c.bf16 %v4574_v52, %v4573_v13  ;;  %v7867_v11 = vld [vmem:[%s11441_s6 + $0x88] sm:$0xff]  ;;  %v11817_v19 = vld [vmem:[#allocation137_spill] sm:$0xff]  ;;  %v11819_v52 = vld [vmem:[#allocation186_spill] sm:$0xff] }
 0x4c0   : > { %v3869_v30 = vadd.f32 %v9439_v38, %v3824_v33  ;;  %7427 = vmatmul.msk.bf16.gmra.mxu2 %vm307_vm3, %v4133_v44  ;;  %v2578_v33 = vadd.f32 %v11817_v19, %v2266_v48  ;;  %v2267_v28 = vadd.f32 %v11820_v20, %v11819_v52  ;;  %v11824_v19 = vld [vmem:[#allocation139_spill] sm:$0xff] }
 0x4c1   : > { %7509 = vmatmul.msk.bf16.gmra.mxu0 %vm307_vm3, %v9824_v61  ;;  %v3130_v6 = vpop.f32.mrf.mxu3  ;;  %5341 = vmatpush.bf16.msrb.mxu2 %v7867_v11  ;;  %v2948_v11 = vld [vmem:[#allocation2 + $0x169] sm:$0xf] }
 0x4c2   : > { %v3910_v46 = vmax.f32 %v3869_v30, 0.0  ;;  %v3201_v16 = vadd.f32 %v3130_v6, %v2889_v60  ;;  %v2890_v60 = vadd.f32 %v11821_v22, %v2578_v33 }
 0x4c3   : > { %v9841_v29 = vpop.f32.mrf.mxu2 }
 0x4c4   : > { %v3951_v63 = vmul.f32 %v3910_v46, %v11815_v31  ;;  %v3513_v24 = vadd.f32 %v11816_v1, %v3201_v16  ;;  %v2969_v31 = vpack.c.bf16 %v2948_v11, %v2948_v11  ;;  %v11823_v1 = vld [vmem:[#allocation203_spill] sm:$0xff]  ;;  %v11828_v11 = vld [vmem:[#allocation140_spill] sm:$0xff] }
 0x4c5   : > { %v9854_v46 = vpop.f32.mrf.mxu1  ;;  %v4575_v22 = vld [vmem:[#allocation3 + $0xb7] sm:$0xff] }
 0x4c6   : > { %3992 = vst.msk [vmem:[#allocation3 + $0xc0] sm:$0xff] %vm307_vm3, %v3951_v63  ;;  %v3825_v44 = vadd.f32 %v9531_v42, %v3513_v24  ;;  %v9848_v13 = vpop.f32.mrf.mxu0  ;;  %v11822_v63 = vld [vmem:[#allocation44_spill] sm:$0xff] }
 0x4c7   : > { %11818 = vst [vmem:[#allocation43_spill] sm:$0xff] %v9848_v13  ;;  %v2579_v13 = vadd.f32 %v11824_v19, %v2267_v28  ;;  %v11827_v28 = vld [vmem:[#allocation81_spill] sm:$0xff] }
 0x4c8   : > { %v3870_v30 = vadd.f32 %v9439_v38, %v3825_v44  ;;  %7551 = vmatmul.msk.bf16.gmra.mxu1 %vm307_vm3, %v9748_v4  ;;  %v4104_v44 = vld [vmem:[#allocation3 + $0xb6] sm:$0xff] }
 0x4c9   : > { %v3132_v6 = vpop.f32.mrf.mxu3 }
 0x4ca   : > { %v3911_v16 = vmax.f32 %v3870_v30, 0.0  ;;  %v3202_v7 = vadd.f32 %v3132_v6, %v2890_v60 }
 0x4cb   : > { %v9856_v48 = vpop.f32.mrf.mxu2 }
 0x4cc   : > { %v3952_v42 = vmul.f32 %v3911_v16, %v11822_v63  ;;  %v3514_v24 = vadd.f32 %v11823_v1, %v3202_v7  ;;  %v11826_v16 = vld [vmem:[#allocation187_spill] sm:$0xff]  ;;  %v2891_v63 = vadd.f32 %v11828_v11, %v2579_v13 }
 0x4cd   : > { %v4105_v33 = vld [vmem:[#allocation3 + $0xbe] sm:$0xff]  ;;  %v2268_v7 = vadd.f32 %v11827_v28, %v11826_v16 }
 0x4ce   : > { %3993 = vst.msk [vmem:[#allocation3 + $0xc8] sm:$0xff] %vm307_vm3, %v3952_v42  ;;  %v3826_v52 = vadd.f32 %v9554_v47, %v3514_v24  ;;  %v9865_v20 = vpop.f32.mrf.mxu0  ;;  %7302 = vmatmul.msk.bf16.gmra.mxu3 %vm307_vm3, %v2969_v31  ;;  %v4134_v30 = vpack.c.bf16 %v4105_v33, %v4104_v44  ;;  %v4576_v60 = vld [vmem:[#allocation3 + $0xbf] sm:$0xff]  ;;  %v3801_v42 = vpop.f32.mrf.mxu1  ;;  %v7850_v24 = vld [vmem:[%s11441_s6] sm:$0xff] }
 0x4cf   : > { %11825 = vst [vmem:[#allocation123_spill] sm:$0xff] %v9865_v20  ;;  %v9868_v6 = vpack.c.bf16 %v4576_v60, %v4575_v22  ;;  %v11830_v44 = vld [vmem:[#allocation37_spill] sm:$0xff]  ;;  %4447 = vmatpush.bf16.msrb.mxu3 %v7850_v24  ;;  %v11834_v28 = vld [vmem:[#allocation188_spill] sm:$0xff]  ;;  %v4013_v24 = vld [vmem:[#allocation3 + $0xd] sm:$0xff] }
 0x4d0   : > { %v3871_v4 = vadd.f32 %v9439_v38, %v3826_v52  ;;  %7428 = vmatmul.msk.bf16.gmra.mxu2 %vm307_vm3, %v4134_v30  ;;  %v11831_v52 = vld [vmem:[#allocation205_spill] sm:$0xff] }
 0x4d1   : > { %7510 = vmatmul.msk.bf16.gmra.mxu0 %vm307_vm3, %v9868_v6  ;;  %v3135_v47 = vpop.f32.mrf.mxu3  ;;  %v11832_v30 = vld [vmem:[#allocation141_spill] sm:$0xff] }
 0x4d2   : > { %v3912_v31 = vmax.f32 %v3871_v4, 0.0  ;;  %v3203_v1 = vadd.f32 %v3135_v47, %v2891_v63  ;;  %v2580_v60 = vadd.f32 %v11832_v30, %v2268_v7  ;;  %v11835_v4 = vld [vmem:[#allocation84_spill] sm:$0xff]  ;;  %v11836_v47 = vld [vmem:[#allocation142_spill] sm:$0xff]  ;;  %v11839_v30 = vld [vmem:[#allocation207_spill] sm:$0xff] }
 0x4d3   : > { %v9880_v19 = vpop.f32.mrf.mxu2  ;;  %v2269_v11 = vadd.f32 %v11835_v4, %v11834_v28  ;;  %v4012_v7 = vld [vmem:[#allocation3 + $0x5] sm:$0xff] }
 0x4d4   : > { %11829 = vst [vmem:[#allocation68_spill] sm:$0xff] %v9880_v19  ;;  %v3953_v33 = vmul.f32 %v3912_v31, %v11830_v44  ;;  %v3515_v22 = vadd.f32 %v11831_v52, %v3203_v1  ;;  %v2892_v42 = vadd.f32 %v11836_v47, %v2580_v60  ;;  %v11840_v19 = vld [vmem:[#allocation143_spill] sm:$0xff] }
 0x4d5   : > { %v2581_v28 = vadd.f32 %v11840_v19, %v2269_v11  ;;  %v11843_v19 = vld [vmem:[#allocation87_spill] sm:$0xff] }
 0x4d6   : > { %3994 = vst.msk [vmem:[#allocation3 + $0xd0] sm:$0xff] %vm307_vm3, %v3953_v33  ;;  %v3827_v13 = vadd.f32 %v9567_v54, %v3515_v22  ;;  %v9887_v16 = vpop.f32.mrf.mxu0  ;;  %v9893_v31 = vpop.f32.mrf.mxu1  ;;  %v4053_v33 = vpack.c.bf16 %v4013_v24, %v4012_v7  ;;  %v11838_v54 = vld [vmem:[#allocation36_spill] sm:$0xff] }
 0x4d7   : > { %11833 = vst [vmem:[#allocation48_spill] sm:$0xff] %v9887_v16 }
 0x4d8   : > { %v3872_v63 = vadd.f32 %v9439_v38, %v3827_v13  ;;  %7552 = vmatmul.msk.bf16.gmra.mxu1 %vm307_vm3, %v9786_v39  ;;  %v4106_v38 = vld [vmem:[#allocation3 + $0xc6] sm:$0xff] }
 0x4d9   : > { %v3137_v20 = vpop.f32.mrf.mxu3  ;;  %v9914_v39 = vld [vmem:[%s11440_s5] ss:$0 sm:$0xff] }
 0x4da   : > { %v3913_v1 = vmax.f32 %v3872_v63, 0.0  ;;  %v3204_v44 = vadd.f32 %v3137_v20, %v2892_v42  ;;  %v4577_v63 = vld [vmem:[#allocation3 + $0xc7] sm:$0xff] }
 0x4db   : > { %v9895_v52 = vpop.f32.mrf.mxu2 }
 0x4dc   : > { %11837 = vst [vmem:[#allocation70_spill] sm:$0xff] %v9895_v52  ;;  %v3954_v22 = vmul.f32 %v3913_v1, %v11838_v54  ;;  %v3516_v16 = vadd.f32 %v11839_v30, %v3204_v44  ;;  %v11842_v1 = vld [vmem:[#allocation190_spill] sm:$0xff]  ;;  %v11846_v30 = vld [vmem:[#allocation45_spill] sm:$0xff]  ;;  %v11855_v52 = vld [vmem:[#allocation147_spill] sm:$0xff] }
 0x4dd   : > { %v4107_v60 = vld [vmem:[#allocation3 + $0xce] sm:$0xff]  ;;  %v2270_v11 = vadd.f32 %v11843_v19, %v11842_v1  ;;  %v11850_v1 = vld [vmem:[#allocation192_spill] sm:$0xff] }
 0x4de   : > { %3995 = vst.msk [vmem:[#allocation3 + $0xd8] sm:$0xff] %vm307_vm3, %v3954_v22  ;;  %v3828_v20 = vadd.f32 %v9585_v34, %v3516_v16  ;;  %v9904_v13 = vpop.f32.mrf.mxu0  ;;  %7454 = vmatmul.msk.bf16.vlgmr.msrb.gmra.mxu3 %vm307_vm3, %v4053_v33  ;;  %v4135_v4 = vpack.c.bf16 %v4107_v60, %v4106_v38  ;;  %v4578_v47 = vld [vmem:[#allocation3 + $0xcf] sm:$0xff]  ;;  %v11844_v34 = vld [vmem:[#allocation144_spill] sm:$0xff]  ;;  %v9921_v24 = vpop.f32.mrf.mxu1  ;;  %v11847_v60 = vld [vmem:[#allocation209_spill] sm:$0xff] }
 0x4df   : > { %11841 = vst [vmem:[#allocation71_spill] sm:$0xff] %v9904_v13  ;;  %v9907_v42 = vpack.c.bf16 %v4578_v47, %v4577_v63  ;;  %v2893_v16 = vadd.f32 %v11844_v34, %v2581_v28  ;;  %v11848_v47 = vld [vmem:[#allocation145_spill] sm:$0xff]  ;;  %v11851_v19 = vld [vmem:[#allocation90_spill] sm:$0xff] }
 0x4e0   : > { %v3873_v44 = vadd.f32 %v9914_v39, %v3828_v20  ;;  %7429 = vmatmul.msk.bf16.gmra.mxu2 %vm307_vm3, %v4135_v4  ;;  %v2582_v20 = vadd.f32 %v11848_v47, %v2270_v11  ;;  %v2271_v34 = vadd.f32 %v11851_v19, %v11850_v1 }
 0x4e1   : > { %7511 = vmatmul.msk.bf16.gmra.mxu0 %vm307_vm3, %v9907_v42  ;;  %v3140_v7 = vpop.f32.mrf.mxu3 }
 0x4e2   : > { %v3914_v33 = vmax.f32 %v3873_v44, 0.0  ;;  %v3205_v54 = vadd.f32 %v3140_v7, %v2893_v16  ;;  %v11852_v16 = vld [vmem:[#allocation146_spill] sm:$0xff]  ;;  %v2583_v1 = vadd.f32 %v11855_v52, %v2271_v34  ;;  %v11858_v52 = vld [vmem:[#allocation93_spill] sm:$0xff] }
 0x4e3   : > { %v9923_v22 = vpop.f32.mrf.mxu2  ;;  %v2894_v7 = vadd.f32 %v11852_v16, %v2582_v20 }
 0x4e4   : > { %11845 = vst [vmem:[#allocation128_spill] sm:$0xff] %v9923_v22  ;;  %v3955_v38 = vmul.f32 %v3914_v33, %v11846_v30  ;;  %v3517_v63 = vadd.f32 %v11847_v60, %v3205_v54  ;;  %v4015_v22 = vld [vmem:[#allocation3 + $0x1d] sm:$0xff]  ;;  %v11853_v60 = vld [vmem:[#allocation39_spill] sm:$0xff] }
 0x4e5   : > { %v4108_v20 = vld [vmem:[#allocation3 + $0xd6] sm:$0xff] }
 0x4e6   : > { %3996 = vst.msk [vmem:[#allocation3 + $0xe0] sm:$0xff] %vm307_vm3, %v3955_v38  ;;  %v3829_v28 = vadd.f32 %v9598_v26, %v3517_v63  ;;  %v9930_v4 = vpop.f32.mrf.mxu0  ;;  %v9936_v33 = vpop.f32.mrf.mxu1  ;;  %v4014_v38 = vld [vmem:[#allocation3 + $0x15] sm:$0xff] }
 0x4e7   : > { %11849 = vst [vmem:[#allocation49_spill] sm:$0xff] %v9930_v4  ;;  %v11854_v63 = vld [vmem:[#allocation47_spill] sm:$0xff]  ;;  %v4054_v4 = vpack.c.bf16 %v4015_v22, %v4014_v38  ;;  %v11857_v22 = vld [vmem:[#allocation194_spill] sm:$0xff] }
 0x4e8   : > { %v3874_v44 = vadd.f32 %v9914_v39, %v3829_v28  ;;  %7553 = vmatmul.msk.bf16.gmra.mxu1 %vm307_vm3, %v9824_v61  ;;  %v4579_v16 = vld [vmem:[#allocation3 + $0xd7] sm:$0xff]  ;;  %v2272_v34 = vadd.f32 %v11858_v52, %v11857_v22 }
 0x4e9   : > { %v3142_v13 = vpop.f32.mrf.mxu3  ;;  %v11865_v22 = vld [vmem:[#allocation195_spill] sm:$0xff]  ;;  %v11866_v52 = vld [vmem:[#allocation96_spill] sm:$0xff] }
 0x4ea   : > { %v3915_v54 = vmax.f32 %v3874_v44, 0.0  ;;  %v3206_v30 = vadd.f32 %v3142_v13, %v2894_v7 }
 0x4eb   : > { %v9938_v11 = vpop.f32.mrf.mxu2 }
 0x4ec   : > { %v3956_v26 = vmul.f32 %v3915_v54, %v11853_v60  ;;  %v3518_v47 = vadd.f32 %v11854_v63, %v3206_v30  ;;  %v11859_v30 = vld [vmem:[#allocation149_spill] sm:$0xff] }
 0x4ed   : > { %v4109_v28 = vld [vmem:[#allocation3 + $0xde] sm:$0xff]  ;;  %v2895_v38 = vadd.f32 %v11859_v30, %v2583_v1  ;;  %v2273_v30 = vadd.f32 %v11866_v52, %v11865_v22 }
 0x4ee   : > { %3997 = vst.msk [vmem:[#allocation3 + $0xe8] sm:$0xff] %vm307_vm3, %v3956_v26  ;;  %v3830_v19 = vadd.f32 %v9619_v59, %v3518_v47  ;;  %v9947_v13 = vpop.f32.mrf.mxu0  ;;  %7455 = vmatmul.msk.bf16.gmra.mxu3 %vm307_vm3, %v4054_v4  ;;  %v4136_v44 = vpack.c.bf16 %v4109_v28, %v4108_v20  ;;  %v4580_v7 = vld [vmem:[#allocation3 + $0xdf] sm:$0xff]  ;;  %v9959_v60 = vpop.f32.mrf.mxu1  ;;  %v11861_v47 = vld [vmem:[#allocation38_spill] sm:$0xff] }
 0x4ef   : > { %11856 = vst [vmem:[#allocation73_spill] sm:$0xff] %v9947_v13  ;;  %v9950_v54 = vpack.c.bf16 %v4580_v7, %v4579_v16  ;;  %v11862_v28 = vld [vmem:[#allocation40_spill] sm:$0xff]  ;;  %v11863_v7 = vld [vmem:[#allocation150_spill] sm:$0xff] }
 0x4f0   : > { %v3875_v61 = vadd.f32 %v9914_v39, %v3830_v19  ;;  %7430 = vmatmul.msk.bf16.gmra.mxu2 %vm307_vm3, %v4136_v44  ;;  %v2584_v19 = vadd.f32 %v11863_v7, %v2272_v34 }
 0x4f1   : > { %7512 = vmatmul.msk.bf16.gmra.mxu0 %vm307_vm3, %v9950_v54  ;;  %v3145_v59 = vpop.f32.mrf.mxu3 }
 0x4f2   : > { %v3916_v4 = vmax.f32 %v3875_v61, 0.0  ;;  %v3207_v26 = vadd.f32 %v3145_v59, %v2895_v38  ;;  %v11867_v38 = vld [vmem:[#allocation152_spill] sm:$0xff] }
 0x4f3   : > { %v9961_v63 = vpop.f32.mrf.mxu2  ;;  %v2896_v59 = vadd.f32 %v11867_v38, %v2584_v19 }
 0x4f4   : > { %11860 = vst [vmem:[#allocation4_spill] sm:$0xff] %v9961_v63  ;;  %v3957_v20 = vmul.f32 %v3916_v4, %v11861_v47  ;;  %v3519_v16 = vadd.f32 %v11862_v28, %v3207_v26  ;;  %v4017_v63 = vld [vmem:[#allocation3 + $0x2d] sm:$0xff] }
 0x4f5   : > { %v11868_v28 = vld [vmem:[#allocation46_spill] sm:$0xff] }
 0x4f6   : > { %3998 = vst.msk [vmem:[#allocation3 + $0xf0] sm:$0xff] %vm307_vm3, %v3957_v20  ;;  %v3831_v1 = vadd.f32 %v9632_v57, %v3519_v16  ;;  %v9968_v44 = vpop.f32.mrf.mxu0  ;;  %v9974_v4 = vpop.f32.mrf.mxu1  ;;  %v4016_v20 = vld [vmem:[#allocation3 + $0x25] sm:$0xff] }
 0x4f7   : > { %11864 = vst [vmem:[#allocation74_spill] sm:$0xff] %v9968_v44  ;;  %v4055_v7 = vpack.c.bf16 %v4017_v63, %v4016_v20  ;;  %v11869_v44 = vld [vmem:[#allocation153_spill] sm:$0xff]  ;;  %v11871_v63 = vld [vmem:[#allocation196_spill] sm:$0xff] }
 0x4f8   : > { %v3876_v61 = vadd.f32 %v9914_v39, %v3831_v1  ;;  %v2585_v22 = vadd.f32 %v11869_v44, %v2273_v30  ;;  %7554 = vmatmul.msk.bf16.gmra.mxu1 %vm307_vm3, %v9868_v6  ;;  %v4110_v19 = vld [vmem:[#allocation3 + $0xe6] sm:$0xff]  ;;  %v11872_v44 = vld [vmem:[#allocation99_spill] sm:$0xff] }
 0x4f9   : > { %v3147_v13 = vpop.f32.mrf.mxu3  ;;  %v4581_v38 = vld [vmem:[#allocation3 + $0xe7] sm:$0xff]  ;;  %v2274_v30 = vadd.f32 %v11872_v44, %v11871_v63 }
 0x4fa   : > { %v3917_v26 = vmax.f32 %v3876_v61, 0.0  ;;  %v3208_v47 = vadd.f32 %v3147_v13, %v2896_v59  ;;  %v11878_v63 = vld [vmem:[#allocation102_spill] sm:$0xff] }
 0x4fb   : > { %v9976_v34 = vpop.f32.mrf.mxu2 }
 0x4fc   : > { %v3958_v57 = vmul.f32 %v3917_v26, %v11868_v28  ;;  %v3520_v16 = vadd.f32 %v9476_v17, %v3208_v47  ;;  %v11873_v26 = vld [vmem:[#allocation155_spill] sm:$0xff] }
 0x4fd   : > { %v4111_v1 = vld [vmem:[#allocation3 + $0xee] sm:$0xff]  ;;  %v2897_v47 = vadd.f32 %v11873_v26, %v2585_v22 }
 0x4fe   : > { %3999 = vst.msk [vmem:[#allocation3 + $0xf8] sm:$0xff] %vm307_vm3, %v3958_v57  ;;  %v3832_v52 = vadd.f32 %v9656_v14, %v3520_v16  ;;  %v9985_v13 = vpop.f32.mrf.mxu0  ;;  %7456 = vmatmul.msk.bf16.gmra.mxu3 %vm307_vm3, %v4055_v7  ;;  %v4137_v61 = vpack.c.bf16 %v4111_v1, %v4110_v19  ;;  %v4582_v59 = vld [vmem:[#allocation3 + $0xef] sm:$0xff]  ;;  %v9997_v20 = vpop.f32.mrf.mxu1  ;;  %v11874_v7 = vld [vmem:[#allocation13_spill] sm:$0xff] }
 0x4ff   : > { %11870 = vst [vmem:[#allocation50_spill] sm:$0xff] %v9985_v13  ;;  %v9988_v17 = vpack.c.bf16 %v4582_v59, %v4581_v38  ;;  %v11875_v38 = vld [vmem:[#allocation156_spill] sm:$0xff]  ;;  %v11877_v59 = vld [vmem:[#allocation197_spill] sm:$0xff]  ;;  %v11879_v26 = vld [vmem:[#allocation158_spill] sm:$0xff] }
 0x500   : > { %v3877_v6 = vadd.f32 %v9914_v39, %v3832_v52  ;;  %7431 = vmatmul.msk.bf16.gmra.mxu2 %vm307_vm3, %v4137_v61  ;;  %v2586_v52 = vadd.f32 %v11875_v38, %v2274_v30  ;;  %v2275_v44 = vadd.f32 %v11878_v63, %v11877_v59  ;;  %v4019_v13 = vld [vmem:[#allocation3 + $0x3d] sm:$0xff] }
 0x501   : > { %7513 = vmatmul.msk.bf16.gmra.mxu0 %vm307_vm3, %v9988_v17  ;;  %v3150_v14 = vpop.f32.mrf.mxu3 }
 0x502   : > { %v3918_v28 = vmax.f32 %v3877_v6, 0.0  ;;  %v3209_v57 = vadd.f32 %v3150_v14, %v2897_v47  ;;  %v2898_v47 = vadd.f32 %v11879_v26, %v2586_v52 }
 0x503   : > { %v9999_v16 = vpop.f32.mrf.mxu2 }
 0x504   : > { %v3959_v19 = vmul.f32 %v3918_v28, %v11874_v7  ;;  %v3521_v1 = vadd.f32 %v9494_v58, %v3209_v57  ;;  %v4018_v7 = vld [vmem:[#allocation3 + $0x35] sm:$0xff] }
 0x505   : > { %v4056_v38 = vpack.c.bf16 %v4019_v13, %v4018_v7  ;;  %v4112_v52 = vld [vmem:[#allocation3 + $0xf6] sm:$0xff]  ;;  %v11883_v13 = vld [vmem:[#allocation198_spill] sm:$0xff] }
 0x506   : > { %4000 = vst.msk [vmem:[#allocation3 + $0x100] sm:$0xff] %vm307_vm3, %v3959_v19  ;;  %v3833_v22 = vadd.f32 %v9670_v53, %v3521_v1  ;;  %v10006_v61 = vpop.f32.mrf.mxu0  ;;  %v10012_v28 = vpop.f32.mrf.mxu1  ;;  %v11880_v19 = vld [vmem:[#allocation15_spill] sm:$0xff] }
 0x507   : > { %11876 = vst [vmem:[#allocation76_spill] sm:$0xff] %v10006_v61  ;;  %v11881_v61 = vld [vmem:[#allocation159_spill] sm:$0xff] }
 0x508   : > { %v3878_v6 = vadd.f32 %v9914_v39, %v3833_v22  ;;  %v2587_v59 = vadd.f32 %v11881_v61, %v2275_v44  ;;  %7555 = vmatmul.msk.bf16.gmra.mxu1 %vm307_vm3, %v9907_v42  ;;  %v11884_v61 = vld [vmem:[#allocation105_spill] sm:$0xff] }
 0x509   : > { %v3152_v14 = vpop.f32.mrf.mxu3  ;;  %v2276_v44 = vadd.f32 %v11884_v61, %v11883_v13  ;;  %v11890_v13 = vld [vmem:[#allocation108_spill] sm:$0xff] }
 0x50a   : > { %v3919_v58 = vmax.f32 %v3878_v6, 0.0  ;;  %v3210_v57 = vadd.f32 %v3152_v14, %v2898_v47  ;;  %v4583_v47 = vld [vmem:[#allocation3 + $0xf7] sm:$0xff] }
 0x50b   : > { %v10014_v30 = vpop.f32.mrf.mxu2 }
 0x50c   : > { %v3960_v53 = vmul.f32 %v3919_v58, %v11880_v19  ;;  %v3522_v1 = vadd.f32 %v9523_v23, %v3210_v57  ;;  %v11885_v58 = vld [vmem:[#allocation161_spill] sm:$0xff] }
 0x50d   : > { %v4113_v22 = vld [vmem:[#allocation3 + $0xfe] sm:$0xff]  ;;  %v2899_v57 = vadd.f32 %v11885_v58, %v2587_v59 }
 0x50e   : > { %4001 = vst.msk [vmem:[#allocation3 + $0x108] sm:$0xff] %vm307_vm3, %v3960_v53  ;;  %v3834_v63 = vadd.f32 %v9691_v62, %v3522_v1  ;;  %v10023_v6 = vpop.f32.mrf.mxu0  ;;  %7457 = vmatmul.msk.bf16.gmra.mxu3 %vm307_vm3, %v4056_v38  ;;  %v4138_v26 = vpack.c.bf16 %v4113_v22, %v4112_v52  ;;  %v4584_v14 = vld [vmem:[#allocation3 + $0xff] sm:$0xff]  ;;  %v10035_v7 = vpop.f32.mrf.mxu1  ;;  %v11886_v38 = vld [vmem:[#allocation18_spill] sm:$0xff] }
 0x50f   : > { %11882 = vst [vmem:[#allocation7_spill] sm:$0xff] %v10023_v6  ;;  %v10026_v23 = vpack.c.bf16 %v4584_v14, %v4583_v47  ;;  %v11887_v47 = vld [vmem:[#allocation162_spill] sm:$0xff]  ;;  %v11889_v14 = vld [vmem:[#allocation199_spill] sm:$0xff]  ;;  %v11891_v58 = vld [vmem:[#allocation164_spill] sm:$0xff] }
 0x510   : > { %v3879_v42 = vadd.f32 %v9914_v39, %v3834_v63  ;;  %7432 = vmatmul.msk.bf16.gmra.mxu2 %vm307_vm3, %v4138_v26  ;;  %v2588_v63 = vadd.f32 %v11887_v47, %v2276_v44  ;;  %v2277_v61 = vadd.f32 %v11890_v13, %v11889_v14  ;;  %v4021_v6 = vld [vmem:[#allocation3 + $0x4d] sm:$0xff] }
 0x511   : > { %7514 = vmatmul.msk.bf16.gmra.mxu0 %vm307_vm3, %v10026_v23  ;;  %v3155_v62 = vpop.f32.mrf.mxu3  ;;  %v7866_v44 = vld [vmem:[%s11441_s6 + $0x80] sm:$0xff] }
 0x512   : > { %v3920_v19 = vmax.f32 %v3879_v42, 0.0  ;;  %v3211_v53 = vadd.f32 %v3155_v62, %v2899_v57  ;;  %v2900_v57 = vadd.f32 %v11891_v58, %v2588_v63  ;;  %5342 = vmatpush.bf16.msrb.mxu2 %v7866_v44  ;;  %v11894_v63 = vld [vmem:[#allocation165_spill] sm:$0xff] }
 0x513   : > { %v10037_v1 = vpop.f32.mrf.mxu2  ;;  %v2589_v14 = vadd.f32 %v11894_v63, %v2277_v61  ;;  %v11897_v61 = vld [vmem:[#allocation111_spill] sm:$0xff] }
 0x514   : > { %v3961_v52 = vmul.f32 %v3920_v19, %v11886_v38  ;;  %v3523_v22 = vadd.f32 %v9543_v5, %v3211_v53  ;;  %v4020_v38 = vld [vmem:[#allocation3 + $0x45] sm:$0xff] }
 0x515   : > { %v4114_v13 = vld [vmem:[#allocation3 + $0x106] sm:$0xff] }
 0x516   : > { %4002 = vst.msk [vmem:[#allocation3 + $0x110] sm:$0xff] %vm307_vm3, %v3961_v52  ;;  %v3835_v59 = vadd.f32 %v9704_v40, %v3523_v22  ;;  %v10044_v26 = vpop.f32.mrf.mxu0  ;;  %v10050_v19 = vpop.f32.mrf.mxu1  ;;  %v11893_v52 = vld [vmem:[#allocation20_spill] sm:$0xff] }
 0x517   : > { %11888 = vst [vmem:[#allocation77_spill] sm:$0xff] %v10044_v26 }
 0x518   : > { %v3880_v42 = vadd.f32 %v9914_v39, %v3835_v59  ;;  %v4057_v59 = vpack.c.bf16 %v4021_v6, %v4020_v38  ;;  %7556 = vmatmul.msk.bf16.gmra.mxu1 %vm307_vm3, %v9950_v54  ;;  %v11896_v6 = vld [vmem:[#allocation200_spill] sm:$0xff]  ;;  %v11898_v38 = vld [vmem:[#allocation167_spill] sm:$0xff] }
 0x519   : > { %v3157_v62 = vpop.f32.mrf.mxu3  ;;  %v2278_v44 = vadd.f32 %v11897_v61, %v11896_v6  ;;  %v11903_v6 = vld [vmem:[#allocation202_spill] sm:$0xff]  ;;  %v11904_v61 = vld [vmem:[#allocation115_spill] sm:$0xff] }
 0x51a   : > { %v3921_v5 = vmax.f32 %v3880_v42, 0.0  ;;  %v3212_v53 = vadd.f32 %v3157_v62, %v2900_v57 }
 0x51b   : > { %v10055_v40 = vpop.f32.mrf.mxu2 }
 0x51c   : > { %11892 = vst [vmem:[#allocation51_spill] sm:$0xff] %v10055_v40  ;;  %v3962_v22 = vmul.f32 %v3921_v5, %v11893_v52  ;;  %v3524_v47 = vadd.f32 %v9565_v51, %v3212_v53  ;;  %v4585_v5 = vld [vmem:[#allocation3 + $0x107] sm:$0xff]  ;;  %v2901_v52 = vadd.f32 %v11898_v38, %v2589_v14  ;;  %v2279_v38 = vadd.f32 %v11904_v61, %v11903_v6 }
 0x51d   : > { %v4115_v42 = vld [vmem:[#allocation3 + $0x10e] sm:$0xff] }
 0x51e   : > { %4003 = vst.msk [vmem:[#allocation3 + $0x118] sm:$0xff] %vm307_vm3, %v3962_v22  ;;  %v3836_v58 = vadd.f32 %v9725_v45, %v3524_v47  ;;  %v10064_v57 = vpop.f32.mrf.mxu0  ;;  %7458 = vmatmul.msk.bf16.gmra.mxu3 %vm307_vm3, %v4057_v59  ;;  %v4139_v62 = vpack.c.bf16 %v4115_v42, %v4114_v13  ;;  %v4586_v51 = vld [vmem:[#allocation3 + $0x10f] sm:$0xff]  ;;  %v10076_v22 = vpop.f32.mrf.mxu1  ;;  %v11900_v13 = vld [vmem:[#allocation21_spill] sm:$0xff] }
 0x51f   : > { %11895 = vst [vmem:[#allocation79_spill] sm:$0xff] %v10064_v57  ;;  %v10067_v53 = vpack.c.bf16 %v4586_v51, %v4585_v5  ;;  %v11901_v51 = vld [vmem:[#allocation168_spill] sm:$0xff] }
 0x520   : > { %v3881_v54 = vadd.f32 %v9914_v39, %v3836_v58  ;;  %7433 = vmatmul.msk.bf16.gmra.mxu2 %vm307_vm3, %v4139_v62  ;;  %v2590_v58 = vadd.f32 %v11901_v51, %v2278_v44 }
 0x521   : > { %7515 = vmatmul.msk.bf16.gmra.mxu0 %vm307_vm3, %v10067_v53  ;;  %v3160_v45 = vpop.f32.mrf.mxu3 }
 0x522   : > { %v3922_v47 = vmax.f32 %v3881_v54, 0.0  ;;  %v3213_v59 = vadd.f32 %v3160_v45, %v2901_v52  ;;  %v11905_v52 = vld [vmem:[#allocation170_spill] sm:$0xff] }
 0x523   : > { %v10078_v63 = vpop.f32.mrf.mxu2  ;;  %v2902_v45 = vadd.f32 %v11905_v52, %v2590_v58 }
 0x524   : > { %11899 = vst [vmem:[#allocation5_spill] sm:$0xff] %v10078_v63  ;;  %v3963_v42 = vmul.f32 %v3922_v47, %v11900_v13  ;;  %v3525_v5 = vadd.f32 %v9587_v9, %v3213_v59  ;;  %v4023_v63 = vld [vmem:[#allocation3 + $0x5d] sm:$0xff]  ;;  %v4022_v13 = vld [vmem:[#allocation3 + $0x55] sm:$0xff] }
 0x525   : > { %v4058_v51 = vpack.c.bf16 %v4023_v63, %v4022_v13  ;;  %v4116_v58 = vld [vmem:[#allocation3 + $0x116] sm:$0xff] }
 0x526   : > { %4004 = vst.msk [vmem:[#allocation3 + $0x120] sm:$0xff] %vm307_vm3, %v3963_v42  ;;  %v3837_v14 = vadd.f32 %v9736_v32, %v3525_v5  ;;  %v10085_v62 = vpop.f32.mrf.mxu0  ;;  %v10091_v47 = vpop.f32.mrf.mxu1  ;;  %v11907_v42 = vld [vmem:[#allocation23_spill] sm:$0xff]  ;;  %v11910_v63 = vld [vmem:[#allocation204_spill] sm:$0xff] }
 0x527   : > { %11902 = vst [vmem:[#allocation80_spill] sm:$0xff] %v10085_v62  ;;  %v11908_v62 = vld [vmem:[#allocation171_spill] sm:$0xff] }
 0x528   : > { %v3882_v54 = vadd.f32 %v9914_v39, %v3837_v14  ;;  %v2591_v6 = vadd.f32 %v11908_v62, %v2279_v38  ;;  %7557 = vmatmul.msk.bf16.gmra.mxu1 %vm307_vm3, %v9988_v17  ;;  %v4587_v52 = vld [vmem:[#allocation3 + $0x117] sm:$0xff]  ;;  %v11911_v62 = vld [vmem:[#allocation118_spill] sm:$0xff] }
 0x529   : > { %v3162_v57 = vpop.f32.mrf.mxu3  ;;  %v2280_v38 = vadd.f32 %v11911_v62, %v11910_v63  ;;  %v11918_v63 = vld [vmem:[#allocation121_spill] sm:$0xff] }
 0x52a   : > { %v3923_v9 = vmax.f32 %v3882_v54, 0.0  ;;  %v3214_v59 = vadd.f32 %v3162_v57, %v2902_v45 }
 0x52b   : > { %v10093_v44 = vpop.f32.mrf.mxu2 }
 0x52c   : > { %11906 = vst [vmem:[#allocation52_spill] sm:$0xff] %v10093_v44  ;;  %v3964_v32 = vmul.f32 %v3923_v9, %v11907_v42  ;;  %v3526_v5 = vadd.f32 %v9603_v49, %v3214_v59  ;;  %v11912_v9 = vld [vmem:[#allocation173_spill] sm:$0xff] }
 0x52d   : > { %v4117_v14 = vld [vmem:[#allocation3 + $0x11e] sm:$0xff]  ;;  %v2903_v59 = vadd.f32 %v11912_v9, %v2591_v6 }
 0x52e   : > { %4005 = vst.msk [vmem:[#allocation3 + $0x128] sm:$0xff] %vm307_vm3, %v3964_v32  ;;  %v3838_v61 = vadd.f32 %v9759_v12, %v3526_v5  ;;  %v10102_v57 = vpop.f32.mrf.mxu0  ;;  %7459 = vmatmul.msk.bf16.gmra.mxu3 %vm307_vm3, %v4058_v51  ;;  %v4140_v54 = vpack.c.bf16 %v4117_v14, %v4116_v58  ;;  %v4588_v45 = vld [vmem:[#allocation3 + $0x11f] sm:$0xff]  ;;  %v10114_v13 = vpop.f32.mrf.mxu1 }
 0x52f   : > { %11909 = vst [vmem:[#allocation82_spill] sm:$0xff] %v10102_v57  ;;  %v10105_v49 = vpack.c.bf16 %v4588_v45, %v4587_v52  ;;  %v11914_v51 = vld [vmem:[#allocation25_spill] sm:$0xff]  ;;  %v11915_v52 = vld [vmem:[#allocation174_spill] sm:$0xff]  ;;  %v11919_v9 = vld [vmem:[#allocation176_spill] sm:$0xff] }
 0x530   : > { %v3883_v17 = vadd.f32 %v9914_v39, %v3838_v61  ;;  %7434 = vmatmul.msk.bf16.gmra.mxu2 %vm307_vm3, %v4140_v54  ;;  %v2592_v61 = vadd.f32 %v11915_v52, %v2280_v38  ;;  %v11917_v45 = vld [vmem:[#allocation206_spill] sm:$0xff]  ;;  %v5811_v44 = vld [vmem:[#allocation3 + $0x79] sm:$0xff] }
 0x531   : > { %7516 = vmatmul.msk.bf16.gmra.mxu0 %vm307_vm3, %v10105_v49  ;;  %v3165_v12 = vpop.f32.mrf.mxu3  ;;  %v2281_v62 = vadd.f32 %v11918_v63, %v11917_v45  ;;  %v4025_v57 = vld [vmem:[#allocation3 + $0x6d] sm:$0xff] }
 0x532   : > { %v3924_v42 = vmax.f32 %v3883_v17, 0.0  ;;  %v3215_v32 = vadd.f32 %v3165_v12, %v2903_v59  ;;  %v2904_v59 = vadd.f32 %v11919_v9, %v2592_v61 }
 0x533   : > { %v10116_v5 = vpop.f32.mrf.mxu2 }
 0x534   : > { %11913 = vst [vmem:[#allocation8_spill] sm:$0xff] %v10116_v5  ;;  %v3965_v58 = vmul.f32 %v3924_v42, %v11914_v51  ;;  %v3527_v14 = vadd.f32 %v9626_v35, %v3215_v32  ;;  %v4024_v51 = vld [vmem:[#allocation3 + $0x65] sm:$0xff] }
 0x535   : > { %v4059_v52 = vpack.c.bf16 %v4025_v57, %v4024_v51  ;;  %v4118_v61 = vld [vmem:[#allocation3 + $0x126] sm:$0xff]  ;;  %v11924_v57 = vld [vmem:[#allocation208_spill] sm:$0xff] }
 0x536   : > { %4006 = vst.msk [vmem:[#allocation3 + $0x130] sm:$0xff] %vm307_vm3, %v3965_v58  ;;  %v3839_v6 = vadd.f32 %v9772_v8, %v3527_v14  ;;  %v10123_v54 = vpop.f32.mrf.mxu0  ;;  %v10129_v42 = vpop.f32.mrf.mxu1  ;;  %v11921_v58 = vld [vmem:[#allocation29_spill] sm:$0xff]  ;;  %v5809_v5 = vld [vmem:[#allocation3 + $0x69] sm:$0xff] }
 0x537   : > { %11916 = vst [vmem:[#allocation83_spill] sm:$0xff] %v10123_v54  ;;  %v11922_v54 = vld [vmem:[#allocation177_spill] sm:$0xff] }
 0x538   : > { %v3884_v17 = vadd.f32 %v9914_v39, %v3839_v6  ;;  %v2593_v45 = vadd.f32 %v11922_v54, %v2281_v62  ;;  %7558 = vmatmul.msk.bf16.gmra.mxu1 %vm307_vm3, %v10026_v23  ;;  %v11925_v54 = vld [vmem:[#allocation125_spill] sm:$0xff] }
 0x539   : > { %v3167_v12 = vpop.f32.mrf.mxu3  ;;  %v2282_v62 = vadd.f32 %v11925_v54, %v11924_v57  ;;  %v11932_v57 = vld [vmem:[#allocation129_spill] sm:$0xff] }
 0x53a   : > { %v3925_v35 = vmax.f32 %v3884_v17, 0.0  ;;  %v3216_v32 = vadd.f32 %v3167_v12, %v2904_v59  ;;  %v4589_v59 = vld [vmem:[#allocation3 + $0x127] sm:$0xff] }
 0x53b   : > { %v10131_v38 = vpop.f32.mrf.mxu2 }
 0x53c   : > { %11920 = vst [vmem:[#allocation53_spill] sm:$0xff] %v10131_v38  ;;  %v3966_v8 = vmul.f32 %v3925_v35, %v11921_v58  ;;  %v3528_v14 = vadd.f32 %v9652_v2, %v3216_v32  ;;  %v11926_v35 = vld [vmem:[#allocation179_spill] sm:$0xff] }
 0x53d   : > { %v4119_v6 = vld [vmem:[#allocation3 + $0x12e] sm:$0xff]  ;;  %v2905_v32 = vadd.f32 %v11926_v35, %v2593_v45 }
 0x53e   : > { %4007 = vst.msk [vmem:[#allocation3 + $0x138] sm:$0xff] %vm307_vm3, %v3966_v8  ;;  %v3840_v63 = vadd.f32 %v9795_v15, %v3528_v14  ;;  %v10140_v17 = vpop.f32.mrf.mxu0  ;;  %7460 = vmatmul.msk.bf16.gmra.mxu3 %vm307_vm3, %v4059_v52  ;;  %v4141_v9 = vpack.c.bf16 %v4119_v6, %v4118_v61  ;;  %v4590_v12 = vld [vmem:[#allocation3 + $0x12f] sm:$0xff]  ;;  %v10152_v51 = vpop.f32.mrf.mxu1  ;;  %v11928_v52 = vld [vmem:[#allocation28_spill] sm:$0xff] }
 0x53f   : > { %11923 = vst [vmem:[#allocation85_spill] sm:$0xff] %v10140_v17  ;;  %v10143_v2 = vpack.c.bf16 %v4590_v12, %v4589_v59  ;;  %v11929_v59 = vld [vmem:[#allocation180_spill] sm:$0xff]  ;;  %v11931_v12 = vld [vmem:[#allocation113_spill] sm:$0xff]  ;;  %v11933_v35 = vld [vmem:[#allocation182_spill] sm:$0xff] }
 0x540   : > { %v3885_v23 = vadd.f32 %v9914_v39, %v3840_v63  ;;  %7435 = vmatmul.msk.bf16.gmra.mxu2 %vm307_vm3, %v4141_v9  ;;  %v2594_v63 = vadd.f32 %v11929_v59, %v2282_v62  ;;  %v2283_v54 = vadd.f32 %v11932_v57, %v11931_v12  ;;  %v4027_v17 = vld [vmem:[#allocation3 + $0x7d] sm:$0xff] }
 0x541   : > { %7517 = vmatmul.msk.bf16.gmra.mxu0 %vm307_vm3, %v10143_v2  ;;  %v3170_v15 = vpop.f32.mrf.mxu3 }
 0x542   : > { %v3926_v58 = vmax.f32 %v3885_v23, 0.0  ;;  %v3217_v8 = vadd.f32 %v3170_v15, %v2905_v32  ;;  %v2906_v32 = vadd.f32 %v11933_v35, %v2594_v63 }
 0x543   : > { %v10154_v14 = vpop.f32.mrf.mxu2 }
 0x544   : > { %11927 = vst [vmem:[#allocation6_spill] sm:$0xff] %v10154_v14  ;;  %v3967_v61 = vmul.f32 %v3926_v58, %v11928_v52  ;;  %v3529_v6 = vadd.f32 %v9672_v43, %v3217_v8  ;;  %v4026_v52 = vld [vmem:[#allocation3 + $0x75] sm:$0xff] }
 0x545   : > { %v4060_v59 = vpack.c.bf16 %v4027_v17, %v4026_v52  ;;  %v4120_v63 = vld [vmem:[#allocation3 + $0x136] sm:$0xff] }
 0x546   : > { %4008 = vst.msk [vmem:[#allocation3 + $0x140] sm:$0xff] %vm307_vm3, %v3967_v61  ;;  %v3841_v45 = vadd.f32 %v9810_v41, %v3529_v6  ;;  %v10161_v9 = vpop.f32.mrf.mxu0  ;;  %v10167_v58 = vpop.f32.mrf.mxu1  ;;  %v11936_v61 = vld [vmem:[#allocation32_spill] sm:$0xff] }
 0x547   : > { %11930 = vst [vmem:[#allocation86_spill] sm:$0xff] %v10161_v9  ;;  %v11937_v9 = vld [vmem:[#allocation183_spill] sm:$0xff] }
 0x548   : > { %v3886_v23 = vadd.f32 %v9914_v39, %v3841_v45  ;;  %11934 = vst [vmem:[#allocation54_spill] sm:$0xff] %v10167_v58  ;;  %v2595_v12 = vadd.f32 %v11937_v9, %v2283_v54  ;;  %7559 = vmatmul.msk.bf16.gmra.mxu1 %vm307_vm3, %v10067_v53  ;;  %v11939_v53 = vld [vmem:[#allocation185_spill] sm:$0xff] }
 0x549   : > { %v3172_v15 = vpop.f32.mrf.mxu3  ;;  %v5815_v58 = vld [vmem:[#allocation3 + $0x99] sm:$0xff] }
 0x54a   : > { %v3927_v43 = vmax.f32 %v3886_v23, 0.0  ;;  %v3218_v8 = vadd.f32 %v3172_v15, %v2906_v32  ;;  %v4591_v32 = vld [vmem:[#allocation3 + $0x137] sm:$0xff]  ;;  %v2907_v9 = vadd.f32 %v11939_v53, %v2595_v12  ;;  %v11946_v53 = vld [vmem:[#allocation41_spill] sm:$0xff] }
 0x54b   : > { %v10169_v62 = vpop.f32.mrf.mxu2 }
 0x54c   : > { %11935 = vst [vmem:[#allocation88_spill] sm:$0xff] %v10169_v62  ;;  %v3968_v41 = vmul.f32 %v3927_v43, %v11936_v61  ;;  %v3530_v6 = vadd.f32 %v9696_v50, %v3218_v8  ;;  %v11942_v61 = vld [vmem:[#allocation42_spill] sm:$0xff] }
 0x54d   : > { %v4121_v45 = vld [vmem:[#allocation3 + $0x13e] sm:$0xff]  ;;  %v5805_v62 = vld [vmem:[#allocation3 + $0x49] sm:$0xff] }
 0x54e   : > { %4009 = vst.msk [vmem:[#allocation3 + $0x148] sm:$0xff] %vm307_vm3, %v3968_v41  ;;  %v3842_v57 = vadd.f32 %v9833_v27, %v3530_v6  ;;  %v10178_v23 = vpop.f32.mrf.mxu0  ;;  %7461 = vmatmul.msk.bf16.gmra.mxu3 %vm307_vm3, %v4060_v59  ;;  %v4142_v35 = vpack.c.bf16 %v4121_v45, %v4120_v63  ;;  %v4592_v15 = vld [vmem:[#allocation3 + $0x13f] sm:$0xff]  ;;  %v10188_v27 = vpop.f32.mrf.mxu1 }
 0x54f   : > { %11938 = vst [vmem:[#allocation9_spill] sm:$0xff] %v10178_v23  ;;  %v10181_v50 = vpack.c.bf16 %v4592_v15, %v4591_v32  ;;  %v4034_v23 = vld [vmem:[#allocation3 + $0xb5] sm:$0xff] }
 0x550   : > { %v3887_v17 = vadd.f32 %v9914_v39, %v3842_v57  ;;  %7436 = vmatmul.msk.bf16.gmra.mxu2 %vm307_vm3, %v4142_v35  ;;  %11940 = vst [vmem:[#allocation89_spill] sm:$0xff] %v10188_v27  ;;  %v4029_v57 = vld [vmem:[#allocation3 + $0x8d] sm:$0xff] }
 0x551   : > { %7518 = vmatmul.msk.bf16.gmra.mxu0 %vm307_vm3, %v10181_v50  ;;  %v3175_v54 = vpop.f32.mrf.mxu3  ;;  %v5813_v27 = vld [vmem:[#allocation3 + $0x89] sm:$0xff] }
 0x552   : > { %v3928_v43 = vmax.f32 %v3887_v17, 0.0  ;;  %v3219_v8 = vadd.f32 %v3175_v54, %v2907_v9  ;;  %v4028_v17 = vld [vmem:[#allocation3 + $0x85] sm:$0xff] }
 0x553   : > { %v10190_v52 = vpop.f32.mrf.mxu2  ;;  %v4061_v54 = vpack.c.bf16 %v4029_v57, %v4028_v17 }
 0x554   : > { %11941 = vst [vmem:[#allocation55_spill] sm:$0xff] %v10190_v52  ;;  %v3969_v41 = vmul.f32 %v3928_v43, %v11942_v61  ;;  %v3531_v6 = vadd.f32 %v9711_v18, %v3219_v8 }
 0x555   : > { %v4122_v18 = vld [vmem:[#allocation3 + $0x146] sm:$0xf] }
 0x556   : > { %4010 = vst.msk [vmem:[#allocation3 + $0x150] sm:$0xff] %vm307_vm3, %v3969_v41  ;;  %v3843_v59 = vadd.f32 %v9854_v46, %v3531_v6  ;;  %v10196_v63 = vpop.f32.mrf.mxu0  ;;  %v10199_v35 = vpop.f32.mrf.mxu1  ;;  %v4593_v46 = vld [vmem:[#allocation3 + $0x147] sm:$0xf]  ;;  %v4143_v8 = vpack.c.bf16 %v4122_v18, %v4122_v18  ;;  %v7876_v6 = vld [vmem:[%s11441_s6 + $0xd0] sm:$0xff] }
 0x557   : > { %11943 = vst [vmem:[#allocation91_spill] sm:$0xff] %v10196_v63  ;;  %v4614_v61 = vpack.c.bf16 %v4593_v46, %v4593_v46  ;;  %v4030_v18 = vld [vmem:[#allocation3 + $0x95] sm:$0xff]  ;;  %v5178_v46 = vld [vmem:[#allocation3 + $0x20] sm:$0xff] }
 0x558   : > { %v3888_v12 = vadd.f32 %v9914_v39, %v3843_v59  ;;  %11944 = vst [vmem:[#allocation10_spill] sm:$0xff] %v10199_v35  ;;  %7560 = vmatmul.msk.bf16.gmra.mxu1 %vm307_vm3, %v10105_v49  ;;  %v7877_v39 = vld [vmem:[%s11441_s6 + $0xd8] sm:$0xff] }
 0x559   : > { %v3177_v45 = vpop.f32.mrf.mxu3  ;;  %5963 = vmatpush.bf16.msra.mxu0 %v7877_v39 }
 0x55a   : > { %v3929_v32 = vmax.f32 %v3888_v12, 0.0  ;;  %v7875_v12 = vld [vmem:[%s11441_s6 + $0xc8] sm:$0xff] }
 0x55b   : > { %v10201_v15 = vpop.f32.mrf.mxu2 }
 0x55c   : > { %11945 = vst [vmem:[#allocation92_spill] sm:$0xff] %v10201_v15  ;;  %v3970_v9 = vmul.f32 %v3929_v32, %v11946_v53  ;;  %v4031_v32 = vld [vmem:[#allocation3 + $0x9d] sm:$0xff]  ;;  %v7878_v15 = vld [vmem:[%s11441_s6 + $0xe0] sm:$0xff] }
 0x55d   : > { %5964 = vmatpush.bf16.msra.mxu0 %v7876_v6  ;;  %v7873_v53 = vld [vmem:[%s11441_s6 + $0xb8] sm:$0xff]  ;;  %v4062_v39 = vpack.c.bf16 %v4031_v32, %v4030_v18 }
 0x55e   : > { %4011 = vst.msk [vmem:[#allocation3 + $0x158] sm:$0xf] %vm354_vm4, %v3970_v9  ;;  %v10210_v43 = vpop.f32.mrf.mxu0  ;;  %7462 = vmatmul.msk.bf16.gmra.mxu3 %vm307_vm3, %v4061_v54  ;;  %v10217_v41 = vpop.f32.mrf.mxu1  ;;  %v7874_v9 = vld [vmem:[%s11441_s6 + $0xc0] sm:$0xff]  ;;  %v7885_v6 = vld [vmem:[%s11441_s6 + $0x118] sm:$0xff] }
 0x55f   : > { %11947 = vst [vmem:[#allocation56_spill] sm:$0xff] %v10210_v43  ;;  %5651 = vmatpush.bf16.msra.mxu3 %v7873_v53  ;;  %6587 = vmatpush.bf16.msra.mxu2 %v7885_v6  ;;  %v7881_v53 = vld [vmem:[%s11441_s6 + $0xf8] sm:$0xff] }
 0x560   : > { %7437 = vmatmul.msk.bf16.gmra.mxu2 %vm307_vm3, %v4143_v8  ;;  %11948 = vst [vmem:[#allocation94_spill] sm:$0xff] %v10217_v41  ;;  %v5802_v8 = vld [vmem:[#allocation3 + $0x31] sm:$0xff]  ;;  %6275 = vmatpush.bf16.msra.mxu1 %v7881_v53 }
 0x561   : > { %7519 = vmatmul.msk.bf16.gmra.mxu0 %vm307_vm3, %v4614_v61  ;;  %v10215_v49 = vpop.f32.mrf.mxu3  ;;  %v5177_v61 = vld [vmem:[#allocation3 + $0x18] sm:$0xff] }
 0x562   : > { %5965 = vmatpush.bf16.msra.mxu0 %v7875_v12  ;;  %v5810_v41 = vld [vmem:[#allocation3 + $0x71] sm:$0xff] }
 0x563   : > { %v10222_v59 = vpop.f32.mrf.mxu2  ;;  %v10354_v35 = vpack.c.bf16 %v5810_v41, %v5809_v5  ;;  %v6115_v5 = vld [vmem:[#allocation3 + $0x3a] sm:$0xff] }
 0x564   : > { %11949 = vst [vmem:[#allocation11_spill] sm:$0xff] %v10222_v59  ;;  %v5179_v59 = vld [vmem:[#allocation3 + $0x28] sm:$0xff] }
 0x565   : > { %11979 = vst [vmem:[#allocation114_spill] sm:$0xff] %v10354_v35 }
 0x566   : > { %v10227_v45 = vpop.f32.mrf.mxu0  ;;  %v10231_v17 = vpop.f32.mrf.mxu1  ;;  %5966 = vmatpush.bf16.msra.mxu0 %v7874_v9 }
 0x567   : > { %11950 = vst [vmem:[#allocation95_spill] sm:$0xff] %v10227_v45  ;;  %v5218_v45 = vpack.c.bf16 %v5178_v46, %v5177_v61  ;;  %v4033_v46 = vld [vmem:[#allocation3 + $0xad] sm:$0xff] }
 0x568   : > { %11951 = vst [vmem:[#allocation57_spill] sm:$0xff] %v10231_v17  ;;  %7561 = vmatmul.msk.bf16.gmra.mxu1 %vm307_vm3, %v10143_v2  ;;  %v5180_v61 = vld [vmem:[#allocation3 + $0x30] sm:$0xff] }
 0x569   : > { %v10229_v57 = vpop.f32.mrf.mxu3  ;;  %v5219_v53 = vpack.c.bf16 %v5180_v61, %v5179_v59  ;;  %v7879_v59 = vld [vmem:[%s11441_s6 + $0xe8] sm:$0xff] }
 0x56b   : > { %v10239_v54 = vpop.f32.mrf.mxu2 }
 0x56c   : > { %11952 = vst [vmem:[#allocation97_spill] sm:$0xff] %v10239_v54  ;;  %v5801_v54 = vld [vmem:[#allocation3 + $0x29] sm:$0xff] }
 0x56d   : > { %v10249_v43 = vpack.c.bf16 %v5802_v8, %v5801_v54  ;;  %v4032_v8 = vld [vmem:[#allocation3 + $0xa5] sm:$0xff] }
 0x56e   : > { %v10246_v12 = vpop.f32.mrf.mxu0  ;;  %7463 = vmatmul.msk.bf16.gmra.mxu3 %vm307_vm3, %v4062_v39  ;;  %v10256_v32 = vpop.f32.mrf.mxu1  ;;  %v4063_v6 = vpack.c.bf16 %v4033_v46, %v4032_v8 }
 0x56f   : > { %11953 = vst [vmem:[#allocation12_spill] sm:$0xff] %v10246_v12  ;;  %v5804_v12 = vld [vmem:[#allocation3 + $0x41] sm:$0xff] }
 0x570   : > { %7589 = vmatmul.msk.bf16.vlgmr.msrb.gmra.mxu2 %vm307_vm3, %v5218_v45  ;;  %11954 = vst [vmem:[#allocation98_spill] sm:$0xff] %v10256_v32 }
 0x571   : > { %7679 = vmatmul.msk.bf16.vlgmr.msra.gmra.mxu0 %vm307_vm3, %v10249_v43  ;;  %v10254_v2 = vpop.f32.mrf.mxu3 }
 0x573   : > { %v10261_v9 = vpop.f32.mrf.mxu2 }
 0x574   : > { %11955 = vst [vmem:[#allocation148_spill] sm:$0xff] %v10261_v9 }
 0x576   : > { %v10263_v18 = vpop.f32.mrf.mxu0  ;;  %v10267_v45 = vpop.f32.mrf.mxu1 }
 0x577   : > { %11956 = vst [vmem:[#allocation58_spill] sm:$0xff] %v10263_v18  ;;  %v5803_v18 = vld [vmem:[#allocation3 + $0x39] sm:$0xff] }
 0x578   : > { %11957 = vst [vmem:[#allocation100_spill] sm:$0xff] %v10267_v45  ;;  %7562 = vmatmul.msk.bf16.gmra.mxu1 %vm307_vm3, %v10181_v50  ;;  %v10276_v9 = vpack.c.bf16 %v5804_v12, %v5803_v18  ;;  %v7880_v50 = vld [vmem:[%s11441_s6 + $0xf0] sm:$0xff]  ;;  %v4904_v18 = vld [vmem:[#allocation3 + $0x14f] sm:$0xff] }
 0x579   : > { %v10265_v54 = vpop.f32.mrf.mxu3  ;;  %6276 = vmatpush.bf16.msra.mxu1 %v7880_v50 }
 0x57b   : > { %v10269_v39 = vpop.f32.mrf.mxu2 }
 0x57c   : > { %11958 = vst [vmem:[#allocation14_spill] sm:$0xff] %v10269_v39 }
 0x57d   : > { %6277 = vmatpush.bf16.msra.mxu1 %v7879_v59  ;;  %v5181_v59 = vld [vmem:[#allocation3 + $0x38] sm:$0xff] }
 0x57e   : > { %v10273_v63 = vpop.f32.mrf.mxu0  ;;  %7464 = vmatmul.msk.bf16.gmra.mxu3 %vm307_vm3, %v4063_v6  ;;  %v10283_v46 = vpop.f32.mrf.mxu1  ;;  %v4035_v6 = vld [vmem:[#allocation3 + $0xbd] sm:$0xff] }
 0x57f   : > { %11959 = vst [vmem:[#allocation101_spill] sm:$0xff] %v10273_v63  ;;  %v4903_v63 = vld [vmem:[#allocation3 + $0x147] sm:$0xff]  ;;  %v4064_v52 = vpack.c.bf16 %v4035_v6, %v4034_v23 }
 0x580   : > { %7590 = vmatmul.msk.bf16.gmra.mxu2 %vm307_vm3, %v5219_v53  ;;  %11960 = vst [vmem:[#allocation151_spill] sm:$0xff] %v10283_v46  ;;  %v5182_v46 = vld [vmem:[#allocation3 + $0x40] sm:$0xff] }
 0x581   : > { %7680 = vmatmul.msk.bf16.gmra.mxu0 %vm307_vm3, %v10276_v9  ;;  %v10281_v39 = vpop.f32.mrf.mxu3  ;;  %6278 = vmatpush.bf16.msra.mxu1 %v7878_v15 }
 0x583   : > { %v10288_v8 = vpop.f32.mrf.mxu2 }
 0x584   : > { %11961 = vst [vmem:[#allocation59_spill] sm:$0xff] %v10288_v8  ;;  %v4925_v8 = vpack.c.bf16 %v4904_v18, %v4903_v63  ;;  %v4905_v18 = vld [vmem:[#allocation3 + $0x157] sm:$0xf] }
 0x586   : > { %v10293_v12 = vpop.f32.mrf.mxu0  ;;  %v10297_v53 = vpop.f32.mrf.mxu1 }
 0x587   : > { %11962 = vst [vmem:[#allocation103_spill] sm:$0xff] %v10293_v12  ;;  %v5806_v12 = vld [vmem:[#allocation3 + $0x51] sm:$0xff] }
 0x588   : > { %11963 = vst [vmem:[#allocation16_spill] sm:$0xff] %v10297_v53  ;;  %7563 = vmatmul.msk.bf16.gmra.mxu1 %vm307_vm3, %v4925_v8  ;;  %v5220_v53 = vpack.c.bf16 %v5182_v46, %v5181_v59  ;;  %v10308_v32 = vpack.c.bf16 %v5806_v12, %v5805_v62  ;;  %v4926_v62 = vpack.c.bf16 %v4905_v18, %v4905_v18  ;;  %v5184_v59 = vld [vmem:[#allocation3 + $0x50] sm:$0xff] }
 0x589   : > { %v10295_v61 = vpop.f32.mrf.mxu3 }
 0x58b   : > { %v10302_v50 = vpop.f32.mrf.mxu2 }
 0x58c   : > { %11964 = vst [vmem:[#allocation104_spill] sm:$0xff] %v10302_v50  ;;  %v5808_v50 = vld [vmem:[#allocation3 + $0x61] sm:$0xff] }
 0x58e   : > { %v10305_v45 = vpop.f32.mrf.mxu0  ;;  %7465 = vmatmul.msk.bf16.gmra.mxu3 %vm307_vm3, %v4064_v52  ;;  %v10315_v23 = vpop.f32.mrf.mxu1  ;;  %v4037_v52 = vld [vmem:[#allocation3 + $0xcd] sm:$0xff] }
 0x58f   : > { %11965 = vst [vmem:[#allocation154_spill] sm:$0xff] %v10305_v45 }
 0x590   : > { %7591 = vmatmul.msk.bf16.gmra.mxu2 %vm307_vm3, %v5220_v53  ;;  %11966 = vst [vmem:[#allocation60_spill] sm:$0xff] %v10315_v23  ;;  %v4036_v53 = vld [vmem:[#allocation3 + $0xc5] sm:$0xff] }
 0x591   : > { %7681 = vmatmul.msk.bf16.gmra.mxu0 %vm307_vm3, %v10308_v32  ;;  %v10313_v63 = vpop.f32.mrf.mxu3  ;;  %v4065_v45 = vpack.c.bf16 %v4037_v52, %v4036_v53  ;;  %v5183_v23 = vld [vmem:[#allocation3 + $0x48] sm:$0xff] }
 0x593   : > { %v10317_v15 = vpop.f32.mrf.mxu2 }
 0x594   : > { %11967 = vst [vmem:[#allocation106_spill] sm:$0xff] %v10317_v15  ;;  %v5807_v15 = vld [vmem:[#allocation3 + $0x59] sm:$0xff] }
 0x595   : > { %v10331_v17 = vpack.c.bf16 %v5808_v50, %v5807_v15  ;;  %v6113_v50 = vld [vmem:[#allocation3 + $0x2a] sm:$0xff] }
 0x596   : > { %v10319_v8 = vpop.f32.mrf.mxu0  ;;  %v10323_v46 = vpop.f32.mrf.mxu1 }
 0x597   : > { %11968 = vst [vmem:[#allocation17_spill] sm:$0xff] %v10319_v8  ;;  %v5221_v8 = vpack.c.bf16 %v5184_v59, %v5183_v23  ;;  %v4038_v59 = vld [vmem:[#allocation3 + $0xd5] sm:$0xff] }
 0x598   : > { %11969 = vst [vmem:[#allocation107_spill] sm:$0xff] %v10323_v46  ;;  %7564 = vmatmul.msk.bf16.gmra.mxu1 %vm307_vm3, %v4926_v62  ;;  %v5186_v46 = vld [vmem:[#allocation3 + $0x60] sm:$0xff] }
 0x599   : > { %v10321_v6 = vpop.f32.mrf.mxu3  ;;  %11972 = vst [vmem:[#allocation109_spill] sm:$0xff] %v10331_v17 }
 0x59b   : > { %v10325_v12 = vpop.f32.mrf.mxu2 }
 0x59c   : > { %11970 = vst [vmem:[#allocation157_spill] sm:$0xff] %v10325_v12 }
 0x59e   : > { %v10328_v14 = vpop.f32.mrf.mxu0  ;;  %7466 = vmatmul.msk.bf16.gmra.mxu3 %vm307_vm3, %v4065_v45  ;;  %v10338_v52 = vpop.f32.mrf.mxu1  ;;  %v4039_v45 = vld [vmem:[#allocation3 + $0xdd] sm:$0xff] }
 0x59f   : > { %11971 = vst [vmem:[#allocation61_spill] sm:$0xff] %v10328_v14  ;;  %v6114_v14 = vld [vmem:[#allocation3 + $0x32] sm:$0xff]  ;;  %v4066_v38 = vpack.c.bf16 %v4039_v45, %v4038_v59  ;;  %v6116_v59 = vld [vmem:[#allocation3 + $0x42] sm:$0xff] }
 0x5a0   : > { %7592 = vmatmul.msk.bf16.gmra.mxu2 %vm307_vm3, %v5221_v8  ;;  %11973 = vst [vmem:[#allocation19_spill] sm:$0xff] %v10338_v52  ;;  %v6154_v15 = vpack.c.bf16 %v6114_v14, %v6113_v50  ;;  %v5185_v52 = vld [vmem:[#allocation3 + $0x58] sm:$0xff]  ;;  %v6155_v41 = vpack.c.bf16 %v6116_v59, %v6115_v5 }
 0x5a1   : > { %7682 = vmatmul.msk.bf16.gmra.mxu0 %vm307_vm3, %v10331_v17  ;;  %v10336_v18 = vpop.f32.mrf.mxu3  ;;  %v5814_v17 = vld [vmem:[#allocation3 + $0x91] sm:$0xff] }
 0x5a2   : > { %v10406_v26 = vpack.c.bf16 %v5814_v17, %v5813_v27  ;;  %v6119_v27 = vld [vmem:[#allocation3 + $0x5a] sm:$0xff] }
 0x5a3   : > { %v10340_v53 = vpop.f32.mrf.mxu2 }
 0x5a4   : > { %11974 = vst [vmem:[#allocation110_spill] sm:$0xff] %v10340_v53 }
 0x5a5   : > { %11993 = vst [vmem:[#allocation65_spill] sm:$0xff] %v10406_v26 }
 0x5a6   : > { %v10342_v62 = vpop.f32.mrf.mxu0  ;;  %v10346_v23 = vpop.f32.mrf.mxu1 }
 0x5a7   : > { %11975 = vst [vmem:[#allocation160_spill] sm:$0xff] %v10342_v62  ;;  %v5222_v62 = vpack.c.bf16 %v5186_v46, %v5185_v52 }
 0x5a8   : > { %11976 = vst [vmem:[#allocation62_spill] sm:$0xff] %v10346_v23  ;;  %7724 = vmatmul.msk.bf16.vlgmr.msra.gmra.mxu1 %vm307_vm3, %v6154_v15 }
 0x5a9   : > { %v10344_v12 = vpop.f32.mrf.mxu3 }
 0x5ab   : > { %v10348_v8 = vpop.f32.mrf.mxu2 }
 0x5ac   : > { %11977 = vst [vmem:[#allocation112_spill] sm:$0xff] %v10348_v8  ;;  %v5188_v8 = vld [vmem:[#allocation3 + $0x70] sm:$0xff] }
 0x5ae   : > { %v10351_v53 = vpop.f32.mrf.mxu0  ;;  %7467 = vmatmul.msk.bf16.gmra.mxu3 %vm307_vm3, %v4066_v38  ;;  %v10361_v45 = vpop.f32.mrf.mxu1  ;;  %v4041_v38 = vld [vmem:[#allocation3 + $0xed] sm:$0xff] }
 0x5af   : > { %11978 = vst [vmem:[#allocation22_spill] sm:$0xff] %v10351_v53 }
 0x5b0   : > { %7593 = vmatmul.msk.bf16.gmra.mxu2 %vm307_vm3, %v5222_v62  ;;  %11980 = vst [vmem:[#allocation163_spill] sm:$0xff] %v10361_v45  ;;  %v4040_v62 = vld [vmem:[#allocation3 + $0xe5] sm:$0xff] }
 0x5b1   : > { %7683 = vmatmul.msk.bf16.gmra.mxu0 %vm307_vm3, %v10354_v35  ;;  %v10359_v14 = vpop.f32.mrf.mxu3  ;;  %v4067_v23 = vpack.c.bf16 %v4041_v38, %v4040_v62  ;;  %v5812_v35 = vld [vmem:[#allocation3 + $0x81] sm:$0xff] }
 0x5b2   : > { %v5187_v45 = vld [vmem:[#allocation3 + $0x68] sm:$0xff]  ;;  %v10380_v59 = vpack.c.bf16 %v5812_v35, %v5811_v44  ;;  %v6118_v44 = vld [vmem:[#allocation3 + $0x52] sm:$0xff] }
 0x5b3   : > { %v10363_v50 = vpop.f32.mrf.mxu2 }
 0x5b4   : > { %11981 = vst [vmem:[#allocation63_spill] sm:$0xff] %v10363_v50 }
 0x5b5   : > { %11986 = vst [vmem:[#allocation166_spill] sm:$0xff] %v10380_v59 }
 0x5b6   : > { %v10365_v15 = vpop.f32.mrf.mxu0  ;;  %v10369_v46 = vpop.f32.mrf.mxu1 }
 0x5b7   : > { %11982 = vst [vmem:[#allocation116_spill] sm:$0xff] %v10365_v15  ;;  %v7872_v15 = vld [vmem:[%s11441_s6 + $0xb0] sm:$0xff] }
 0x5b8   : > { %11983 = vst [vmem:[#allocation24_spill] sm:$0xff] %v10369_v46  ;;  %7725 = vmatmul.msk.bf16.gmra.mxu1 %vm307_vm3, %v6155_v41  ;;  %v5223_v46 = vpack.c.bf16 %v5188_v8, %v5187_v45  ;;  %5652 = vmatpush.bf16.msra.mxu3 %v7872_v15  ;;  %v7884_v41 = vld [vmem:[%s11441_s6 + $0x110] sm:$0xff]  ;;  %v6117_v15 = vld [vmem:[#allocation3 + $0x4a] sm:$0xff] }
 0x5b9   : > { %v10367_v53 = vpop.f32.mrf.mxu3  ;;  %6588 = vmatpush.bf16.msra.mxu2 %v7884_v41  ;;  %v4043_v8 = vld [vmem:[#allocation3 + $0xfd] sm:$0xff] }
 0x5bb   : > { %v10371_v52 = vpop.f32.mrf.mxu2 }
 0x5bc   : > { %11984 = vst [vmem:[#allocation189_spill] sm:$0xff] %v10371_v52  ;;  %v4042_v52 = vld [vmem:[#allocation3 + $0xf5] sm:$0xff] }
 0x5be   : > { %v10377_v50 = vpop.f32.mrf.mxu0  ;;  %7468 = vmatmul.msk.bf16.gmra.mxu3 %vm307_vm3, %v4067_v23  ;;  %v10387_v5 = vpop.f32.mrf.mxu1 }
 0x5bf   : > { %11985 = vst [vmem:[#allocation117_spill] sm:$0xff] %v10377_v50 }
 0x5c0   : > { %7594 = vmatmul.msk.bf16.gmra.mxu2 %vm307_vm3, %v5223_v46  ;;  %11987 = vst [vmem:[#allocation64_spill] sm:$0xff] %v10387_v5  ;;  %v6156_v46 = vpack.c.bf16 %v6118_v44, %v6117_v15  ;;  %v5190_v5 = vld [vmem:[#allocation3 + $0x80] sm:$0xff] }
 0x5c1   : > { %7684 = vmatmul.msk.bf16.gmra.mxu0 %vm307_vm3, %v10380_v59  ;;  %v10385_v38 = vpop.f32.mrf.mxu3  ;;  %v4068_v59 = vpack.c.bf16 %v4043_v8, %v4042_v52 }
 0x5c3   : > { %v10392_v62 = vpop.f32.mrf.mxu2 }
 0x5c4   : > { %11988 = vst [vmem:[#allocation119_spill] sm:$0xff] %v10392_v62  ;;  %v5189_v62 = vld [vmem:[#allocation3 + $0x78] sm:$0xff] }
 0x5c6   : > { %v10394_v23 = vpop.f32.mrf.mxu0  ;;  %v10398_v45 = vpop.f32.mrf.mxu1 }
 0x5c7   : > { %11989 = vst [vmem:[#allocation26_spill] sm:$0xff] %v10394_v23  ;;  %v5224_v23 = vpack.c.bf16 %v5190_v5, %v5189_v62 }
 0x5c8   : > { %11990 = vst [vmem:[#allocation191_spill] sm:$0xff] %v10398_v45  ;;  %7726 = vmatmul.msk.bf16.gmra.mxu1 %vm307_vm3, %v6156_v46  ;;  %v6120_v46 = vld [vmem:[#allocation3 + $0x62] sm:$0xff] }
 0x5c9   : > { %v10396_v35 = vpop.f32.mrf.mxu3  ;;  %v6157_v17 = vpack.c.bf16 %v6120_v46, %v6119_v27 }
 0x5cb   : > { %v10400_v50 = vpop.f32.mrf.mxu2 }
 0x5cc   : > { %11991 = vst [vmem:[#allocation120_spill] sm:$0xff] %v10400_v50  ;;  %v5192_v50 = vld [vmem:[#allocation3 + $0x90] sm:$0xff] }
 0x5ce   : > { %v10403_v41 = vpop.f32.mrf.mxu0  ;;  %7469 = vmatmul.msk.bf16.gmra.mxu3 %vm307_vm3, %v4068_v59  ;;  %v10413_v52 = vpop.f32.mrf.mxu1  ;;  %v4045_v59 = vld [vmem:[#allocation3 + $0x10d] sm:$0xff] }
 0x5cf   : > { %11992 = vst [vmem:[#allocation169_spill] sm:$0xff] %v10403_v41 }
 0x5d0   : > { %7595 = vmatmul.msk.bf16.gmra.mxu2 %vm307_vm3, %v5224_v23  ;;  %11994 = vst [vmem:[#allocation122_spill] sm:$0xff] %v10413_v52  ;;  %v4044_v23 = vld [vmem:[#allocation3 + $0x105] sm:$0xff] }
 0x5d1   : > { %7685 = vmatmul.msk.bf16.gmra.mxu0 %vm307_vm3, %v10406_v26  ;;  %v10411_v44 = vpop.f32.mrf.mxu3  ;;  %v4069_v45 = vpack.c.bf16 %v4045_v59, %v4044_v23  ;;  %v5816_v26 = vld [vmem:[#allocation3 + $0xa1] sm:$0xff]  ;;  %v6122_v23 = vld [vmem:[#allocation3 + $0x72] sm:$0xff] }
 0x5d2   : > { %v5191_v52 = vld [vmem:[#allocation3 + $0x88] sm:$0xff] }
 0x5d3   : > { %v10415_v8 = vpop.f32.mrf.mxu2 }
 0x5d4   : > { %11995 = vst [vmem:[#allocation27_spill] sm:$0xff] %v10415_v8 }
 0x5d6   : > { %v10417_v15 = vpop.f32.mrf.mxu0  ;;  %v10421_v5 = vpop.f32.mrf.mxu1 }
 0x5d7   : > { %11996 = vst [vmem:[#allocation193_spill] sm:$0xff] %v10417_v15  ;;  %v5225_v15 = vpack.c.bf16 %v5192_v50, %v5191_v52  ;;  %v6121_v50 = vld [vmem:[#allocation3 + $0x6a] sm:$0xff] }
 0x5d8   : > { %11998 = vst [vmem:[#allocation172_spill] sm:$0xff] %v10421_v5  ;;  %7727 = vmatmul.msk.bf16.gmra.mxu1 %vm307_vm3, %v6157_v17  ;;  %v6158_v52 = vpack.c.bf16 %v6122_v23, %v6121_v50  ;;  %v5194_v5 = vld [vmem:[#allocation3 + $0xa0] sm:$0xff] }
 0x5d9   : > { %v10419_v41 = vpop.f32.mrf.mxu3 }
 0x5da   : > { %11997 = vst [vmem:[#allocation124_spill] sm:$0xff] %v10419_v41  ;;  %v10429_v41 = vpack.c.bf16 %v5816_v26, %v5815_v58  ;;  %v4450_v26 = vadd.f32 %v10215_v49, %v9755_v36  ;;  %v4452_v49 = vadd.f32 %v10229_v57, %v9774_v0 }
 0x5db   : > { %v10423_v62 = vpop.f32.mrf.mxu2 }
 0x5dc   : > { %11999 = vst [vmem:[#allocation66_spill] sm:$0xff] %v10423_v62  ;;  %v4046_v62 = vld [vmem:[#allocation3 + $0x115] sm:$0xff] }
 0x5dd   : > { %12001 = vst [vmem:[#allocation30_spill] sm:$0xff] %v10429_v41 }
 0x5de   : > { %v10426_v8 = vpop.f32.mrf.mxu0  ;;  %7470 = vmatmul.msk.bf16.gmra.mxu3 %vm307_vm3, %v4069_v45  ;;  %v10436_v59 = vpop.f32.mrf.mxu1  ;;  %v4047_v45 = vld [vmem:[#allocation3 + $0x11d] sm:$0xff] }
 0x5df   : > { %12000 = vst [vmem:[#allocation126_spill] sm:$0xff] %v10426_v8 }
 0x5e0   : > { %7596 = vmatmul.msk.bf16.gmra.mxu2 %vm307_vm3, %v5225_v15  ;;  %12003 = vst [vmem:[#allocation175_spill] sm:$0xff] %v10436_v59 }
 0x5e1   : > { %7686 = vmatmul.msk.bf16.gmra.mxu0 %vm307_vm3, %v10429_v41  ;;  %v10434_v46 = vpop.f32.mrf.mxu3  ;;  %v4070_v41 = vpack.c.bf16 %v4047_v45, %v4046_v62 }
 0x5e2   : > { %12002 = vst [vmem:[#allocation127_spill] sm:$0xff] %v10434_v46  ;;  %v5818_v46 = vld [vmem:[#allocation3 + $0xb1] sm:$0xff] }
 0x5e3   : > { %v10438_v27 = vpop.f32.mrf.mxu2 }
 0x5e4   : > { %12004 = vst [vmem:[#allocation67_spill] sm:$0xff] %v10438_v27  ;;  %v5193_v27 = vld [vmem:[#allocation3 + $0x98] sm:$0xff] }
 0x5e5   : > { %v5226_v59 = vpack.c.bf16 %v5194_v5, %v5193_v27  ;;  %v6124_v5 = vld [vmem:[#allocation3 + $0x82] sm:$0xff]  ;;  %v4455_v27 = vadd.f32 %v10254_v2, %v9797_v3  ;;  %v5819_v2 = vld [vmem:[#allocation3 + $0xb9] sm:$0xff] }
 0x5e6   : > { %v4822_v17 = vpop.f32.mrf.mxu0  ;;  %v10444_v58 = vpop.f32.mrf.mxu1 }
 0x5e7   : > { %v4824_v17 = vadd.f32 %v9743_v55, %v4450_v26  ;;  %v6123_v26 = vld [vmem:[#allocation3 + $0x7a] sm:$0xff] }
 0x5e8   : > { %7728 = vmatmul.msk.bf16.gmra.mxu1 %vm307_vm3, %v6158_v52  ;;  %v6159_v57 = vpack.c.bf16 %v6124_v5, %v6123_v26  ;;  %v5196_v52 = vld [vmem:[#allocation3 + $0xb0] sm:$0xff] }
 0x5e9   : > { %v10440_v8 = vpop.f32.mrf.mxu3  ;;  %v5136_v55 = vadd.f32 %v9893_v31, %v4824_v17  ;;  %v4048_v31 = vld [vmem:[#allocation3 + $0x125] sm:$0xff] }
 0x5ea   : > { %12005 = vst [vmem:[#allocation130_spill] sm:$0xff] %v10440_v8  ;;  %v5817_v8 = vld [vmem:[#allocation3 + $0xa9] sm:$0xff] }
 0x5eb   : > { %v4351_v15 = vpop.f32.mrf.mxu2  ;;  %v10449_v40 = vpack.c.bf16 %v5818_v46, %v5817_v8  ;;  %v4825_v8 = vadd.f32 %v9764_v10, %v4452_v49  ;;  %v5820_v10 = vld [vmem:[#allocation3 + $0xc1] sm:$0xff] }
 0x5ec   : > { %v5195_v49 = vld [vmem:[#allocation3 + $0xa8] sm:$0xff] }
 0x5ed   : > { %v5137_v0 = vadd.f32 %v9921_v24, %v4825_v8  ;;  %v5227_v3 = vpack.c.bf16 %v5196_v52, %v5195_v49  ;;  %v4457_v8 = vadd.f32 %v10265_v54, %v9812_v25  ;;  %v6125_v25 = vld [vmem:[#allocation3 + $0x8a] sm:$0xff]  ;;  %v4050_v49 = vld [vmem:[#allocation3 + $0x135] sm:$0xff] }
 0x5ee   : > { %7471 = vmatmul.msk.bf16.gmra.mxu3 %vm307_vm3, %v4070_v41  ;;  %v10458_v62 = vpop.f32.mrf.mxu1 }
 0x5ef   : > { %v4827_v26 = vadd.f32 %v9804_v37, %v4457_v8  ;;  %v5197_v8 = vld [vmem:[#allocation3 + $0xb8] sm:$0xff] }
 0x5f0   : > { %7597 = vmatmul.msk.bf16.gmra.mxu2 %vm307_vm3, %v5226_v59  ;;  %v4049_v59 = vld [vmem:[#allocation3 + $0x12d] sm:$0xff] }
 0x5f1   : > { %7687 = vmatmul.msk.bf16.gmra.mxu0 %vm307_vm3, %v10449_v40  ;;  %v10454_v36 = vpop.f32.mrf.mxu3  ;;  %v4071_v17 = vpack.c.bf16 %v4049_v59, %v4048_v31  ;;  %v4460_v31 = vadd.f32 %v10281_v39, %v9841_v29  ;;  %v5139_v54 = vadd.f32 %v9959_v60, %v4827_v26  ;;  %v4462_v26 = vadd.f32 %v10295_v61, %v9856_v48  ;;  %v12009_v48 = vld [vmem:[#allocation43_spill] sm:$0xff] }
 0x5f3   : > { %v5344_v23 = vpop.f32.mrf.mxu2  ;;  %v4828_v29 = vadd.f32 %v9821_v56, %v4460_v31  ;;  %v7883_v31 = vld [vmem:[%s11441_s6 + $0x108] sm:$0xff]  ;;  %v4829_v61 = vadd.f32 %v12009_v48, %v4462_v26  ;;  %v5199_v26 = vld [vmem:[#allocation3 + $0xc8] sm:$0xff] }
 0x5f4   : > { %v10461_v41 = vadd.f32 %v5344_v23, %v5136_v55  ;;  %v4826_v55 = vadd.f32 %v9783_v21, %v4455_v27  ;;  %v10476_v23 = vpack.c.bf16 %v5820_v10, %v5819_v2  ;;  %v5822_v2 = vld [vmem:[#allocation3 + $0xd1] sm:$0xff]  ;;  %6589 = vmatpush.bf16.msra.mxu2 %v7883_v31  ;;  %v5824_v31 = vld [vmem:[#allocation3 + $0xe1] sm:$0xff] }
 0x5f5   : > { %v5140_v56 = vadd.f32 %v9974_v4, %v4828_v29  ;;  %v4052_v4 = vld [vmem:[#allocation3 + $0x145] sm:$0xf]  ;;  %v5141_v29 = vadd.f32 %v9997_v20, %v4829_v61  ;;  %v12012_v48 = vld [vmem:[#allocation123_spill] sm:$0xff] }
 0x5f6   : > { %v10468_v45 = vpop.f32.mrf.mxu1  ;;  %v5138_v21 = vadd.f32 %v9936_v33, %v4826_v55  ;;  %v5198_v55 = vld [vmem:[#allocation3 + $0xc0] sm:$0xff]  ;;  %v12014_v61 = vld [vmem:[#allocation70_spill] sm:$0xff] }
 0x5f7   : > { %v5228_v39 = vpack.c.bf16 %v5198_v55, %v5197_v8  ;;  %v12010_v55 = vld [vmem:[#allocation68_spill] sm:$0xff] }
 0x5f8   : > { %7729 = vmatmul.msk.bf16.gmra.mxu1 %vm307_vm3, %v6159_v57  ;;  %v6127_v8 = vld [vmem:[#allocation3 + $0x9a] sm:$0xff] }
 0x5f9   : > { %v10464_v46 = vpop.f32.mrf.mxu3 }
 0x5fb   : > { %v5346_v50 = vpop.f32.mrf.mxu2 }
 0x5fc   : > { %v10471_v15 = vadd.f32 %v5346_v50, %v5137_v0  ;;  %v6126_v0 = vld [vmem:[#allocation3 + $0x92] sm:$0xff]  ;;  %v4051_v50 = vld [vmem:[#allocation3 + $0x13d] sm:$0xff] }
 0x5fd   : > { %v6160_v33 = vpack.c.bf16 %v6126_v0, %v6125_v25  ;;  %v4072_v37 = vpack.c.bf16 %v4051_v50, %v4050_v49  ;;  %v7871_v50 = vld [vmem:[%s11441_s6 + $0xa8] sm:$0xff] }
 0x5fe   : > { %7472 = vmatmul.msk.bf16.gmra.mxu3 %vm307_vm3, %v4071_v17  ;;  %v10485_v5 = vpop.f32.mrf.mxu1  ;;  %v10497_v17 = vpop.f32.mrf.mxu0 }
 0x5ff   : > { %12006 = vst [vmem:[#allocation31_spill] sm:$0xff] %v10497_v17  ;;  %5653 = vmatpush.bf16.msra.mxu3 %v7871_v50  ;;  %v4073_v50 = vpack.c.bf16 %v4052_v4, %v4052_v4 }
 0x600   : > { %7598 = vmatmul.msk.bf16.gmra.mxu2 %vm307_vm3, %v5227_v3 }
 0x601   : > { %7688 = vmatmul.msk.bf16.gmra.mxu0 %vm307_vm3, %v10476_v23  ;;  %v10481_v24 = vpop.f32.mrf.mxu3 }
 0x603   : > { %v5349_v59 = vpop.f32.mrf.mxu2 }
 0x604   : > { %v10488_v27 = vadd.f32 %v5349_v59, %v5138_v21  ;;  %v5821_v21 = vld [vmem:[#allocation3 + $0xc9] sm:$0xff] }
 0x605   : > { %v10505_v59 = vpack.c.bf16 %v5822_v2, %v5821_v21 }
 0x606   : > { %v10495_v52 = vpop.f32.mrf.mxu1 }
 0x608   : > { %7730 = vmatmul.msk.bf16.gmra.mxu1 %vm307_vm3, %v6160_v33 }
 0x609   : > { %v10491_v57 = vpop.f32.mrf.mxu3 }
 0x60b   : > { %v5351_v10 = vpop.f32.mrf.mxu2 }
 0x60c   : > { %v10500_v3 = vadd.f32 %v5351_v10, %v5139_v54  ;;  %v10523_v54 = vpop.f32.mrf.mxu0  ;;  %v6128_v10 = vld [vmem:[#allocation3 + $0xa2] sm:$0xff] }
 0x60d   : > { %12008 = vst [vmem:[#allocation178_spill] sm:$0xff] %v10523_v54 }
 0x60e   : > { %7473 = vmatmul.msk.bf16.gmra.mxu3 %vm307_vm3, %v4072_v37  ;;  %v10514_v0 = vpop.f32.mrf.mxu1  ;;  %v4465_v37 = vadd.f32 %v10313_v63, %v12010_v55  ;;  %v5823_v55 = vld [vmem:[#allocation3 + $0xd9] sm:$0xff] }
 0x60f   : > { %12007 = vst [vmem:[#allocation131_spill] sm:$0xff] %v10514_v0 }
 0x610   : > { %7599 = vmatmul.msk.bf16.gmra.mxu2 %vm307_vm3, %v5228_v39  ;;  %v6161_v39 = vpack.c.bf16 %v6128_v10, %v6127_v8  ;;  %v4830_v54 = vadd.f32 %v12012_v48, %v4465_v37  ;;  %v4467_v10 = vadd.f32 %v10321_v6, %v12014_v61  ;;  %v7870_v8 = vld [vmem:[%s11441_s6 + $0xa0] sm:$0xff]  ;;  %v12017_v6 = vld [vmem:[#allocation128_spill] sm:$0xff] }
 0x611   : > { %7689 = vmatmul.msk.bf16.gmra.mxu0 %vm307_vm3, %v10505_v59  ;;  %v10510_v60 = vpop.f32.mrf.mxu3  ;;  %5654 = vmatpush.bf16.msra.mxu3 %v7870_v8  ;;  %v5490_v48 = vld [vmem:[#allocation3 + $0x21] sm:$0xff] }
 0x612   : > { %v5142_v37 = vadd.f32 %v10012_v28, %v4830_v54  ;;  %v6129_v28 = vld [vmem:[#allocation3 + $0xaa] sm:$0xff] }
 0x613   : > { %v5354_v25 = vpop.f32.mrf.mxu2 }
 0x614   : > { %v10525_v33 = vadd.f32 %v5354_v25, %v5140_v56  ;;  %v5200_v56 = vld [vmem:[#allocation3 + $0xd0] sm:$0xff]  ;;  %v10539_v17 = vpop.f32.mrf.mxu0 }
 0x615   : > { %12013 = vst [vmem:[#allocation132_spill] sm:$0xff] %v10539_v17  ;;  %v5229_v63 = vpack.c.bf16 %v5200_v56, %v5199_v26 }
 0x616   : > { %v10532_v2 = vpop.f32.mrf.mxu1 }
 0x617   : > { %12011 = vst [vmem:[#allocation69_spill] sm:$0xff] %v10532_v2  ;;  %v10542_v2 = vpack.c.bf16 %v5824_v31, %v5823_v55  ;;  %v6130_v31 = vld [vmem:[#allocation3 + $0xb2] sm:$0xff] }
 0x618   : > { %7731 = vmatmul.msk.bf16.gmra.mxu1 %vm307_vm3, %v6161_v39  ;;  %v6162_v55 = vpack.c.bf16 %v6130_v31, %v6129_v28  ;;  %v12020_v28 = vld [vmem:[#allocation49_spill] sm:$0xff] }
 0x619   : > { %v10528_v49 = vpop.f32.mrf.mxu3 }
 0x61b   : > { %v5356_v21 = vpop.f32.mrf.mxu2 }
 0x61c   : > { %v10535_v25 = vadd.f32 %v5356_v21, %v5141_v29  ;;  %v12015_v21 = vld [vmem:[#allocation48_spill] sm:$0xff] }
 0x61d   : > { %v4831_v56 = vadd.f32 %v12015_v21, %v4467_v10  ;;  %v5826_v10 = vld [vmem:[#allocation3 + $0xf1] sm:$0xff] }
 0x61e   : > { %7474 = vmatmul.msk.bf16.gmra.mxu3 %vm307_vm3, %v4073_v50  ;;  %v5134_v4 = vpop.f32.mrf.mxu1  ;;  %v10558_v50 = vpop.f32.mrf.mxu0  ;;  %v5201_v21 = vld [vmem:[#allocation3 + $0xd8] sm:$0xff] }
 0x61f   : > { %12016 = vst [vmem:[#allocation35_spill] sm:$0xff] %v10558_v50  ;;  %v5143_v54 = vadd.f32 %v10035_v7, %v4831_v56  ;;  %v5489_v4 = vld [vmem:[#allocation3 + $0x19] sm:$0xff]  ;;  %v12018_v50 = vld [vmem:[#allocation71_spill] sm:$0xff]  ;;  %v4472_v56 = vadd.f32 %v10344_v12, %v9938_v11 }
 0x620   : > { %7600 = vmatmul.msk.bf16.gmra.mxu2 %vm307_vm3, %v5229_v63  ;;  %v4470_v63 = vadd.f32 %v10336_v18, %v12017_v6  ;;  %v5530_v8 = vpack.c.bf16 %v5490_v48, %v5489_v4  ;;  %v5825_v18 = vld [vmem:[#allocation3 + $0xe9] sm:$0xff] }
 0x621   : > { %7690 = vmatmul.msk.bf16.gmra.mxu0 %vm307_vm3, %v10542_v2  ;;  %v10547_v20 = vpop.f32.mrf.mxu3  ;;  %v10570_v6 = vpack.c.bf16 %v5826_v10, %v5825_v18  ;;  %v5204_v12 = vld [vmem:[#allocation3 + $0xf0] sm:$0xff]  ;;  %v5203_v18 = vld [vmem:[#allocation3 + $0xe8] sm:$0xff] }
 0x622   : > { %v4832_v17 = vadd.f32 %v12018_v50, %v4470_v63 }
 0x623   : > { %v5359_v29 = vpop.f32.mrf.mxu2 }
 0x624   : > { %v10555_v39 = vadd.f32 %v5359_v29, %v5142_v37  ;;  %v5202_v37 = vld [vmem:[#allocation3 + $0xe0] sm:$0xff]  ;;  %v5144_v50 = vadd.f32 %v10050_v19, %v4832_v17 }
 0x625   : > { %v5230_v0 = vpack.c.bf16 %v5202_v37, %v5201_v21  ;;  %v6131_v37 = vld [vmem:[#allocation3 + $0xba] sm:$0xff] }
 0x626   : > { %v10579_v31 = vpop.f32.mrf.mxu0  ;;  %v5828_v17 = vld [vmem:[#allocation3 + $0x101] sm:$0xff] }
 0x627   : > { %12019 = vst [vmem:[#allocation133_spill] sm:$0xff] %v10579_v31  ;;  %v12043_v31 = vld [vmem:[#allocation89_spill] sm:$0xff] }
 0x628   : > { %7732 = vmatmul.msk.bf16.gmra.mxu1 %vm307_vm3, %v6162_v55  ;;  %v6132_v55 = vld [vmem:[#allocation3 + $0xc2] sm:$0xff] }
 0x629   : > { %v10560_v26 = vpop.f32.mrf.mxu3  ;;  %v6163_v10 = vpack.c.bf16 %v6132_v55, %v6131_v37 }
 0x62b   : > { %v5361_v61 = vpop.f32.mrf.mxu2 }
 0x62c   : > { %v10565_v29 = vadd.f32 %v5361_v61, %v5143_v54  ;;  %v4833_v54 = vadd.f32 %v12020_v28, %v4472_v56  ;;  %v12023_v56 = vld [vmem:[#allocation73_spill] sm:$0xff] }
 0x62e   : > { %7634 = vmatmul.msk.bf16.vlgmr.msra.gmra.mxu3 %vm307_vm3, %v5530_v8  ;;  %v5145_v8 = vadd.f32 %v10076_v22, %v4833_v54  ;;  %v10590_v21 = vpop.f32.mrf.mxu0  ;;  %v4477_v54 = vadd.f32 %v10367_v53, %v9976_v34 }
 0x62f   : > { %12022 = vst [vmem:[#allocation181_spill] sm:$0xff] %v10590_v21  ;;  %v6137_v21 = vld [vmem:[#allocation3 + $0xea] sm:$0xff] }
 0x630   : > { %7601 = vmatmul.msk.bf16.gmra.mxu2 %vm307_vm3, %v5230_v0  ;;  %v12021_v0 = vld [vmem:[#allocation4_spill] sm:$0xff] }
 0x631   : > { %7691 = vmatmul.msk.bf16.gmra.mxu0 %vm307_vm3, %v10570_v6  ;;  %v10575_v7 = vpop.f32.mrf.mxu3  ;;  %v4475_v4 = vadd.f32 %v10359_v14, %v12021_v0  ;;  %v5231_v14 = vpack.c.bf16 %v5204_v12, %v5203_v18  ;;  %v6133_v18 = vld [vmem:[#allocation3 + $0xca] sm:$0xff] }
 0x633   : > { %v5364_v48 = vpop.f32.mrf.mxu2 }
 0x634   : > { %v10582_v63 = vadd.f32 %v5364_v48, %v5144_v50  ;;  %v4834_v50 = vadd.f32 %v12023_v56, %v4475_v4  ;;  %v5827_v48 = vld [vmem:[#allocation3 + $0xf9] sm:$0xff] }
 0x635   : > { %v10598_v28 = vpack.c.bf16 %v5828_v17, %v5827_v48  ;;  %v4480_v17 = vadd.f32 %v10385_v38, %v9999_v16  ;;  %v5206_v56 = vld [vmem:[#allocation3 + $0x100] sm:$0xff]  ;;  %v5205_v48 = vld [vmem:[#allocation3 + $0xf8] sm:$0xff] }
 0x636   : > { %v5146_v55 = vadd.f32 %v10091_v47, %v4834_v50 }
 0x638   : > { %7733 = vmatmul.msk.bf16.gmra.mxu1 %vm307_vm3, %v6163_v10  ;;  %v10613_v10 = vpop.f32.mrf.mxu1 }
 0x639   : > { %v10585_v61 = vpop.f32.mrf.mxu3  ;;  %12026 = vst [vmem:[#allocation134_spill] sm:$0xff] %v10613_v10  ;;  %v6139_v10 = vld [vmem:[#allocation3 + $0xfa] sm:$0xff] }
 0x63b   : > { %v5366_v11 = vpop.f32.mrf.mxu2 }
 0x63c   : > { %v10592_v19 = vadd.f32 %v5366_v11, %v5145_v8  ;;  %v10611_v8 = vpop.f32.mrf.mxu0  ;;  %v6134_v11 = vld [vmem:[#allocation3 + $0xd2] sm:$0xff] }
 0x63d   : > { %12025 = vst [vmem:[#allocation72_spill] sm:$0xff] %v10611_v8  ;;  %v6164_v53 = vpack.c.bf16 %v6134_v11, %v6133_v18  ;;  %v4482_v11 = vadd.f32 %v10396_v35, %v10014_v30  ;;  %v5208_v35 = vld [vmem:[#allocation3 + $0x110] sm:$0xff] }
 0x63e   : > { %7635 = vmatmul.msk.bf16.gmra.mxu3 %vm307_vm3, %v10249_v43  ;;  %v12024_v43 = vld [vmem:[#allocation74_spill] sm:$0xff] }
 0x63f   : > { %v4835_v37 = vadd.f32 %v12024_v43, %v4477_v54  ;;  %v12027_v54 = vld [vmem:[#allocation50_spill] sm:$0xff] }
 0x640   : > { %7602 = vmatmul.msk.bf16.gmra.mxu2 %vm307_vm3, %v5231_v14  ;;  %v5830_v14 = vld [vmem:[#allocation3 + $0x111] sm:$0xff]  ;;  %v5829_v43 = vld [vmem:[#allocation3 + $0x109] sm:$0xff] }
 0x641   : > { %7692 = vmatmul.msk.bf16.gmra.mxu0 %vm307_vm3, %v10598_v28  ;;  %v10603_v22 = vpop.f32.mrf.mxu3  ;;  %v5147_v34 = vadd.f32 %v10114_v13, %v4835_v37  ;;  %v10626_v16 = vpack.c.bf16 %v5830_v14, %v5829_v43  ;;  %v10631_v13 = vpop.f32.mrf.mxu1  ;;  %v4485_v14 = vadd.f32 %v10411_v44, %v10037_v1  ;;  %v5831_v44 = vld [vmem:[#allocation3 + $0x119] sm:$0xff] }
 0x642   : > { %12029 = vst [vmem:[#allocation135_spill] sm:$0xff] %v10631_v13 }
 0x643   : > { %v5369_v0 = vpop.f32.mrf.mxu2 }
 0x644   : > { %v10608_v4 = vadd.f32 %v5369_v0, %v5146_v55  ;;  %v4836_v55 = vadd.f32 %v12027_v54, %v4480_v17  ;;  %v5232_v0 = vpack.c.bf16 %v5206_v56, %v5205_v48  ;;  %v10628_v38 = vpop.f32.mrf.mxu0  ;;  %v6135_v54 = vld [vmem:[#allocation3 + $0xda] sm:$0xff] }
 0x645   : > { %12028 = vst [vmem:[#allocation34_spill] sm:$0xff] %v10628_v38  ;;  %v12042_v38 = vld [vmem:[#allocation127_spill] sm:$0xff] }
 0x648   : > { %7734 = vmatmul.msk.bf16.gmra.mxu1 %vm307_vm3, %v6164_v53 }
 0x649   : > { %v10615_v12 = vpop.f32.mrf.mxu3  ;;  %v10650_v43 = vpop.f32.mrf.mxu1 }
 0x64a   : > { %12032 = vst [vmem:[#allocation75_spill] sm:$0xff] %v10650_v43 }
 0x64b   : > { %v5371_v47 = vpop.f32.mrf.mxu2 }
 0x64c   : > { %v10620_v50 = vadd.f32 %v5371_v47, %v5147_v34  ;;  %v12030_v34 = vld [vmem:[#allocation76_spill] sm:$0xff]  ;;  %v6136_v47 = vld [vmem:[#allocation3 + $0xe2] sm:$0xff]  ;;  %v10647_v48 = vpop.f32.mrf.mxu0 }
 0x64d   : > { %v4837_v53 = vadd.f32 %v12030_v34, %v4482_v11  ;;  %12031 = vst [vmem:[#allocation184_spill] sm:$0xff] %v10647_v48  ;;  %v6165_v30 = vpack.c.bf16 %v6136_v47, %v6135_v54  ;;  %v5207_v11 = vld [vmem:[#allocation3 + $0x108] sm:$0xff]  ;;  %v12036_v47 = vld [vmem:[#allocation124_spill] sm:$0xff] }
 0x64e   : > { %7636 = vmatmul.msk.bf16.gmra.mxu3 %vm307_vm3, %v10276_v9  ;;  %v5148_v9 = vadd.f32 %v10129_v42, %v4836_v55  ;;  %v5233_v1 = vpack.c.bf16 %v5208_v35, %v5207_v11 }
 0x650   : > { %7603 = vmatmul.msk.bf16.gmra.mxu2 %vm307_vm3, %v5232_v0  ;;  %v5149_v0 = vadd.f32 %v10152_v51, %v4837_v53  ;;  %v12035_v53 = vld [vmem:[#allocation51_spill] sm:$0xff] }
 0x651   : > { %7693 = vmatmul.msk.bf16.gmra.mxu0 %vm307_vm3, %v10626_v16  ;;  %v10635_v37 = vpop.f32.mrf.mxu3  ;;  %v4487_v54 = vadd.f32 %v12036_v47, %v12035_v53  ;;  %v10672_v35 = vpop.f32.mrf.mxu1 }
 0x652   : > { %12039 = vst [vmem:[#allocation201_spill] sm:$0xff] %v10672_v35 }
 0x653   : > { %v5374_v17 = vpop.f32.mrf.mxu2 }
 0x654   : > { %v10640_v18 = vadd.f32 %v5374_v17, %v5148_v9  ;;  %v5832_v9 = vld [vmem:[#allocation3 + $0x121] sm:$0xff]  ;;  %v12033_v17 = vld [vmem:[#allocation7_spill] sm:$0xff] }
 0x655   : > { %v4838_v34 = vadd.f32 %v12033_v17, %v4485_v14  ;;  %v10658_v48 = vpack.c.bf16 %v5832_v9, %v5831_v44  ;;  %v12040_v9 = vld [vmem:[#allocation77_spill] sm:$0xff]  ;;  %v6138_v17 = vld [vmem:[#allocation3 + $0xf2] sm:$0xff] }
 0x656   : > { %v4839_v11 = vadd.f32 %v12040_v9, %v4487_v54  ;;  %v12041_v44 = vld [vmem:[#allocation5_spill] sm:$0xff]  ;;  %v6166_v47 = vpack.c.bf16 %v6138_v17, %v6137_v21  ;;  %v5834_v54 = vld [vmem:[#allocation3 + $0x131] sm:$0xff] }
 0x657   : > { %12034 = vst [vmem:[#allocation136_spill] sm:$0xff] %v10658_v48  ;;  %v4490_v8 = vadd.f32 %v12042_v38, %v12041_v44  ;;  %v5209_v9 = vld [vmem:[#allocation3 + $0x118] sm:$0xff]  ;;  %v12047_v44 = vld [vmem:[#allocation109_spill] sm:$0xff] }
 0x658   : > { %7735 = vmatmul.msk.bf16.gmra.mxu1 %vm307_vm3, %v6165_v30  ;;  %v5151_v53 = vadd.f32 %v12043_v31, %v4839_v11  ;;  %v5833_v11 = vld [vmem:[#allocation3 + $0x129] sm:$0xff] }
 0x659   : > { %v10643_v56 = vpop.f32.mrf.mxu3  ;;  %v10691_v43 = vpop.f32.mrf.mxu1  ;;  %v10693_v21 = vpack.c.bf16 %v5834_v54, %v5833_v11  ;;  %v6140_v54 = vld [vmem:[#allocation3 + $0x102] sm:$0xff] }
 0x65a   : > { %12048 = vst [vmem:[#allocation78_spill] sm:$0xff] %v10691_v43  ;;  %v12057_v43 = vld [vmem:[#allocation8_spill] sm:$0xff] }
 0x65b   : > { %v5376_v42 = vpop.f32.mrf.mxu2  ;;  %12049 = vst [vmem:[#allocation138_spill] sm:$0xff] %v10693_v21  ;;  %v4495_v13 = vadd.f32 %v10454_v36, %v12057_v43  ;;  %v12063_v43 = vld [vmem:[#allocation53_spill] sm:$0xff] }
 0x65c   : > { %v10652_v55 = vadd.f32 %v5376_v42, %v5149_v0  ;;  %v12037_v0 = vld [vmem:[#allocation54_spill] sm:$0xff]  ;;  %v10668_v42 = vpop.f32.mrf.mxu0 }
 0x65d   : > { %v5150_v30 = vadd.f32 %v12037_v0, %v4838_v34  ;;  %12038 = vst [vmem:[#allocation33_spill] sm:$0xff] %v10668_v42  ;;  %v7882_v34 = vld [vmem:[%s11441_s6 + $0x100] sm:$0xff]  ;;  %v12045_v42 = vld [vmem:[#allocation79_spill] sm:$0xff] }
 0x65e   : > { %7637 = vmatmul.msk.bf16.gmra.mxu3 %vm307_vm3, %v10308_v32  ;;  %6590 = vmatpush.bf16.msra.mxu2 %v7882_v34  ;;  %v4840_v35 = vadd.f32 %v12045_v42, %v4490_v8  ;;  %v12051_v8 = vld [vmem:[#allocation130_spill] sm:$0xff] }
 0x65f   : > { %v12052_v34 = vld [vmem:[#allocation10_spill] sm:$0xff] }
 0x660   : > { %7604 = vmatmul.msk.bf16.gmra.mxu2 %vm307_vm3, %v5233_v1 }
 0x661   : > { %7694 = vmatmul.msk.bf16.gmra.mxu0 %vm307_vm3, %v10658_v48  ;;  %v10663_v51 = vpop.f32.mrf.mxu3  ;;  %v10708_v11 = vpop.f32.mrf.mxu1  ;;  %v5835_v48 = vld [vmem:[#allocation3 + $0x139] sm:$0xff] }
 0x662   : > { %12056 = vst [vmem:[#allocation139_spill] sm:$0xff] %v10708_v11  ;;  %v12061_v11 = vld [vmem:[#allocation114_spill] sm:$0xff] }
 0x663   : > { %v5379_v14 = vpop.f32.mrf.mxu2 }
 0x664   : > { %v10670_v32 = vadd.f32 %v5379_v14, %v5150_v30  ;;  %v5210_v30 = vld [vmem:[#allocation3 + $0x120] sm:$0xff]  ;;  %v10687_v38 = vpop.f32.mrf.mxu0 }
 0x665   : > { %12046 = vst [vmem:[#allocation186_spill] sm:$0xff] %v10687_v38  ;;  %v5234_v31 = vpack.c.bf16 %v5210_v30, %v5209_v9  ;;  %v12054_v30 = vld [vmem:[#allocation80_spill] sm:$0xff] }
 0x668   : > { %7736 = vmatmul.msk.bf16.gmra.mxu1 %vm307_vm3, %v6166_v47  ;;  %v5152_v47 = vadd.f32 %v12052_v34, %v4840_v35  ;;  %v5212_v34 = vld [vmem:[#allocation3 + $0x130] sm:$0xff] }
 0x669   : > { %v10675_v1 = vpop.f32.mrf.mxu3 }
 0x66b   : > { %v5381_v0 = vpop.f32.mrf.mxu2 }
 0x66c   : > { %v10683_v14 = vadd.f32 %v5381_v0, %v5151_v53  ;;  %v12050_v53 = vld [vmem:[#allocation52_spill] sm:$0xff]  ;;  %v10706_v38 = vpop.f32.mrf.mxu0 }
 0x66d   : > { %v4492_v42 = vadd.f32 %v12051_v8, %v12050_v53  ;;  %12055 = vst [vmem:[#allocation203_spill] sm:$0xff] %v10706_v38  ;;  %v6167_v8 = vpack.c.bf16 %v6140_v54, %v6139_v10 }
 0x66e   : > { %12044 = vst [vmem:[#allocation137_spill] sm:$0xff] %v10683_v14  ;;  %7638 = vmatmul.msk.bf16.gmra.mxu3 %vm307_vm3, %v12047_v44 }
 0x66f   : > { %v4841_v9 = vadd.f32 %v12054_v30, %v4492_v42  ;;  %v5211_v42 = vld [vmem:[#allocation3 + $0x128] sm:$0xff] }
 0x670   : > { %7605 = vmatmul.msk.bf16.gmra.mxu2 %vm307_vm3, %v5234_v31  ;;  %v12060_v30 = vld [vmem:[#allocation82_spill] sm:$0xff] }
 0x671   : > { %7695 = vmatmul.msk.bf16.gmra.mxu0 %vm307_vm3, %v10693_v21  ;;  %v10698_v17 = vpop.f32.mrf.mxu3  ;;  %v12058_v21 = vld [vmem:[#allocation94_spill] sm:$0xff]  ;;  %v4842_v38 = vadd.f32 %v12060_v30, %v4495_v13  ;;  %v12065_v13 = vld [vmem:[#allocation57_spill] sm:$0xff] }
 0x672   : > { %v5153_v53 = vadd.f32 %v12058_v21, %v4841_v9  ;;  %v4497_v21 = vadd.f32 %v10464_v46, %v12063_v43  ;;  %v6141_v30 = vld [vmem:[#allocation3 + $0x10a] sm:$0xff] }
 0x673   : > { %v5384_v0 = vpop.f32.mrf.mxu2  ;;  %v5154_v54 = vadd.f32 %v12065_v13, %v4842_v38 }
 0x674   : > { %v10703_v44 = vadd.f32 %v5384_v0, %v5152_v47  ;;  %v5836_v0 = vld [vmem:[#allocation3 + $0x141] sm:$0xff]  ;;  %v10730_v9 = vpop.f32.mrf.mxu0 }
 0x675   : > { %v10721_v36 = vpack.c.bf16 %v5836_v0, %v5835_v48  ;;  %12064 = vst [vmem:[#allocation140_spill] sm:$0xff] %v10730_v9  ;;  %v12068_v48 = vld [vmem:[#allocation83_spill] sm:$0xff]  ;;  %v12069_v0 = vld [vmem:[#allocation6_spill] sm:$0xff] }
 0x676   : > { %12053 = vst [vmem:[#allocation44_spill] sm:$0xff] %v10703_v44  ;;  %v5235_v44 = vpack.c.bf16 %v5212_v34, %v5211_v42  ;;  %v4500_v42 = vadd.f32 %v10481_v24, %v12069_v0 }
 0x677   : > { %12062 = vst [vmem:[#allocation81_spill] sm:$0xff] %v10721_v36 }
 0x678   : > { %7737 = vmatmul.msk.bf16.gmra.mxu1 %vm307_vm3, %v6167_v8 }
 0x679   : > { %v10710_v31 = vpop.f32.mrf.mxu3 }
 0x67b   : > { %v5386_v35 = vpop.f32.mrf.mxu2 }
 0x67c   : > { %v10715_v47 = vadd.f32 %v5386_v35, %v5153_v53  ;;  %v10733_v53 = vpop.f32.mrf.mxu1  ;;  %v4843_v35 = vadd.f32 %v12068_v48, %v4497_v21  ;;  %v10743_v38 = vpop.f32.mrf.mxu0  ;;  %v5213_v21 = vld [vmem:[#allocation3 + $0x138] sm:$0xff]  ;;  %v12074_v48 = vld [vmem:[#allocation85_spill] sm:$0xff] }
 0x67d   : > { %12066 = vst [vmem:[#allocation37_spill] sm:$0xff] %v10733_v53  ;;  %v4844_v53 = vadd.f32 %v12074_v48, %v4500_v42  ;;  %v6144_v48 = vld [vmem:[#allocation3 + $0x122] sm:$0xff] }
 0x67e   : > { %12059 = vst [vmem:[#allocation187_spill] sm:$0xff] %v10715_v47  ;;  %7639 = vmatmul.msk.bf16.gmra.mxu3 %vm307_vm3, %v12061_v11  ;;  %v5214_v47 = vld [vmem:[#allocation3 + $0x140] sm:$0xff] }
 0x67f   : > { %12071 = vst [vmem:[#allocation141_spill] sm:$0xff] %v10743_v38  ;;  %v5236_v24 = vpack.c.bf16 %v5214_v47, %v5213_v21 }
 0x680   : > { %7606 = vmatmul.msk.bf16.gmra.mxu2 %vm307_vm3, %v5235_v44  ;;  %v6142_v44 = vld [vmem:[#allocation3 + $0x112] sm:$0xff] }
 0x681   : > { %7696 = vmatmul.msk.bf16.gmra.mxu0 %vm307_vm3, %v10721_v36  ;;  %v10726_v10 = vpop.f32.mrf.mxu3  ;;  %v12070_v36 = vld [vmem:[#allocation98_spill] sm:$0xff]  ;;  %v6168_v43 = vpack.c.bf16 %v6142_v44, %v6141_v30  ;;  %v12077_v44 = vld [vmem:[#allocation88_spill] sm:$0xff] }
 0x682   : > { %v5155_v46 = vadd.f32 %v12070_v36, %v4843_v35  ;;  %v5837_v36 = vld [vmem:[#allocation3 + $0x149] sm:$0xff]  ;;  %v4502_v0 = vadd.f32 %v10491_v57, %v12077_v44  ;;  %v12078_v30 = vld [vmem:[#allocation100_spill] sm:$0xff] }
 0x683   : > { %v5389_v11 = vpop.f32.mrf.mxu2 }
 0x684   : > { %v10735_v8 = vadd.f32 %v5389_v11, %v5154_v54  ;;  %v5838_v54 = vld [vmem:[#allocation3 + $0x151] sm:$0xff]  ;;  %v10747_v11 = vpop.f32.mrf.mxu1  ;;  %v10766_v21 = vpop.f32.mrf.mxu0 }
 0x685   : > { %12073 = vst [vmem:[#allocation84_spill] sm:$0xff] %v10747_v11  ;;  %v10753_v35 = vpack.c.bf16 %v5838_v54, %v5837_v36  ;;  %v12083_v36 = vld [vmem:[#allocation55_spill] sm:$0xff]  ;;  %v6143_v11 = vld [vmem:[#allocation3 + $0x11a] sm:$0xff] }
 0x686   : > { %12067 = vst [vmem:[#allocation205_spill] sm:$0xff] %v10735_v8  ;;  %v12075_v8 = vld [vmem:[#allocation166_spill] sm:$0xff]  ;;  %v4505_v38 = vadd.f32 %v10510_v60, %v12083_v36  ;;  %v6169_v44 = vpack.c.bf16 %v6144_v48, %v6143_v11 }
 0x687   : > { %12076 = vst [vmem:[#allocation142_spill] sm:$0xff] %v10753_v35 }
 0x688   : > { %7738 = vmatmul.msk.bf16.gmra.mxu1 %vm307_vm3, %v6168_v43  ;;  %12081 = vst [vmem:[#allocation207_spill] sm:$0xff] %v10766_v21  ;;  %v12086_v21 = vld [vmem:[#allocation9_spill] sm:$0xff] }
 0x689   : > { %v10738_v34 = vpop.f32.mrf.mxu3 }
 0x68b   : > { %v5391_v9 = vpop.f32.mrf.mxu2 }
 0x68c   : > { %v10745_v13 = vadd.f32 %v5391_v9, %v5155_v46  ;;  %v5156_v46 = vadd.f32 %v12078_v30, %v4844_v53  ;;  %v10768_v54 = vpop.f32.mrf.mxu1  ;;  %v5216_v30 = vld [vmem:[#allocation3 + $0x150] sm:$0xff]  ;;  %v10781_v36 = vpop.f32.mrf.mxu0 }
 0x68d   : > { %12082 = vst [vmem:[#allocation143_spill] sm:$0xff] %v10768_v54  ;;  %v4846_v54 = vadd.f32 %v12086_v21, %v4505_v38 }
 0x68e   : > { %12072 = vst [vmem:[#allocation188_spill] sm:$0xff] %v10745_v13  ;;  %7640 = vmatmul.msk.bf16.gmra.mxu3 %vm307_vm3, %v12075_v8  ;;  %v12080_v8 = vld [vmem:[#allocation86_spill] sm:$0xff] }
 0x68f   : > { %v4845_v47 = vadd.f32 %v12080_v8, %v4502_v0  ;;  %v5840_v0 = vld [vmem:[#allocation3 + $0x161] sm:$0xff]  ;;  %12088 = vst [vmem:[#allocation87_spill] sm:$0xff] %v10781_v36  ;;  %v12094_v36 = vld [vmem:[#allocation60_spill] sm:$0xff] }
 0x690   : > { %7607 = vmatmul.msk.bf16.gmra.mxu2 %vm307_vm3, %v5236_v24  ;;  %v5215_v8 = vld [vmem:[#allocation3 + $0x148] sm:$0xff] }
 0x691   : > { %7697 = vmatmul.msk.bf16.gmra.mxu0 %vm307_vm3, %v10753_v35  ;;  %v10758_v9 = vpop.f32.mrf.mxu3  ;;  %v12084_v35 = vld [vmem:[#allocation151_spill] sm:$0xff]  ;;  %v5237_v13 = vpack.c.bf16 %v5216_v30, %v5215_v8 }
 0x692   : > { %v5157_v57 = vadd.f32 %v12084_v35, %v4845_v47  ;;  %v12090_v47 = vld [vmem:[#allocation92_spill] sm:$0xff]  ;;  %v6145_v8 = vld [vmem:[#allocation3 + $0x12a] sm:$0xff] }
 0x693   : > { %v5394_v42 = vpop.f32.mrf.mxu2  ;;  %v4507_v48 = vadd.f32 %v10528_v49, %v12090_v47  ;;  %v6146_v30 = vld [vmem:[#allocation3 + $0x132] sm:$0xff] }
 0x694   : > { %v10763_v43 = vadd.f32 %v5394_v42, %v5156_v46  ;;  %v5839_v42 = vld [vmem:[#allocation3 + $0x159] sm:$0xff]  ;;  %v10784_v11 = vpop.f32.mrf.mxu1 }
 0x695   : > { %v5861_v60 = vpack.c.bf16 %v5840_v0, %v5839_v42  ;;  %12089 = vst [vmem:[#allocation144_spill] sm:$0xff] %v10784_v11  ;;  %v12093_v0 = vld [vmem:[#allocation11_spill] sm:$0xff]  ;;  %v5217_v49 = vld [vmem:[#allocation3 + $0x158] sm:$0xf] }
 0x696   : > { %12079 = vst [vmem:[#allocation36_spill] sm:$0xff] %v10763_v43  ;;  %v12087_v43 = vld [vmem:[#allocation65_spill] sm:$0xff] }
 0x698   : > { %7739 = vmatmul.msk.bf16.gmra.mxu1 %vm307_vm3, %v6169_v44 }
 0x699   : > { %v10770_v24 = vpop.f32.mrf.mxu3 }
 0x69b   : > { %v5396_v53 = vpop.f32.mrf.mxu2 }
 0x69c   : > { %v10775_v46 = vadd.f32 %v5396_v53, %v5157_v57  ;;  %v12091_v57 = vld [vmem:[#allocation16_spill] sm:$0xff]  ;;  %v10798_v11 = vpop.f32.mrf.mxu1 }
 0x69d   : > { %v5158_v38 = vadd.f32 %v12091_v57, %v4846_v54  ;;  %v12095_v54 = vld [vmem:[#allocation56_spill] sm:$0xff] }
 0x69e   : > { %12085 = vst [vmem:[#allocation190_spill] sm:$0xff] %v10775_v46  ;;  %7641 = vmatmul.msk.bf16.gmra.mxu3 %vm307_vm3, %v12087_v43  ;;  %v12092_v43 = vld [vmem:[#allocation91_spill] sm:$0xff]  ;;  %v6170_v46 = vpack.c.bf16 %v6146_v30, %v6145_v8  ;;  %v6148_v8 = vld [vmem:[#allocation3 + $0x142] sm:$0xff] }
 0x69f   : > { %v4847_v53 = vadd.f32 %v12092_v43, %v4507_v48  ;;  %v12096_v48 = vld [vmem:[#allocation30_spill] sm:$0xff] }
 0x6a0   : > { %7608 = vmatmul.msk.bf16.gmra.mxu2 %vm307_vm3, %v5237_v13  ;;  %v4510_v13 = vadd.f32 %v10547_v20, %v12093_v0  ;;  %v12099_v0 = vld [vmem:[#allocation95_spill] sm:$0xff] }
 0x6a1   : > { %7698 = vmatmul.msk.bf16.gmra.mxu0 %vm307_vm3, %v5861_v60  ;;  %v10787_v35 = vpop.f32.mrf.mxu3  ;;  %v5159_v60 = vadd.f32 %v12094_v36, %v4847_v53  ;;  %v12098_v53 = vld [vmem:[#allocation107_spill] sm:$0xff] }
 0x6a2   : > { %v4848_v57 = vadd.f32 %v12095_v54, %v4510_v13 }
 0x6a3   : > { %v5399_v21 = vpop.f32.mrf.mxu2 }
 0x6a4   : > { %v10792_v44 = vadd.f32 %v5399_v21, %v5158_v38  ;;  %v5238_v38 = vpack.c.bf16 %v5217_v49, %v5217_v49  ;;  %v12097_v21 = vld [vmem:[#allocation97_spill] sm:$0xff]  ;;  %v12100_v49 = vld [vmem:[#allocation148_spill] sm:$0xff] }
 0x6a5   : > { %v4512_v36 = vadd.f32 %v10560_v26, %v12097_v21  ;;  %v4515_v54 = vadd.f32 %v10575_v7, %v12100_v49  ;;  %v6426_v21 = vld [vmem:[#allocation3 + $0x33] sm:$0xff]  ;;  %v12104_v49 = vld [vmem:[#allocation62_spill] sm:$0xff] }
 0x6a7   : > { %v4849_v13 = vadd.f32 %v12099_v0, %v4512_v36  ;;  %v12102_v36 = vld [vmem:[#allocation12_spill] sm:$0xff] }
 0x6a8   : > { %7740 = vmatmul.msk.bf16.gmra.mxu1 %vm307_vm3, %v6170_v46  ;;  %v10815_v46 = vpop.f32.mrf.mxu1 }
 0x6a9   : > { %v4551_v42 = vpop.f32.mrf.mxu3 }
 0x6ab   : > { %v5401_v14 = vpop.f32.mrf.mxu2 }
 0x6ac   : > { %v10800_v47 = vadd.f32 %v5401_v14, %v5159_v60  ;;  %v5160_v14 = vadd.f32 %v12098_v53, %v4848_v57 }
 0x6ae   : > { %7642 = vmatmul.msk.bf16.gmra.mxu3 %vm307_vm3, %v12096_v48  ;;  %v6147_v48 = vld [vmem:[#allocation3 + $0x13a] sm:$0xff] }
 0x6b0   : > { %7609 = vmatmul.msk.bf16.gmra.mxu2 %vm307_vm3, %v5238_v38  ;;  %v10830_v0 = vpop.f32.mrf.mxu1 }
 0x6b1   : > { %v5656_v20 = vpop.f32.mrf.mxu3 }
 0x6b2   : > { %v10810_v43 = vadd.f32 %v5656_v20, %v10461_v41  ;;  %v12101_v41 = vld [vmem:[#allocation19_spill] sm:$0xff]  ;;  %v6171_v20 = vpack.c.bf16 %v6148_v8, %v6147_v48 }
 0x6b3   : > { %v5404_v30 = vpop.f32.mrf.mxu2  ;;  %v5161_v38 = vadd.f32 %v12101_v41, %v4849_v13  ;;  %v12103_v13 = vld [vmem:[#allocation14_spill] sm:$0xff] }
 0x6b4   : > { %v10813_v42 = vadd.f32 %v5404_v30, %v5160_v14  ;;  %v6425_v14 = vld [vmem:[#allocation3 + $0x2b] sm:$0xff]  ;;  %v4850_v30 = vadd.f32 %v12102_v36, %v4515_v54  ;;  %v4517_v8 = vadd.f32 %v10585_v61, %v12103_v13 }
 0x6b5   : > { %v6466_v7 = vpack.c.bf16 %v6426_v21, %v6425_v14  ;;  %v12105_v54 = vld [vmem:[#allocation58_spill] sm:$0xff]  ;;  %v12106_v14 = vld [vmem:[#allocation59_spill] sm:$0xff] }
 0x6b6   : > { %v5162_v48 = vadd.f32 %v12104_v49, %v4850_v30  ;;  %v4520_v36 = vadd.f32 %v10603_v22, %v12106_v14  ;;  %v6428_v49 = vld [vmem:[#allocation3 + $0x43] sm:$0xff]  ;;  %v12110_v14 = vld [vmem:[#allocation24_spill] sm:$0xff] }
 0x6b8   : > { %7741 = vmatmul.msk.bf16.gmra.mxu1 %vm307_vm3, %v6171_v20  ;;  %v4851_v20 = vadd.f32 %v12105_v54, %v4517_v8  ;;  %v6427_v8 = vld [vmem:[#allocation3 + $0x3b] sm:$0xff] }
 0x6b9   : > { %v5658_v60 = vpop.f32.mrf.mxu3  ;;  %v6467_v22 = vpack.c.bf16 %v6428_v49, %v6427_v8  ;;  %v6152_v49 = vld [vmem:[#allocation3 + $0x162] sm:$0xff] }
 0x6ba   : > { %v10821_v26 = vadd.f32 %v5658_v60, %v10471_v15 }
 0x6bb   : > { %v5406_v57 = vpop.f32.mrf.mxu2 }
 0x6bc   : > { %v10824_v53 = vadd.f32 %v5406_v57, %v5161_v38  ;;  %v10842_v57 = vpop.f32.mrf.mxu1 }
 0x6be   : > { %7643 = vmatmul.msk.bf16.gmra.mxu3 %vm307_vm3, %v10449_v40  ;;  %v6150_v40 = vld [vmem:[#allocation3 + $0x152] sm:$0xff] }
 0x6c0   : > { %7769 = vmatmul.msk.bf16.vlgmr.msra.gmra.mxu2 %vm307_vm3, %v6466_v7  ;;  %v6149_v7 = vld [vmem:[#allocation3 + $0x14a] sm:$0xff] }
 0x6c1   : > { %v5661_v15 = vpop.f32.mrf.mxu3  ;;  %v6172_v13 = vpack.c.bf16 %v6150_v40, %v6149_v7 }
 0x6c2   : > { %v10836_v60 = vadd.f32 %v5661_v15, %v10488_v27  ;;  %v12107_v27 = vld [vmem:[#allocation163_spill] sm:$0xff] }
 0x6c3   : > { %v5409_v41 = vpop.f32.mrf.mxu2  ;;  %v5163_v15 = vadd.f32 %v12107_v27, %v4851_v20 }
 0x6c4   : > { %v10839_v38 = vadd.f32 %v5409_v41, %v5162_v48  ;;  %v12108_v41 = vld [vmem:[#allocation101_spill] sm:$0xff]  ;;  %v10863_v27 = vpop.f32.mrf.mxu1 }
 0x6c5   : > { %v4852_v54 = vadd.f32 %v12108_v41, %v4520_v36  ;;  %12111 = vst [vmem:[#allocation45_spill] sm:$0xff] %v10863_v27  ;;  %v12112_v36 = vld [vmem:[#allocation103_spill] sm:$0xff]  ;;  %v12113_v41 = vld [vmem:[#allocation106_spill] sm:$0xff] }
 0x6c7   : > { %v5164_v7 = vadd.f32 %v12110_v14, %v4852_v54  ;;  %v6430_v14 = vld [vmem:[#allocation3 + $0x53] sm:$0xff] }
 0x6c8   : > { %7742 = vmatmul.msk.bf16.gmra.mxu1 %vm307_vm3, %v6172_v13 }
 0x6c9   : > { %v5663_v21 = vpop.f32.mrf.mxu3 }
 0x6ca   : > { %v10847_v61 = vadd.f32 %v5663_v21, %v10500_v3  ;;  %v12109_v21 = vld [vmem:[#allocation104_spill] sm:$0xff] }
 0x6cb   : > { %v5411_v30 = vpop.f32.mrf.mxu2  ;;  %v4522_v20 = vadd.f32 %v10615_v12, %v12109_v21 }
 0x6cc   : > { %v10850_v48 = vadd.f32 %v5411_v30, %v5163_v15 }
 0x6cd   : > { %v4853_v30 = vadd.f32 %v12112_v36, %v4522_v20  ;;  %v6429_v20 = vld [vmem:[#allocation3 + $0x4b] sm:$0xff] }
 0x6ce   : > { %7644 = vmatmul.msk.bf16.gmra.mxu3 %vm307_vm3, %v10476_v23  ;;  %v6151_v23 = vld [vmem:[#allocation3 + $0x15a] sm:$0xff] }
 0x6cf   : > { %v6173_v21 = vpack.c.bf16 %v6152_v49, %v6151_v23 }
 0x6d0   : > { %7770 = vmatmul.msk.bf16.gmra.mxu2 %vm307_vm3, %v6467_v22  ;;  %v4525_v22 = vadd.f32 %v10635_v37, %v12113_v41  ;;  %v6468_v37 = vpack.c.bf16 %v6430_v14, %v6429_v20  ;;  %v10894_v14 = vpop.f32.mrf.mxu0 }
 0x6d1   : > { %v5666_v3 = vpop.f32.mrf.mxu3 }
 0x6d2   : > { %v10860_v40 = vadd.f32 %v5666_v3, %v10525_v33  ;;  %v12114_v33 = vld [vmem:[#allocation64_spill] sm:$0xff] }
 0x6d3   : > { %v5414_v15 = vpop.f32.mrf.mxu2  ;;  %v5165_v3 = vadd.f32 %v12114_v33, %v4853_v30  ;;  %v12116_v30 = vld [vmem:[#allocation157_spill] sm:$0xff] }
 0x6d4   : > { %v10865_v13 = vadd.f32 %v5414_v15, %v5164_v7  ;;  %v10876_v7 = vpop.f32.mrf.mxu1  ;;  %v12115_v15 = vld [vmem:[#allocation154_spill] sm:$0xff]  ;;  %v4527_v23 = vadd.f32 %v10643_v56, %v12116_v30 }
 0x6d5   : > { %v4854_v36 = vadd.f32 %v12115_v15, %v4525_v22  ;;  %v12119_v15 = vld [vmem:[#allocation110_spill] sm:$0xff] }
 0x6d8   : > { %7743 = vmatmul.msk.bf16.gmra.mxu1 %vm307_vm3, %v6173_v21  ;;  %v12118_v21 = vld [vmem:[#allocation17_spill] sm:$0xff] }
 0x6d9   : > { %v5668_v8 = vpop.f32.mrf.mxu3  ;;  %v4855_v22 = vadd.f32 %v12118_v21, %v4527_v23  ;;  %v12123_v21 = vld [vmem:[#allocation112_spill] sm:$0xff] }
 0x6da   : > { %v10871_v12 = vadd.f32 %v5668_v8, %v10535_v25  ;;  %v12117_v8 = vld [vmem:[#allocation191_spill] sm:$0xff] }
 0x6db   : > { %v5416_v54 = vpop.f32.mrf.mxu2  ;;  %v5166_v41 = vadd.f32 %v12117_v8, %v4854_v36  ;;  %v6432_v36 = vld [vmem:[#allocation3 + $0x63] sm:$0xff]  ;;  %v6431_v8 = vld [vmem:[#allocation3 + $0x5b] sm:$0xff] }
 0x6dc   : > { %v10874_v27 = vadd.f32 %v5416_v54, %v5165_v3  ;;  %v10896_v20 = vpop.f32.mrf.mxu1 }
 0x6dd   : > { %12120 = vst [vmem:[#allocation209_spill] sm:$0xff] %v10896_v20  ;;  %v12130_v20 = vld [vmem:[#allocation22_spill] sm:$0xff] }
 0x6de   : > { %7645 = vmatmul.msk.bf16.gmra.mxu3 %vm307_vm3, %v10505_v59  ;;  %v4530_v59 = vadd.f32 %v10663_v51, %v12119_v15  ;;  %v6469_v51 = vpack.c.bf16 %v6432_v36, %v6431_v8 }
 0x6e0   : > { %7771 = vmatmul.msk.bf16.gmra.mxu2 %vm307_vm3, %v6468_v37 }
 0x6e1   : > { %v5671_v25 = vpop.f32.mrf.mxu3 }
 0x6e2   : > { %v10886_v49 = vadd.f32 %v5671_v25, %v10555_v39  ;;  %v12121_v39 = vld [vmem:[#allocation122_spill] sm:$0xff] }
 0x6e3   : > { %v5419_v33 = vpop.f32.mrf.mxu2  ;;  %v5167_v37 = vadd.f32 %v12121_v39, %v4855_v22  ;;  %v12124_v22 = vld [vmem:[#allocation172_spill] sm:$0xff] }
 0x6e4   : > { %v10889_v3 = vadd.f32 %v5419_v33, %v5166_v41  ;;  %v12122_v41 = vld [vmem:[#allocation61_spill] sm:$0xff] }
 0x6e5   : > { %v4856_v23 = vadd.f32 %v12122_v41, %v4530_v59  ;;  %v12128_v41 = vld [vmem:[#allocation63_spill] sm:$0xff] }
 0x6e7   : > { %v5168_v15 = vadd.f32 %v12124_v22, %v4856_v23  ;;  %v6434_v23 = vld [vmem:[#allocation3 + $0x73] sm:$0xff] }
 0x6e9   : > { %v5673_v54 = vpop.f32.mrf.mxu3 }
 0x6ea   : > { %v10899_v56 = vadd.f32 %v5673_v54, %v10565_v29  ;;  %v4532_v29 = vadd.f32 %v10675_v1, %v12123_v21 }
 0x6eb   : > { %v5421_v25 = vpop.f32.mrf.mxu2 }
 0x6ec   : > { %v10902_v30 = vadd.f32 %v5421_v25, %v5167_v37  ;;  %v10914_v37 = vpop.f32.mrf.mxu0  ;;  %v10916_v25 = vpop.f32.mrf.mxu1 }
 0x6ed   : > { %12125 = vst [vmem:[#allocation145_spill] sm:$0xff] %v10914_v37  ;;  %v6433_v37 = vld [vmem:[#allocation3 + $0x6b] sm:$0xff] }
 0x6ee   : > { %7646 = vmatmul.msk.bf16.gmra.mxu3 %vm307_vm3, %v10542_v2  ;;  %12126 = vst [vmem:[#allocation192_spill] sm:$0xff] %v10916_v25  ;;  %v12127_v2 = vld [vmem:[#allocation160_spill] sm:$0xff] }
 0x6ef   : > { %v4857_v36 = vadd.f32 %v12127_v2, %v4532_v29  ;;  %v12131_v29 = vld [vmem:[#allocation189_spill] sm:$0xff] }
 0x6f0   : > { %7772 = vmatmul.msk.bf16.gmra.mxu2 %vm307_vm3, %v6469_v51  ;;  %v4535_v51 = vadd.f32 %v10698_v17, %v12128_v41  ;;  %v6470_v17 = vpack.c.bf16 %v6434_v23, %v6433_v37  ;;  %v4537_v2 = vadd.f32 %v10710_v31, %v12131_v29  ;;  %v12134_v29 = vld [vmem:[#allocation117_spill] sm:$0xff] }
 0x6f1   : > { %v5676_v33 = vpop.f32.mrf.mxu3 }
 0x6f2   : > { %v10911_v54 = vadd.f32 %v5676_v33, %v10582_v63  ;;  %v12129_v63 = vld [vmem:[#allocation175_spill] sm:$0xff]  ;;  %v4858_v25 = vadd.f32 %v12130_v20, %v4535_v51  ;;  %v12132_v51 = vld [vmem:[#allocation116_spill] sm:$0xff] }
 0x6f3   : > { %v5424_v39 = vpop.f32.mrf.mxu2  ;;  %v5169_v33 = vadd.f32 %v12129_v63, %v4857_v36  ;;  %v4859_v63 = vadd.f32 %v12132_v51, %v4537_v2 }
 0x6f4   : > { %v10918_v59 = vadd.f32 %v5424_v39, %v5168_v15  ;;  %v10930_v15 = vpop.f32.mrf.mxu0  ;;  %v10932_v39 = vpop.f32.mrf.mxu1 }
 0x6f9   : > { %v5678_v8 = vpop.f32.mrf.mxu3 }
 0x6fa   : > { %v10924_v1 = vadd.f32 %v5678_v8, %v10592_v19  ;;  %v5170_v8 = vadd.f32 %v10444_v58, %v4858_v25  ;;  %v6436_v58 = vld [vmem:[#allocation3 + $0x83] sm:$0xff] }
 0x6fb   : > { %v5426_v21 = vpop.f32.mrf.mxu2 }
 0x6fc   : > { %v10927_v22 = vadd.f32 %v5426_v21, %v5169_v33  ;;  %v10946_v33 = vpop.f32.mrf.mxu0  ;;  %v12133_v21 = vld [vmem:[#allocation119_spill] sm:$0xff] }
 0x6fd   : > { %v4540_v23 = vadd.f32 %v10726_v10, %v12133_v21  ;;  %v12135_v10 = vld [vmem:[#allocation120_spill] sm:$0xff] }
 0x6fe   : > { %7647 = vmatmul.msk.bf16.gmra.mxu3 %vm307_vm3, %v10570_v6  ;;  %v10948_v6 = vpop.f32.mrf.mxu1 }
 0x6ff   : > { %v4860_v2 = vadd.f32 %v12134_v29, %v4540_v23 }
 0x700   : > { %7773 = vmatmul.msk.bf16.gmra.mxu2 %vm307_vm3, %v6470_v17 }
 0x701   : > { %v5681_v19 = vpop.f32.mrf.mxu3 }
 0x702   : > { %v10940_v36 = vadd.f32 %v5681_v19, %v10608_v4  ;;  %v5171_v4 = vadd.f32 %v10458_v62, %v4859_v63  ;;  %v6435_v19 = vld [vmem:[#allocation3 + $0x7b] sm:$0xff] }
 0x703   : > { %v5429_v20 = vpop.f32.mrf.mxu2 }
 0x704   : > { %v10943_v41 = vadd.f32 %v5429_v20, %v5170_v8  ;;  %v6471_v8 = vpack.c.bf16 %v6436_v58, %v6435_v19  ;;  %v10964_v51 = vpop.f32.mrf.mxu0  ;;  %v12137_v58 = vld [vmem:[#allocation27_spill] sm:$0xff] }
 0x705   : > { %v4545_v19 = vadd.f32 %v10758_v9, %v12137_v58 }
 0x706   : > { %v10966_v62 = vpop.f32.mrf.mxu1 }
 0x709   : > { %v5683_v37 = vpop.f32.mrf.mxu3 }
 0x70a   : > { %v10953_v31 = vadd.f32 %v5683_v37, %v10620_v50  ;;  %v4542_v50 = vadd.f32 %v10738_v34, %v12135_v10  ;;  %v5172_v37 = vadd.f32 %v10468_v45, %v4860_v2  ;;  %v6438_v10 = vld [vmem:[#allocation3 + $0x93] sm:$0xff]  ;;  %v6437_v2 = vld [vmem:[#allocation3 + $0x8b] sm:$0xff] }
 0x70b   : > { %v5431_v17 = vpop.f32.mrf.mxu2  ;;  %v6472_v9 = vpack.c.bf16 %v6438_v10, %v6437_v2  ;;  %v12145_v2 = vld [vmem:[#allocation67_spill] sm:$0xff] }
 0x70c   : > { %v10956_v25 = vadd.f32 %v5431_v17, %v5171_v4 }
 0x70e   : > { %7648 = vmatmul.msk.bf16.gmra.mxu3 %vm307_vm3, %v10598_v28  ;;  %v12136_v28 = vld [vmem:[#allocation26_spill] sm:$0xff] }
 0x70f   : > { %v4861_v4 = vadd.f32 %v12136_v28, %v4542_v50 }
 0x710   : > { %7774 = vmatmul.msk.bf16.gmra.mxu2 %vm307_vm3, %v6471_v8 }
 0x711   : > { %v5686_v20 = vpop.f32.mrf.mxu3  ;;  %v5173_v29 = vadd.f32 %v10485_v5, %v4861_v4 }
 0x712   : > { %v10969_v63 = vadd.f32 %v5686_v20, %v10640_v18  ;;  %v10981_v18 = vpop.f32.mrf.mxu0  ;;  %v10983_v20 = vpop.f32.mrf.mxu1 }
 0x713   : > { %v5434_v21 = vpop.f32.mrf.mxu2  ;;  %12138 = vst [vmem:[#allocation90_spill] sm:$0xff] %v10981_v18 }
 0x714   : > { %v10972_v23 = vadd.f32 %v5434_v21, %v5172_v37  ;;  %12139 = vst [vmem:[#allocation146_spill] sm:$0xff] %v10983_v20  ;;  %v12140_v37 = vld [vmem:[#allocation169_spill] sm:$0xff]  ;;  %v12141_v21 = vld [vmem:[#allocation66_spill] sm:$0xff] }
 0x715   : > { %v4862_v50 = vadd.f32 %v12140_v37, %v4545_v19  ;;  %v4547_v5 = vadd.f32 %v10770_v24, %v12141_v21  ;;  %v4550_v37 = vadd.f32 %v10787_v35, %v12145_v2  ;;  %v12154_v2 = vld [vmem:[#allocation69_spill] sm:$0xff] }
 0x717   : > { %v5174_v4 = vadd.f32 %v10495_v52, %v4862_v50  ;;  %v6440_v52 = vld [vmem:[#allocation3 + $0xa3] sm:$0xff] }
 0x719   : > { %v5688_v17 = vpop.f32.mrf.mxu3 }
 0x71a   : > { %v10978_v34 = vadd.f32 %v5688_v17, %v10652_v55 }
 0x71b   : > { %v5436_v8 = vpop.f32.mrf.mxu2 }
 0x71c   : > { %v10985_v45 = vadd.f32 %v5436_v8, %v5173_v29  ;;  %v12142_v29 = vld [vmem:[#allocation193_spill] sm:$0xff]  ;;  %v11000_v8 = vpop.f32.mrf.mxu0 }
 0x71d   : > { %v4863_v19 = vadd.f32 %v12142_v29, %v4547_v5  ;;  %12143 = vst [vmem:[#allocation39_spill] sm:$0xff] %v11000_v8  ;;  %v12150_v29 = vld [vmem:[#allocation136_spill] sm:$0xff] }
 0x71e   : > { %7649 = vmatmul.msk.bf16.gmra.mxu3 %vm307_vm3, %v10626_v16  ;;  %v11002_v16 = vpop.f32.mrf.mxu1 }
 0x71f   : > { %12144 = vst [vmem:[#allocation47_spill] sm:$0xff] %v11002_v16 }
 0x720   : > { %7775 = vmatmul.msk.bf16.gmra.mxu2 %vm307_vm3, %v6472_v9  ;;  %v12146_v9 = vld [vmem:[#allocation137_spill] sm:$0xff] }
 0x721   : > { %v5691_v55 = vpop.f32.mrf.mxu3 }
 0x722   : > { %v10994_v28 = vadd.f32 %v5691_v55, %v10670_v32  ;;  %v12147_v32 = vld [vmem:[#allocation131_spill] sm:$0xff] }
 0x723   : > { %v5439_v17 = vpop.f32.mrf.mxu2  ;;  %v5175_v55 = vadd.f32 %v12147_v32, %v4863_v19 }
 0x724   : > { %v10997_v58 = vadd.f32 %v5439_v17, %v5174_v4  ;;  %v6439_v4 = vld [vmem:[#allocation3 + $0x9b] sm:$0xff]  ;;  %v12149_v17 = vld [vmem:[#allocation126_spill] sm:$0xff]  ;;  %v11015_v8 = vpop.f32.mrf.mxu0 }
 0x725   : > { %v4864_v5 = vadd.f32 %v12149_v17, %v4550_v37  ;;  %v6473_v16 = vpack.c.bf16 %v6440_v52, %v6439_v4  ;;  %12151 = vst [vmem:[#allocation194_spill] sm:$0xff] %v11015_v8  ;;  %v12158_v4 = vld [vmem:[#allocation187_spill] sm:$0xff]  ;;  %v12160_v8 = vld [vmem:[#allocation138_spill] sm:$0xff] }
 0x726   : > { %v11017_v20 = vpop.f32.mrf.mxu1 }
 0x727   : > { %12152 = vst [vmem:[#allocation93_spill] sm:$0xff] %v11017_v20  ;;  %v6441_v20 = vld [vmem:[#allocation3 + $0xab] sm:$0xff] }
 0x729   : > { %v5693_v10 = vpop.f32.mrf.mxu3 }
 0x72a   : > { %v11007_v24 = vadd.f32 %v5693_v10, %v12146_v9  ;;  %v12153_v10 = vld [vmem:[#allocation44_spill] sm:$0xff]  ;;  %v5176_v9 = vadd.f32 %v12154_v2, %v4864_v5 }
 0x72b   : > { %v5441_v21 = vpop.f32.mrf.mxu2 }
 0x72c   : > { %v11010_v50 = vadd.f32 %v5441_v21, %v5175_v55  ;;  %v11026_v21 = vpop.f32.mrf.mxu0 }
 0x72d   : > { %12156 = vst [vmem:[#allocation38_spill] sm:$0xff] %v11026_v21  ;;  %v6443_v21 = vld [vmem:[#allocation3 + $0xbb] sm:$0xff] }
 0x72e   : > { %12148 = vst [vmem:[#allocation147_spill] sm:$0xff] %v11010_v50  ;;  %7650 = vmatmul.msk.bf16.gmra.mxu3 %vm307_vm3, %v12150_v29  ;;  %v11028_v52 = vpop.f32.mrf.mxu1  ;;  %v12169_v50 = vld [vmem:[#allocation132_spill] sm:$0xff] }
 0x72f   : > { %12157 = vst [vmem:[#allocation40_spill] sm:$0xff] %v11028_v52  ;;  %v12162_v52 = vld [vmem:[#allocation134_spill] sm:$0xff] }
 0x730   : > { %7776 = vmatmul.msk.bf16.gmra.mxu2 %vm307_vm3, %v6473_v16  ;;  %v6442_v16 = vld [vmem:[#allocation3 + $0xb3] sm:$0xff] }
 0x731   : > { %v5696_v35 = vpop.f32.mrf.mxu3  ;;  %v6474_v5 = vpack.c.bf16 %v6442_v16, %v6441_v20 }
 0x732   : > { %v11021_v19 = vadd.f32 %v5696_v35, %v12153_v10  ;;  %v12159_v35 = vld [vmem:[#allocation31_spill] sm:$0xff] }
 0x733   : > { %v5444_v32 = vpop.f32.mrf.mxu2  ;;  %v6072_v10 = vadd.f32 %v12159_v35, %v10810_v43 }
 0x734   : > { %v11024_v55 = vadd.f32 %v5444_v32, %v5176_v9  ;;  %v12161_v9 = vld [vmem:[#allocation205_spill] sm:$0xff]  ;;  %v11048_v43 = vpop.f32.mrf.mxu0 }
 0x735   : > { %12163 = vst [vmem:[#allocation150_spill] sm:$0xff] %v11048_v43 }
 0x736   : > { %12155 = vst [vmem:[#allocation149_spill] sm:$0xff] %v11024_v55  ;;  %v11050_v35 = vpop.f32.mrf.mxu1 }
 0x737   : > { %12164 = vst [vmem:[#allocation195_spill] sm:$0xff] %v11050_v35  ;;  %v6444_v35 = vld [vmem:[#allocation3 + $0xc3] sm:$0xff] }
 0x739   : > { %v5698_v37 = vpop.f32.mrf.mxu3 }
 0x73a   : > { %v11031_v17 = vadd.f32 %v5698_v37, %v12158_v4  ;;  %v6384_v37 = vadd.f32 %v12162_v52, %v6072_v10  ;;  %v11046_v4 = vld [vmem:[%s11442_s7] ss:$0 sm:$0xff] }
 0x73b   : > { %v5446_v29 = vpop.f32.mrf.mxu2 }
 0x73c   : > { %v11066_v55 = vpop.f32.mrf.mxu0 }
 0x73d   : > { %12168 = vst [vmem:[#allocation96_spill] sm:$0xff] %v11066_v55 }
 0x73e   : > { %7651 = vmatmul.msk.bf16.gmra.mxu3 %vm307_vm3, %v12160_v8  ;;  %v12165_v8 = vld [vmem:[#allocation178_spill] sm:$0xff] }
 0x73f   : > { %v6073_v52 = vadd.f32 %v12165_v8, %v10821_v26  ;;  %v6074_v26 = vadd.f32 %v12169_v50, %v10836_v60  ;;  %v11070_v8 = vpop.f32.mrf.mxu1 }
 0x740   : > { %7777 = vmatmul.msk.bf16.gmra.mxu2 %vm307_vm3, %v6474_v5  ;;  %v12166_v5 = vld [vmem:[#allocation188_spill] sm:$0xff]  ;;  %12170 = vst [vmem:[#allocation152_spill] sm:$0xff] %v11070_v8  ;;  %v12174_v8 = vld [vmem:[#allocation35_spill] sm:$0xff] }
 0x741   : > { %v5701_v2 = vpop.f32.mrf.mxu3  ;;  %v6075_v55 = vadd.f32 %v12174_v8, %v10847_v61  ;;  %v6446_v8 = vld [vmem:[#allocation3 + $0xd3] sm:$0xff] }
 0x742   : > { %v11040_v32 = vadd.f32 %v5701_v2, %v12161_v9  ;;  %v12167_v9 = vld [vmem:[#allocation135_spill] sm:$0xff] }
 0x743   : > { %v6592_v29 = vpop.f32.mrf.mxu2 }
 0x744   : > { %v6696_v20 = vadd.f32 %v6592_v29, %v6384_v37  ;;  %v6385_v37 = vadd.f32 %v12167_v9, %v6073_v52  ;;  %v11085_v18 = vpop.f32.mrf.mxu0 }
 0x746   : > { %v6741_v16 = vadd.f32 %v11046_v4, %v6696_v20 }
 0x748   : > { %6783 = vst.msk [vmem:[%s11055_s28] sm:$0xff] %vm6782_vm5, %v6741_v16  ;;  %v12171_v16 = vld [vmem:[#allocation81_spill] sm:$0xff] }
 0x749   : > { %v5703_v10 = vpop.f32.mrf.mxu3 }
 0x74a   : > { %v11063_v2 = vadd.f32 %v5703_v10, %v12166_v5  ;;  %v6475_v10 = vpack.c.bf16 %v6444_v35, %v6443_v21  ;;  %v12172_v5 = vld [vmem:[#allocation36_spill] sm:$0xff]  ;;  %v11087_v21 = vpop.f32.mrf.mxu1  ;;  %v5841_v35 = vld [vmem:[#allocation3 + $0x169] sm:$0xf] }
 0x74b   : > { %v6594_v29 = vpop.f32.mrf.mxu2  ;;  %12175 = vst [vmem:[#allocation46_spill] sm:$0xff] %v11087_v21 }
 0x74c   : > { %v6697_v43 = vadd.f32 %v6594_v29, %v6385_v37  ;;  %v12173_v37 = vld [vmem:[#allocation75_spill] sm:$0xff] }
 0x74d   : > { %v6386_v29 = vadd.f32 %v12173_v37, %v6074_v26  ;;  %v12176_v26 = vld [vmem:[#allocation190_spill] sm:$0xff]  ;;  %v12177_v37 = vld [vmem:[#allocation201_spill] sm:$0xff] }
 0x74e   : > { %v6742_v20 = vadd.f32 %v11046_v4, %v6697_v43  ;;  %7652 = vmatmul.msk.bf16.gmra.mxu3 %vm307_vm3, %v12171_v16 }
 0x750   : > { %6784 = vst.msk [vmem:[%s11055_s28 + $0x8] sm:$0xff] %vm6782_vm5, %v6742_v20  ;;  %7778 = vmatmul.msk.bf16.gmra.mxu2 %vm307_vm3, %v6475_v10  ;;  %v6153_v20 = vld [vmem:[#allocation3 + $0x16a] sm:$0xf]  ;;  %v5862_v10 = vpack.c.bf16 %v5841_v35, %v5841_v35 }
 0x751   : > { %v5706_v52 = vpop.f32.mrf.mxu3 }
 0x752   : > { %v11079_v9 = vadd.f32 %v5706_v52, %v12172_v5  ;;  %v6174_v52 = vpack.c.bf16 %v6153_v20, %v6153_v20  ;;  %7699 = vmatmul.msk.bf16.gmra.mxu0 %vm307_vm3, %v5862_v10  ;;  %v12179_v20 = vld [vmem:[#allocation142_spill] sm:$0xff]  ;;  %v11105_v10 = vpop.f32.mrf.mxu0 }
 0x753   : > { %v6597_v60 = vpop.f32.mrf.mxu2 }
 0x754   : > { %v6698_v50 = vadd.f32 %v6597_v60, %v6386_v29  ;;  %v6387_v29 = vadd.f32 %v12177_v37, %v6075_v55  ;;  %7744 = vmatmul.msk.bf16.gmra.mxu1 %vm307_vm3, %v6174_v52  ;;  %v11107_v52 = vpop.f32.mrf.mxu1  ;;  %v12181_v37 = vld [vmem:[#allocation78_spill] sm:$0xff] }
 0x755   : > { %12180 = vst [vmem:[#allocation153_spill] sm:$0xff] %v11107_v52  ;;  %v6448_v52 = vld [vmem:[#allocation3 + $0xe3] sm:$0xff] }
 0x756   : > { %v6743_v43 = vadd.f32 %v11046_v4, %v6698_v50  ;;  %v6445_v50 = vld [vmem:[#allocation3 + $0xcb] sm:$0xff] }
 0x758   : > { %6785 = vst.msk [vmem:[%s11055_s28 + $0x10] sm:$0xff] %vm6782_vm5, %v6743_v43  ;;  %v12178_v43 = vld [vmem:[#allocation133_spill] sm:$0xff] }
 0x759   : > { %v5708_v16 = vpop.f32.mrf.mxu3  ;;  %v6076_v21 = vadd.f32 %v12178_v43, %v10860_v40 }
 0x75a   : > { %v11092_v5 = vadd.f32 %v5708_v16, %v12176_v26  ;;  %v6476_v16 = vpack.c.bf16 %v6446_v8, %v6445_v50 }
 0x75b   : > { %v6599_v61 = vpop.f32.mrf.mxu2  ;;  %v6388_v40 = vadd.f32 %v12181_v37, %v6076_v21  ;;  %v11122_v21 = vpop.f32.mrf.mxu0 }
 0x75c   : > { %v6699_v60 = vadd.f32 %v6599_v61, %v6387_v29  ;;  %v11124_v37 = vpop.f32.mrf.mxu1 }
 0x75d   : > { %12184 = vst [vmem:[#allocation196_spill] sm:$0xff] %v11124_v37 }
 0x75e   : > { %v6744_v35 = vadd.f32 %v11046_v4, %v6699_v60  ;;  %7653 = vmatmul.msk.bf16.gmra.mxu3 %vm307_vm3, %v12179_v20  ;;  %v12182_v60 = vld [vmem:[#allocation181_spill] sm:$0xff] }
 0x75f   : > { %v6077_v43 = vadd.f32 %v12182_v60, %v10871_v12 }
 0x760   : > { %6786 = vst.msk [vmem:[%s11055_s28 + $0x18] sm:$0xff] %vm6782_vm5, %v6744_v35  ;;  %7779 = vmatmul.msk.bf16.gmra.mxu2 %vm307_vm3, %v6476_v16  ;;  %v5529_v35 = vld [vmem:[#allocation3 + $0x159] sm:$0xf]  ;;  %v12183_v16 = vld [vmem:[#allocation139_spill] sm:$0xff] }
 0x761   : > { %v5711_v55 = vpop.f32.mrf.mxu3  ;;  %v5550_v12 = vpack.c.bf16 %v5529_v35, %v5529_v35 }
 0x762   : > { %v11110_v26 = vadd.f32 %v5711_v55, %v10792_v44  ;;  %v6389_v44 = vadd.f32 %v12183_v16, %v6077_v43  ;;  %v12186_v16 = vld [vmem:[#allocation37_spill] sm:$0xff] }
 0x763   : > { %v6602_v29 = vpop.f32.mrf.mxu2  ;;  %v11137_v37 = vpop.f32.mrf.mxu0 }
 0x764   : > { %v6700_v61 = vadd.f32 %v6602_v29, %v6388_v40  ;;  %v6447_v29 = vld [vmem:[#allocation3 + $0xdb] sm:$0xff] }
 0x766   : > { %v6745_v8 = vadd.f32 %v11046_v4, %v6700_v61  ;;  %v12185_v61 = vld [vmem:[#allocation72_spill] sm:$0xff] }
 0x767   : > { %v6078_v60 = vadd.f32 %v12185_v61, %v10886_v49  ;;  %v12187_v49 = vld [vmem:[#allocation34_spill] sm:$0xff]  ;;  %v12188_v61 = vld [vmem:[#allocation84_spill] sm:$0xff] }
 0x768   : > { %6787 = vst.msk [vmem:[%s11055_s28 + $0x20] sm:$0xff] %vm6782_vm5, %v6745_v8 }
 0x769   : > { %v5713_v50 = vpop.f32.mrf.mxu3  ;;  %v6390_v35 = vadd.f32 %v12186_v16, %v6078_v60  ;;  %v6449_v16 = vld [vmem:[#allocation3 + $0xeb] sm:$0xff] }
 0x76a   : > { %v11119_v20 = vadd.f32 %v5713_v50, %v10800_v47  ;;  %v6477_v47 = vpack.c.bf16 %v6448_v52, %v6447_v29 }
 0x76b   : > { %v6604_v55 = vpop.f32.mrf.mxu2 }
 0x76c   : > { %v6701_v40 = vadd.f32 %v6604_v55, %v6389_v44 }
 0x76e   : > { %v6746_v8 = vadd.f32 %v11046_v4, %v6701_v40  ;;  %7654 = vmatmul.msk.bf16.gmra.mxu3 %vm307_vm3, %v5550_v12  ;;  %v6079_v40 = vadd.f32 %v12187_v49, %v10899_v56  ;;  %v11141_v12 = vpop.f32.mrf.mxu1  ;;  %v12189_v56 = vld [vmem:[#allocation184_spill] sm:$0xff] }
 0x770   : > { %6788 = vst.msk [vmem:[%s11055_s28 + $0x28] sm:$0xff] %vm6782_vm5, %v6746_v8  ;;  %7780 = vmatmul.msk.bf16.gmra.mxu2 %vm307_vm3, %v6477_v47  ;;  %v6391_v60 = vadd.f32 %v12188_v61, %v6079_v40  ;;  %v6450_v47 = vld [vmem:[#allocation3 + $0xf3] sm:$0xff] }
 0x771   : > { %v5716_v43 = vpop.f32.mrf.mxu3  ;;  %v6478_v49 = vpack.c.bf16 %v6450_v47, %v6449_v16 }
 0x772   : > { %v11134_v50 = vadd.f32 %v5716_v43, %v10813_v42 }
 0x773   : > { %v6607_v44 = vpop.f32.mrf.mxu2 }
 0x774   : > { %v6702_v55 = vadd.f32 %v6607_v44, %v6390_v35  ;;  %v6080_v35 = vadd.f32 %v12189_v56, %v10911_v54  ;;  %v12191_v54 = vld [vmem:[#allocation33_spill] sm:$0xff] }
 0x775   : > { %v6081_v47 = vadd.f32 %v12191_v54, %v10924_v1  ;;  %v12194_v1 = vld [vmem:[#allocation186_spill] sm:$0xff] }
 0x776   : > { %v6747_v52 = vadd.f32 %v11046_v4, %v6702_v55  ;;  %v11153_v55 = vpop.f32.mrf.mxu0 }
 0x778   : > { %6789 = vst.msk [vmem:[%s11055_s28 + $0x30] sm:$0xff] %vm6782_vm5, %v6747_v52  ;;  %v11155_v52 = vpop.f32.mrf.mxu1 }
 0x779   : > { %v5718_v29 = vpop.f32.mrf.mxu3 }
 0x77a   : > { %v11147_v42 = vadd.f32 %v5718_v29, %v10824_v53  ;;  %v12190_v29 = vld [vmem:[#allocation143_spill] sm:$0xff] }
 0x77b   : > { %v6609_v8 = vpop.f32.mrf.mxu2  ;;  %v6392_v61 = vadd.f32 %v12190_v29, %v6080_v35  ;;  %v6452_v29 = vld [vmem:[#allocation3 + $0x103] sm:$0xff] }
 0x77c   : > { %v6703_v43 = vadd.f32 %v6609_v8, %v6391_v60 }
 0x77e   : > { %v6748_v44 = vadd.f32 %v11046_v4, %v6703_v43  ;;  %v11169_v56 = vpop.f32.mrf.mxu0 }
 0x780   : > { %6790 = vst.msk [vmem:[%s11055_s28 + $0x38] sm:$0xff] %vm6782_vm5, %v6748_v44  ;;  %7781 = vmatmul.msk.bf16.gmra.mxu2 %vm307_vm3, %v6478_v49  ;;  %v11171_v44 = vpop.f32.mrf.mxu1  ;;  %v12193_v49 = vld [vmem:[#allocation144_spill] sm:$0xff] }
 0x781   : > { %v5721_v53 = vpop.f32.mrf.mxu3  ;;  %12192 = vst [vmem:[#allocation99_spill] sm:$0xff] %v11171_v44  ;;  %v6393_v35 = vadd.f32 %v12193_v49, %v6081_v47 }
 0x782   : > { %v11161_v40 = vadd.f32 %v5721_v53, %v10839_v38 }
 0x783   : > { %v6612_v60 = vpop.f32.mrf.mxu2 }
 0x784   : > { %v6704_v8 = vadd.f32 %v6612_v60, %v6392_v61  ;;  %v6451_v60 = vld [vmem:[#allocation3 + $0xfb] sm:$0xff] }
 0x786   : > { %v6749_v43 = vadd.f32 %v11046_v4, %v6704_v8  ;;  %v6082_v8 = vadd.f32 %v12194_v1, %v10940_v36  ;;  %v11187_v49 = vpop.f32.mrf.mxu0  ;;  %v12195_v36 = vld [vmem:[#allocation203_spill] sm:$0xff] }
 0x787   : > { %v6454_v1 = vld [vmem:[#allocation3 + $0x113] sm:$0xff] }
 0x788   : > { %6791 = vst.msk [vmem:[%s11055_s28 + $0x40] sm:$0xff] %vm6782_vm5, %v6749_v43  ;;  %v6479_v43 = vpack.c.bf16 %v6452_v29, %v6451_v60  ;;  %v6394_v47 = vadd.f32 %v10798_v11, %v6082_v8  ;;  %v6083_v29 = vadd.f32 %v12195_v36, %v10953_v31 }
 0x789   : > { %v5723_v16 = vpop.f32.mrf.mxu3 }
 0x78a   : > { %v11174_v38 = vadd.f32 %v5723_v16, %v10850_v48  ;;  %v6395_v11 = vadd.f32 %v10815_v46, %v6083_v29 }
 0x78b   : > { %v6614_v53 = vpop.f32.mrf.mxu2 }
 0x78c   : > { %v6705_v61 = vadd.f32 %v6614_v53, %v6393_v35  ;;  %v11189_v35 = vpop.f32.mrf.mxu1 }
 0x78e   : > { %v6750_v54 = vadd.f32 %v11046_v4, %v6705_v61 }
 0x790   : > { %6792 = vst.msk [vmem:[%s11055_s28 + $0x48] sm:$0xff] %vm6782_vm5, %v6750_v54  ;;  %7782 = vmatmul.msk.bf16.gmra.mxu2 %vm307_vm3, %v6479_v43  ;;  %v6453_v54 = vld [vmem:[#allocation3 + $0x10b] sm:$0xff]  ;;  %v11200_v43 = vpop.f32.mrf.mxu0 }
 0x791   : > { %v5726_v44 = vpop.f32.mrf.mxu3  ;;  %v6480_v36 = vpack.c.bf16 %v6454_v1, %v6453_v54 }
 0x792   : > { %v11184_v48 = vadd.f32 %v5726_v44, %v10865_v13 }
 0x793   : > { %v6617_v16 = vpop.f32.mrf.mxu2 }
 0x794   : > { %v6706_v53 = vadd.f32 %v6617_v16, %v6394_v47  ;;  %v12196_v47 = vld [vmem:[#allocation140_spill] sm:$0xff]  ;;  %v11204_v16 = vpop.f32.mrf.mxu1 }
 0x795   : > { %v6084_v31 = vadd.f32 %v12196_v47, %v10969_v63 }
 0x796   : > { %v6751_v61 = vadd.f32 %v11046_v4, %v6706_v53 }
 0x797   : > { %v6396_v29 = vadd.f32 %v10830_v0, %v6084_v31  ;;  %v6456_v31 = vld [vmem:[#allocation3 + $0x123] sm:$0xff] }
 0x798   : > { %6793 = vst.msk [vmem:[%s11055_s28 + $0x50] sm:$0xff] %vm6782_vm5, %v6751_v61 }
 0x799   : > { %v5728_v60 = vpop.f32.mrf.mxu3 }
 0x79a   : > { %v11197_v13 = vadd.f32 %v5728_v60, %v10874_v27 }
 0x79b   : > { %v6619_v44 = vpop.f32.mrf.mxu2 }
 0x79c   : > { %v6707_v8 = vadd.f32 %v6619_v44, %v6395_v11  ;;  %v12197_v11 = vld [vmem:[#allocation141_spill] sm:$0xff]  ;;  %v11219_v1 = vpop.f32.mrf.mxu1 }
 0x79d   : > { %v6085_v63 = vadd.f32 %v12197_v11, %v10978_v34  ;;  %v12198_v34 = vld [vmem:[#allocation207_spill] sm:$0xff] }
 0x79e   : > { %v6752_v53 = vadd.f32 %v11046_v4, %v6707_v8  ;;  %v11217_v8 = vpop.f32.mrf.mxu0 }
 0x79f   : > { %v6397_v0 = vadd.f32 %v10842_v57, %v6085_v63  ;;  %v12199_v63 = vld [vmem:[#allocation45_spill] sm:$0xff] }
 0x7a0   : > { %6794 = vst.msk [vmem:[%s11055_s28 + $0x58] sm:$0xff] %vm6782_vm5, %v6752_v53  ;;  %7783 = vmatmul.msk.bf16.gmra.mxu2 %vm307_vm3, %v6480_v36  ;;  %v6455_v36 = vld [vmem:[#allocation3 + $0x11b] sm:$0xff] }
 0x7a1   : > { %v5731_v46 = vpop.f32.mrf.mxu3 }
 0x7a2   : > { %v11211_v27 = vadd.f32 %v5731_v46, %v10889_v3  ;;  %v6086_v46 = vadd.f32 %v12198_v34, %v10994_v28  ;;  %v12200_v28 = vld [vmem:[#allocation87_spill] sm:$0xff] }
 0x7a3   : > { %v6622_v61 = vpop.f32.mrf.mxu2 }
 0x7a4   : > { %v6708_v60 = vadd.f32 %v6622_v61, %v6396_v29  ;;  %v6481_v61 = vpack.c.bf16 %v6456_v31, %v6455_v36  ;;  %v11235_v11 = vpop.f32.mrf.mxu1 }
 0x7a6   : > { %v6753_v44 = vadd.f32 %v11046_v4, %v6708_v60 }
 0x7a8   : > { %6795 = vst.msk [vmem:[%s11055_s28 + $0x60] sm:$0xff] %vm6782_vm5, %v6753_v44  ;;  %v6398_v44 = vadd.f32 %v12199_v63, %v6086_v46  ;;  %v6457_v63 = vld [vmem:[#allocation3 + $0x12b] sm:$0xff] }
 0x7a9   : > { %v5733_v54 = vpop.f32.mrf.mxu3 }
 0x7aa   : > { %v11224_v3 = vadd.f32 %v5733_v54, %v10902_v30  ;;  %v11233_v30 = vpop.f32.mrf.mxu0 }
 0x7ab   : > { %v6624_v47 = vpop.f32.mrf.mxu2 }
 0x7ac   : > { %v6709_v53 = vadd.f32 %v6624_v47, %v6397_v0  ;;  %v6087_v47 = vadd.f32 %v12200_v28, %v11007_v24  ;;  %v11252_v46 = vpop.f32.mrf.mxu1  ;;  %v6088_v24 = vadd.f32 %v10894_v14, %v11021_v19 }
 0x7ae   : > { %v6754_v29 = vadd.f32 %v11046_v4, %v6709_v53  ;;  %v6399_v34 = vadd.f32 %v10876_v7, %v6087_v47 }
 0x7b0   : > { %6796 = vst.msk [vmem:[%s11055_s28 + $0x68] sm:$0xff] %vm6782_vm5, %v6754_v29  ;;  %7784 = vmatmul.msk.bf16.gmra.mxu2 %vm307_vm3, %v6481_v61  ;;  %v6458_v29 = vld [vmem:[#allocation3 + $0x133] sm:$0xff] }
 0x7b1   : > { %v5736_v60 = vpop.f32.mrf.mxu3 }
 0x7b2   : > { %v11238_v57 = vadd.f32 %v5736_v60, %v10918_v59  ;;  %v11250_v61 = vpop.f32.mrf.mxu0 }
 0x7b3   : > { %v6627_v54 = vpop.f32.mrf.mxu2 }
 0x7b4   : > { %v6710_v0 = vadd.f32 %v6627_v54, %v6398_v44  ;;  %v6482_v54 = vpack.c.bf16 %v6458_v29, %v6457_v63  ;;  %v11268_v19 = vpop.f32.mrf.mxu1 }
 0x7b6   : > { %v6755_v31 = vadd.f32 %v11046_v4, %v6710_v0  ;;  %v12201_v0 = vld [vmem:[#allocation209_spill] sm:$0xff] }
 0x7b7   : > { %v6400_v28 = vadd.f32 %v12201_v0, %v6088_v24 }
 0x7b8   : > { %6797 = vst.msk [vmem:[%s11055_s28 + $0x70] sm:$0xff] %vm6782_vm5, %v6755_v31 }
 0x7b9   : > { %v5738_v53 = vpop.f32.mrf.mxu3 }
 0x7ba   : > { %v11247_v36 = vadd.f32 %v5738_v53, %v10927_v22  ;;  %v11264_v53 = vpop.f32.mrf.mxu0 }
 0x7bb   : > { %v6629_v59 = vpop.f32.mrf.mxu2 }
 0x7bc   : > { %v6711_v60 = vadd.f32 %v6629_v59, %v6399_v34  ;;  %v12202_v34 = vld [vmem:[#allocation145_spill] sm:$0xff] }
 0x7bd   : > { %v6089_v14 = vadd.f32 %v12202_v34, %v11031_v17  ;;  %v6090_v17 = vadd.f32 %v10930_v15, %v11040_v32  ;;  %v6091_v15 = vadd.f32 %v10946_v33, %v11063_v2  ;;  %v6092_v33 = vadd.f32 %v10964_v51, %v11079_v9  ;;  %v12204_v51 = vld [vmem:[#allocation90_spill] sm:$0xff] }
 0x7be   : > { %v6756_v44 = vadd.f32 %v11046_v4, %v6711_v60  ;;  %v12203_v60 = vld [vmem:[#allocation192_spill] sm:$0xff]  ;;  %v6093_v9 = vadd.f32 %v12204_v51, %v11092_v5 }
 0x7bf   : > { %v6401_v63 = vadd.f32 %v12203_v60, %v6089_v14  ;;  %v6402_v14 = vadd.f32 %v10932_v39, %v6090_v17  ;;  %v6462_v39 = vld [vmem:[#allocation3 + $0x153] sm:$0xff]  ;;  %v6461_v17 = vld [vmem:[#allocation3 + $0x14b] sm:$0xff] }
 0x7c0   : > { %6798 = vst.msk [vmem:[%s11055_s28 + $0x78] sm:$0xff] %vm6782_vm5, %v6756_v44  ;;  %7785 = vmatmul.msk.bf16.gmra.mxu2 %vm307_vm3, %v6482_v54  ;;  %v6460_v44 = vld [vmem:[#allocation3 + $0x143] sm:$0xff] }
 0x7c1   : > { %v5741_v7 = vpop.f32.mrf.mxu3 }
 0x7c2   : > { %v11261_v22 = vadd.f32 %v5741_v7, %v10943_v41  ;;  %v6459_v7 = vld [vmem:[#allocation3 + $0x13b] sm:$0xff] }
 0x7c3   : > { %v6632_v47 = vpop.f32.mrf.mxu2 }
 0x7c4   : > { %v6712_v31 = vadd.f32 %v6632_v47, %v6400_v28  ;;  %v6483_v28 = vpack.c.bf16 %v6460_v44, %v6459_v7  ;;  %v6065_v47 = vpop.f32.mrf.mxu0 }
 0x7c6   : > { %v6757_v59 = vadd.f32 %v11046_v4, %v6712_v31  ;;  %v6377_v31 = vpop.f32.mrf.mxu1 }
 0x7c8   : > { %6799 = vst.msk [vmem:[%s11055_s28 + $0x80] sm:$0xff] %vm6782_vm5, %v6757_v59 }
 0x7c9   : > { %v5743_v29 = vpop.f32.mrf.mxu3 }
 0x7ca   : > { %v11274_v41 = vadd.f32 %v5743_v29, %v10956_v25 }
 0x7cb   : > { %v6634_v24 = vpop.f32.mrf.mxu2 }
 0x7cc   : > { %v6713_v54 = vadd.f32 %v6634_v24, %v6401_v63 }
 0x7ce   : > { %v6758_v0 = vadd.f32 %v11046_v4, %v6713_v54 }
 0x7cf   : > { %v6068_v60 = vpop.f32.mrf.mxu0 }
 0x7d0   : > { %6800 = vst.msk [vmem:[%s11055_s28 + $0x88] sm:$0xff] %vm6782_vm5, %v6758_v0  ;;  %7786 = vmatmul.msk.bf16.gmra.mxu2 %vm307_vm3, %v6483_v28  ;;  %v6484_v0 = vpack.c.bf16 %v6462_v39, %v6461_v17  ;;  %v6464_v17 = vld [vmem:[#allocation3 + $0x163] sm:$0xff] }
 0x7d1   : > { %v5746_v25 = vpop.f32.mrf.mxu3  ;;  %v6380_v63 = vpop.f32.mrf.mxu1 }
 0x7d2   : > { %v11284_v34 = vadd.f32 %v5746_v25, %v10972_v23  ;;  %v6403_v23 = vadd.f32 %v10948_v6, %v6091_v15 }
 0x7d3   : > { %v6637_v59 = vpop.f32.mrf.mxu2 }
 0x7d4   : > { %v6714_v29 = vadd.f32 %v6637_v59, %v6402_v14  ;;  %v6404_v14 = vadd.f32 %v10966_v62, %v6092_v33  ;;  %v12207_v33 = vld [vmem:[#allocation39_spill] sm:$0xff] }
 0x7d6   : > { %v6759_v32 = vadd.f32 %v11046_v4, %v6714_v29 }
 0x7d7   : > { %v6070_v28 = vpop.f32.mrf.mxu0 }
 0x7d8   : > { %6801 = vst.msk [vmem:[%s11055_s28 + $0x90] sm:$0xff] %vm6782_vm5, %v6759_v32 }
 0x7d9   : > { %v5748_v24 = vpop.f32.mrf.mxu3 }
 0x7da   : > { %v11293_v44 = vadd.f32 %v5748_v24, %v10985_v45  ;;  %v6382_v45 = vpop.f32.mrf.mxu1  ;;  %v12205_v24 = vld [vmem:[#allocation147_spill] sm:$0xff] }
 0x7db   : > { %v6639_v54 = vpop.f32.mrf.mxu2 }
 0x7dc   : > { %v6715_v7 = vadd.f32 %v6639_v54, %v6403_v23  ;;  %v12206_v54 = vld [vmem:[#allocation146_spill] sm:$0xff] }
 0x7dd   : > { %v6405_v39 = vadd.f32 %v12206_v54, %v6093_v9 }
 0x7de   : > { %v6760_v2 = vadd.f32 %v11046_v4, %v6715_v7 }
 0x7e0   : > { %6802 = vst.msk [vmem:[%s11055_s28 + $0x98] sm:$0xff] %vm6782_vm5, %v6760_v2  ;;  %7787 = vmatmul.msk.bf16.gmra.mxu2 %vm307_vm3, %v6484_v0  ;;  %v6094_v0 = vadd.f32 %v12207_v33, %v11110_v26  ;;  %v12212_v33 = vld [vmem:[#allocation38_spill] sm:$0xff] }
 0x7e1   : > { %v5751_v25 = vpop.f32.mrf.mxu3 }
 0x7e2   : > { %v11303_v6 = vadd.f32 %v5751_v25, %v10997_v58  ;;  %v6463_v58 = vld [vmem:[#allocation3 + $0x15b] sm:$0xff] }
 0x7e3   : > { %v6642_v59 = vpop.f32.mrf.mxu2  ;;  %v6485_v28 = vpack.c.bf16 %v6464_v17, %v6463_v58  ;;  %v12208_v25 = vld [vmem:[#allocation149_spill] sm:$0xff] }
 0x7e4   : > { %v6716_v29 = vadd.f32 %v6642_v59, %v6404_v14  ;;  %v12209_v59 = vld [vmem:[#allocation47_spill] sm:$0xff] }
 0x7e6   : > { %v6761_v15 = vadd.f32 %v11046_v4, %v6716_v29  ;;  %v6406_v29 = vadd.f32 %v12209_v59, %v6094_v0 }
 0x7e8   : > { %6803 = vst.msk [vmem:[%s11055_s28 + $0xa0] sm:$0xff] %vm6782_vm5, %v6761_v15  ;;  %v12210_v15 = vld [vmem:[#allocation194_spill] sm:$0xff] }
 0x7e9   : > { %v5753_v32 = vpop.f32.mrf.mxu3 }
 0x7ea   : > { %v5799_v23 = vadd.f32 %v5753_v32, %v12205_v24  ;;  %v6095_v32 = vadd.f32 %v12210_v15, %v11119_v20  ;;  %v6096_v20 = vadd.f32 %v12212_v33, %v11134_v50  ;;  %v12217_v15 = vld [vmem:[#allocation152_spill] sm:$0xff]  ;;  %v12219_v33 = vld [vmem:[#allocation153_spill] sm:$0xff] }
 0x7eb   : > { %v6644_v7 = vpop.f32.mrf.mxu2 }
 0x7ec   : > { %v6111_v2 = vadd.f32 %v6065_v47, %v5799_v23  ;;  %v6717_v62 = vadd.f32 %v6644_v7, %v6405_v39  ;;  %v6465_v39 = vld [vmem:[#allocation3 + $0x16b] sm:$0xf]  ;;  %v12211_v7 = vld [vmem:[#allocation93_spill] sm:$0xff] }
 0x7ed   : > { %v6407_v58 = vadd.f32 %v12211_v7, %v6095_v32  ;;  %v12218_v7 = vld [vmem:[#allocation46_spill] sm:$0xff] }
 0x7ee   : > { %v6762_v5 = vadd.f32 %v11046_v4, %v6717_v62  ;;  %v11328_v23 = vadd.f32 %v6377_v31, %v6111_v2  ;;  %v12213_v31 = vld [vmem:[#allocation40_spill] sm:$0xff] }
 0x7f0   : > { %6804 = vst.msk [vmem:[%s11055_s28 + $0xa8] sm:$0xff] %vm6782_vm5, %v6762_v5  ;;  %7788 = vmatmul.msk.bf16.gmra.mxu2 %vm307_vm3, %v6485_v28  ;;  %v12214_v28 = vld [vmem:[#allocation150_spill] sm:$0xff] }
 0x7f1   : > { %v5756_v45 = vpop.f32.mrf.mxu3 }
 0x7f2   : > { %v5800_v14 = vadd.f32 %v5756_v45, %v12208_v25  ;;  %v6097_v45 = vadd.f32 %v12214_v28, %v11147_v42 }
 0x7f3   : > { %v6647_v51 = vpop.f32.mrf.mxu2 }
 0x7f4   : > { %v6112_v47 = vadd.f32 %v6068_v60, %v5800_v14  ;;  %v6718_v9 = vadd.f32 %v6647_v51, %v6406_v29  ;;  %v6486_v60 = vpack.c.bf16 %v6465_v39, %v6465_v39  ;;  %v12215_v14 = vld [vmem:[#allocation195_spill] sm:$0xff]  ;;  %v12216_v51 = vld [vmem:[#allocation96_spill] sm:$0xff] }
 0x7f5   : > { %v6409_v50 = vadd.f32 %v12215_v14, %v6097_v45 }
 0x7f6   : > { %v6763_v26 = vadd.f32 %v11046_v4, %v6718_v9  ;;  %v11324_v24 = vadd.f32 %v6380_v63, %v6112_v47  ;;  %v6408_v63 = vadd.f32 %v12213_v31, %v6096_v20  ;;  %v6098_v47 = vadd.f32 %v12216_v51, %v11161_v40 }
 0x7f8   : > { %6805 = vst.msk [vmem:[%s11055_s28 + $0xb0] sm:$0xff] %vm6782_vm5, %v6763_v26  ;;  %v6410_v32 = vadd.f32 %v12217_v15, %v6098_v47 }
 0x7f9   : > { %v5758_v54 = vpop.f32.mrf.mxu3 }
 0x7fa   : > { %v6099_v54 = vadd.f32 %v11085_v18, %v11174_v38  ;;  %v6101_v38 = vadd.f32 %v11122_v21, %v11197_v13  ;;  %v6103_v13 = vadd.f32 %v11153_v55, %v11224_v3  ;;  %v6105_v3 = vadd.f32 %v11187_v49, %v11247_v36 }
 0x7fb   : > { %v6649_v17 = vpop.f32.mrf.mxu2  ;;  %v6107_v36 = vadd.f32 %v11217_v8, %v11274_v41 }
 0x7fc   : > { %v6719_v62 = vadd.f32 %v6649_v17, %v6407_v58  ;;  %v6411_v58 = vadd.f32 %v12218_v7, %v6099_v54 }
 0x7fd   : > { %v6419_v54 = vadd.f32 %v11219_v1, %v6107_v36 }
 0x7fe   : > { %v6764_v0 = vadd.f32 %v11046_v4, %v6719_v62  ;;  %v6100_v62 = vadd.f32 %v11105_v10, %v11184_v48  ;;  %v6102_v48 = vadd.f32 %v11137_v37, %v11211_v27  ;;  %v6104_v27 = vadd.f32 %v11169_v56, %v11238_v57 }
 0x7ff   : > { %v6106_v57 = vadd.f32 %v11200_v43, %v11261_v22  ;;  %v6108_v22 = vadd.f32 %v11233_v30, %v11284_v34 }
 0x800   : > { %6806 = vst.msk [vmem:[%s11055_s28 + $0xb8] sm:$0xff] %vm6782_vm5, %v6764_v0  ;;  %7789 = vmatmul.msk.bf16.gmra.mxu2 %vm307_vm3, %v6486_v60  ;;  %v6412_v20 = vadd.f32 %v12219_v33, %v6100_v62  ;;  %v6414_v45 = vadd.f32 %v11141_v12, %v6102_v48 }
 0x801   : > { %v6420_v7 = vadd.f32 %v11235_v11, %v6108_v22 }
 0x803   : > { %v6652_v2 = vpop.f32.mrf.mxu2 }
 0x804   : > { %v6720_v5 = vadd.f32 %v6652_v2, %v6408_v63  ;;  %v12220_v63 = vld [vmem:[#allocation196_spill] sm:$0xff] }
 0x805   : > { %v6413_v2 = vadd.f32 %v12220_v63, %v6101_v38 }
 0x806   : > { %v6765_v25 = vadd.f32 %v11046_v4, %v6720_v5 }
 0x808   : > { %6807 = vst.msk [vmem:[%s11055_s28 + $0xc0] sm:$0xff] %vm6782_vm5, %v6765_v25 }
 0x80b   : > { %v6654_v59 = vpop.f32.mrf.mxu2 }
 0x80c   : > { %v6721_v29 = vadd.f32 %v6654_v59, %v6409_v50  ;;  %v6415_v50 = vadd.f32 %v11155_v52, %v6103_v13 }
 0x80e   : > { %v6766_v9 = vadd.f32 %v11046_v4, %v6721_v29  ;;  %v12221_v29 = vld [vmem:[#allocation99_spill] sm:$0xff] }
 0x80f   : > { %v6416_v51 = vadd.f32 %v12221_v29, %v6104_v27 }
 0x810   : > { %6808 = vst.msk [vmem:[%s11055_s28 + $0xc8] sm:$0xff] %vm6782_vm5, %v6766_v9  ;;  %v6417_v9 = vadd.f32 %v11189_v35, %v6105_v3 }
 0x813   : > { %v6657_v26 = vpop.f32.mrf.mxu2 }
 0x814   : > { %v6722_v42 = vadd.f32 %v6657_v26, %v6410_v32  ;;  %v6418_v26 = vadd.f32 %v11204_v16, %v6106_v57 }
 0x816   : > { %v6767_v39 = vadd.f32 %v11046_v4, %v6722_v42 }
 0x818   : > { %6809 = vst.msk [vmem:[%s11055_s28 + $0xd0] sm:$0xff] %vm6782_vm5, %v6767_v39 }
 0x81b   : > { %v6659_v17 = vpop.f32.mrf.mxu2 }
 0x81c   : > { %v6723_v40 = vadd.f32 %v6659_v17, %v6411_v58  ;;  %v6109_v58 = vadd.f32 %v11250_v61, %v11293_v44 }
 0x81e   : > { %v6768_v60 = vadd.f32 %v11046_v4, %v6723_v40  ;;  %v6421_v17 = vadd.f32 %v11252_v46, %v6109_v58  ;;  %v6110_v40 = vadd.f32 %v11264_v53, %v11303_v6 }
 0x820   : > { %6810 = vst.msk [vmem:[%s11055_s28 + $0xd8] sm:$0xff] %vm6782_vm5, %v6768_v60  ;;  %v6422_v62 = vadd.f32 %v11268_v19, %v6110_v40 }
 0x823   : > { %v6662_v0 = vpop.f32.mrf.mxu2 }
 0x824   : > { %v6724_v18 = vadd.f32 %v6662_v0, %v6412_v20 }
 0x826   : > { %v6769_v31 = vadd.f32 %v11046_v4, %v6724_v18 }
 0x828   : > { %6811 = vst.msk [vmem:[%s11055_s28 + $0xe0] sm:$0xff] %vm6782_vm5, %v6769_v31 }
 0x82b   : > { %v6664_v5 = vpop.f32.mrf.mxu2 }
 0x82c   : > { %v6725_v10 = vadd.f32 %v6664_v5, %v6413_v2 }
 0x82e   : > { %v6770_v28 = vadd.f32 %v11046_v4, %v6725_v10 }
 0x830   : > { %6812 = vst.msk [vmem:[%s11055_s28 + $0xe8] sm:$0xff] %vm6782_vm5, %v6770_v28 }
 0x833   : > { %v6667_v25 = vpop.f32.mrf.mxu2 }
 0x834   : > { %v6726_v21 = vadd.f32 %v6667_v25, %v6414_v45 }
 0x836   : > { %v6771_v14 = vadd.f32 %v11046_v4, %v6726_v21 }
 0x838   : > { %6813 = vst.msk [vmem:[%s11055_s28 + $0xf0] sm:$0xff] %vm6782_vm5, %v6771_v14 }
 0x83b   : > { %v6669_v59 = vpop.f32.mrf.mxu2 }
 0x83c   : > { %v6727_v37 = vadd.f32 %v6669_v59, %v6415_v50 }
 0x83e   : > { %v6772_v12 = vadd.f32 %v11046_v4, %v6727_v37 }
 0x840   : > { %6814 = vst.msk [vmem:[%s11055_s28 + $0xf8] sm:$0xff] %vm6782_vm5, %v6772_v12 }
 0x843   : > { %v6672_v47 = vpop.f32.mrf.mxu2 }
 0x844   : > { %v6728_v55 = vadd.f32 %v6672_v47, %v6416_v51 }
 0x846   : > { %v6773_v52 = vadd.f32 %v11046_v4, %v6728_v55 }
 0x848   : > { %6815 = vst.msk [vmem:[%s11055_s28 + $0x100] sm:$0xff] %vm6782_vm5, %v6773_v52 }
 0x84b   : > { %v6674_v15 = vpop.f32.mrf.mxu2 }
 0x84c   : > { %v6729_v56 = vadd.f32 %v6674_v15, %v6417_v9 }
 0x84e   : > { %v6774_v32 = vadd.f32 %v11046_v4, %v6729_v56 }
 0x850   : > { %6816 = vst.msk [vmem:[%s11055_s28 + $0x108] sm:$0xff] %vm6782_vm5, %v6774_v32 }
 0x853   : > { %v6677_v42 = vpop.f32.mrf.mxu2 }
 0x854   : > { %v6730_v49 = vadd.f32 %v6677_v42, %v6418_v26 }
 0x856   : > { %v6775_v35 = vadd.f32 %v11046_v4, %v6730_v49 }
 0x858   : > { %6817 = vst.msk [vmem:[%s11055_s28 + $0x110] sm:$0xff] %vm6782_vm5, %v6775_v35 }
 0x85b   : > { %v6679_v39 = vpop.f32.mrf.mxu2 }
 0x85c   : > { %v6731_v43 = vadd.f32 %v6679_v39, %v6419_v54 }
 0x85e   : > { %v6776_v16 = vadd.f32 %v11046_v4, %v6731_v43 }
 0x860   : > { %6818 = vst.msk [vmem:[%s11055_s28 + $0x118] sm:$0xff] %vm6782_vm5, %v6776_v16 }
 0x863   : > { %v6682_v8 = vpop.f32.mrf.mxu2 }
 0x864   : > { %v6732_v41 = vadd.f32 %v6682_v8, %v6420_v7 }
 0x866   : > { %v6777_v1 = vadd.f32 %v11046_v4, %v6732_v41 }
 0x868   : > { %6819 = vst.msk [vmem:[%s11055_s28 + $0x120] sm:$0xff] %vm6782_vm5, %v6777_v1 }
 0x86b   : > { %v6684_v30 = vpop.f32.mrf.mxu2 }
 0x86c   : > { %v6733_v34 = vadd.f32 %v6684_v30, %v6421_v17 }
 0x86e   : > { %v6778_v11 = vadd.f32 %v11046_v4, %v6733_v34 }
 0x870   : > { %6820 = vst.msk [vmem:[%s11055_s28 + $0x128] sm:$0xff] %vm6782_vm5, %v6778_v11 }
 0x873   : > { %v6687_v61 = vpop.f32.mrf.mxu2 }
 0x874   : > { %v6734_v44 = vadd.f32 %v6687_v61, %v6422_v62 }
 0x876   : > { %v6779_v60 = vadd.f32 %v11046_v4, %v6734_v44 }
 0x878   : > { %6821 = vst.msk [vmem:[%s11055_s28 + $0x130] sm:$0xff] %vm6782_vm5, %v6779_v60 }
 0x87b   : > { %v6689_v33 = vpop.f32.mrf.mxu2 }
 0x87c   : > { %v6735_v46 = vadd.f32 %v6689_v33, %v11328_v23 }
 0x87e   : > { %v6780_v20 = vadd.f32 %v11046_v4, %v6735_v46 }
 0x880   : > { %6822 = vst.msk [vmem:[%s11055_s28 + $0x138] sm:$0xff] %vm6782_vm5, %v6780_v20 }
 0x883   : > { %v6692_v53 = vpop.f32.mrf.mxu2 }
 0x884   : > { %v6736_v6 = vadd.f32 %v6692_v53, %v11324_v24 }
 0x886   : > { %v6781_v0 = vadd.f32 %v11046_v4, %v6736_v6 }
 0x888   : > { %6824 = vst.msk [vmem:[%s11055_s28 + $0x140] sm:$0xf] %vm6823_vm6, %v6781_v0 }
 0x88b   : > { %v6694_v19 = vpop.f32.mrf.mxu2 }
 0x88c PF: > { %s18_s27 = sadd.s32 1, %s7923_s27  }
 0x88d   : > { %p15_p4 = scmp.ge.s32.totalorder %s18_s27, 4  }
 0x88f   :  { %17 = sbr.rel (!%p15_p4) target bundleno = 1 (0x1), region = 98 }

</bundles_post_ra>
